<compile_context>
chip_gen: v7x
topology: tpu7x:2x2x1
jax: 0.10.0
libtpu: 0.0.40
codegen_flags: <defaults>
</compile_context>

<pallas_src>
import functools
import math

import jax
import jax.numpy as jnp
from jax.experimental import pallas as pl
from jax.experimental.pallas import tpu as pltpu

_LN_EPS = 1e-5


# --------------------------------------------------------------------------
# In-kernel helpers (operate on values, not refs)
# --------------------------------------------------------------------------

def _ln(x, g, b, eps=_LN_EPS):
    mu = jnp.mean(x, axis=-1, keepdims=True)
    var = jnp.mean(jnp.square(x - mu), axis=-1, keepdims=True)
    return (x - mu) * jax.lax.rsqrt(var + eps) * g + b


def _mm(a, w):
    """bf16 MXU matmul with f32 accumulation."""
    return jnp.dot(a.astype(jnp.bfloat16), w, preferred_element_type=jnp.float32)


def _erf(x):
    # Abramowitz & Stegun 7.1.26 (|err| < 1.5e-7): exact-GELU without relying
    # on a Mosaic erf lowering.  Uses only exp / mul / add / select (VPU+EUP).
    p = 0.3275911
    a1, a2, a3, a4, a5 = (0.254829592, -0.284496736, 1.421413741,
                          -1.453152027, 1.061405429)
    s = jnp.where(x >= 0.0, 1.0, -1.0)
    ax = jnp.abs(x)
    t = 1.0 / (1.0 + p * ax)
    poly = t * (a1 + t * (a2 + t * (a3 + t * (a4 + t * a5))))
    return s * (1.0 - poly * jnp.exp(-ax * ax))


def _gelu_exact(x):
    return 0.5 * x * (1.0 + _erf(x * 0.7071067811865476))


def _quick_gelu(x):
    return x * jax.nn.sigmoid(1.702 * x)


def _channel_attention(q, k, v):
    """nn.MultiheadAttention with head_dim == 1 ("per-channel" attention).

    q, k, v: (L, E) f32.  logits[i, j, e] = q[i, e] * k[j, e] (scale = 1 since
    head_dim == 1); softmax over j; out[i, e] = sum_j attn * v[j, e].
    """
    logits = q[:, None, :] * k[None, :, :]                 # (L, L, E)
    m = jnp.max(logits, axis=1, keepdims=True)
    p = jnp.exp(logits - m)
    attn = p / jnp.sum(p, axis=1, keepdims=True)
    return jnp.sum(attn * v[None, :, :], axis=1)           # (L, E)


def _vit_mha(h, qkv_w_ref, out_w_ref, heads, dim_head):
    """Multi-head attention for one sequence, heads unrolled in one program.

    h: (N, D) f32.  qkv_w_ref: (3*heads, D, dim_head) bf16 (q-heads, k-heads,
    v-heads).  out_w_ref: (heads, dim_head, D) bf16 -> out-projection is
    accumulated per head (mathematically identical to concat + project).
    """
    n = h.shape[0]
    d = out_w_ref.shape[-1]
    scale = dim_head ** -0.5
    hb = h.astype(jnp.bfloat16)
    acc = jnp.zeros((n, d), jnp.float32)
    for hh in range(heads):
        qh = jnp.dot(hb, qkv_w_ref[hh], preferred_element_type=jnp.float32)
        kh = jnp.dot(hb, qkv_w_ref[heads + hh], preferred_element_type=jnp.float32)
        vh = jnp.dot(hb, qkv_w_ref[2 * heads + hh], preferred_element_type=jnp.float32)
        s = jax.lax.dot_general(qh.astype(jnp.bfloat16), kh.astype(jnp.bfloat16),
                                (((1,), (1,)), ((), ())),
                                preferred_element_type=jnp.float32) * scale
        s = s - jnp.max(s, axis=-1, keepdims=True)
        p = jnp.exp(s)
        p = p / jnp.sum(p, axis=-1, keepdims=True)
        oh = jnp.dot(p.astype(jnp.bfloat16), vh.astype(jnp.bfloat16),
                     preferred_element_type=jnp.float32)
        acc = acc + jnp.dot(oh.astype(jnp.bfloat16), out_w_ref[hh],
                            preferred_element_type=jnp.float32)
    return acc


# --------------------------------------------------------------------------
# Fused kernels
# --------------------------------------------------------------------------

def _patch_embed_kernel(p_ref, ln0_g, ln0_b, w, b, ln1_g, ln1_b, pos, o_ref):
    x = p_ref[0]                                            # (f*n, patch_dim) f32
    x = _ln(x, ln0_g[...], ln0_b[...])                      # LN over patch_dim (no pad)
    x = _mm(x, w[...]) + b[...]
    x = _ln(x, ln1_g[...], ln1_b[...])
    o_ref[0] = x + pos[...]                                 # fused pos-embedding add


def _transformer_layer_kernel(x_ref, aln_g, aln_b, qkv_w, out_w, out_b,
                              fln_g, fln_b, ff_w1, ff_b1, ff_w2, ff_b2,
                              o_ref, *, heads, dim_head):
    x = x_ref[0]                                            # (N, D) f32
    # PreNorm + Attention + residual
    h = _ln(x, aln_g[...], aln_b[...])
    x = x + _vit_mha(h, qkv_w, out_w, heads, dim_head) + out_b[...]
    # PreNorm + FeedForward (exact-erf GELU fused) + residual
    h = _ln(x, fln_g[...], fln_b[...])
    h = _gelu_exact(_mm(h, ff_w1[...]) + ff_b1[...])
    h = _mm(h, ff_w2[...]) + ff_b2[...]
    o_ref[0] = x + h


def _cross_block_kernel(x_ref,
                        msg_fc_w, msg_fc_b, msg_ln_g, msg_ln_b,
                        msg_in_w, msg_in_b, msg_out_w, msg_out_b,
                        ln1_g, ln1_b, attn_in_w, attn_in_b,
                        attn_out_w, attn_out_b,
                        ln2_g, ln2_b, mlp_fc_w, mlp_fc_b,
                        mlp_proj_w, mlp_proj_b,
                        o_ref, *, b_c, T):
    x = x_ref[...]                                          # (b_c*T, L, D) f32
    bf, l_tok, d = x.shape

    # ---- message tokens: message_fc on each (batch, frame) spatial CLS ----
    cls = x[:, 0, :]                                        # (BF, D), row m = j*T + t
    msg = _mm(cls, msg_fc_w[...]) + msg_fc_b[...]
    m_ln = _ln(msg, msg_ln_g[...], msg_ln_b[...])
    qkv = _mm(m_ln, msg_in_w[...]) + msg_in_b[...]          # (BF, 3D)
    qm, km, vm = qkv[:, :d], qkv[:, d:2 * d], qkv[:, 2 * d:]
    rows = []
    for j in range(b_c):                                    # attention across the T frames
        sl = slice(j * T, (j + 1) * T)
        rows.append(_channel_attention(qm[sl], km[sl], vm[sl]))
    a = jnp.concatenate(rows, axis=0)                       # (BF, D)
    msg = msg + _mm(a, msg_out_w[...]) + msg_out_b[...]     # residual on msg_token

    # ---- per (batch, frame): [patch tokens ; message token] attn + MLP ----
    for m in range(bf):
        seq = jnp.concatenate([x[m], msg[m:m + 1, :]], axis=0)   # (L+1, D)
        h = _ln(seq, ln1_g[...], ln1_b[...])
        qkv = _mm(h, attn_in_w[...]) + attn_in_b[...]            # (L+1, 3D)
        q, k, v = qkv[:, :d], qkv[:, d:2 * d], qkv[:, 2 * d:]
        a = _channel_attention(q, k, v)                          # head_dim == 1
        x_att = seq + _mm(a, attn_out_w[...]) + attn_out_b[...]
        patch = x_att[:l_tok]                                    # drop message token
        h = _ln(patch, ln2_g[...], ln2_b[...])
        h = _quick_gelu(_mm(h, mlp_fc_w[...]) + mlp_fc_b[...])
        h = _mm(h, mlp_proj_w[...]) + mlp_proj_b[...]
        o_ref[m] = patch + h                                     # already (b*f, l, d) layout


def _head_kernel(x_ref, g, b, w, wb, o_ref):
    h = _ln(x_ref[...], g[...], b[...])
    o_ref[...] = _mm(h, w[...]) + wb[...]


# --------------------------------------------------------------------------
# pallas_call wrappers
# --------------------------------------------------------------------------

def _const_spec(shape):
    nd = len(shape)
    return pl.BlockSpec(shape, lambda *_: (0,) * nd)


def pallas_patch_embed(patches, pos, P):
    b, fn, pd = patches.shape
    d = pos.shape[-1]
    return pl.pallas_call(
        _patch_embed_kernel,
        out_shape=jax.ShapeDtypeStruct((b, fn, d), jnp.float32),
        grid=(b,),
        in_specs=[pl.BlockSpec((1, fn, pd), lambda i: (i, 0, 0)),
                  _const_spec((1, pd)), _const_spec((1, pd)),
                  _const_spec((pd, d)), _const_spec((1, d)),
                  _const_spec((1, d)), _const_spec((1, d)),
                  _const_spec((fn, d))],
        out_specs=pl.BlockSpec((1, fn, d), lambda i: (i, 0, 0)),
        compiler_params=pltpu.CompilerParams(dimension_semantics=("parallel",)),
    )(patches, P["pe_ln0_g"], P["pe_ln0_b"], P["pe_w"], P["pe_b"],
      P["pe_ln1_g"], P["pe_ln1_b"], pos)


def pallas_transformer_layer(x, lp, heads, dim_head):
    bsz, n, d = x.shape
    mlp = lp["ff_w1"].shape[1]
    return pl.pallas_call(
        functools.partial(_transformer_layer_kernel, heads=heads, dim_head=dim_head),
        out_shape=jax.ShapeDtypeStruct((bsz, n, d), jnp.float32),
        grid=(bsz,),
        in_specs=[pl.BlockSpec((1, n, d), lambda i: (i, 0, 0)),
                  _const_spec((1, d)), _const_spec((1, d)),
                  _const_spec((3 * heads, d, dim_head)),
                  _const_spec((heads, dim_head, d)), _const_spec((1, d)),
                  _const_spec((1, d)), _const_spec((1, d)),
                  _const_spec((d, mlp)), _const_spec((1, mlp)),
                  _const_spec((mlp, d)), _const_spec((1, d))],
        out_specs=pl.BlockSpec((1, n, d), lambda i: (i, 0, 0)),
        compiler_params=pltpu.CompilerParams(dimension_semantics=("parallel",)),
    )(x, lp["attn_ln_g"], lp["attn_ln_b"], lp["qkv_w"], lp["out_w"], lp["out_b"],
      lp["ff_ln_g"], lp["ff_ln_b"], lp["ff_w1"], lp["ff_b1"], lp["ff_w2"], lp["ff_b2"])


def transformer_forward(x, layers, heads, dim_head):
    for lp in layers:
        x = pallas_transformer_layer(x, lp, heads, dim_head)
    return x


def pallas_cross_block(x, P, T):
    bf, l_tok, d = x.shape
    b_c = bf // T
    in_specs = [pl.BlockSpec((bf, l_tok, d), lambda i: (0, 0, 0)),
                _const_spec((d, d)), _const_spec((1, d)),
                _const_spec((1, d)), _const_spec((1, d)),
                _const_spec((d, 3 * d)), _const_spec((1, 3 * d)),
                _const_spec((d, d)), _const_spec((1, d)),
                _const_spec((1, d)), _const_spec((1, d)),
                _const_spec((d, 3 * d)), _const_spec((1, 3 * d)),
                _const_spec((d, d)), _const_spec((1, d)),
                _const_spec((1, d)), _const_spec((1, d)),
                _const_spec((d, 4 * d)), _const_spec((1, 4 * d)),
                _const_spec((4 * d, d)), _const_spec((1, d))]
    return pl.pallas_call(
        functools.partial(_cross_block_kernel, b_c=b_c, T=T),
        out_shape=jax.ShapeDtypeStruct((bf, l_tok, d), jnp.float32),
        grid=(1,),
        in_specs=in_specs,
        out_specs=pl.BlockSpec((bf, l_tok, d), lambda i: (0, 0, 0)),
        compiler_params=pltpu.CompilerParams(dimension_semantics=("arbitrary",)),
    )(x,
      P["msg_fc_w"], P["msg_fc_b"], P["msg_ln_g"], P["msg_ln_b"],
      P["msg_attn"]["in_w"], P["msg_attn"]["in_b"],
      P["msg_attn"]["out_w"], P["msg_attn"]["out_b"],
      P["ln1_g"], P["ln1_b"],
      P["attn"]["in_w"], P["attn"]["in_b"],
      P["attn"]["out_w"], P["attn"]["out_b"],
      P["ln2_g"], P["ln2_b"],
      P["mlp_fc_w"], P["mlp_fc_b"], P["mlp_proj_w"], P["mlp_proj_b"])


def pallas_head(x, P, num_classes):
    bsz, d = x.shape
    np_lanes = P["head_w"].shape[1]                         # lane-padded to 128
    out = pl.pallas_call(
        _head_kernel,
        out_shape=jax.ShapeDtypeStruct((bsz, np_lanes), jnp.float32),
        grid=(1,),
        in_specs=[pl.BlockSpec((bsz, d), lambda i: (0, 0)),
                  _const_spec((1, d)), _const_spec((1, d)),
                  _const_spec((d, np_lanes)), _const_spec((1, np_lanes))],
        out_specs=pl.BlockSpec((bsz, np_lanes), lambda i: (0, 0)),
        compiler_params=pltpu.CompilerParams(dimension_semantics=("arbitrary",)),
    )(x, P["head_ln_g"], P["head_ln_b"], P["head_w"], P["head_b"])
    return out[:, :num_classes]


# --------------------------------------------------------------------------
# Forward pass (glue ops in plain JAX under jit; all heavy math in Pallas)
# --------------------------------------------------------------------------

def patchify(video, ph, pw, pf):
    # 'b c (f pf) (h p1) (w p2) -> b f (h w) (p1 p2 pf c)'
    b, c, F, H, W = video.shape
    f, h, w = F // pf, H // ph, W // pw
    x = video.reshape(b, c, f, pf, h, ph, w, pw)
    x = jnp.transpose(x, (0, 2, 4, 6, 5, 7, 3, 1))          # b f h w p1 p2 pf c
    return x.reshape(b, f, h * w, ph * pw * pf * c)


def cst_forward(video, P, *, patch_h, patch_w, frame_patch, heads, dim_head,
                num_classes):
    # --- to_patch_embedding (+ pos-embedding add fused into the kernel) ---
    xp = patchify(video, patch_h, patch_w, frame_patch)     # (b, f, n, patch_dim)
    b, f, n, pd = xp.shape
    d = P["pe_w"].shape[1]
    pos = P["pos_emb"][0, :, :n, :].reshape(f * n, d)
    x = pallas_patch_embed(xp.reshape(b, f * n, pd), pos, P)
    x = x.reshape(b, f, n, d)

    # spatial CLS token (Dropout p=0 -> identity)
    cls_sp = jnp.broadcast_to(P["spatial_cls"].reshape(1, 1, 1, d), (b, f, 1, d))
    x = jnp.concatenate([cls_sp, x], axis=2)                # (b, f, n+1, d)
    l_tok = n + 1
    x = x.reshape(b * f, l_tok, d)

    # --- spatial transformer: one fused pallas_call per layer ---
    x = transformer_forward(x, P["spatial_layers"], heads, dim_head)

    # --- cross-frame message-token block: fully fused in one kernel ---
    # (all the (l, b, T, d) permutes of the PyTorch code become Ref indexing)
    x = pallas_cross_block(x, P, T=f)                       # (b*f, l, d)

    # CLS pooling over spatial tokens
    x = x.reshape(b, f, l_tok, d)[:, :, 0]                  # (b, f, d)

    # --- temporal transformer ---
    cls_t = jnp.broadcast_to(P["temporal_cls"].reshape(1, 1, d), (b, 1, d))
    x = jnp.concatenate([cls_t, x], axis=1)                 # (b, f+1, d)
    x = transformer_forward(x, P["temporal_layers"], heads, dim_head)
    x = x[:, 0]                                             # (b, d), to_latent=Identity

    # --- mlp head (LN + Linear fused; output lane-padded then sliced) ---
    logits = pallas_head(x, P, num_classes)
    return x, logits


# --------------------------------------------------------------------------
# Deterministic parameter init (weights bf16 for the MXU, LN/bias f32)
# --------------------------------------------------------------------------

def init_params(key, *, patch_dim, dim, depth, heads, dim_head, mlp_dim,
                num_frame_patches, num_image_patches, num_classes):
    keys = iter(jax.random.split(key, 200))
    wdt = jnp.bfloat16

    def nrm(shape, s=0.02, dtype=jnp.float32):
        return (s * jax.random.normal(next(keys), shape, jnp.float32)).astype(dtype)

    def w(shape):
        return nrm(shape, dtype=wdt)

    def vec(n, s=0.01):
        return nrm((1, n), s)

    def ln(n):
        return jnp.ones((1, n), jnp.float32), jnp.zeros((1, n), jnp.float32)

    def make_transformer():
        layers = []
        for _ in range(depth):
            ag, ab = ln(dim)
            fg, fb = ln(dim)
            layers.append(dict(
                attn_ln_g=ag, attn_ln_b=ab,
                # per-head slabs: [q heads..., k heads..., v heads...]
                qkv_w=w((3 * heads, dim, dim_head)),
                out_w=w((heads, dim_head, dim)), out_b=vec(dim),
                ff_ln_g=fg, ff_ln_b=fb,
                ff_w1=w((dim, mlp_dim)), ff_b1=vec(mlp_dim),
                ff_w2=w((mlp_dim, dim)), ff_b2=vec(dim)))
        return layers

    def make_mha():
        return dict(in_w=w((dim, 3 * dim)), in_b=vec(3 * dim),
                    out_w=w((dim, dim)), out_b=vec(dim))

    pe_ln0 = ln(patch_dim)
    pe_ln1 = ln(dim)
    msg_ln = ln(dim)
    ln1 = ln(dim)
    ln2 = ln(dim)
    head_ln = ln(dim)

    n_pad = ((num_classes + 127) // 128) * 128
    head_w = jnp.zeros((dim, n_pad), jnp.float32)
    head_w = head_w.at[:, :num_classes].set(
        0.02 * jax.random.normal(next(keys), (dim, num_classes), jnp.float32))
    head_b = jnp.zeros((1, n_pad), jnp.float32)
    head_b = head_b.at[0, :num_classes].set(
        0.01 * jax.random.normal(next(keys), (num_classes,), jnp.float32))

    return dict(
        pe_ln0_g=pe_ln0[0], pe_ln0_b=pe_ln0[1],
        pe_w=w((patch_dim, dim)), pe_b=vec(dim),
        pe_ln1_g=pe_ln1[0], pe_ln1_b=pe_ln1[1],
        pos_emb=nrm((1, num_frame_patches, num_image_patches, dim), 1.0),
        spatial_cls=nrm((1, 1, dim), 1.0),
        temporal_cls=nrm((1, 1, dim), 1.0),
        spatial_layers=make_transformer(),
        temporal_layers=make_transformer(),
        msg_fc_w=w((dim, dim)), msg_fc_b=vec(dim),
        msg_ln_g=msg_ln[0], msg_ln_b=msg_ln[1],
        msg_attn=make_mha(),         # nn.MultiheadAttention(dim, dim) -> head_dim 1
        attn=make_mha(),             # nn.MultiheadAttention(dim, 128) -> head_dim 1
        ln1_g=ln1[0], ln1_b=ln1[1],
        mlp_fc_w=w((dim, 4 * dim)), mlp_fc_b=vec(4 * dim),
        mlp_proj_w=w((4 * dim, dim)), mlp_proj_b=vec(dim),
        ln2_g=ln2[0], ln2_b=ln2[1],
        head_ln_g=head_ln[0], head_ln_b=head_ln[1],
        head_w=head_w.astype(wdt), head_b=head_b)


# --------------------------------------------------------------------------

if __name__ == "__main__":
    B, C = 2, 3
    IMAGE_H = IMAGE_W = 8
    PATCH_H = PATCH_W = 4
    FRAMES, FRAME_PATCH = 4, 2
    DIM, DEPTH, HEADS, DIM_HEAD, MLP_DIM = 128, 1, 4, 16, 64   # dim % 128 == 0 required
    NUM_CLASSES = 10

    num_image_patches = (IMAGE_H // PATCH_H) * (IMAGE_W // PATCH_W)
    num_frame_patches = FRAMES // FRAME_PATCH
    patch_dim = C * PATCH_H * PATCH_W * FRAME_PATCH

    root = jax.random.PRNGKey(0)
    k_video, k_params = jax.random.split(root)
    video = jax.random.normal(k_video, (B, C, FRAMES, IMAGE_H, IMAGE_W), jnp.float32)

    params = init_params(
        k_params, patch_dim=patch_dim, dim=DIM, depth=DEPTH, heads=HEADS,
        dim_head=DIM_HEAD, mlp_dim=MLP_DIM,
        num_frame_patches=num_frame_patches,
        num_image_patches=num_image_patches,
        num_classes=NUM_CLASSES)

    fwd = jax.jit(functools.partial(
        cst_forward, patch_h=PATCH_H, patch_w=PATCH_W, frame_patch=FRAME_PATCH,
        heads=HEADS, dim_head=DIM_HEAD, num_classes=NUM_CLASSES))

    pooled, logits = fwd(video, params)
    jax.block_until_ready((pooled, logits))
    assert pooled.shape == (B, DIM) and logits.shape == (B, NUM_CLASSES)
    assert bool(jnp.all(jnp.isfinite(pooled))) and bool(jnp.all(jnp.isfinite(logits)))
    print("KERNEL_OK")
</pallas_src>

<mosaic_0001>
module attributes {stable_mosaic.version = 11 : i64} {
  func.func @_patch_embed_kernel(%arg0: i32, %arg1: memref<1x8x96xf32, #tpu.memory_space<vmem>>, %arg2: memref<1x96xf32, #tpu.memory_space<vmem>>, %arg3: memref<1x96xf32, #tpu.memory_space<vmem>>, %arg4: memref<96x128xbf16, #tpu.memory_space<vmem>>, %arg5: memref<1x128xf32, #tpu.memory_space<vmem>>, %arg6: memref<1x128xf32, #tpu.memory_space<vmem>>, %arg7: memref<1x128xf32, #tpu.memory_space<vmem>>, %arg8: memref<8x128xf32, #tpu.memory_space<vmem>>, %arg9: memref<1x8x128xf32, #tpu.memory_space<vmem>>) attributes {dimension_semantics = [#tpu.dimension_semantics<parallel>], iteration_bounds = array<i64: 2>, scalar_prefetch = 0 : i64, scratch_operands = 0 : i64, tpu.core_type = #tpu.core_type<tc>, window_params = [{transform_indices = @transform_0, window_bounds = array<i64: 1, 8, 96>}, {pipeline_mode = #tpu.pipeline_mode<synchronous>, transform_indices = @transform_1, window_bounds = array<i64: 1, 96>}, {pipeline_mode = #tpu.pipeline_mode<synchronous>, transform_indices = @transform_2, window_bounds = array<i64: 1, 96>}, {pipeline_mode = #tpu.pipeline_mode<synchronous>, transform_indices = @transform_3, window_bounds = array<i64: 96, 128>}, {pipeline_mode = #tpu.pipeline_mode<synchronous>, transform_indices = @transform_4, window_bounds = array<i64: 1, 128>}, {pipeline_mode = #tpu.pipeline_mode<synchronous>, transform_indices = @transform_5, window_bounds = array<i64: 1, 128>}, {pipeline_mode = #tpu.pipeline_mode<synchronous>, transform_indices = @transform_6, window_bounds = array<i64: 1, 128>}, {pipeline_mode = #tpu.pipeline_mode<synchronous>, transform_indices = @transform_7, window_bounds = array<i64: 8, 128>}, {transform_indices = @transform_8, window_bounds = array<i64: 1, 8, 128>}]} {
    %c0 = arith.constant 0 : index
    %c0_0 = arith.constant 0 : index
    %c0_1 = arith.constant 0 : index
    %0 = vector.load %arg1[%c0, %c0_0, %c0_1] : memref<1x8x96xf32, #tpu.memory_space<vmem>>, vector<1x8x96xf32>
    %1 = vector.shape_cast %0 : vector<1x8x96xf32> to vector<8x96xf32>
    %c0_2 = arith.constant 0 : index
    %c0_3 = arith.constant 0 : index
    %2 = vector.load %arg2[%c0_2, %c0_3] : memref<1x96xf32, #tpu.memory_space<vmem>>, vector<1x96xf32>
    %c0_4 = arith.constant 0 : index
    %c0_5 = arith.constant 0 : index
    %3 = vector.load %arg3[%c0_4, %c0_5] : memref<1x96xf32, #tpu.memory_space<vmem>>, vector<1x96xf32>
    %cst = arith.constant dense<0.000000e+00> : vector<8xf32>
    %4 = vector.multi_reduction <add>, %1, %cst [1] : vector<8x96xf32> to vector<8xf32>
    %5 = vector.shape_cast %4 : vector<8xf32> to vector<8x1xf32>
    %cst_6 = arith.constant 9.600000e+01 : f32
    %6 = vector.broadcast %cst_6 : f32 to vector<8x1xf32>
    %7 = arith.divf %5, %6 : vector<8x1xf32>
    %8 = vector.broadcast %7 : vector<8x1xf32> to vector<8x96xf32>
    %9 = arith.subf %1, %8 : vector<8x96xf32>
    %10 = arith.mulf %9, %9 : vector<8x96xf32>
    %cst_7 = arith.constant dense<0.000000e+00> : vector<8xf32>
    %11 = vector.multi_reduction <add>, %10, %cst_7 [1] : vector<8x96xf32> to vector<8xf32>
    %12 = vector.shape_cast %11 : vector<8xf32> to vector<8x1xf32>
    %cst_8 = arith.constant 9.600000e+01 : f32
    %13 = vector.broadcast %cst_8 : f32 to vector<8x1xf32>
    %14 = arith.divf %12, %13 : vector<8x1xf32>
    %15 = vector.broadcast %7 : vector<8x1xf32> to vector<8x96xf32>
    %16 = arith.subf %1, %15 : vector<8x96xf32>
    %cst_9 = arith.constant 9.99999974E-6 : f32
    %17 = vector.broadcast %cst_9 : f32 to vector<8x1xf32>
    %18 = arith.addf %14, %17 : vector<8x1xf32>
    %19 = math.rsqrt %18 : vector<8x1xf32>
    %20 = vector.broadcast %19 : vector<8x1xf32> to vector<8x96xf32>
    %21 = arith.mulf %16, %20 : vector<8x96xf32>
    %22 = vector.broadcast %2 : vector<1x96xf32> to vector<8x96xf32>
    %23 = arith.mulf %21, %22 : vector<8x96xf32>
    %24 = vector.broadcast %3 : vector<1x96xf32> to vector<8x96xf32>
    %25 = arith.addf %23, %24 : vector<8x96xf32>
    %c0_10 = arith.constant 0 : index
    %c0_11 = arith.constant 0 : index
    %26 = vector.load %arg4[%c0_10, %c0_11] : memref<96x128xbf16, #tpu.memory_space<vmem>>, vector<96x128xbf16>
    %27 = arith.truncf %25 : vector<8x96xf32> to vector<8x96xbf16>
    %cst_12 = arith.constant dense<0.000000e+00> : vector<8x128xf32>
    %28 = tpu.matmul %27, %26, %cst_12 {dimension_numbers = #tpu.dot_dimension_numbers<[1], [0], [0], [1], [0, 0, 1, 1], [], []>} : vector<8x96xbf16>, vector<96x128xbf16>, vector<8x128xf32> -> vector<8x128xf32>
    %c0_13 = arith.constant 0 : index
    %c0_14 = arith.constant 0 : index
    %29 = vector.load %arg5[%c0_13, %c0_14] : memref<1x128xf32, #tpu.memory_space<vmem>>, vector<1x128xf32>
    %30 = vector.broadcast %29 : vector<1x128xf32> to vector<8x128xf32>
    %31 = arith.addf %28, %30 : vector<8x128xf32>
    %c0_15 = arith.constant 0 : index
    %c0_16 = arith.constant 0 : index
    %32 = vector.load %arg6[%c0_15, %c0_16] : memref<1x128xf32, #tpu.memory_space<vmem>>, vector<1x128xf32>
    %c0_17 = arith.constant 0 : index
    %c0_18 = arith.constant 0 : index
    %33 = vector.load %arg7[%c0_17, %c0_18] : memref<1x128xf32, #tpu.memory_space<vmem>>, vector<1x128xf32>
    %cst_19 = arith.constant dense<0.000000e+00> : vector<8xf32>
    %34 = vector.multi_reduction <add>, %31, %cst_19 [1] : vector<8x128xf32> to vector<8xf32>
    %35 = vector.shape_cast %34 : vector<8xf32> to vector<8x1xf32>
    %cst_20 = arith.constant 1.280000e+02 : f32
    %36 = vector.broadcast %cst_20 : f32 to vector<8x1xf32>
    %37 = arith.divf %35, %36 : vector<8x1xf32>
    %38 = vector.broadcast %37 : vector<8x1xf32> to vector<8x128xf32>
    %39 = arith.subf %31, %38 : vector<8x128xf32>
    %40 = arith.mulf %39, %39 : vector<8x128xf32>
    %cst_21 = arith.constant dense<0.000000e+00> : vector<8xf32>
    %41 = vector.multi_reduction <add>, %40, %cst_21 [1] : vector<8x128xf32> to vector<8xf32>
    %42 = vector.shape_cast %41 : vector<8xf32> to vector<8x1xf32>
    %cst_22 = arith.constant 1.280000e+02 : f32
    %43 = vector.broadcast %cst_22 : f32 to vector<8x1xf32>
    %44 = arith.divf %42, %43 : vector<8x1xf32>
    %45 = vector.broadcast %37 : vector<8x1xf32> to vector<8x128xf32>
    %46 = arith.subf %31, %45 : vector<8x128xf32>
    %cst_23 = arith.constant 9.99999974E-6 : f32
    %47 = vector.broadcast %cst_23 : f32 to vector<8x1xf32>
    %48 = arith.addf %44, %47 : vector<8x1xf32>
    %49 = math.rsqrt %48 : vector<8x1xf32>
    %50 = vector.broadcast %49 : vector<8x1xf32> to vector<8x128xf32>
    %51 = arith.mulf %46, %50 : vector<8x128xf32>
    %52 = vector.broadcast %32 : vector<1x128xf32> to vector<8x128xf32>
    %53 = arith.mulf %51, %52 : vector<8x128xf32>
    %54 = vector.broadcast %33 : vector<1x128xf32> to vector<8x128xf32>
    %55 = arith.addf %53, %54 : vector<8x128xf32>
    %c0_24 = arith.constant 0 : index
    %c0_25 = arith.constant 0 : index
    %56 = vector.load %arg8[%c0_24, %c0_25] : memref<8x128xf32, #tpu.memory_space<vmem>>, vector<8x128xf32>
    %57 = arith.addf %55, %56 : vector<8x128xf32>
    %c0_26 = arith.constant 0 : index
    %c0_27 = arith.constant 0 : index
    %c0_28 = arith.constant 0 : index
    %58 = vector.load %arg9[%c0_26, %c0_27, %c0_28] : memref<1x8x128xf32, #tpu.memory_space<vmem>>, vector<1x8x128xf32>
    %59 = vector.shape_cast %58 : vector<1x8x128xf32> to vector<8x128xf32>
    %60 = vector.shape_cast %57 : vector<8x128xf32> to vector<1x8x128xf32>
    tpu.vector_store %arg9[%c0_26, %c0_27, %c0_28], %60 {strides = array<i32>} : memref<1x8x128xf32, #tpu.memory_space<vmem>>, vector<1x8x128xf32>,
    return
  }
  func.func @transform_0(%arg0: i32) -> (i32, i32, i32) {
    %c0_i32 = arith.constant 0 : i32
    %c0_i32_0 = arith.constant 0 : i32
    %c0_i32_1 = arith.constant 0 : i32
    return %arg0, %c0_i32, %c0_i32_0 : i32, i32, i32
  }
  func.func @transform_1(%arg0: i32) -> (i32, i32) {
    %c0_i32 = arith.constant 0 : i32
    %c0_i32_0 = arith.constant 0 : i32
    %c0_i32_1 = arith.constant 0 : i32
    return %c0_i32, %c0_i32_0 : i32, i32
  }
  func.func @transform_2(%arg0: i32) -> (i32, i32) {
    %c0_i32 = arith.constant 0 : i32
    %c0_i32_0 = arith.constant 0 : i32
    %c0_i32_1 = arith.constant 0 : i32
    return %c0_i32, %c0_i32_0 : i32, i32
  }
  func.func @transform_3(%arg0: i32) -> (i32, i32) {
    %c0_i32 = arith.constant 0 : i32
    %c0_i32_0 = arith.constant 0 : i32
    %c0_i32_1 = arith.constant 0 : i32
    return %c0_i32, %c0_i32_0 : i32, i32
  }
  func.func @transform_4(%arg0: i32) -> (i32, i32) {
    %c0_i32 = arith.constant 0 : i32
    %c0_i32_0 = arith.constant 0 : i32
    %c0_i32_1 = arith.constant 0 : i32
    return %c0_i32, %c0_i32_0 : i32, i32
  }
  func.func @transform_5(%arg0: i32) -> (i32, i32) {
    %c0_i32 = arith.constant 0 : i32
    %c0_i32_0 = arith.constant 0 : i32
    %c0_i32_1 = arith.constant 0 : i32
    return %c0_i32, %c0_i32_0 : i32, i32
  }
  func.func @transform_6(%arg0: i32) -> (i32, i32) {
    %c0_i32 = arith.constant 0 : i32
    %c0_i32_0 = arith.constant 0 : i32
    %c0_i32_1 = arith.constant 0 : i32
    return %c0_i32, %c0_i32_0 : i32, i32
  }
  func.func @transform_7(%arg0: i32) -> (i32, i32) {
    %c0_i32 = arith.constant 0 : i32
    %c0_i32_0 = arith.constant 0 : i32
    %c0_i32_1 = arith.constant 0 : i32
    return %c0_i32, %c0_i32_0 : i32, i32
  }
  func.func @transform_8(%arg0: i32) -> (i32, i32, i32) {
    %c0_i32 = arith.constant 0 : i32
    %c0_i32_0 = arith.constant 0 : i32
    %c0_i32_1 = arith.constant 0 : i32
    return %arg0, %c0_i32, %c0_i32_0 : i32, i32, i32
  }
}

module attributes {stable_mosaic.version = 11 : i64} {
  func.func @_transformer_layer_kernel(%arg0: i32, %arg1: memref<1x5x128xf32, #tpu.memory_space<vmem>>, %arg2: memref<1x128xf32, #tpu.memory_space<vmem>>, %arg3: memref<1x128xf32, #tpu.memory_space<vmem>>, %arg4: memref<12x128x16xbf16, #tpu.memory_space<vmem>>, %arg5: memref<4x16x128xbf16, #tpu.memory_space<vmem>>, %arg6: memref<1x128xf32, #tpu.memory_space<vmem>>, %arg7: memref<1x128xf32, #tpu.memory_space<vmem>>, %arg8: memref<1x128xf32, #tpu.memory_space<vmem>>, %arg9: memref<128x64xbf16, #tpu.memory_space<vmem>>, %arg10: memref<1x64xf32, #tpu.memory_space<vmem>>, %arg11: memref<64x128xbf16, #tpu.memory_space<vmem>>, %arg12: memref<1x128xf32, #tpu.memory_space<vmem>>, %arg13: memref<1x5x128xf32, #tpu.memory_space<vmem>>) attributes {dimension_semantics = [#tpu.dimension_semantics<parallel>], iteration_bounds = array<i64: 4>, scalar_prefetch = 0 : i64, scratch_operands = 0 : i64, tpu.core_type = #tpu.core_type<tc>, window_params = [{transform_indices = @transform_0, window_bounds = array<i64: 1, 5, 128>}, {pipeline_mode = #tpu.pipeline_mode<synchronous>, transform_indices = @transform_1, window_bounds = array<i64: 1, 128>}, {pipeline_mode = #tpu.pipeline_mode<synchronous>, transform_indices = @transform_2, window_bounds = array<i64: 1, 128>}, {pipeline_mode = #tpu.pipeline_mode<synchronous>, transform_indices = @transform_3, window_bounds = array<i64: 12, 128, 16>}, {pipeline_mode = #tpu.pipeline_mode<synchronous>, transform_indices = @transform_4, window_bounds = array<i64: 4, 16, 128>}, {pipeline_mode = #tpu.pipeline_mode<synchronous>, transform_indices = @transform_5, window_bounds = array<i64: 1, 128>}, {pipeline_mode = #tpu.pipeline_mode<synchronous>, transform_indices = @transform_6, window_bounds = array<i64: 1, 128>}, {pipeline_mode = #tpu.pipeline_mode<synchronous>, transform_indices = @transform_7, window_bounds = array<i64: 1, 128>}, {pipeline_mode = #tpu.pipeline_mode<synchronous>, transform_indices = @transform_8, window_bounds = array<i64: 128, 64>}, {pipeline_mode = #tpu.pipeline_mode<synchronous>, transform_indices = @transform_9, window_bounds = array<i64: 1, 64>}, {pipeline_mode = #tpu.pipeline_mode<synchronous>, transform_indices = @transform_10, window_bounds = array<i64: 64, 128>}, {pipeline_mode = #tpu.pipeline_mode<synchronous>, transform_indices = @transform_11, window_bounds = array<i64: 1, 128>}, {transform_indices = @transform_12, window_bounds = array<i64: 1, 5, 128>}]} {
    %c0 = arith.constant 0 : index
    %c0_0 = arith.constant 0 : index
    %c0_1 = arith.constant 0 : index
    %0 = vector.load %arg1[%c0, %c0_0, %c0_1] : memref<1x5x128xf32, #tpu.memory_space<vmem>>, vector<1x5x128xf32>
    %1 = vector.shape_cast %0 : vector<1x5x128xf32> to vector<5x128xf32>
    %c0_2 = arith.constant 0 : index
    %c0_3 = arith.constant 0 : index
    %2 = vector.load %arg2[%c0_2, %c0_3] : memref<1x128xf32, #tpu.memory_space<vmem>>, vector<1x128xf32>
    %c0_4 = arith.constant 0 : index
    %c0_5 = arith.constant 0 : index
    %3 = vector.load %arg3[%c0_4, %c0_5] : memref<1x128xf32, #tpu.memory_space<vmem>>, vector<1x128xf32>
    %cst = arith.constant dense<0.000000e+00> : vector<5xf32>
    %4 = vector.multi_reduction <add>, %1, %cst [1] : vector<5x128xf32> to vector<5xf32>
    %5 = vector.shape_cast %4 : vector<5xf32> to vector<5x1xf32>
    %cst_6 = arith.constant 1.280000e+02 : f32
    %6 = vector.broadcast %cst_6 : f32 to vector<5x1xf32>
    %7 = arith.divf %5, %6 : vector<5x1xf32>
    %8 = vector.broadcast %7 : vector<5x1xf32> to vector<5x128xf32>
    %9 = arith.subf %1, %8 : vector<5x128xf32>
    %10 = arith.mulf %9, %9 : vector<5x128xf32>
    %cst_7 = arith.constant dense<0.000000e+00> : vector<5xf32>
    %11 = vector.multi_reduction <add>, %10, %cst_7 [1] : vector<5x128xf32> to vector<5xf32>
    %12 = vector.shape_cast %11 : vector<5xf32> to vector<5x1xf32>
    %cst_8 = arith.constant 1.280000e+02 : f32
    %13 = vector.broadcast %cst_8 : f32 to vector<5x1xf32>
    %14 = arith.divf %12, %13 : vector<5x1xf32>
    %15 = vector.broadcast %7 : vector<5x1xf32> to vector<5x128xf32>
    %16 = arith.subf %1, %15 : vector<5x128xf32>
    %cst_9 = arith.constant 9.99999974E-6 : f32
    %17 = vector.broadcast %cst_9 : f32 to vector<5x1xf32>
    %18 = arith.addf %14, %17 : vector<5x1xf32>
    %19 = math.rsqrt %18 : vector<5x1xf32>
    %20 = vector.broadcast %19 : vector<5x1xf32> to vector<5x128xf32>
    %21 = arith.mulf %16, %20 : vector<5x128xf32>
    %22 = vector.broadcast %2 : vector<1x128xf32> to vector<5x128xf32>
    %23 = arith.mulf %21, %22 : vector<5x128xf32>
    %24 = vector.broadcast %3 : vector<1x128xf32> to vector<5x128xf32>
    %25 = arith.addf %23, %24 : vector<5x128xf32>
    %26 = arith.truncf %25 : vector<5x128xf32> to vector<5x128xbf16>
    %cst_10 = arith.constant 0.000000e+00 : f32
    %27 = vector.broadcast %cst_10 : f32 to vector<5x128xf32>
    %c0_11 = arith.constant 0 : index
    %c0_12 = arith.constant 0 : index
    %c0_13 = arith.constant 0 : index
    %28 = vector.load %arg4[%c0_11, %c0_12, %c0_13] : memref<12x128x16xbf16, #tpu.memory_space<vmem>>, vector<1x128x16xbf16>
    %29 = vector.shape_cast %28 : vector<1x128x16xbf16> to vector<128x16xbf16>
    %cst_14 = arith.constant dense<0.000000e+00> : vector<5x16xf32>
    %30 = tpu.matmul %26, %29, %cst_14 {dimension_numbers = #tpu.dot_dimension_numbers<[1], [0], [0], [1], [0, 0, 1, 1], [], []>} : vector<5x128xbf16>, vector<128x16xbf16>, vector<5x16xf32> -> vector<5x16xf32>
    %c4 = arith.constant 4 : index
    %c0_15 = arith.constant 0 : index
    %c0_16 = arith.constant 0 : index
    %31 = vector.load %arg4[%c4, %c0_15, %c0_16] : memref<12x128x16xbf16, #tpu.memory_space<vmem>>, vector<1x128x16xbf16>
    %32 = vector.shape_cast %31 : vector<1x128x16xbf16> to vector<128x16xbf16>
    %cst_17 = arith.constant dense<0.000000e+00> : vector<5x16xf32>
    %33 = tpu.matmul %26, %32, %cst_17 {dimension_numbers = #tpu.dot_dimension_numbers<[1], [0], [0], [1], [0, 0, 1, 1], [], []>} : vector<5x128xbf16>, vector<128x16xbf16>, vector<5x16xf32> -> vector<5x16xf32>
    %c8 = arith.constant 8 : index
    %c0_18 = arith.constant 0 : index
    %c0_19 = arith.constant 0 : index
    %34 = vector.load %arg4[%c8, %c0_18, %c0_19] : memref<12x128x16xbf16, #tpu.memory_space<vmem>>, vector<1x128x16xbf16>
    %35 = vector.shape_cast %34 : vector<1x128x16xbf16> to vector<128x16xbf16>
    %cst_20 = arith.constant dense<0.000000e+00> : vector<5x16xf32>
    %36 = tpu.matmul %26, %35, %cst_20 {dimension_numbers = #tpu.dot_dimension_numbers<[1], [0], [0], [1], [0, 0, 1, 1], [], []>} : vector<5x128xbf16>, vector<128x16xbf16>, vector<5x16xf32> -> vector<5x16xf32>
    %37 = arith.truncf %30 : vector<5x16xf32> to vector<5x16xbf16>
    %38 = arith.truncf %33 : vector<5x16xf32> to vector<5x16xbf16>
    %cst_21 = arith.constant dense<0.000000e+00> : vector<5x5xf32>
    %39 = tpu.matmul %37, %38, %cst_21 {dimension_numbers = #tpu.dot_dimension_numbers<[1], [1], [0], [0], [0, 0, 1, 0], [], []>} : vector<5x16xbf16>, vector<5x16xbf16>, vector<5x5xf32> -> vector<5x5xf32>
    %cst_22 = arith.constant 2.500000e-01 : f32
    %40 = vector.broadcast %cst_22 : f32 to vector<5x5xf32>
    %41 = arith.mulf %39, %40 : vector<5x5xf32>
    %cst_23 = arith.constant dense<0xFF800000> : vector<5xf32>
    %42 = vector.multi_reduction <maximumf>, %41, %cst_23 [1] : vector<5x5xf32> to vector<5xf32>
    %43 = vector.shape_cast %42 : vector<5xf32> to vector<5x1xf32>
    %44 = vector.broadcast %43 : vector<5x1xf32> to vector<5x5xf32>
    %45 = arith.subf %41, %44 : vector<5x5xf32>
    %46 = math.exp %45 : vector<5x5xf32>
    %cst_24 = arith.constant dense<0.000000e+00> : vector<5xf32>
    %47 = vector.multi_reduction <add>, %46, %cst_24 [1] : vector<5x5xf32> to vector<5xf32>
    %48 = vector.shape_cast %47 : vector<5xf32> to vector<5x1xf32>
    %49 = vector.broadcast %48 : vector<5x1xf32> to vector<5x5xf32>
    %50 = arith.divf %46, %49 : vector<5x5xf32>
    %51 = arith.truncf %50 : vector<5x5xf32> to vector<5x5xbf16>
    %52 = arith.truncf %36 : vector<5x16xf32> to vector<5x16xbf16>
    %cst_25 = arith.constant dense<0.000000e+00> : vector<5x16xf32>
    %53 = tpu.matmul %51, %52, %cst_25 {dimension_numbers = #tpu.dot_dimension_numbers<[1], [0], [0], [1], [0, 0, 1, 1], [], []>} : vector<5x5xbf16>, vector<5x16xbf16>, vector<5x16xf32> -> vector<5x16xf32>
    %54 = arith.truncf %53 : vector<5x16xf32> to vector<5x16xbf16>
    %c0_26 = arith.constant 0 : index
    %c0_27 = arith.constant 0 : index
    %c0_28 = arith.constant 0 : index
    %55 = vector.load %arg5[%c0_26, %c0_27, %c0_28] : memref<4x16x128xbf16, #tpu.memory_space<vmem>>, vector<1x16x128xbf16>
    %56 = vector.shape_cast %55 : vector<1x16x128xbf16> to vector<16x128xbf16>
    %cst_29 = arith.constant dense<0.000000e+00> : vector<5x128xf32>
    %57 = tpu.matmul %54, %56, %cst_29 {dimension_numbers = #tpu.dot_dimension_numbers<[1], [0], [0], [1], [0, 0, 1, 1], [], []>} : vector<5x16xbf16>, vector<16x128xbf16>, vector<5x128xf32> -> vector<5x128xf32>
    %58 = arith.addf %27, %57 : vector<5x128xf32>
    %c1 = arith.constant 1 : index
    %c0_30 = arith.constant 0 : index
    %c0_31 = arith.constant 0 : index
    %59 = vector.load %arg4[%c1, %c0_30, %c0_31] : memref<12x128x16xbf16, #tpu.memory_space<vmem>>, vector<1x128x16xbf16>
    %60 = vector.shape_cast %59 : vector<1x128x16xbf16> to vector<128x16xbf16>
    %cst_32 = arith.constant dense<0.000000e+00> : vector<5x16xf32>
    %61 = tpu.matmul %26, %60, %cst_32 {dimension_numbers = #tpu.dot_dimension_numbers<[1], [0], [0], [1], [0, 0, 1, 1], [], []>} : vector<5x128xbf16>, vector<128x16xbf16>, vector<5x16xf32> -> vector<5x16xf32>
    %c5 = arith.constant 5 : index
    %c0_33 = arith.constant 0 : index
    %c0_34 = arith.constant 0 : index
    %62 = vector.load %arg4[%c5, %c0_33, %c0_34] : memref<12x128x16xbf16, #tpu.memory_space<vmem>>, vector<1x128x16xbf16>
    %63 = vector.shape_cast %62 : vector<1x128x16xbf16> to vector<128x16xbf16>
    %cst_35 = arith.constant dense<0.000000e+00> : vector<5x16xf32>
    %64 = tpu.matmul %26, %63, %cst_35 {dimension_numbers = #tpu.dot_dimension_numbers<[1], [0], [0], [1], [0, 0, 1, 1], [], []>} : vector<5x128xbf16>, vector<128x16xbf16>, vector<5x16xf32> -> vector<5x16xf32>
    %c9 = arith.constant 9 : index
    %c0_36 = arith.constant 0 : index
    %c0_37 = arith.constant 0 : index
    %65 = vector.load %arg4[%c9, %c0_36, %c0_37] : memref<12x128x16xbf16, #tpu.memory_space<vmem>>, vector<1x128x16xbf16>
    %66 = vector.shape_cast %65 : vector<1x128x16xbf16> to vector<128x16xbf16>
    %cst_38 = arith.constant dense<0.000000e+00> : vector<5x16xf32>
    %67 = tpu.matmul %26, %66, %cst_38 {dimension_numbers = #tpu.dot_dimension_numbers<[1], [0], [0], [1], [0, 0, 1, 1], [], []>} : vector<5x128xbf16>, vector<128x16xbf16>, vector<5x16xf32> -> vector<5x16xf32>
    %68 = arith.truncf %61 : vector<5x16xf32> to vector<5x16xbf16>
    %69 = arith.truncf %64 : vector<5x16xf32> to vector<5x16xbf16>
    %cst_39 = arith.constant dense<0.000000e+00> : vector<5x5xf32>
    %70 = tpu.matmul %68, %69, %cst_39 {dimension_numbers = #tpu.dot_dimension_numbers<[1], [1], [0], [0], [0, 0, 1, 0], [], []>} : vector<5x16xbf16>, vector<5x16xbf16>, vector<5x5xf32> -> vector<5x5xf32>
    %cst_40 = arith.constant 2.500000e-01 : f32
    %71 = vector.broadcast %cst_40 : f32 to vector<5x5xf32>
    %72 = arith.mulf %70, %71 : vector<5x5xf32>
    %cst_41 = arith.constant dense<0xFF800000> : vector<5xf32>
    %73 = vector.multi_reduction <maximumf>, %72, %cst_41 [1] : vector<5x5xf32> to vector<5xf32>
    %74 = vector.shape_cast %73 : vector<5xf32> to vector<5x1xf32>
    %75 = vector.broadcast %74 : vector<5x1xf32> to vector<5x5xf32>
    %76 = arith.subf %72, %75 : vector<5x5xf32>
    %77 = math.exp %76 : vector<5x5xf32>
    %cst_42 = arith.constant dense<0.000000e+00> : vector<5xf32>
    %78 = vector.multi_reduction <add>, %77, %cst_42 [1] : vector<5x5xf32> to vector<5xf32>
    %79 = vector.shape_cast %78 : vector<5xf32> to vector<5x1xf32>
    %80 = vector.broadcast %79 : vector<5x1xf32> to vector<5x5xf32>
    %81 = arith.divf %77, %80 : vector<5x5xf32>
    %82 = arith.truncf %81 : vector<5x5xf32> to vector<5x5xbf16>
    %83 = arith.truncf %67 : vector<5x16xf32> to vector<5x16xbf16>
    %cst_43 = arith.constant dense<0.000000e+00> : vector<5x16xf32>
    %84 = tpu.matmul %82, %83, %cst_43 {dimension_numbers = #tpu.dot_dimension_numbers<[1], [0], [0], [1], [0, 0, 1, 1], [], []>} : vector<5x5xbf16>, vector<5x16xbf16>, vector<5x16xf32> -> vector<5x16xf32>
    %85 = arith.truncf %84 : vector<5x16xf32> to vector<5x16xbf16>
    %c1_44 = arith.constant 1 : index
    %c0_45 = arith.constant 0 : index
    %c0_46 = arith.constant 0 : index
    %86 = vector.load %arg5[%c1_44, %c0_45, %c0_46] : memref<4x16x128xbf16, #tpu.memory_space<vmem>>, vector<1x16x128xbf16>
    %87 = vector.shape_cast %86 : vector<1x16x128xbf16> to vector<16x128xbf16>
    %cst_47 = arith.constant dense<0.000000e+00> : vector<5x128xf32>
    %88 = tpu.matmul %85, %87, %cst_47 {dimension_numbers = #tpu.dot_dimension_numbers<[1], [0], [0], [1], [0, 0, 1, 1], [], []>} : vector<5x16xbf16>, vector<16x128xbf16>, vector<5x128xf32> -> vector<5x128xf32>
    %89 = arith.addf %58, %88 : vector<5x128xf32>
    %c2 = arith.constant 2 : index
    %c0_48 = arith.constant 0 : index
    %c0_49 = arith.constant 0 : index
    %90 = vector.load %arg4[%c2, %c0_48, %c0_49] : memref<12x128x16xbf16, #tpu.memory_space<vmem>>, vector<1x128x16xbf16>
    %91 = vector.shape_cast %90 : vector<1x128x16xbf16> to vector<128x16xbf16>
    %cst_50 = arith.constant dense<0.000000e+00> : vector<5x16xf32>
    %92 = tpu.matmul %26, %91, %cst_50 {dimension_numbers = #tpu.dot_dimension_numbers<[1], [0], [0], [1], [0, 0, 1, 1], [], []>} : vector<5x128xbf16>, vector<128x16xbf16>, vector<5x16xf32> -> vector<5x16xf32>
    %c6 = arith.constant 6 : index
    %c0_51 = arith.constant 0 : index
    %c0_52 = arith.constant 0 : index
    %93 = vector.load %arg4[%c6, %c0_51, %c0_52] : memref<12x128x16xbf16, #tpu.memory_space<vmem>>, vector<1x128x16xbf16>
    %94 = vector.shape_cast %93 : vector<1x128x16xbf16> to vector<128x16xbf16>
    %cst_53 = arith.constant dense<0.000000e+00> : vector<5x16xf32>
    %95 = tpu.matmul %26, %94, %cst_53 {dimension_numbers = #tpu.dot_dimension_numbers<[1], [0], [0], [1], [0, 0, 1, 1], [], []>} : vector<5x128xbf16>, vector<128x16xbf16>, vector<5x16xf32> -> vector<5x16xf32>
    %c10 = arith.constant 10 : index
    %c0_54 = arith.constant 0 : index
    %c0_55 = arith.constant 0 : index
    %96 = vector.load %arg4[%c10, %c0_54, %c0_55] : memref<12x128x16xbf16, #tpu.memory_space<vmem>>, vector<1x128x16xbf16>
    %97 = vector.shape_cast %96 : vector<1x128x16xbf16> to vector<128x16xbf16>
    %cst_56 = arith.constant dense<0.000000e+00> : vector<5x16xf32>
    %98 = tpu.matmul %26, %97, %cst_56 {dimension_numbers = #tpu.dot_dimension_numbers<[1], [0], [0], [1], [0, 0, 1, 1], [], []>} : vector<5x128xbf16>, vector<128x16xbf16>, vector<5x16xf32> -> vector<5x16xf32>
    %99 = arith.truncf %92 : vector<5x16xf32> to vector<5x16xbf16>
    %100 = arith.truncf %95 : vector<5x16xf32> to vector<5x16xbf16>
    %cst_57 = arith.constant dense<0.000000e+00> : vector<5x5xf32>
    %101 = tpu.matmul %99, %100, %cst_57 {dimension_numbers = #tpu.dot_dimension_numbers<[1], [1], [0], [0], [0, 0, 1, 0], [], []>} : vector<5x16xbf16>, vector<5x16xbf16>, vector<5x5xf32> -> vector<5x5xf32>
    %cst_58 = arith.constant 2.500000e-01 : f32
    %102 = vector.broadcast %cst_58 : f32 to vector<5x5xf32>
    %103 = arith.mulf %101, %102 : vector<5x5xf32>
    %cst_59 = arith.constant dense<0xFF800000> : vector<5xf32>
    %104 = vector.multi_reduction <maximumf>, %103, %cst_59 [1] : vector<5x5xf32> to vector<5xf32>
    %105 = vector.shape_cast %104 : vector<5xf32> to vector<5x1xf32>
    %106 = vector.broadcast %105 : vector<5x1xf32> to vector<5x5xf32>
    %107 = arith.subf %103, %106 : vector<5x5xf32>
    %108 = math.exp %107 : vector<5x5xf32>
    %cst_60 = arith.constant dense<0.000000e+00> : vector<5xf32>
    %109 = vector.multi_reduction <add>, %108, %cst_60 [1] : vector<5x5xf32> to vector<5xf32>
    %110 = vector.shape_cast %109 : vector<5xf32> to vector<5x1xf32>
    %111 = vector.broadcast %110 : vector<5x1xf32> to vector<5x5xf32>
    %112 = arith.divf %108, %111 : vector<5x5xf32>
    %113 = arith.truncf %112 : vector<5x5xf32> to vector<5x5xbf16>
    %114 = arith.truncf %98 : vector<5x16xf32> to vector<5x16xbf16>
    %cst_61 = arith.constant dense<0.000000e+00> : vector<5x16xf32>
    %115 = tpu.matmul %113, %114, %cst_61 {dimension_numbers = #tpu.dot_dimension_numbers<[1], [0], [0], [1], [0, 0, 1, 1], [], []>} : vector<5x5xbf16>, vector<5x16xbf16>, vector<5x16xf32> -> vector<5x16xf32>
    %116 = arith.truncf %115 : vector<5x16xf32> to vector<5x16xbf16>
    %c2_62 = arith.constant 2 : index
    %c0_63 = arith.constant 0 : index
    %c0_64 = arith.constant 0 : index
    %117 = vector.load %arg5[%c2_62, %c0_63, %c0_64] : memref<4x16x128xbf16, #tpu.memory_space<vmem>>, vector<1x16x128xbf16>
    %118 = vector.shape_cast %117 : vector<1x16x128xbf16> to vector<16x128xbf16>
    %cst_65 = arith.constant dense<0.000000e+00> : vector<5x128xf32>
    %119 = tpu.matmul %116, %118, %cst_65 {dimension_numbers = #tpu.dot_dimension_numbers<[1], [0], [0], [1], [0, 0, 1, 1], [], []>} : vector<5x16xbf16>, vector<16x128xbf16>, vector<5x128xf32> -> vector<5x128xf32>
    %120 = arith.addf %89, %119 : vector<5x128xf32>
    %c3 = arith.constant 3 : index
    %c0_66 = arith.constant 0 : index
    %c0_67 = arith.constant 0 : index
    %121 = vector.load %arg4[%c3, %c0_66, %c0_67] : memref<12x128x16xbf16, #tpu.memory_space<vmem>>, vector<1x128x16xbf16>
    %122 = vector.shape_cast %121 : vector<1x128x16xbf16> to vector<128x16xbf16>
    %cst_68 = arith.constant dense<0.000000e+00> : vector<5x16xf32>
    %123 = tpu.matmul %26, %122, %cst_68 {dimension_numbers = #tpu.dot_dimension_numbers<[1], [0], [0], [1], [0, 0, 1, 1], [], []>} : vector<5x128xbf16>, vector<128x16xbf16>, vector<5x16xf32> -> vector<5x16xf32>
    %c7 = arith.constant 7 : index
    %c0_69 = arith.constant 0 : index
    %c0_70 = arith.constant 0 : index
    %124 = vector.load %arg4[%c7, %c0_69, %c0_70] : memref<12x128x16xbf16, #tpu.memory_space<vmem>>, vector<1x128x16xbf16>
    %125 = vector.shape_cast %124 : vector<1x128x16xbf16> to vector<128x16xbf16>
    %cst_71 = arith.constant dense<0.000000e+00> : vector<5x16xf32>
    %126 = tpu.matmul %26, %125, %cst_71 {dimension_numbers = #tpu.dot_dimension_numbers<[1], [0], [0], [1], [0, 0, 1, 1], [], []>} : vector<5x128xbf16>, vector<128x16xbf16>, vector<5x16xf32> -> vector<5x16xf32>
    %c11 = arith.constant 11 : index
    %c0_72 = arith.constant 0 : index
    %c0_73 = arith.constant 0 : index
    %127 = vector.load %arg4[%c11, %c0_72, %c0_73] : memref<12x128x16xbf16, #tpu.memory_space<vmem>>, vector<1x128x16xbf16>
    %128 = vector.shape_cast %127 : vector<1x128x16xbf16> to vector<128x16xbf16>
    %cst_74 = arith.constant dense<0.000000e+00> : vector<5x16xf32>
    %129 = tpu.matmul %26, %128, %cst_74 {dimension_numbers = #tpu.dot_dimension_numbers<[1], [0], [0], [1], [0, 0, 1, 1], [], []>} : vector<5x128xbf16>, vector<128x16xbf16>, vector<5x16xf32> -> vector<5x16xf32>
    %130 = arith.truncf %123 : vector<5x16xf32> to vector<5x16xbf16>
    %131 = arith.truncf %126 : vector<5x16xf32> to vector<5x16xbf16>
    %cst_75 = arith.constant dense<0.000000e+00> : vector<5x5xf32>
    %132 = tpu.matmul %130, %131, %cst_75 {dimension_numbers = #tpu.dot_dimension_numbers<[1], [1], [0], [0], [0, 0, 1, 0], [], []>} : vector<5x16xbf16>, vector<5x16xbf16>, vector<5x5xf32> -> vector<5x5xf32>
    %cst_76 = arith.constant 2.500000e-01 : f32
    %133 = vector.broadcast %cst_76 : f32 to vector<5x5xf32>
    %134 = arith.mulf %132, %133 : vector<5x5xf32>
    %cst_77 = arith.constant dense<0xFF800000> : vector<5xf32>
    %135 = vector.multi_reduction <maximumf>, %134, %cst_77 [1] : vector<5x5xf32> to vector<5xf32>
    %136 = vector.shape_cast %135 : vector<5xf32> to vector<5x1xf32>
    %137 = vector.broadcast %136 : vector<5x1xf32> to vector<5x5xf32>
    %138 = arith.subf %134, %137 : vector<5x5xf32>
    %139 = math.exp %138 : vector<5x5xf32>
    %cst_78 = arith.constant dense<0.000000e+00> : vector<5xf32>
    %140 = vector.multi_reduction <add>, %139, %cst_78 [1] : vector<5x5xf32> to vector<5xf32>
    %141 = vector.shape_cast %140 : vector<5xf32> to vector<5x1xf32>
    %142 = vector.broadcast %141 : vector<5x1xf32> to vector<5x5xf32>
    %143 = arith.divf %139, %142 : vector<5x5xf32>
    %144 = arith.truncf %143 : vector<5x5xf32> to vector<5x5xbf16>
    %145 = arith.truncf %129 : vector<5x16xf32> to vector<5x16xbf16>
    %cst_79 = arith.constant dense<0.000000e+00> : vector<5x16xf32>
    %146 = tpu.matmul %144, %145, %cst_79 {dimension_numbers = #tpu.dot_dimension_numbers<[1], [0], [0], [1], [0, 0, 1, 1], [], []>} : vector<5x5xbf16>, vector<5x16xbf16>, vector<5x16xf32> -> vector<5x16xf32>
    %147 = arith.truncf %146 : vector<5x16xf32> to vector<5x16xbf16>
    %c3_80 = arith.constant 3 : index
    %c0_81 = arith.constant 0 : index
    %c0_82 = arith.constant 0 : index
    %148 = vector.load %arg5[%c3_80, %c0_81, %c0_82] : memref<4x16x128xbf16, #tpu.memory_space<vmem>>, vector<1x16x128xbf16>
    %149 = vector.shape_cast %148 : vector<1x16x128xbf16> to vector<16x128xbf16>
    %cst_83 = arith.constant dense<0.000000e+00> : vector<5x128xf32>
    %150 = tpu.matmul %147, %149, %cst_83 {dimension_numbers = #tpu.dot_dimension_numbers<[1], [0], [0], [1], [0, 0, 1, 1], [], []>} : vector<5x16xbf16>, vector<16x128xbf16>, vector<5x128xf32> -> vector<5x128xf32>
    %151 = arith.addf %120, %150 : vector<5x128xf32>
    %152 = arith.addf %1, %151 : vector<5x128xf32>
    %c0_84 = arith.constant 0 : index
    %c0_85 = arith.constant 0 : index
    %153 = vector.load %arg6[%c0_84, %c0_85] : memref<1x128xf32, #tpu.memory_space<vmem>>, vector<1x128xf32>
    %154 = vector.broadcast %153 : vector<1x128xf32> to vector<5x128xf32>
    %155 = arith.addf %152, %154 : vector<5x128xf32>
    %c0_86 = arith.constant 0 : index
    %c0_87 = arith.constant 0 : index
    %156 = vector.load %arg7[%c0_86, %c0_87] : memref<1x128xf32, #tpu.memory_space<vmem>>, vector<1x128xf32>
    %c0_88 = arith.constant 0 : index
    %c0_89 = arith.constant 0 : index
    %157 = vector.load %arg8[%c0_88, %c0_89] : memref<1x128xf32, #tpu.memory_space<vmem>>, vector<1x128xf32>
    %cst_90 = arith.constant dense<0.000000e+00> : vector<5xf32>
    %158 = vector.multi_reduction <add>, %155, %cst_90 [1] : vector<5x128xf32> to vector<5xf32>
    %159 = vector.shape_cast %158 : vector<5xf32> to vector<5x1xf32>
    %cst_91 = arith.constant 1.280000e+02 : f32
    %160 = vector.broadcast %cst_91 : f32 to vector<5x1xf32>
    %161 = arith.divf %159, %160 : vector<5x1xf32>
    %162 = vector.broadcast %161 : vector<5x1xf32> to vector<5x128xf32>
    %163 = arith.subf %155, %162 : vector<5x128xf32>
    %164 = arith.mulf %163, %163 : vector<5x128xf32>
    %cst_92 = arith.constant dense<0.000000e+00> : vector<5xf32>
    %165 = vector.multi_reduction <add>, %164, %cst_92 [1] : vector<5x128xf32> to vector<5xf32>
    %166 = vector.shape_cast %165 : vector<5xf32> to vector<5x1xf32>
    %cst_93 = arith.constant 1.280000e+02 : f32
    %167 = vector.broadcast %cst_93 : f32 to vector<5x1xf32>
    %168 = arith.divf %166, %167 : vector<5x1xf32>
    %169 = vector.broadcast %161 : vector<5x1xf32> to vector<5x128xf32>
    %170 = arith.subf %155, %169 : vector<5x128xf32>
    %cst_94 = arith.constant 9.99999974E-6 : f32
    %171 = vector.broadcast %cst_94 : f32 to vector<5x1xf32>
    %172 = arith.addf %168, %171 : vector<5x1xf32>
    %173 = math.rsqrt %172 : vector<5x1xf32>
    %174 = vector.broadcast %173 : vector<5x1xf32> to vector<5x128xf32>
    %175 = arith.mulf %170, %174 : vector<5x128xf32>
    %176 = vector.broadcast %156 : vector<1x128xf32> to vector<5x128xf32>
    %177 = arith.mulf %175, %176 : vector<5x128xf32>
    %178 = vector.broadcast %157 : vector<1x128xf32> to vector<5x128xf32>
    %179 = arith.addf %177, %178 : vector<5x128xf32>
    %c0_95 = arith.constant 0 : index
    %c0_96 = arith.constant 0 : index
    %180 = vector.load %arg9[%c0_95, %c0_96] : memref<128x64xbf16, #tpu.memory_space<vmem>>, vector<128x64xbf16>
    %181 = arith.truncf %179 : vector<5x128xf32> to vector<5x128xbf16>
    %cst_97 = arith.constant dense<0.000000e+00> : vector<5x64xf32>
    %182 = tpu.matmul %181, %180, %cst_97 {dimension_numbers = #tpu.dot_dimension_numbers<[1], [0], [0], [1], [0, 0, 1, 1], [], []>} : vector<5x128xbf16>, vector<128x64xbf16>, vector<5x64xf32> -> vector<5x64xf32>
    %c0_98 = arith.constant 0 : index
    %c0_99 = arith.constant 0 : index
    %183 = vector.load %arg10[%c0_98, %c0_99] : memref<1x64xf32, #tpu.memory_space<vmem>>, vector<1x64xf32>
    %184 = vector.broadcast %183 : vector<1x64xf32> to vector<5x64xf32>
    %185 = arith.addf %182, %184 : vector<5x64xf32>
    %cst_100 = arith.constant 5.000000e-01 : f32
    %186 = vector.broadcast %cst_100 : f32 to vector<5x64xf32>
    %187 = arith.mulf %186, %185 : vector<5x64xf32>
    %cst_101 = arith.constant 0.707106769 : f32
    %188 = vector.broadcast %cst_101 : f32 to vector<5x64xf32>
    %189 = arith.mulf %185, %188 : vector<5x64xf32>
    %cst_102 = arith.constant 0.000000e+00 : f32
    %190 = vector.broadcast %cst_102 : f32 to vector<5x64xf32>
    %191 = arith.cmpf oge, %189, %190 : vector<5x64xf32>
    %cst_103 = arith.constant 1.000000e+00 : f32
    %cst_104 = arith.constant -1.000000e+00 : f32
    %192 = vector.broadcast %cst_103 : f32 to vector<5x64xf32>
    %193 = vector.broadcast %cst_104 : f32 to vector<5x64xf32>
    %194 = arith.select %191, %192, %193 : vector<5x64xi1>, vector<5x64xf32>
    %195 = math.absf %189 : vector<5x64xf32>
    %cst_105 = arith.constant 0.327591091 : f32
    %196 = vector.broadcast %cst_105 : f32 to vector<5x64xf32>
    %197 = arith.mulf %196, %195 : vector<5x64xf32>
    %cst_106 = arith.constant 1.000000e+00 : f32
    %198 = vector.broadcast %cst_106 : f32 to vector<5x64xf32>
    %199 = arith.addf %198, %197 : vector<5x64xf32>
    %cst_107 = arith.constant 1.000000e+00 : f32
    %200 = vector.broadcast %cst_107 : f32 to vector<5x64xf32>
    %201 = arith.divf %200, %199 : vector<5x64xf32>
    %cst_108 = arith.constant 1.06140542 : f32
    %202 = vector.broadcast %cst_108 : f32 to vector<5x64xf32>
    %203 = arith.mulf %201, %202 : vector<5x64xf32>
    %cst_109 = arith.constant -1.45315206 : f32
    %204 = vector.broadcast %cst_109 : f32 to vector<5x64xf32>
    %205 = arith.addf %204, %203 : vector<5x64xf32>
    %206 = arith.mulf %201, %205 : vector<5x64xf32>
    %cst_110 = arith.constant 1.42141378 : f32
    %207 = vector.broadcast %cst_110 : f32 to vector<5x64xf32>
    %208 = arith.addf %207, %206 : vector<5x64xf32>
    %209 = arith.mulf %201, %208 : vector<5x64xf32>
    %cst_111 = arith.constant -0.284496725 : f32
    %210 = vector.broadcast %cst_111 : f32 to vector<5x64xf32>
    %211 = arith.addf %210, %209 : vector<5x64xf32>
    %212 = arith.mulf %201, %211 : vector<5x64xf32>
    %cst_112 = arith.constant 0.254829586 : f32
    %213 = vector.broadcast %cst_112 : f32 to vector<5x64xf32>
    %214 = arith.addf %213, %212 : vector<5x64xf32>
    %215 = arith.mulf %201, %214 : vector<5x64xf32>
    %cst_113 = arith.constant 0.000000e+00 : f32
    %216 = vector.broadcast %cst_113 : f32 to vector<5x64xf32>
    %217 = arith.subf %216, %195 : vector<5x64xf32>
    %218 = arith.mulf %217, %195 : vector<5x64xf32>
    %219 = math.exp %218 : vector<5x64xf32>
    %220 = arith.mulf %215, %219 : vector<5x64xf32>
    %cst_114 = arith.constant 1.000000e+00 : f32
    %221 = vector.broadcast %cst_114 : f32 to vector<5x64xf32>
    %222 = arith.subf %221, %220 : vector<5x64xf32>
    %223 = arith.mulf %194, %222 : vector<5x64xf32>
    %cst_115 = arith.constant 1.000000e+00 : f32
    %224 = vector.broadcast %cst_115 : f32 to vector<5x64xf32>
    %225 = arith.addf %224, %223 : vector<5x64xf32>
    %226 = arith.mulf %187, %225 : vector<5x64xf32>
    %c0_116 = arith.constant 0 : index
    %c0_117 = arith.constant 0 : index
    %227 = vector.load %arg11[%c0_116, %c0_117] : memref<64x128xbf16, #tpu.memory_space<vmem>>, vector<64x128xbf16>
    %228 = arith.truncf %226 : vector<5x64xf32> to vector<5x64xbf16>
    %cst_118 = arith.constant dense<0.000000e+00> : vector<5x128xf32>
    %229 = tpu.matmul %228, %227, %cst_118 {dimension_numbers = #tpu.dot_dimension_numbers<[1], [0], [0], [1], [0, 0, 1, 1], [], []>} : vector<5x64xbf16>, vector<64x128xbf16>, vector<5x128xf32> -> vector<5x128xf32>
    %c0_119 = arith.constant 0 : index
    %c0_120 = arith.constant 0 : index
    %230 = vector.load %arg12[%c0_119, %c0_120] : memref<1x128xf32, #tpu.memory_space<vmem>>, vector<1x128xf32>
    %231 = vector.broadcast %230 : vector<1x128xf32> to vector<5x128xf32>
    %232 = arith.addf %229, %231 : vector<5x128xf32>
    %233 = arith.addf %155, %232 : vector<5x128xf32>
    %c0_121 = arith.constant 0 : index
    %c0_122 = arith.constant 0 : index
    %c0_123 = arith.constant 0 : index
    %234 = vector.load %arg13[%c0_121, %c0_122, %c0_123] : memref<1x5x128xf32, #tpu.memory_space<vmem>>, vector<1x5x128xf32>
    %235 = vector.shape_cast %234 : vector<1x5x128xf32> to vector<5x128xf32>
    %236 = vector.shape_cast %233 : vector<5x128xf32> to vector<1x5x128xf32>
    tpu.vector_store %arg13[%c0_121, %c0_122, %c0_123], %236 {strides = array<i32>} : memref<1x5x128xf32, #tpu.memory_space<vmem>>, vector<1x5x128xf32>,
    return
  }
  func.func @transform_0(%arg0: i32) -> (i32, i32, i32) {
    %c0_i32 = arith.constant 0 : i32
    %c0_i32_0 = arith.constant 0 : i32
    %c0_i32_1 = arith.constant 0 : i32
    return %arg0, %c0_i32, %c0_i32_0 : i32, i32, i32
  }
  func.func @transform_1(%arg0: i32) -> (i32, i32) {
    %c0_i32 = arith.constant 0 : i32
    %c0_i32_0 = arith.constant 0 : i32
    %c0_i32_1 = arith.constant 0 : i32
    return %c0_i32, %c0_i32_0 : i32, i32
  }
  func.func @transform_2(%arg0: i32) -> (i32, i32) {
    %c0_i32 = arith.constant 0 : i32
    %c0_i32_0 = arith.constant 0 : i32
    %c0_i32_1 = arith.constant 0 : i32
    return %c0_i32, %c0_i32_0 : i32, i32
  }
  func.func @transform_3(%arg0: i32) -> (i32, i32, i32) {
    %c0_i32 = arith.constant 0 : i32
    %c0_i32_0 = arith.constant 0 : i32
    %c0_i32_1 = arith.constant 0 : i32
    %c0_i32_2 = arith.constant 0 : i32
    return %c0_i32, %c0_i32_0, %c0_i32_1 : i32, i32, i32
  }
  func.func @transform_4(%arg0: i32) -> (i32, i32, i32) {
    %c0_i32 = arith.constant 0 : i32
    %c0_i32_0 = arith.constant 0 : i32
    %c0_i32_1 = arith.constant 0 : i32
    %c0_i32_2 = arith.constant 0 : i32
    return %c0_i32, %c0_i32_0, %c0_i32_1 : i32, i32, i32
  }
  func.func @transform_5(%arg0: i32) -> (i32, i32) {
    %c0_i32 = arith.constant 0 : i32
    %c0_i32_0 = arith.constant 0 : i32
    %c0_i32_1 = arith.constant 0 : i32
    return %c0_i32, %c0_i32_0 : i32, i32
  }
  func.func @transform_6(%arg0: i32) -> (i32, i32) {
    %c0_i32 = arith.constant 0 : i32
    %c0_i32_0 = arith.constant 0 : i32
    %c0_i32_1 = arith.constant 0 : i32
    return %c0_i32, %c0_i32_0 : i32, i32
  }
  func.func @transform_7(%arg0: i32) -> (i32, i32) {
    %c0_i32 = arith.constant 0 : i32
    %c0_i32_0 = arith.constant 0 : i32
    %c0_i32_1 = arith.constant 0 : i32
    return %c0_i32, %c0_i32_0 : i32, i32
  }
  func.func @transform_8(%arg0: i32) -> (i32, i32) {
    %c0_i32 = arith.constant 0 : i32
    %c0_i32_0 = arith.constant 0 : i32
    %c0_i32_1 = arith.constant 0 : i32
    return %c0_i32, %c0_i32_0 : i32, i32
  }
  func.func @transform_9(%arg0: i32) -> (i32, i32) {
    %c0_i32 = arith.constant 0 : i32
    %c0_i32_0 = arith.constant 0 : i32
    %c0_i32_1 = arith.constant 0 : i32
    return %c0_i32, %c0_i32_0 : i32, i32
  }
  func.func @transform_10(%arg0: i32) -> (i32, i32) {
    %c0_i32 = arith.constant 0 : i32
    %c0_i32_0 = arith.constant 0 : i32
    %c0_i32_1 = arith.constant 0 : i32
    return %c0_i32, %c0_i32_0 : i32, i32
  }
  func.func @transform_11(%arg0: i32) -> (i32, i32) {
    %c0_i32 = arith.constant 0 : i32
    %c0_i32_0 = arith.constant 0 : i32
    %c0_i32_1 = arith.constant 0 : i32
    return %c0_i32, %c0_i32_0 : i32, i32
  }
  func.func @transform_12(%arg0: i32) -> (i32, i32, i32) {
    %c0_i32 = arith.constant 0 : i32
    %c0_i32_0 = arith.constant 0 : i32
    %c0_i32_1 = arith.constant 0 : i32
    return %arg0, %c0_i32, %c0_i32_0 : i32, i32, i32
  }
}

module attributes {stable_mosaic.version = 11 : i64} {
  func.func @_cross_block_kernel(%arg0: i32, %arg1: memref<4x5x128xf32, #tpu.memory_space<vmem>>, %arg2: memref<128x128xbf16, #tpu.memory_space<vmem>>, %arg3: memref<1x128xf32, #tpu.memory_space<vmem>>, %arg4: memref<1x128xf32, #tpu.memory_space<vmem>>, %arg5: memref<1x128xf32, #tpu.memory_space<vmem>>, %arg6: memref<128x384xbf16, #tpu.memory_space<vmem>>, %arg7: memref<1x384xf32, #tpu.memory_space<vmem>>, %arg8: memref<128x128xbf16, #tpu.memory_space<vmem>>, %arg9: memref<1x128xf32, #tpu.memory_space<vmem>>, %arg10: memref<1x128xf32, #tpu.memory_space<vmem>>, %arg11: memref<1x128xf32, #tpu.memory_space<vmem>>, %arg12: memref<128x384xbf16, #tpu.memory_space<vmem>>, %arg13: memref<1x384xf32, #tpu.memory_space<vmem>>, %arg14: memref<128x128xbf16, #tpu.memory_space<vmem>>, %arg15: memref<1x128xf32, #tpu.memory_space<vmem>>, %arg16: memref<1x128xf32, #tpu.memory_space<vmem>>, %arg17: memref<1x128xf32, #tpu.memory_space<vmem>>, %arg18: memref<128x512xbf16, #tpu.memory_space<vmem>>, %arg19: memref<1x512xf32, #tpu.memory_space<vmem>>, %arg20: memref<512x128xbf16, #tpu.memory_space<vmem>>, %arg21: memref<1x128xf32, #tpu.memory_space<vmem>>, %arg22: memref<4x5x128xf32, #tpu.memory_space<vmem>>) attributes {dimension_semantics = [#tpu.dimension_semantics<arbitrary>], iteration_bounds = array<i64: 1>, scalar_prefetch = 0 : i64, scratch_operands = 0 : i64, tpu.core_type = #tpu.core_type<tc>, window_params = [{pipeline_mode = #tpu.pipeline_mode<synchronous>, transform_indices = @transform_0, window_bounds = array<i64: 4, 5, 128>}, {pipeline_mode = #tpu.pipeline_mode<synchronous>, transform_indices = @transform_1, window_bounds = array<i64: 128, 128>}, {pipeline_mode = #tpu.pipeline_mode<synchronous>, transform_indices = @transform_2, window_bounds = array<i64: 1, 128>}, {pipeline_mode = #tpu.pipeline_mode<synchronous>, transform_indices = @transform_3, window_bounds = array<i64: 1, 128>}, {pipeline_mode = #tpu.pipeline_mode<synchronous>, transform_indices = @transform_4, window_bounds = array<i64: 1, 128>}, {pipeline_mode = #tpu.pipeline_mode<synchronous>, transform_indices = @transform_5, window_bounds = array<i64: 128, 384>}, {pipeline_mode = #tpu.pipeline_mode<synchronous>, transform_indices = @transform_6, window_bounds = array<i64: 1, 384>}, {pipeline_mode = #tpu.pipeline_mode<synchronous>, transform_indices = @transform_7, window_bounds = array<i64: 128, 128>}, {pipeline_mode = #tpu.pipeline_mode<synchronous>, transform_indices = @transform_8, window_bounds = array<i64: 1, 128>}, {pipeline_mode = #tpu.pipeline_mode<synchronous>, transform_indices = @transform_9, window_bounds = array<i64: 1, 128>}, {pipeline_mode = #tpu.pipeline_mode<synchronous>, transform_indices = @transform_10, window_bounds = array<i64: 1, 128>}, {pipeline_mode = #tpu.pipeline_mode<synchronous>, transform_indices = @transform_11, window_bounds = array<i64: 128, 384>}, {pipeline_mode = #tpu.pipeline_mode<synchronous>, transform_indices = @transform_12, window_bounds = array<i64: 1, 384>}, {pipeline_mode = #tpu.pipeline_mode<synchronous>, transform_indices = @transform_13, window_bounds = array<i64: 128, 128>}, {pipeline_mode = #tpu.pipeline_mode<synchronous>, transform_indices = @transform_14, window_bounds = array<i64: 1, 128>}, {pipeline_mode = #tpu.pipeline_mode<synchronous>, transform_indices = @transform_15, window_bounds = array<i64: 1, 128>}, {pipeline_mode = #tpu.pipeline_mode<synchronous>, transform_indices = @transform_16, window_bounds = array<i64: 1, 128>}, {pipeline_mode = #tpu.pipeline_mode<synchronous>, transform_indices = @transform_17, window_bounds = array<i64: 128, 512>}, {pipeline_mode = #tpu.pipeline_mode<synchronous>, transform_indices = @transform_18, window_bounds = array<i64: 1, 512>}, {pipeline_mode = #tpu.pipeline_mode<synchronous>, transform_indices = @transform_19, window_bounds = array<i64: 512, 128>}, {pipeline_mode = #tpu.pipeline_mode<synchronous>, transform_indices = @transform_20, window_bounds = array<i64: 1, 128>}, {pipeline_mode = #tpu.pipeline_mode<synchronous>, transform_indices = @transform_21, window_bounds = array<i64: 4, 5, 128>}]} {
    %c0 = arith.constant 0 : index
    %c0_0 = arith.constant 0 : index
    %c0_1 = arith.constant 0 : index
    %0 = vector.load %arg1[%c0, %c0_0, %c0_1] : memref<4x5x128xf32, #tpu.memory_space<vmem>>, vector<4x5x128xf32>
    %1 = vector.extract_strided_slice %0 {offsets = [0, 0, 0], sizes = [4, 1, 128], strides = [1, 1, 1]} : vector<4x5x128xf32> to vector<4x1x128xf32>
    %2 = vector.shape_cast %1 : vector<4x1x128xf32> to vector<4x128xf32>
    %c0_2 = arith.constant 0 : index
    %c0_3 = arith.constant 0 : index
    %3 = vector.load %arg2[%c0_2, %c0_3] : memref<128x128xbf16, #tpu.memory_space<vmem>>, vector<128x128xbf16>
    %4 = arith.truncf %2 : vector<4x128xf32> to vector<4x128xbf16>
    %cst = arith.constant dense<0.000000e+00> : vector<4x128xf32>
    %5 = tpu.matmul %4, %3, %cst {dimension_numbers = #tpu.dot_dimension_numbers<[1], [0], [0], [1], [0, 0, 1, 1], [], []>} : vector<4x128xbf16>, vector<128x128xbf16>, vector<4x128xf32> -> vector<4x128xf32>
    %c0_4 = arith.constant 0 : index
    %c0_5 = arith.constant 0 : index
    %6 = vector.load %arg3[%c0_4, %c0_5] : memref<1x128xf32, #tpu.memory_space<vmem>>, vector<1x128xf32>
    %7 = vector.broadcast %6 : vector<1x128xf32> to vector<4x128xf32>
    %8 = arith.addf %5, %7 : vector<4x128xf32>
    %c0_6 = arith.constant 0 : index
    %c0_7 = arith.constant 0 : index
    %9 = vector.load %arg4[%c0_6, %c0_7] : memref<1x128xf32, #tpu.memory_space<vmem>>, vector<1x128xf32>
    %c0_8 = arith.constant 0 : index
    %c0_9 = arith.constant 0 : index
    %10 = vector.load %arg5[%c0_8, %c0_9] : memref<1x128xf32, #tpu.memory_space<vmem>>, vector<1x128xf32>
    %cst_10 = arith.constant dense<0.000000e+00> : vector<4xf32>
    %11 = vector.multi_reduction <add>, %8, %cst_10 [1] : vector<4x128xf32> to vector<4xf32>
    %12 = vector.shape_cast %11 : vector<4xf32> to vector<4x1xf32>
    %cst_11 = arith.constant 1.280000e+02 : f32
    %13 = vector.broadcast %cst_11 : f32 to vector<4x1xf32>
    %14 = arith.divf %12, %13 : vector<4x1xf32>
    %15 = vector.broadcast %14 : vector<4x1xf32> to vector<4x128xf32>
    %16 = arith.subf %8, %15 : vector<4x128xf32>
    %17 = arith.mulf %16, %16 : vector<4x128xf32>
    %cst_12 = arith.constant dense<0.000000e+00> : vector<4xf32>
    %18 = vector.multi_reduction <add>, %17, %cst_12 [1] : vector<4x128xf32> to vector<4xf32>
    %19 = vector.shape_cast %18 : vector<4xf32> to vector<4x1xf32>
    %cst_13 = arith.constant 1.280000e+02 : f32
    %20 = vector.broadcast %cst_13 : f32 to vector<4x1xf32>
    %21 = arith.divf %19, %20 : vector<4x1xf32>
    %22 = vector.broadcast %14 : vector<4x1xf32> to vector<4x128xf32>
    %23 = arith.subf %8, %22 : vector<4x128xf32>
    %cst_14 = arith.constant 9.99999974E-6 : f32
    %24 = vector.broadcast %cst_14 : f32 to vector<4x1xf32>
    %25 = arith.addf %21, %24 : vector<4x1xf32>
    %26 = math.rsqrt %25 : vector<4x1xf32>
    %27 = vector.broadcast %26 : vector<4x1xf32> to vector<4x128xf32>
    %28 = arith.mulf %23, %27 : vector<4x128xf32>
    %29 = vector.broadcast %9 : vector<1x128xf32> to vector<4x128xf32>
    %30 = arith.mulf %28, %29 : vector<4x128xf32>
    %31 = vector.broadcast %10 : vector<1x128xf32> to vector<4x128xf32>
    %32 = arith.addf %30, %31 : vector<4x128xf32>
    %c0_15 = arith.constant 0 : index
    %c0_16 = arith.constant 0 : index
    %33 = vector.load %arg6[%c0_15, %c0_16] : memref<128x384xbf16, #tpu.memory_space<vmem>>, vector<128x384xbf16>
    %34 = arith.truncf %32 : vector<4x128xf32> to vector<4x128xbf16>
    %cst_17 = arith.constant dense<0.000000e+00> : vector<4x384xf32>
    %35 = tpu.matmul %34, %33, %cst_17 {dimension_numbers = #tpu.dot_dimension_numbers<[1], [0], [0], [1], [0, 0, 1, 1], [], []>} : vector<4x128xbf16>, vector<128x384xbf16>, vector<4x384xf32> -> vector<4x384xf32>
    %c0_18 = arith.constant 0 : index
    %c0_19 = arith.constant 0 : index
    %36 = vector.load %arg7[%c0_18, %c0_19] : memref<1x384xf32, #tpu.memory_space<vmem>>, vector<1x384xf32>
    %37 = vector.broadcast %36 : vector<1x384xf32> to vector<4x384xf32>
    %38 = arith.addf %35, %37 : vector<4x384xf32>
    %39 = vector.extract_strided_slice %38 {offsets = [0, 0], sizes = [4, 128], strides = [1, 1]} : vector<4x384xf32> to vector<4x128xf32>
    %40 = vector.extract_strided_slice %38 {offsets = [0, 128], sizes = [4, 128], strides = [1, 1]} : vector<4x384xf32> to vector<4x128xf32>
    %41 = vector.extract_strided_slice %38 {offsets = [0, 256], sizes = [4, 128], strides = [1, 1]} : vector<4x384xf32> to vector<4x128xf32>
    %42 = vector.extract_strided_slice %39 {offsets = [0, 0], sizes = [2, 128], strides = [1, 1]} : vector<4x128xf32> to vector<2x128xf32>
    %43 = vector.extract_strided_slice %40 {offsets = [0, 0], sizes = [2, 128], strides = [1, 1]} : vector<4x128xf32> to vector<2x128xf32>
    %44 = vector.extract_strided_slice %41 {offsets = [0, 0], sizes = [2, 128], strides = [1, 1]} : vector<4x128xf32> to vector<2x128xf32>
    %45 = vector.shape_cast %42 : vector<2x128xf32> to vector<2x1x128xf32>
    %46 = vector.shape_cast %43 : vector<2x128xf32> to vector<1x2x128xf32>
    %47 = vector.broadcast %45 : vector<2x1x128xf32> to vector<2x2x128xf32>
    %48 = vector.broadcast %46 : vector<1x2x128xf32> to vector<2x2x128xf32>
    %49 = arith.mulf %47, %48 : vector<2x2x128xf32>
    %cst_20 = arith.constant dense<0xFF800000> : vector<2x128xf32>
    %50 = vector.multi_reduction <maximumf>, %49, %cst_20 [1] : vector<2x2x128xf32> to vector<2x128xf32>
    %51 = vector.shape_cast %50 : vector<2x128xf32> to vector<2x1x128xf32>
    %52 = vector.broadcast %51 : vector<2x1x128xf32> to vector<2x2x128xf32>
    %53 = arith.subf %49, %52 : vector<2x2x128xf32>
    %54 = math.exp %53 : vector<2x2x128xf32>
    %cst_21 = arith.constant dense<0.000000e+00> : vector<2x128xf32>
    %55 = vector.multi_reduction <add>, %54, %cst_21 [1] : vector<2x2x128xf32> to vector<2x128xf32>
    %56 = vector.shape_cast %55 : vector<2x128xf32> to vector<2x1x128xf32>
    %57 = vector.broadcast %56 : vector<2x1x128xf32> to vector<2x2x128xf32>
    %58 = arith.divf %54, %57 : vector<2x2x128xf32>
    %59 = vector.shape_cast %44 : vector<2x128xf32> to vector<1x2x128xf32>
    %60 = vector.broadcast %59 : vector<1x2x128xf32> to vector<2x2x128xf32>
    %61 = arith.mulf %58, %60 : vector<2x2x128xf32>
    %cst_22 = arith.constant dense<0.000000e+00> : vector<2x128xf32>
    %62 = vector.multi_reduction <add>, %61, %cst_22 [1] : vector<2x2x128xf32> to vector<2x128xf32>
    %63 = vector.extract_strided_slice %39 {offsets = [2, 0], sizes = [2, 128], strides = [1, 1]} : vector<4x128xf32> to vector<2x128xf32>
    %64 = vector.extract_strided_slice %40 {offsets = [2, 0], sizes = [2, 128], strides = [1, 1]} : vector<4x128xf32> to vector<2x128xf32>
    %65 = vector.extract_strided_slice %41 {offsets = [2, 0], sizes = [2, 128], strides = [1, 1]} : vector<4x128xf32> to vector<2x128xf32>
    %66 = vector.shape_cast %63 : vector<2x128xf32> to vector<2x1x128xf32>
    %67 = vector.shape_cast %64 : vector<2x128xf32> to vector<1x2x128xf32>
    %68 = vector.broadcast %66 : vector<2x1x128xf32> to vector<2x2x128xf32>
    %69 = vector.broadcast %67 : vector<1x2x128xf32> to vector<2x2x128xf32>
    %70 = arith.mulf %68, %69 : vector<2x2x128xf32>
    %cst_23 = arith.constant dense<0xFF800000> : vector<2x128xf32>
    %71 = vector.multi_reduction <maximumf>, %70, %cst_23 [1] : vector<2x2x128xf32> to vector<2x128xf32>
    %72 = vector.shape_cast %71 : vector<2x128xf32> to vector<2x1x128xf32>
    %73 = vector.broadcast %72 : vector<2x1x128xf32> to vector<2x2x128xf32>
    %74 = arith.subf %70, %73 : vector<2x2x128xf32>
    %75 = math.exp %74 : vector<2x2x128xf32>
    %cst_24 = arith.constant dense<0.000000e+00> : vector<2x128xf32>
    %76 = vector.multi_reduction <add>, %75, %cst_24 [1] : vector<2x2x128xf32> to vector<2x128xf32>
    %77 = vector.shape_cast %76 : vector<2x128xf32> to vector<2x1x128xf32>
    %78 = vector.broadcast %77 : vector<2x1x128xf32> to vector<2x2x128xf32>
    %79 = arith.divf %75, %78 : vector<2x2x128xf32>
    %80 = vector.shape_cast %65 : vector<2x128xf32> to vector<1x2x128xf32>
    %81 = vector.broadcast %80 : vector<1x2x128xf32> to vector<2x2x128xf32>
    %82 = arith.mulf %79, %81 : vector<2x2x128xf32>
    %cst_25 = arith.constant dense<0.000000e+00> : vector<2x128xf32>
    %83 = vector.multi_reduction <add>, %82, %cst_25 [1] : vector<2x2x128xf32> to vector<2x128xf32>
    %84 = tpu.concatenate %62, %83 in 0 : vector<2x128xf32>, vector<2x128xf32> -> vector<4x128xf32>
    %c0_26 = arith.constant 0 : index
    %c0_27 = arith.constant 0 : index
    %85 = vector.load %arg8[%c0_26, %c0_27] : memref<128x128xbf16, #tpu.memory_space<vmem>>, vector<128x128xbf16>
    %86 = arith.truncf %84 : vector<4x128xf32> to vector<4x128xbf16>
    %cst_28 = arith.constant dense<0.000000e+00> : vector<4x128xf32>
    %87 = tpu.matmul %86, %85, %cst_28 {dimension_numbers = #tpu.dot_dimension_numbers<[1], [0], [0], [1], [0, 0, 1, 1], [], []>} : vector<4x128xbf16>, vector<128x128xbf16>, vector<4x128xf32> -> vector<4x128xf32>
    %88 = arith.addf %8, %87 : vector<4x128xf32>
    %c0_29 = arith.constant 0 : index
    %c0_30 = arith.constant 0 : index
    %89 = vector.load %arg9[%c0_29, %c0_30] : memref<1x128xf32, #tpu.memory_space<vmem>>, vector<1x128xf32>
    %90 = vector.broadcast %89 : vector<1x128xf32> to vector<4x128xf32>
    %91 = arith.addf %88, %90 : vector<4x128xf32>
    %92 = vector.extract_strided_slice %0 {offsets = [0, 0, 0], sizes = [1, 5, 128], strides = [1, 1, 1]} : vector<4x5x128xf32> to vector<1x5x128xf32>
    %93 = vector.shape_cast %92 : vector<1x5x128xf32> to vector<5x128xf32>
    %94 = vector.extract_strided_slice %91 {offsets = [0, 0], sizes = [1, 128], strides = [1, 1]} : vector<4x128xf32> to vector<1x128xf32>
    %95 = tpu.concatenate %93, %94 in 0 : vector<5x128xf32>, vector<1x128xf32> -> vector<6x128xf32>
    %c0_31 = arith.constant 0 : index
    %c0_32 = arith.constant 0 : index
    %96 = vector.load %arg10[%c0_31, %c0_32] : memref<1x128xf32, #tpu.memory_space<vmem>>, vector<1x128xf32>
    %c0_33 = arith.constant 0 : index
    %c0_34 = arith.constant 0 : index
    %97 = vector.load %arg11[%c0_33, %c0_34] : memref<1x128xf32, #tpu.memory_space<vmem>>, vector<1x128xf32>
    %cst_35 = arith.constant dense<0.000000e+00> : vector<6xf32>
    %98 = vector.multi_reduction <add>, %95, %cst_35 [1] : vector<6x128xf32> to vector<6xf32>
    %99 = vector.shape_cast %98 : vector<6xf32> to vector<6x1xf32>
    %cst_36 = arith.constant 1.280000e+02 : f32
    %100 = vector.broadcast %cst_36 : f32 to vector<6x1xf32>
    %101 = arith.divf %99, %100 : vector<6x1xf32>
    %102 = vector.broadcast %101 : vector<6x1xf32> to vector<6x128xf32>
    %103 = arith.subf %95, %102 : vector<6x128xf32>
    %104 = arith.mulf %103, %103 : vector<6x128xf32>
    %cst_37 = arith.constant dense<0.000000e+00> : vector<6xf32>
    %105 = vector.multi_reduction <add>, %104, %cst_37 [1] : vector<6x128xf32> to vector<6xf32>
    %106 = vector.shape_cast %105 : vector<6xf32> to vector<6x1xf32>
    %cst_38 = arith.constant 1.280000e+02 : f32
    %107 = vector.broadcast %cst_38 : f32 to vector<6x1xf32>
    %108 = arith.divf %106, %107 : vector<6x1xf32>
    %109 = vector.broadcast %101 : vector<6x1xf32> to vector<6x128xf32>
    %110 = arith.subf %95, %109 : vector<6x128xf32>
    %cst_39 = arith.constant 9.99999974E-6 : f32
    %111 = vector.broadcast %cst_39 : f32 to vector<6x1xf32>
    %112 = arith.addf %108, %111 : vector<6x1xf32>
    %113 = math.rsqrt %112 : vector<6x1xf32>
    %114 = vector.broadcast %113 : vector<6x1xf32> to vector<6x128xf32>
    %115 = arith.mulf %110, %114 : vector<6x128xf32>
    %116 = vector.broadcast %96 : vector<1x128xf32> to vector<6x128xf32>
    %117 = arith.mulf %115, %116 : vector<6x128xf32>
    %118 = vector.broadcast %97 : vector<1x128xf32> to vector<6x128xf32>
    %119 = arith.addf %117, %118 : vector<6x128xf32>
    %c0_40 = arith.constant 0 : index
    %c0_41 = arith.constant 0 : index
    %120 = vector.load %arg12[%c0_40, %c0_41] : memref<128x384xbf16, #tpu.memory_space<vmem>>, vector<128x384xbf16>
    %121 = arith.truncf %119 : vector<6x128xf32> to vector<6x128xbf16>
    %cst_42 = arith.constant dense<0.000000e+00> : vector<6x384xf32>
    %122 = tpu.matmul %121, %120, %cst_42 {dimension_numbers = #tpu.dot_dimension_numbers<[1], [0], [0], [1], [0, 0, 1, 1], [], []>} : vector<6x128xbf16>, vector<128x384xbf16>, vector<6x384xf32> -> vector<6x384xf32>
    %c0_43 = arith.constant 0 : index
    %c0_44 = arith.constant 0 : index
    %123 = vector.load %arg13[%c0_43, %c0_44] : memref<1x384xf32, #tpu.memory_space<vmem>>, vector<1x384xf32>
    %124 = vector.broadcast %123 : vector<1x384xf32> to vector<6x384xf32>
    %125 = arith.addf %122, %124 : vector<6x384xf32>
    %126 = vector.extract_strided_slice %125 {offsets = [0, 0], sizes = [6, 128], strides = [1, 1]} : vector<6x384xf32> to vector<6x128xf32>
    %127 = vector.extract_strided_slice %125 {offsets = [0, 128], sizes = [6, 128], strides = [1, 1]} : vector<6x384xf32> to vector<6x128xf32>
    %128 = vector.extract_strided_slice %125 {offsets = [0, 256], sizes = [6, 128], strides = [1, 1]} : vector<6x384xf32> to vector<6x128xf32>
    %129 = vector.shape_cast %126 : vector<6x128xf32> to vector<6x1x128xf32>
    %130 = vector.shape_cast %127 : vector<6x128xf32> to vector<1x6x128xf32>
    %131 = vector.broadcast %129 : vector<6x1x128xf32> to vector<6x6x128xf32>
    %132 = vector.broadcast %130 : vector<1x6x128xf32> to vector<6x6x128xf32>
    %133 = arith.mulf %131, %132 : vector<6x6x128xf32>
    %cst_45 = arith.constant dense<0xFF800000> : vector<6x128xf32>
    %134 = vector.multi_reduction <maximumf>, %133, %cst_45 [1] : vector<6x6x128xf32> to vector<6x128xf32>
    %135 = vector.shape_cast %134 : vector<6x128xf32> to vector<6x1x128xf32>
    %136 = vector.broadcast %135 : vector<6x1x128xf32> to vector<6x6x128xf32>
    %137 = arith.subf %133, %136 : vector<6x6x128xf32>
    %138 = math.exp %137 : vector<6x6x128xf32>
    %cst_46 = arith.constant dense<0.000000e+00> : vector<6x128xf32>
    %139 = vector.multi_reduction <add>, %138, %cst_46 [1] : vector<6x6x128xf32> to vector<6x128xf32>
    %140 = vector.shape_cast %139 : vector<6x128xf32> to vector<6x1x128xf32>
    %141 = vector.broadcast %140 : vector<6x1x128xf32> to vector<6x6x128xf32>
    %142 = arith.divf %138, %141 : vector<6x6x128xf32>
    %143 = vector.shape_cast %128 : vector<6x128xf32> to vector<1x6x128xf32>
    %144 = vector.broadcast %143 : vector<1x6x128xf32> to vector<6x6x128xf32>
    %145 = arith.mulf %142, %144 : vector<6x6x128xf32>
    %cst_47 = arith.constant dense<0.000000e+00> : vector<6x128xf32>
    %146 = vector.multi_reduction <add>, %145, %cst_47 [1] : vector<6x6x128xf32> to vector<6x128xf32>
    %c0_48 = arith.constant 0 : index
    %c0_49 = arith.constant 0 : index
    %147 = vector.load %arg14[%c0_48, %c0_49] : memref<128x128xbf16, #tpu.memory_space<vmem>>, vector<128x128xbf16>
    %148 = arith.truncf %146 : vector<6x128xf32> to vector<6x128xbf16>
    %cst_50 = arith.constant dense<0.000000e+00> : vector<6x128xf32>
    %149 = tpu.matmul %148, %147, %cst_50 {dimension_numbers = #tpu.dot_dimension_numbers<[1], [0], [0], [1], [0, 0, 1, 1], [], []>} : vector<6x128xbf16>, vector<128x128xbf16>, vector<6x128xf32> -> vector<6x128xf32>
    %150 = arith.addf %95, %149 : vector<6x128xf32>
    %c0_51 = arith.constant 0 : index
    %c0_52 = arith.constant 0 : index
    %151 = vector.load %arg15[%c0_51, %c0_52] : memref<1x128xf32, #tpu.memory_space<vmem>>, vector<1x128xf32>
    %152 = vector.broadcast %151 : vector<1x128xf32> to vector<6x128xf32>
    %153 = arith.addf %150, %152 : vector<6x128xf32>
    %154 = vector.extract_strided_slice %153 {offsets = [0, 0], sizes = [5, 128], strides = [1, 1]} : vector<6x128xf32> to vector<5x128xf32>
    %c0_53 = arith.constant 0 : index
    %c0_54 = arith.constant 0 : index
    %155 = vector.load %arg16[%c0_53, %c0_54] : memref<1x128xf32, #tpu.memory_space<vmem>>, vector<1x128xf32>
    %c0_55 = arith.constant 0 : index
    %c0_56 = arith.constant 0 : index
    %156 = vector.load %arg17[%c0_55, %c0_56] : memref<1x128xf32, #tpu.memory_space<vmem>>, vector<1x128xf32>
    %cst_57 = arith.constant dense<0.000000e+00> : vector<5xf32>
    %157 = vector.multi_reduction <add>, %154, %cst_57 [1] : vector<5x128xf32> to vector<5xf32>
    %158 = vector.shape_cast %157 : vector<5xf32> to vector<5x1xf32>
    %cst_58 = arith.constant 1.280000e+02 : f32
    %159 = vector.broadcast %cst_58 : f32 to vector<5x1xf32>
    %160 = arith.divf %158, %159 : vector<5x1xf32>
    %161 = vector.broadcast %160 : vector<5x1xf32> to vector<5x128xf32>
    %162 = arith.subf %154, %161 : vector<5x128xf32>
    %163 = arith.mulf %162, %162 : vector<5x128xf32>
    %cst_59 = arith.constant dense<0.000000e+00> : vector<5xf32>
    %164 = vector.multi_reduction <add>, %163, %cst_59 [1] : vector<5x128xf32> to vector<5xf32>
    %165 = vector.shape_cast %164 : vector<5xf32> to vector<5x1xf32>
    %cst_60 = arith.constant 1.280000e+02 : f32
    %166 = vector.broadcast %cst_60 : f32 to vector<5x1xf32>
    %167 = arith.divf %165, %166 : vector<5x1xf32>
    %168 = vector.broadcast %160 : vector<5x1xf32> to vector<5x128xf32>
    %169 = arith.subf %154, %168 : vector<5x128xf32>
    %cst_61 = arith.constant 9.99999974E-6 : f32
    %170 = vector.broadcast %cst_61 : f32 to vector<5x1xf32>
    %171 = arith.addf %167, %170 : vector<5x1xf32>
    %172 = math.rsqrt %171 : vector<5x1xf32>
    %173 = vector.broadcast %172 : vector<5x1xf32> to vector<5x128xf32>
    %174 = arith.mulf %169, %173 : vector<5x128xf32>
    %175 = vector.broadcast %155 : vector<1x128xf32> to vector<5x128xf32>
    %176 = arith.mulf %174, %175 : vector<5x128xf32>
    %177 = vector.broadcast %156 : vector<1x128xf32> to vector<5x128xf32>
    %178 = arith.addf %176, %177 : vector<5x128xf32>
    %c0_62 = arith.constant 0 : index
    %c0_63 = arith.constant 0 : index
    %179 = vector.load %arg18[%c0_62, %c0_63] : memref<128x512xbf16, #tpu.memory_space<vmem>>, vector<128x512xbf16>
    %180 = arith.truncf %178 : vector<5x128xf32> to vector<5x128xbf16>
    %cst_64 = arith.constant dense<0.000000e+00> : vector<5x512xf32>
    %181 = tpu.matmul %180, %179, %cst_64 {dimension_numbers = #tpu.dot_dimension_numbers<[1], [0], [0], [1], [0, 0, 1, 1], [], []>} : vector<5x128xbf16>, vector<128x512xbf16>, vector<5x512xf32> -> vector<5x512xf32>
    %c0_65 = arith.constant 0 : index
    %c0_66 = arith.constant 0 : index
    %182 = vector.load %arg19[%c0_65, %c0_66] : memref<1x512xf32, #tpu.memory_space<vmem>>, vector<1x512xf32>
    %183 = vector.broadcast %182 : vector<1x512xf32> to vector<5x512xf32>
    %184 = arith.addf %181, %183 : vector<5x512xf32>
    %cst_67 = arith.constant 1.702000e+00 : f32
    %185 = vector.broadcast %cst_67 : f32 to vector<5x512xf32>
    %186 = arith.mulf %185, %184 : vector<5x512xf32>
    %187 = arith.negf %186 : vector<5x512xf32>
    %188 = math.exp %187 : vector<5x512xf32>
    %cst_68 = arith.constant 1.000000e+00 : f32
    %189 = vector.broadcast %cst_68 : f32 to vector<5x512xf32>
    %190 = arith.addf %189, %188 : vector<5x512xf32>
    %191 = arith.divf %189, %190 : vector<5x512xf32>
    %192 = arith.mulf %184, %191 : vector<5x512xf32>
    %c0_69 = arith.constant 0 : index
    %c0_70 = arith.constant 0 : index
    %193 = vector.load %arg20[%c0_69, %c0_70] : memref<512x128xbf16, #tpu.memory_space<vmem>>, vector<512x128xbf16>
    %194 = arith.truncf %192 : vector<5x512xf32> to vector<5x512xbf16>
    %cst_71 = arith.constant dense<0.000000e+00> : vector<5x128xf32>
    %195 = tpu.matmul %194, %193, %cst_71 {dimension_numbers = #tpu.dot_dimension_numbers<[1], [0], [0], [1], [0, 0, 1, 1], [], []>} : vector<5x512xbf16>, vector<512x128xbf16>, vector<5x128xf32> -> vector<5x128xf32>
    %c0_72 = arith.constant 0 : index
    %c0_73 = arith.constant 0 : index
    %196 = vector.load %arg21[%c0_72, %c0_73] : memref<1x128xf32, #tpu.memory_space<vmem>>, vector<1x128xf32>
    %197 = vector.broadcast %196 : vector<1x128xf32> to vector<5x128xf32>
    %198 = arith.addf %195, %197 : vector<5x128xf32>
    %199 = arith.addf %154, %198 : vector<5x128xf32>
    %c0_74 = arith.constant 0 : index
    %c0_75 = arith.constant 0 : index
    %c0_76 = arith.constant 0 : index
    %200 = vector.load %arg22[%c0_74, %c0_75, %c0_76] : memref<4x5x128xf32, #tpu.memory_space<vmem>>, vector<1x5x128xf32>
    %201 = vector.shape_cast %200 : vector<1x5x128xf32> to vector<5x128xf32>
    %202 = vector.shape_cast %199 : vector<5x128xf32> to vector<1x5x128xf32>
    tpu.vector_store %arg22[%c0_74, %c0_75, %c0_76], %202 {strides = array<i32>} : memref<4x5x128xf32, #tpu.memory_space<vmem>>, vector<1x5x128xf32>,
    %203 = vector.extract_strided_slice %0 {offsets = [1, 0, 0], sizes = [1, 5, 128], strides = [1, 1, 1]} : vector<4x5x128xf32> to vector<1x5x128xf32>
    %204 = vector.shape_cast %203 : vector<1x5x128xf32> to vector<5x128xf32>
    %205 = vector.extract_strided_slice %91 {offsets = [1, 0], sizes = [1, 128], strides = [1, 1]} : vector<4x128xf32> to vector<1x128xf32>
    %206 = tpu.concatenate %204, %205 in 0 : vector<5x128xf32>, vector<1x128xf32> -> vector<6x128xf32>
    %c0_77 = arith.constant 0 : index
    %c0_78 = arith.constant 0 : index
    %207 = vector.load %arg10[%c0_77, %c0_78] : memref<1x128xf32, #tpu.memory_space<vmem>>, vector<1x128xf32>
    %c0_79 = arith.constant 0 : index
    %c0_80 = arith.constant 0 : index
    %208 = vector.load %arg11[%c0_79, %c0_80] : memref<1x128xf32, #tpu.memory_space<vmem>>, vector<1x128xf32>
    %cst_81 = arith.constant dense<0.000000e+00> : vector<6xf32>
    %209 = vector.multi_reduction <add>, %206, %cst_81 [1] : vector<6x128xf32> to vector<6xf32>
    %210 = vector.shape_cast %209 : vector<6xf32> to vector<6x1xf32>
    %cst_82 = arith.constant 1.280000e+02 : f32
    %211 = vector.broadcast %cst_82 : f32 to vector<6x1xf32>
    %212 = arith.divf %210, %211 : vector<6x1xf32>
    %213 = vector.broadcast %212 : vector<6x1xf32> to vector<6x128xf32>
    %214 = arith.subf %206, %213 : vector<6x128xf32>
    %215 = arith.mulf %214, %214 : vector<6x128xf32>
    %cst_83 = arith.constant dense<0.000000e+00> : vector<6xf32>
    %216 = vector.multi_reduction <add>, %215, %cst_83 [1] : vector<6x128xf32> to vector<6xf32>
    %217 = vector.shape_cast %216 : vector<6xf32> to vector<6x1xf32>
    %cst_84 = arith.constant 1.280000e+02 : f32
    %218 = vector.broadcast %cst_84 : f32 to vector<6x1xf32>
    %219 = arith.divf %217, %218 : vector<6x1xf32>
    %220 = vector.broadcast %212 : vector<6x1xf32> to vector<6x128xf32>
    %221 = arith.subf %206, %220 : vector<6x128xf32>
    %cst_85 = arith.constant 9.99999974E-6 : f32
    %222 = vector.broadcast %cst_85 : f32 to vector<6x1xf32>
    %223 = arith.addf %219, %222 : vector<6x1xf32>
    %224 = math.rsqrt %223 : vector<6x1xf32>
    %225 = vector.broadcast %224 : vector<6x1xf32> to vector<6x128xf32>
    %226 = arith.mulf %221, %225 : vector<6x128xf32>
    %227 = vector.broadcast %207 : vector<1x128xf32> to vector<6x128xf32>
    %228 = arith.mulf %226, %227 : vector<6x128xf32>
    %229 = vector.broadcast %208 : vector<1x128xf32> to vector<6x128xf32>
    %230 = arith.addf %228, %229 : vector<6x128xf32>
    %c0_86 = arith.constant 0 : index
    %c0_87 = arith.constant 0 : index
    %231 = vector.load %arg12[%c0_86, %c0_87] : memref<128x384xbf16, #tpu.memory_space<vmem>>, vector<128x384xbf16>
    %232 = arith.truncf %230 : vector<6x128xf32> to vector<6x128xbf16>
    %cst_88 = arith.constant dense<0.000000e+00> : vector<6x384xf32>
    %233 = tpu.matmul %232, %231, %cst_88 {dimension_numbers = #tpu.dot_dimension_numbers<[1], [0], [0], [1], [0, 0, 1, 1], [], []>} : vector<6x128xbf16>, vector<128x384xbf16>, vector<6x384xf32> -> vector<6x384xf32>
    %c0_89 = arith.constant 0 : index
    %c0_90 = arith.constant 0 : index
    %234 = vector.load %arg13[%c0_89, %c0_90] : memref<1x384xf32, #tpu.memory_space<vmem>>, vector<1x384xf32>
    %235 = vector.broadcast %234 : vector<1x384xf32> to vector<6x384xf32>
    %236 = arith.addf %233, %235 : vector<6x384xf32>
    %237 = vector.extract_strided_slice %236 {offsets = [0, 0], sizes = [6, 128], strides = [1, 1]} : vector<6x384xf32> to vector<6x128xf32>
    %238 = vector.extract_strided_slice %236 {offsets = [0, 128], sizes = [6, 128], strides = [1, 1]} : vector<6x384xf32> to vector<6x128xf32>
    %239 = vector.extract_strided_slice %236 {offsets = [0, 256], sizes = [6, 128], strides = [1, 1]} : vector<6x384xf32> to vector<6x128xf32>
    %240 = vector.shape_cast %237 : vector<6x128xf32> to vector<6x1x128xf32>
    %241 = vector.shape_cast %238 : vector<6x128xf32> to vector<1x6x128xf32>
    %242 = vector.broadcast %240 : vector<6x1x128xf32> to vector<6x6x128xf32>
    %243 = vector.broadcast %241 : vector<1x6x128xf32> to vector<6x6x128xf32>
    %244 = arith.mulf %242, %243 : vector<6x6x128xf32>
    %cst_91 = arith.constant dense<0xFF800000> : vector<6x128xf32>
    %245 = vector.multi_reduction <maximumf>, %244, %cst_91 [1] : vector<6x6x128xf32> to vector<6x128xf32>
    %246 = vector.shape_cast %245 : vector<6x128xf32> to vector<6x1x128xf32>
    %247 = vector.broadcast %246 : vector<6x1x128xf32> to vector<6x6x128xf32>
    %248 = arith.subf %244, %247 : vector<6x6x128xf32>
    %249 = math.exp %248 : vector<6x6x128xf32>
    %cst_92 = arith.constant dense<0.000000e+00> : vector<6x128xf32>
    %250 = vector.multi_reduction <add>, %249, %cst_92 [1] : vector<6x6x128xf32> to vector<6x128xf32>
    %251 = vector.shape_cast %250 : vector<6x128xf32> to vector<6x1x128xf32>
    %252 = vector.broadcast %251 : vector<6x1x128xf32> to vector<6x6x128xf32>
    %253 = arith.divf %249, %252 : vector<6x6x128xf32>
    %254 = vector.shape_cast %239 : vector<6x128xf32> to vector<1x6x128xf32>
    %255 = vector.broadcast %254 : vector<1x6x128xf32> to vector<6x6x128xf32>
    %256 = arith.mulf %253, %255 : vector<6x6x128xf32>
    %cst_93 = arith.constant dense<0.000000e+00> : vector<6x128xf32>
    %257 = vector.multi_reduction <add>, %256, %cst_93 [1] : vector<6x6x128xf32> to vector<6x128xf32>
    %c0_94 = arith.constant 0 : index
    %c0_95 = arith.constant 0 : index
    %258 = vector.load %arg14[%c0_94, %c0_95] : memref<128x128xbf16, #tpu.memory_space<vmem>>, vector<128x128xbf16>
    %259 = arith.truncf %257 : vector<6x128xf32> to vector<6x128xbf16>
    %cst_96 = arith.constant dense<0.000000e+00> : vector<6x128xf32>
    %260 = tpu.matmul %259, %258, %cst_96 {dimension_numbers = #tpu.dot_dimension_numbers<[1], [0], [0], [1], [0, 0, 1, 1], [], []>} : vector<6x128xbf16>, vector<128x128xbf16>, vector<6x128xf32> -> vector<6x128xf32>
    %261 = arith.addf %206, %260 : vector<6x128xf32>
    %c0_97 = arith.constant 0 : index
    %c0_98 = arith.constant 0 : index
    %262 = vector.load %arg15[%c0_97, %c0_98] : memref<1x128xf32, #tpu.memory_space<vmem>>, vector<1x128xf32>
    %263 = vector.broadcast %262 : vector<1x128xf32> to vector<6x128xf32>
    %264 = arith.addf %261, %263 : vector<6x128xf32>
    %265 = vector.extract_strided_slice %264 {offsets = [0, 0], sizes = [5, 128], strides = [1, 1]} : vector<6x128xf32> to vector<5x128xf32>
    %c0_99 = arith.constant 0 : index
    %c0_100 = arith.constant 0 : index
    %266 = vector.load %arg16[%c0_99, %c0_100] : memref<1x128xf32, #tpu.memory_space<vmem>>, vector<1x128xf32>
    %c0_101 = arith.constant 0 : index
    %c0_102 = arith.constant 0 : index
    %267 = vector.load %arg17[%c0_101, %c0_102] : memref<1x128xf32, #tpu.memory_space<vmem>>, vector<1x128xf32>
    %cst_103 = arith.constant dense<0.000000e+00> : vector<5xf32>
    %268 = vector.multi_reduction <add>, %265, %cst_103 [1] : vector<5x128xf32> to vector<5xf32>
    %269 = vector.shape_cast %268 : vector<5xf32> to vector<5x1xf32>
    %cst_104 = arith.constant 1.280000e+02 : f32
    %270 = vector.broadcast %cst_104 : f32 to vector<5x1xf32>
    %271 = arith.divf %269, %270 : vector<5x1xf32>
    %272 = vector.broadcast %271 : vector<5x1xf32> to vector<5x128xf32>
    %273 = arith.subf %265, %272 : vector<5x128xf32>
    %274 = arith.mulf %273, %273 : vector<5x128xf32>
    %cst_105 = arith.constant dense<0.000000e+00> : vector<5xf32>
    %275 = vector.multi_reduction <add>, %274, %cst_105 [1] : vector<5x128xf32> to vector<5xf32>
    %276 = vector.shape_cast %275 : vector<5xf32> to vector<5x1xf32>
    %cst_106 = arith.constant 1.280000e+02 : f32
    %277 = vector.broadcast %cst_106 : f32 to vector<5x1xf32>
    %278 = arith.divf %276, %277 : vector<5x1xf32>
    %279 = vector.broadcast %271 : vector<5x1xf32> to vector<5x128xf32>
    %280 = arith.subf %265, %279 : vector<5x128xf32>
    %cst_107 = arith.constant 9.99999974E-6 : f32
    %281 = vector.broadcast %cst_107 : f32 to vector<5x1xf32>
    %282 = arith.addf %278, %281 : vector<5x1xf32>
    %283 = math.rsqrt %282 : vector<5x1xf32>
    %284 = vector.broadcast %283 : vector<5x1xf32> to vector<5x128xf32>
    %285 = arith.mulf %280, %284 : vector<5x128xf32>
    %286 = vector.broadcast %266 : vector<1x128xf32> to vector<5x128xf32>
    %287 = arith.mulf %285, %286 : vector<5x128xf32>
    %288 = vector.broadcast %267 : vector<1x128xf32> to vector<5x128xf32>
    %289 = arith.addf %287, %288 : vector<5x128xf32>
    %c0_108 = arith.constant 0 : index
    %c0_109 = arith.constant 0 : index
    %290 = vector.load %arg18[%c0_108, %c0_109] : memref<128x512xbf16, #tpu.memory_space<vmem>>, vector<128x512xbf16>
    %291 = arith.truncf %289 : vector<5x128xf32> to vector<5x128xbf16>
    %cst_110 = arith.constant dense<0.000000e+00> : vector<5x512xf32>
    %292 = tpu.matmul %291, %290, %cst_110 {dimension_numbers = #tpu.dot_dimension_numbers<[1], [0], [0], [1], [0, 0, 1, 1], [], []>} : vector<5x128xbf16>, vector<128x512xbf16>, vector<5x512xf32> -> vector<5x512xf32>
    %c0_111 = arith.constant 0 : index
    %c0_112 = arith.constant 0 : index
    %293 = vector.load %arg19[%c0_111, %c0_112] : memref<1x512xf32, #tpu.memory_space<vmem>>, vector<1x512xf32>
    %294 = vector.broadcast %293 : vector<1x512xf32> to vector<5x512xf32>
    %295 = arith.addf %292, %294 : vector<5x512xf32>
    %cst_113 = arith.constant 1.702000e+00 : f32
    %296 = vector.broadcast %cst_113 : f32 to vector<5x512xf32>
    %297 = arith.mulf %296, %295 : vector<5x512xf32>
    %298 = arith.negf %297 : vector<5x512xf32>
    %299 = math.exp %298 : vector<5x512xf32>
    %cst_114 = arith.constant 1.000000e+00 : f32
    %300 = vector.broadcast %cst_114 : f32 to vector<5x512xf32>
    %301 = arith.addf %300, %299 : vector<5x512xf32>
    %302 = arith.divf %300, %301 : vector<5x512xf32>
    %303 = arith.mulf %295, %302 : vector<5x512xf32>
    %c0_115 = arith.constant 0 : index
    %c0_116 = arith.constant 0 : index
    %304 = vector.load %arg20[%c0_115, %c0_116] : memref<512x128xbf16, #tpu.memory_space<vmem>>, vector<512x128xbf16>
    %305 = arith.truncf %303 : vector<5x512xf32> to vector<5x512xbf16>
    %cst_117 = arith.constant dense<0.000000e+00> : vector<5x128xf32>
    %306 = tpu.matmul %305, %304, %cst_117 {dimension_numbers = #tpu.dot_dimension_numbers<[1], [0], [0], [1], [0, 0, 1, 1], [], []>} : vector<5x512xbf16>, vector<512x128xbf16>, vector<5x128xf32> -> vector<5x128xf32>
    %c0_118 = arith.constant 0 : index
    %c0_119 = arith.constant 0 : index
    %307 = vector.load %arg21[%c0_118, %c0_119] : memref<1x128xf32, #tpu.memory_space<vmem>>, vector<1x128xf32>
    %308 = vector.broadcast %307 : vector<1x128xf32> to vector<5x128xf32>
    %309 = arith.addf %306, %308 : vector<5x128xf32>
    %310 = arith.addf %265, %309 : vector<5x128xf32>
    %c1 = arith.constant 1 : index
    %c0_120 = arith.constant 0 : index
    %c0_121 = arith.constant 0 : index
    %311 = vector.load %arg22[%c1, %c0_120, %c0_121] : memref<4x5x128xf32, #tpu.memory_space<vmem>>, vector<1x5x128xf32>
    %312 = vector.shape_cast %311 : vector<1x5x128xf32> to vector<5x128xf32>
    %313 = vector.shape_cast %310 : vector<5x128xf32> to vector<1x5x128xf32>
    tpu.vector_store %arg22[%c1, %c0_120, %c0_121], %313 {strides = array<i32>} : memref<4x5x128xf32, #tpu.memory_space<vmem>>, vector<1x5x128xf32>,
    %314 = vector.extract_strided_slice %0 {offsets = [2, 0, 0], sizes = [1, 5, 128], strides = [1, 1, 1]} : vector<4x5x128xf32> to vector<1x5x128xf32>
    %315 = vector.shape_cast %314 : vector<1x5x128xf32> to vector<5x128xf32>
    %316 = vector.extract_strided_slice %91 {offsets = [2, 0], sizes = [1, 128], strides = [1, 1]} : vector<4x128xf32> to vector<1x128xf32>
    %317 = tpu.concatenate %315, %316 in 0 : vector<5x128xf32>, vector<1x128xf32> -> vector<6x128xf32>
    %c0_122 = arith.constant 0 : index
    %c0_123 = arith.constant 0 : index
    %318 = vector.load %arg10[%c0_122, %c0_123] : memref<1x128xf32, #tpu.memory_space<vmem>>, vector<1x128xf32>
    %c0_124 = arith.constant 0 : index
    %c0_125 = arith.constant 0 : index
    %319 = vector.load %arg11[%c0_124, %c0_125] : memref<1x128xf32, #tpu.memory_space<vmem>>, vector<1x128xf32>
    %cst_126 = arith.constant dense<0.000000e+00> : vector<6xf32>
    %320 = vector.multi_reduction <add>, %317, %cst_126 [1] : vector<6x128xf32> to vector<6xf32>
    %321 = vector.shape_cast %320 : vector<6xf32> to vector<6x1xf32>
    %cst_127 = arith.constant 1.280000e+02 : f32
    %322 = vector.broadcast %cst_127 : f32 to vector<6x1xf32>
    %323 = arith.divf %321, %322 : vector<6x1xf32>
    %324 = vector.broadcast %323 : vector<6x1xf32> to vector<6x128xf32>
    %325 = arith.subf %317, %324 : vector<6x128xf32>
    %326 = arith.mulf %325, %325 : vector<6x128xf32>
    %cst_128 = arith.constant dense<0.000000e+00> : vector<6xf32>
    %327 = vector.multi_reduction <add>, %326, %cst_128 [1] : vector<6x128xf32> to vector<6xf32>
    %328 = vector.shape_cast %327 : vector<6xf32> to vector<6x1xf32>
    %cst_129 = arith.constant 1.280000e+02 : f32
    %329 = vector.broadcast %cst_129 : f32 to vector<6x1xf32>
    %330 = arith.divf %328, %329 : vector<6x1xf32>
    %331 = vector.broadcast %323 : vector<6x1xf32> to vector<6x128xf32>
    %332 = arith.subf %317, %331 : vector<6x128xf32>
    %cst_130 = arith.constant 9.99999974E-6 : f32
    %333 = vector.broadcast %cst_130 : f32 to vector<6x1xf32>
    %334 = arith.addf %330, %333 : vector<6x1xf32>
    %335 = math.rsqrt %334 : vector<6x1xf32>
    %336 = vector.broadcast %335 : vector<6x1xf32> to vector<6x128xf32>
    %337 = arith.mulf %332, %336 : vector<6x128xf32>
    %338 = vector.broadcast %318 : vector<1x128xf32> to vector<6x128xf32>
    %339 = arith.mulf %337, %338 : vector<6x128xf32>
    %340 = vector.broadcast %319 : vector<1x128xf32> to vector<6x128xf32>
    %341 = arith.addf %339, %340 : vector<6x128xf32>
    %c0_131 = arith.constant 0 : index
    %c0_132 = arith.constant 0 : index
    %342 = vector.load %arg12[%c0_131, %c0_132] : memref<128x384xbf16, #tpu.memory_space<vmem>>, vector<128x384xbf16>
    %343 = arith.truncf %341 : vector<6x128xf32> to vector<6x128xbf16>
    %cst_133 = arith.constant dense<0.000000e+00> : vector<6x384xf32>
    %344 = tpu.matmul %343, %342, %cst_133 {dimension_numbers = #tpu.dot_dimension_numbers<[1], [0], [0], [1], [0, 0, 1, 1], [], []>} : vector<6x128xbf16>, vector<128x384xbf16>, vector<6x384xf32> -> vector<6x384xf32>
    %c0_134 = arith.constant 0 : index
    %c0_135 = arith.constant 0 : index
    %345 = vector.load %arg13[%c0_134, %c0_135] : memref<1x384xf32, #tpu.memory_space<vmem>>, vector<1x384xf32>
    %346 = vector.broadcast %345 : vector<1x384xf32> to vector<6x384xf32>
    %347 = arith.addf %344, %346 : vector<6x384xf32>
    %348 = vector.extract_strided_slice %347 {offsets = [0, 0], sizes = [6, 128], strides = [1, 1]} : vector<6x384xf32> to vector<6x128xf32>
    %349 = vector.extract_strided_slice %347 {offsets = [0, 128], sizes = [6, 128], strides = [1, 1]} : vector<6x384xf32> to vector<6x128xf32>
    %350 = vector.extract_strided_slice %347 {offsets = [0, 256], sizes = [6, 128], strides = [1, 1]} : vector<6x384xf32> to vector<6x128xf32>
    %351 = vector.shape_cast %348 : vector<6x128xf32> to vector<6x1x128xf32>
    %352 = vector.shape_cast %349 : vector<6x128xf32> to vector<1x6x128xf32>
    %353 = vector.broadcast %351 : vector<6x1x128xf32> to vector<6x6x128xf32>
    %354 = vector.broadcast %352 : vector<1x6x128xf32> to vector<6x6x128xf32>
    %355 = arith.mulf %353, %354 : vector<6x6x128xf32>
    %cst_136 = arith.constant dense<0xFF800000> : vector<6x128xf32>
    %356 = vector.multi_reduction <maximumf>, %355, %cst_136 [1] : vector<6x6x128xf32> to vector<6x128xf32>
    %357 = vector.shape_cast %356 : vector<6x128xf32> to vector<6x1x128xf32>
    %358 = vector.broadcast %357 : vector<6x1x128xf32> to vector<6x6x128xf32>
    %359 = arith.subf %355, %358 : vector<6x6x128xf32>
    %360 = math.exp %359 : vector<6x6x128xf32>
    %cst_137 = arith.constant dense<0.000000e+00> : vector<6x128xf32>
    %361 = vector.multi_reduction <add>, %360, %cst_137 [1] : vector<6x6x128xf32> to vector<6x128xf32>
    %362 = vector.shape_cast %361 : vector<6x128xf32> to vector<6x1x128xf32>
    %363 = vector.broadcast %362 : vector<6x1x128xf32> to vector<6x6x128xf32>
    %364 = arith.divf %360, %363 : vector<6x6x128xf32>
    %365 = vector.shape_cast %350 : vector<6x128xf32> to vector<1x6x128xf32>
    %366 = vector.broadcast %365 : vector<1x6x128xf32> to vector<6x6x128xf32>
    %367 = arith.mulf %364, %366 : vector<6x6x128xf32>
    %cst_138 = arith.constant dense<0.000000e+00> : vector<6x128xf32>
    %368 = vector.multi_reduction <add>, %367, %cst_138 [1] : vector<6x6x128xf32> to vector<6x128xf32>
    %c0_139 = arith.constant 0 : index
    %c0_140 = arith.constant 0 : index
    %369 = vector.load %arg14[%c0_139, %c0_140] : memref<128x128xbf16, #tpu.memory_space<vmem>>, vector<128x128xbf16>
    %370 = arith.truncf %368 : vector<6x128xf32> to vector<6x128xbf16>
    %cst_141 = arith.constant dense<0.000000e+00> : vector<6x128xf32>
    %371 = tpu.matmul %370, %369, %cst_141 {dimension_numbers = #tpu.dot_dimension_numbers<[1], [0], [0], [1], [0, 0, 1, 1], [], []>} : vector<6x128xbf16>, vector<128x128xbf16>, vector<6x128xf32> -> vector<6x128xf32>
    %372 = arith.addf %317, %371 : vector<6x128xf32>
    %c0_142 = arith.constant 0 : index
    %c0_143 = arith.constant 0 : index
    %373 = vector.load %arg15[%c0_142, %c0_143] : memref<1x128xf32, #tpu.memory_space<vmem>>, vector<1x128xf32>
    %374 = vector.broadcast %373 : vector<1x128xf32> to vector<6x128xf32>
    %375 = arith.addf %372, %374 : vector<6x128xf32>
    %376 = vector.extract_strided_slice %375 {offsets = [0, 0], sizes = [5, 128], strides = [1, 1]} : vector<6x128xf32> to vector<5x128xf32>
    %c0_144 = arith.constant 0 : index
    %c0_145 = arith.constant 0 : index
    %377 = vector.load %arg16[%c0_144, %c0_145] : memref<1x128xf32, #tpu.memory_space<vmem>>, vector<1x128xf32>
    %c0_146 = arith.constant 0 : index
    %c0_147 = arith.constant 0 : index
    %378 = vector.load %arg17[%c0_146, %c0_147] : memref<1x128xf32, #tpu.memory_space<vmem>>, vector<1x128xf32>
    %cst_148 = arith.constant dense<0.000000e+00> : vector<5xf32>
    %379 = vector.multi_reduction <add>, %376, %cst_148 [1] : vector<5x128xf32> to vector<5xf32>
    %380 = vector.shape_cast %379 : vector<5xf32> to vector<5x1xf32>
    %cst_149 = arith.constant 1.280000e+02 : f32
    %381 = vector.broadcast %cst_149 : f32 to vector<5x1xf32>
    %382 = arith.divf %380, %381 : vector<5x1xf32>
    %383 = vector.broadcast %382 : vector<5x1xf32> to vector<5x128xf32>
    %384 = arith.subf %376, %383 : vector<5x128xf32>
    %385 = arith.mulf %384, %384 : vector<5x128xf32>
    %cst_150 = arith.constant dense<0.000000e+00> : vector<5xf32>
    %386 = vector.multi_reduction <add>, %385, %cst_150 [1] : vector<5x128xf32> to vector<5xf32>
    %387 = vector.shape_cast %386 : vector<5xf32> to vector<5x1xf32>
    %cst_151 = arith.constant 1.280000e+02 : f32
    %388 = vector.broadcast %cst_151 : f32 to vector<5x1xf32>
    %389 = arith.divf %387, %388 : vector<5x1xf32>
    %390 = vector.broadcast %382 : vector<5x1xf32> to vector<5x128xf32>
    %391 = arith.subf %376, %390 : vector<5x128xf32>
    %cst_152 = arith.constant 9.99999974E-6 : f32
    %392 = vector.broadcast %cst_152 : f32 to vector<5x1xf32>
    %393 = arith.addf %389, %392 : vector<5x1xf32>
    %394 = math.rsqrt %393 : vector<5x1xf32>
    %395 = vector.broadcast %394 : vector<5x1xf32> to vector<5x128xf32>
    %396 = arith.mulf %391, %395 : vector<5x128xf32>
    %397 = vector.broadcast %377 : vector<1x128xf32> to vector<5x128xf32>
    %398 = arith.mulf %396, %397 : vector<5x128xf32>
    %399 = vector.broadcast %378 : vector<1x128xf32> to vector<5x128xf32>
    %400 = arith.addf %398, %399 : vector<5x128xf32>
    %c0_153 = arith.constant 0 : index
    %c0_154 = arith.constant 0 : index
    %401 = vector.load %arg18[%c0_153, %c0_154] : memref<128x512xbf16, #tpu.memory_space<vmem>>, vector<128x512xbf16>
    %402 = arith.truncf %400 : vector<5x128xf32> to vector<5x128xbf16>
    %cst_155 = arith.constant dense<0.000000e+00> : vector<5x512xf32>
    %403 = tpu.matmul %402, %401, %cst_155 {dimension_numbers = #tpu.dot_dimension_numbers<[1], [0], [0], [1], [0, 0, 1, 1], [], []>} : vector<5x128xbf16>, vector<128x512xbf16>, vector<5x512xf32> -> vector<5x512xf32>
    %c0_156 = arith.constant 0 : index
    %c0_157 = arith.constant 0 : index
    %404 = vector.load %arg19[%c0_156, %c0_157] : memref<1x512xf32, #tpu.memory_space<vmem>>, vector<1x512xf32>
    %405 = vector.broadcast %404 : vector<1x512xf32> to vector<5x512xf32>
    %406 = arith.addf %403, %405 : vector<5x512xf32>
    %cst_158 = arith.constant 1.702000e+00 : f32
    %407 = vector.broadcast %cst_158 : f32 to vector<5x512xf32>
    %408 = arith.mulf %407, %406 : vector<5x512xf32>
    %409 = arith.negf %408 : vector<5x512xf32>
    %410 = math.exp %409 : vector<5x512xf32>
    %cst_159 = arith.constant 1.000000e+00 : f32
    %411 = vector.broadcast %cst_159 : f32 to vector<5x512xf32>
    %412 = arith.addf %411, %410 : vector<5x512xf32>
    %413 = arith.divf %411, %412 : vector<5x512xf32>
    %414 = arith.mulf %406, %413 : vector<5x512xf32>
    %c0_160 = arith.constant 0 : index
    %c0_161 = arith.constant 0 : index
    %415 = vector.load %arg20[%c0_160, %c0_161] : memref<512x128xbf16, #tpu.memory_space<vmem>>, vector<512x128xbf16>
    %416 = arith.truncf %414 : vector<5x512xf32> to vector<5x512xbf16>
    %cst_162 = arith.constant dense<0.000000e+00> : vector<5x128xf32>
    %417 = tpu.matmul %416, %415, %cst_162 {dimension_numbers = #tpu.dot_dimension_numbers<[1], [0], [0], [1], [0, 0, 1, 1], [], []>} : vector<5x512xbf16>, vector<512x128xbf16>, vector<5x128xf32> -> vector<5x128xf32>
    %c0_163 = arith.constant 0 : index
    %c0_164 = arith.constant 0 : index
    %418 = vector.load %arg21[%c0_163, %c0_164] : memref<1x128xf32, #tpu.memory_space<vmem>>, vector<1x128xf32>
    %419 = vector.broadcast %418 : vector<1x128xf32> to vector<5x128xf32>
    %420 = arith.addf %417, %419 : vector<5x128xf32>
    %421 = arith.addf %376, %420 : vector<5x128xf32>
    %c2 = arith.constant 2 : index
    %c0_165 = arith.constant 0 : index
    %c0_166 = arith.constant 0 : index
    %422 = vector.load %arg22[%c2, %c0_165, %c0_166] : memref<4x5x128xf32, #tpu.memory_space<vmem>>, vector<1x5x128xf32>
    %423 = vector.shape_cast %422 : vector<1x5x128xf32> to vector<5x128xf32>
    %424 = vector.shape_cast %421 : vector<5x128xf32> to vector<1x5x128xf32>
    tpu.vector_store %arg22[%c2, %c0_165, %c0_166], %424 {strides = array<i32>} : memref<4x5x128xf32, #tpu.memory_space<vmem>>, vector<1x5x128xf32>,
    %425 = vector.extract_strided_slice %0 {offsets = [3, 0, 0], sizes = [1, 5, 128], strides = [1, 1, 1]} : vector<4x5x128xf32> to vector<1x5x128xf32>
    %426 = vector.shape_cast %425 : vector<1x5x128xf32> to vector<5x128xf32>
    %427 = vector.extract_strided_slice %91 {offsets = [3, 0], sizes = [1, 128], strides = [1, 1]} : vector<4x128xf32> to vector<1x128xf32>
    %428 = tpu.concatenate %426, %427 in 0 : vector<5x128xf32>, vector<1x128xf32> -> vector<6x128xf32>
    %c0_167 = arith.constant 0 : index
    %c0_168 = arith.constant 0 : index
    %429 = vector.load %arg10[%c0_167, %c0_168] : memref<1x128xf32, #tpu.memory_space<vmem>>, vector<1x128xf32>
    %c0_169 = arith.constant 0 : index
    %c0_170 = arith.constant 0 : index
    %430 = vector.load %arg11[%c0_169, %c0_170] : memref<1x128xf32, #tpu.memory_space<vmem>>, vector<1x128xf32>
    %cst_171 = arith.constant dense<0.000000e+00> : vector<6xf32>
    %431 = vector.multi_reduction <add>, %428, %cst_171 [1] : vector<6x128xf32> to vector<6xf32>
    %432 = vector.shape_cast %431 : vector<6xf32> to vector<6x1xf32>
    %cst_172 = arith.constant 1.280000e+02 : f32
    %433 = vector.broadcast %cst_172 : f32 to vector<6x1xf32>
    %434 = arith.divf %432, %433 : vector<6x1xf32>
    %435 = vector.broadcast %434 : vector<6x1xf32> to vector<6x128xf32>
    %436 = arith.subf %428, %435 : vector<6x128xf32>
    %437 = arith.mulf %436, %436 : vector<6x128xf32>
    %cst_173 = arith.constant dense<0.000000e+00> : vector<6xf32>
    %438 = vector.multi_reduction <add>, %437, %cst_173 [1] : vector<6x128xf32> to vector<6xf32>
    %439 = vector.shape_cast %438 : vector<6xf32> to vector<6x1xf32>
    %cst_174 = arith.constant 1.280000e+02 : f32
    %440 = vector.broadcast %cst_174 : f32 to vector<6x1xf32>
    %441 = arith.divf %439, %440 : vector<6x1xf32>
    %442 = vector.broadcast %434 : vector<6x1xf32> to vector<6x128xf32>
    %443 = arith.subf %428, %442 : vector<6x128xf32>
    %cst_175 = arith.constant 9.99999974E-6 : f32
    %444 = vector.broadcast %cst_175 : f32 to vector<6x1xf32>
    %445 = arith.addf %441, %444 : vector<6x1xf32>
    %446 = math.rsqrt %445 : vector<6x1xf32>
    %447 = vector.broadcast %446 : vector<6x1xf32> to vector<6x128xf32>
    %448 = arith.mulf %443, %447 : vector<6x128xf32>
    %449 = vector.broadcast %429 : vector<1x128xf32> to vector<6x128xf32>
    %450 = arith.mulf %448, %449 : vector<6x128xf32>
    %451 = vector.broadcast %430 : vector<1x128xf32> to vector<6x128xf32>
    %452 = arith.addf %450, %451 : vector<6x128xf32>
    %c0_176 = arith.constant 0 : index
    %c0_177 = arith.constant 0 : index
    %453 = vector.load %arg12[%c0_176, %c0_177] : memref<128x384xbf16, #tpu.memory_space<vmem>>, vector<128x384xbf16>
    %454 = arith.truncf %452 : vector<6x128xf32> to vector<6x128xbf16>
    %cst_178 = arith.constant dense<0.000000e+00> : vector<6x384xf32>
    %455 = tpu.matmul %454, %453, %cst_178 {dimension_numbers = #tpu.dot_dimension_numbers<[1], [0], [0], [1], [0, 0, 1, 1], [], []>} : vector<6x128xbf16>, vector<128x384xbf16>, vector<6x384xf32> -> vector<6x384xf32>
    %c0_179 = arith.constant 0 : index
    %c0_180 = arith.constant 0 : index
    %456 = vector.load %arg13[%c0_179, %c0_180] : memref<1x384xf32, #tpu.memory_space<vmem>>, vector<1x384xf32>
    %457 = vector.broadcast %456 : vector<1x384xf32> to vector<6x384xf32>
    %458 = arith.addf %455, %457 : vector<6x384xf32>
    %459 = vector.extract_strided_slice %458 {offsets = [0, 0], sizes = [6, 128], strides = [1, 1]} : vector<6x384xf32> to vector<6x128xf32>
    %460 = vector.extract_strided_slice %458 {offsets = [0, 128], sizes = [6, 128], strides = [1, 1]} : vector<6x384xf32> to vector<6x128xf32>
    %461 = vector.extract_strided_slice %458 {offsets = [0, 256], sizes = [6, 128], strides = [1, 1]} : vector<6x384xf32> to vector<6x128xf32>
    %462 = vector.shape_cast %459 : vector<6x128xf32> to vector<6x1x128xf32>
    %463 = vector.shape_cast %460 : vector<6x128xf32> to vector<1x6x128xf32>
    %464 = vector.broadcast %462 : vector<6x1x128xf32> to vector<6x6x128xf32>
    %465 = vector.broadcast %463 : vector<1x6x128xf32> to vector<6x6x128xf32>
    %466 = arith.mulf %464, %465 : vector<6x6x128xf32>
    %cst_181 = arith.constant dense<0xFF800000> : vector<6x128xf32>
    %467 = vector.multi_reduction <maximumf>, %466, %cst_181 [1] : vector<6x6x128xf32> to vector<6x128xf32>
    %468 = vector.shape_cast %467 : vector<6x128xf32> to vector<6x1x128xf32>
    %469 = vector.broadcast %468 : vector<6x1x128xf32> to vector<6x6x128xf32>
    %470 = arith.subf %466, %469 : vector<6x6x128xf32>
    %471 = math.exp %470 : vector<6x6x128xf32>
    %cst_182 = arith.constant dense<0.000000e+00> : vector<6x128xf32>
    %472 = vector.multi_reduction <add>, %471, %cst_182 [1] : vector<6x6x128xf32> to vector<6x128xf32>
    %473 = vector.shape_cast %472 : vector<6x128xf32> to vector<6x1x128xf32>
    %474 = vector.broadcast %473 : vector<6x1x128xf32> to vector<6x6x128xf32>
    %475 = arith.divf %471, %474 : vector<6x6x128xf32>
    %476 = vector.shape_cast %461 : vector<6x128xf32> to vector<1x6x128xf32>
    %477 = vector.broadcast %476 : vector<1x6x128xf32> to vector<6x6x128xf32>
    %478 = arith.mulf %475, %477 : vector<6x6x128xf32>
    %cst_183 = arith.constant dense<0.000000e+00> : vector<6x128xf32>
    %479 = vector.multi_reduction <add>, %478, %cst_183 [1] : vector<6x6x128xf32> to vector<6x128xf32>
    %c0_184 = arith.constant 0 : index
    %c0_185 = arith.constant 0 : index
    %480 = vector.load %arg14[%c0_184, %c0_185] : memref<128x128xbf16, #tpu.memory_space<vmem>>, vector<128x128xbf16>
    %481 = arith.truncf %479 : vector<6x128xf32> to vector<6x128xbf16>
    %cst_186 = arith.constant dense<0.000000e+00> : vector<6x128xf32>
    %482 = tpu.matmul %481, %480, %cst_186 {dimension_numbers = #tpu.dot_dimension_numbers<[1], [0], [0], [1], [0, 0, 1, 1], [], []>} : vector<6x128xbf16>, vector<128x128xbf16>, vector<6x128xf32> -> vector<6x128xf32>
    %483 = arith.addf %428, %482 : vector<6x128xf32>
    %c0_187 = arith.constant 0 : index
    %c0_188 = arith.constant 0 : index
    %484 = vector.load %arg15[%c0_187, %c0_188] : memref<1x128xf32, #tpu.memory_space<vmem>>, vector<1x128xf32>
    %485 = vector.broadcast %484 : vector<1x128xf32> to vector<6x128xf32>
    %486 = arith.addf %483, %485 : vector<6x128xf32>
    %487 = vector.extract_strided_slice %486 {offsets = [0, 0], sizes = [5, 128], strides = [1, 1]} : vector<6x128xf32> to vector<5x128xf32>
    %c0_189 = arith.constant 0 : index
    %c0_190 = arith.constant 0 : index
    %488 = vector.load %arg16[%c0_189, %c0_190] : memref<1x128xf32, #tpu.memory_space<vmem>>, vector<1x128xf32>
    %c0_191 = arith.constant 0 : index
    %c0_192 = arith.constant 0 : index
    %489 = vector.load %arg17[%c0_191, %c0_192] : memref<1x128xf32, #tpu.memory_space<vmem>>, vector<1x128xf32>
    %cst_193 = arith.constant dense<0.000000e+00> : vector<5xf32>
    %490 = vector.multi_reduction <add>, %487, %cst_193 [1] : vector<5x128xf32> to vector<5xf32>
    %491 = vector.shape_cast %490 : vector<5xf32> to vector<5x1xf32>
    %cst_194 = arith.constant 1.280000e+02 : f32
    %492 = vector.broadcast %cst_194 : f32 to vector<5x1xf32>
    %493 = arith.divf %491, %492 : vector<5x1xf32>
    %494 = vector.broadcast %493 : vector<5x1xf32> to vector<5x128xf32>
    %495 = arith.subf %487, %494 : vector<5x128xf32>
    %496 = arith.mulf %495, %495 : vector<5x128xf32>
    %cst_195 = arith.constant dense<0.000000e+00> : vector<5xf32>
    %497 = vector.multi_reduction <add>, %496, %cst_195 [1] : vector<5x128xf32> to vector<5xf32>
    %498 = vector.shape_cast %497 : vector<5xf32> to vector<5x1xf32>
    %cst_196 = arith.constant 1.280000e+02 : f32
    %499 = vector.broadcast %cst_196 : f32 to vector<5x1xf32>
    %500 = arith.divf %498, %499 : vector<5x1xf32>
    %501 = vector.broadcast %493 : vector<5x1xf32> to vector<5x128xf32>
    %502 = arith.subf %487, %501 : vector<5x128xf32>
    %cst_197 = arith.constant 9.99999974E-6 : f32
    %503 = vector.broadcast %cst_197 : f32 to vector<5x1xf32>
    %504 = arith.addf %500, %503 : vector<5x1xf32>
    %505 = math.rsqrt %504 : vector<5x1xf32>
    %506 = vector.broadcast %505 : vector<5x1xf32> to vector<5x128xf32>
    %507 = arith.mulf %502, %506 : vector<5x128xf32>
    %508 = vector.broadcast %488 : vector<1x128xf32> to vector<5x128xf32>
    %509 = arith.mulf %507, %508 : vector<5x128xf32>
    %510 = vector.broadcast %489 : vector<1x128xf32> to vector<5x128xf32>
    %511 = arith.addf %509, %510 : vector<5x128xf32>
    %c0_198 = arith.constant 0 : index
    %c0_199 = arith.constant 0 : index
    %512 = vector.load %arg18[%c0_198, %c0_199] : memref<128x512xbf16, #tpu.memory_space<vmem>>, vector<128x512xbf16>
    %513 = arith.truncf %511 : vector<5x128xf32> to vector<5x128xbf16>
    %cst_200 = arith.constant dense<0.000000e+00> : vector<5x512xf32>
    %514 = tpu.matmul %513, %512, %cst_200 {dimension_numbers = #tpu.dot_dimension_numbers<[1], [0], [0], [1], [0, 0, 1, 1], [], []>} : vector<5x128xbf16>, vector<128x512xbf16>, vector<5x512xf32> -> vector<5x512xf32>
    %c0_201 = arith.constant 0 : index
    %c0_202 = arith.constant 0 : index
    %515 = vector.load %arg19[%c0_201, %c0_202] : memref<1x512xf32, #tpu.memory_space<vmem>>, vector<1x512xf32>
    %516 = vector.broadcast %515 : vector<1x512xf32> to vector<5x512xf32>
    %517 = arith.addf %514, %516 : vector<5x512xf32>
    %cst_203 = arith.constant 1.702000e+00 : f32
    %518 = vector.broadcast %cst_203 : f32 to vector<5x512xf32>
    %519 = arith.mulf %518, %517 : vector<5x512xf32>
    %520 = arith.negf %519 : vector<5x512xf32>
    %521 = math.exp %520 : vector<5x512xf32>
    %cst_204 = arith.constant 1.000000e+00 : f32
    %522 = vector.broadcast %cst_204 : f32 to vector<5x512xf32>
    %523 = arith.addf %522, %521 : vector<5x512xf32>
    %524 = arith.divf %522, %523 : vector<5x512xf32>
    %525 = arith.mulf %517, %524 : vector<5x512xf32>
    %c0_205 = arith.constant 0 : index
    %c0_206 = arith.constant 0 : index
    %526 = vector.load %arg20[%c0_205, %c0_206] : memref<512x128xbf16, #tpu.memory_space<vmem>>, vector<512x128xbf16>
    %527 = arith.truncf %525 : vector<5x512xf32> to vector<5x512xbf16>
    %cst_207 = arith.constant dense<0.000000e+00> : vector<5x128xf32>
    %528 = tpu.matmul %527, %526, %cst_207 {dimension_numbers = #tpu.dot_dimension_numbers<[1], [0], [0], [1], [0, 0, 1, 1], [], []>} : vector<5x512xbf16>, vector<512x128xbf16>, vector<5x128xf32> -> vector<5x128xf32>
    %c0_208 = arith.constant 0 : index
    %c0_209 = arith.constant 0 : index
    %529 = vector.load %arg21[%c0_208, %c0_209] : memref<1x128xf32, #tpu.memory_space<vmem>>, vector<1x128xf32>
    %530 = vector.broadcast %529 : vector<1x128xf32> to vector<5x128xf32>
    %531 = arith.addf %528, %530 : vector<5x128xf32>
    %532 = arith.addf %487, %531 : vector<5x128xf32>
    %c3 = arith.constant 3 : index
    %c0_210 = arith.constant 0 : index
    %c0_211 = arith.constant 0 : index
    %533 = vector.load %arg22[%c3, %c0_210, %c0_211] : memref<4x5x128xf32, #tpu.memory_space<vmem>>, vector<1x5x128xf32>
    %534 = vector.shape_cast %533 : vector<1x5x128xf32> to vector<5x128xf32>
    %535 = vector.shape_cast %532 : vector<5x128xf32> to vector<1x5x128xf32>
    tpu.vector_store %arg22[%c3, %c0_210, %c0_211], %535 {strides = array<i32>} : memref<4x5x128xf32, #tpu.memory_space<vmem>>, vector<1x5x128xf32>,
    return
  }
  func.func @transform_0(%arg0: i32) -> (i32, i32, i32) {
    %c0_i32 = arith.constant 0 : i32
    %c0_i32_0 = arith.constant 0 : i32
    %c0_i32_1 = arith.constant 0 : i32
    %c0_i32_2 = arith.constant 0 : i32
    return %c0_i32, %c0_i32_0, %c0_i32_1 : i32, i32, i32
  }
  func.func @transform_1(%arg0: i32) -> (i32, i32) {
    %c0_i32 = arith.constant 0 : i32
    %c0_i32_0 = arith.constant 0 : i32
    %c0_i32_1 = arith.constant 0 : i32
    return %c0_i32, %c0_i32_0 : i32, i32
  }
  func.func @transform_2(%arg0: i32) -> (i32, i32) {
    %c0_i32 = arith.constant 0 : i32
    %c0_i32_0 = arith.constant 0 : i32
    %c0_i32_1 = arith.constant 0 : i32
    return %c0_i32, %c0_i32_0 : i32, i32
  }
  func.func @transform_3(%arg0: i32) -> (i32, i32) {
    %c0_i32 = arith.constant 0 : i32
    %c0_i32_0 = arith.constant 0 : i32
    %c0_i32_1 = arith.constant 0 : i32
    return %c0_i32, %c0_i32_0 : i32, i32
  }
  func.func @transform_4(%arg0: i32) -> (i32, i32) {
    %c0_i32 = arith.constant 0 : i32
    %c0_i32_0 = arith.constant 0 : i32
    %c0_i32_1 = arith.constant 0 : i32
    return %c0_i32, %c0_i32_0 : i32, i32
  }
  func.func @transform_5(%arg0: i32) -> (i32, i32) {
    %c0_i32 = arith.constant 0 : i32
    %c0_i32_0 = arith.constant 0 : i32
    %c0_i32_1 = arith.constant 0 : i32
    return %c0_i32, %c0_i32_0 : i32, i32
  }
  func.func @transform_6(%arg0: i32) -> (i32, i32) {
    %c0_i32 = arith.constant 0 : i32
    %c0_i32_0 = arith.constant 0 : i32
    %c0_i32_1 = arith.constant 0 : i32
    return %c0_i32, %c0_i32_0 : i32, i32
  }
  func.func @transform_7(%arg0: i32) -> (i32, i32) {
    %c0_i32 = arith.constant 0 : i32
    %c0_i32_0 = arith.constant 0 : i32
    %c0_i32_1 = arith.constant 0 : i32
    return %c0_i32, %c0_i32_0 : i32, i32
  }
  func.func @transform_8(%arg0: i32) -> (i32, i32) {
    %c0_i32 = arith.constant 0 : i32
    %c0_i32_0 = arith.constant 0 : i32
    %c0_i32_1 = arith.constant 0 : i32
    return %c0_i32, %c0_i32_0 : i32, i32
  }
  func.func @transform_9(%arg0: i32) -> (i32, i32) {
    %c0_i32 = arith.constant 0 : i32
    %c0_i32_0 = arith.constant 0 : i32
    %c0_i32_1 = arith.constant 0 : i32
    return %c0_i32, %c0_i32_0 : i32, i32
  }
  func.func @transform_10(%arg0: i32) -> (i32, i32) {
    %c0_i32 = arith.constant 0 : i32
    %c0_i32_0 = arith.constant 0 : i32
    %c0_i32_1 = arith.constant 0 : i32
    return %c0_i32, %c0_i32_0 : i32, i32
  }
  func.func @transform_11(%arg0: i32) -> (i32, i32) {
    %c0_i32 = arith.constant 0 : i32
    %c0_i32_0 = arith.constant 0 : i32
    %c0_i32_1 = arith.constant 0 : i32
    return %c0_i32, %c0_i32_0 : i32, i32
  }
  func.func @transform_12(%arg0: i32) -> (i32, i32) {
    %c0_i32 = arith.constant 0 : i32
    %c0_i32_0 = arith.constant 0 : i32
    %c0_i32_1 = arith.constant 0 : i32
    return %c0_i32, %c0_i32_0 : i32, i32
  }
  func.func @transform_13(%arg0: i32) -> (i32, i32) {
    %c0_i32 = arith.constant 0 : i32
    %c0_i32_0 = arith.constant 0 : i32
    %c0_i32_1 = arith.constant 0 : i32
    return %c0_i32, %c0_i32_0 : i32, i32
  }
  func.func @transform_14(%arg0: i32) -> (i32, i32) {
    %c0_i32 = arith.constant 0 : i32
    %c0_i32_0 = arith.constant 0 : i32
    %c0_i32_1 = arith.constant 0 : i32
    return %c0_i32, %c0_i32_0 : i32, i32
  }
  func.func @transform_15(%arg0: i32) -> (i32, i32) {
    %c0_i32 = arith.constant 0 : i32
    %c0_i32_0 = arith.constant 0 : i32
    %c0_i32_1 = arith.constant 0 : i32
    return %c0_i32, %c0_i32_0 : i32, i32
  }
  func.func @transform_16(%arg0: i32) -> (i32, i32) {
    %c0_i32 = arith.constant 0 : i32
    %c0_i32_0 = arith.constant 0 : i32
    %c0_i32_1 = arith.constant 0 : i32
    return %c0_i32, %c0_i32_0 : i32, i32
  }
  func.func @transform_17(%arg0: i32) -> (i32, i32) {
    %c0_i32 = arith.constant 0 : i32
    %c0_i32_0 = arith.constant 0 : i32
    %c0_i32_1 = arith.constant 0 : i32
    return %c0_i32, %c0_i32_0 : i32, i32
  }
  func.func @transform_18(%arg0: i32) -> (i32, i32) {
    %c0_i32 = arith.constant 0 : i32
    %c0_i32_0 = arith.constant 0 : i32
    %c0_i32_1 = arith.constant 0 : i32
    return %c0_i32, %c0_i32_0 : i32, i32
  }
  func.func @transform_19(%arg0: i32) -> (i32, i32) {
    %c0_i32 = arith.constant 0 : i32
    %c0_i32_0 = arith.constant 0 : i32
    %c0_i32_1 = arith.constant 0 : i32
    return %c0_i32, %c0_i32_0 : i32, i32
  }
  func.func @transform_20(%arg0: i32) -> (i32, i32) {
    %c0_i32 = arith.constant 0 : i32
    %c0_i32_0 = arith.constant 0 : i32
    %c0_i32_1 = arith.constant 0 : i32
    return %c0_i32, %c0_i32_0 : i32, i32
  }
  func.func @transform_21(%arg0: i32) -> (i32, i32, i32) {
    %c0_i32 = arith.constant 0 : i32
    %c0_i32_0 = arith.constant 0 : i32
    %c0_i32_1 = arith.constant 0 : i32
    %c0_i32_2 = arith.constant 0 : i32
    return %c0_i32, %c0_i32_0, %c0_i32_1 : i32, i32, i32
  }
}

module attributes {stable_mosaic.version = 11 : i64} {
  func.func @_transformer_layer_kernel(%arg0: i32, %arg1: memref<1x3x128xf32, #tpu.memory_space<vmem>>, %arg2: memref<1x128xf32, #tpu.memory_space<vmem>>, %arg3: memref<1x128xf32, #tpu.memory_space<vmem>>, %arg4: memref<12x128x16xbf16, #tpu.memory_space<vmem>>, %arg5: memref<4x16x128xbf16, #tpu.memory_space<vmem>>, %arg6: memref<1x128xf32, #tpu.memory_space<vmem>>, %arg7: memref<1x128xf32, #tpu.memory_space<vmem>>, %arg8: memref<1x128xf32, #tpu.memory_space<vmem>>, %arg9: memref<128x64xbf16, #tpu.memory_space<vmem>>, %arg10: memref<1x64xf32, #tpu.memory_space<vmem>>, %arg11: memref<64x128xbf16, #tpu.memory_space<vmem>>, %arg12: memref<1x128xf32, #tpu.memory_space<vmem>>, %arg13: memref<1x3x128xf32, #tpu.memory_space<vmem>>) attributes {dimension_semantics = [#tpu.dimension_semantics<parallel>], iteration_bounds = array<i64: 2>, scalar_prefetch = 0 : i64, scratch_operands = 0 : i64, tpu.core_type = #tpu.core_type<tc>, window_params = [{transform_indices = @transform_0, window_bounds = array<i64: 1, 3, 128>}, {pipeline_mode = #tpu.pipeline_mode<synchronous>, transform_indices = @transform_1, window_bounds = array<i64: 1, 128>}, {pipeline_mode = #tpu.pipeline_mode<synchronous>, transform_indices = @transform_2, window_bounds = array<i64: 1, 128>}, {pipeline_mode = #tpu.pipeline_mode<synchronous>, transform_indices = @transform_3, window_bounds = array<i64: 12, 128, 16>}, {pipeline_mode = #tpu.pipeline_mode<synchronous>, transform_indices = @transform_4, window_bounds = array<i64: 4, 16, 128>}, {pipeline_mode = #tpu.pipeline_mode<synchronous>, transform_indices = @transform_5, window_bounds = array<i64: 1, 128>}, {pipeline_mode = #tpu.pipeline_mode<synchronous>, transform_indices = @transform_6, window_bounds = array<i64: 1, 128>}, {pipeline_mode = #tpu.pipeline_mode<synchronous>, transform_indices = @transform_7, window_bounds = array<i64: 1, 128>}, {pipeline_mode = #tpu.pipeline_mode<synchronous>, transform_indices = @transform_8, window_bounds = array<i64: 128, 64>}, {pipeline_mode = #tpu.pipeline_mode<synchronous>, transform_indices = @transform_9, window_bounds = array<i64: 1, 64>}, {pipeline_mode = #tpu.pipeline_mode<synchronous>, transform_indices = @transform_10, window_bounds = array<i64: 64, 128>}, {pipeline_mode = #tpu.pipeline_mode<synchronous>, transform_indices = @transform_11, window_bounds = array<i64: 1, 128>}, {transform_indices = @transform_12, window_bounds = array<i64: 1, 3, 128>}]} {
    %c0 = arith.constant 0 : index
    %c0_0 = arith.constant 0 : index
    %c0_1 = arith.constant 0 : index
    %0 = vector.load %arg1[%c0, %c0_0, %c0_1] : memref<1x3x128xf32, #tpu.memory_space<vmem>>, vector<1x3x128xf32>
    %1 = vector.shape_cast %0 : vector<1x3x128xf32> to vector<3x128xf32>
    %c0_2 = arith.constant 0 : index
    %c0_3 = arith.constant 0 : index
    %2 = vector.load %arg2[%c0_2, %c0_3] : memref<1x128xf32, #tpu.memory_space<vmem>>, vector<1x128xf32>
    %c0_4 = arith.constant 0 : index
    %c0_5 = arith.constant 0 : index
    %3 = vector.load %arg3[%c0_4, %c0_5] : memref<1x128xf32, #tpu.memory_space<vmem>>, vector<1x128xf32>
    %cst = arith.constant dense<0.000000e+00> : vector<3xf32>
    %4 = vector.multi_reduction <add>, %1, %cst [1] : vector<3x128xf32> to vector<3xf32>
    %5 = vector.shape_cast %4 : vector<3xf32> to vector<3x1xf32>
    %cst_6 = arith.constant 1.280000e+02 : f32
    %6 = vector.broadcast %cst_6 : f32 to vector<3x1xf32>
    %7 = arith.divf %5, %6 : vector<3x1xf32>
    %8 = vector.broadcast %7 : vector<3x1xf32> to vector<3x128xf32>
    %9 = arith.subf %1, %8 : vector<3x128xf32>
    %10 = arith.mulf %9, %9 : vector<3x128xf32>
    %cst_7 = arith.constant dense<0.000000e+00> : vector<3xf32>
    %11 = vector.multi_reduction <add>, %10, %cst_7 [1] : vector<3x128xf32> to vector<3xf32>
    %12 = vector.shape_cast %11 : vector<3xf32> to vector<3x1xf32>
    %cst_8 = arith.constant 1.280000e+02 : f32
    %13 = vector.broadcast %cst_8 : f32 to vector<3x1xf32>
    %14 = arith.divf %12, %13 : vector<3x1xf32>
    %15 = vector.broadcast %7 : vector<3x1xf32> to vector<3x128xf32>
    %16 = arith.subf %1, %15 : vector<3x128xf32>
    %cst_9 = arith.constant 9.99999974E-6 : f32
    %17 = vector.broadcast %cst_9 : f32 to vector<3x1xf32>
    %18 = arith.addf %14, %17 : vector<3x1xf32>
    %19 = math.rsqrt %18 : vector<3x1xf32>
    %20 = vector.broadcast %19 : vector<3x1xf32> to vector<3x128xf32>
    %21 = arith.mulf %16, %20 : vector<3x128xf32>
    %22 = vector.broadcast %2 : vector<1x128xf32> to vector<3x128xf32>
    %23 = arith.mulf %21, %22 : vector<3x128xf32>
    %24 = vector.broadcast %3 : vector<1x128xf32> to vector<3x128xf32>
    %25 = arith.addf %23, %24 : vector<3x128xf32>
    %26 = arith.truncf %25 : vector<3x128xf32> to vector<3x128xbf16>
    %cst_10 = arith.constant 0.000000e+00 : f32
    %27 = vector.broadcast %cst_10 : f32 to vector<3x128xf32>
    %c0_11 = arith.constant 0 : index
    %c0_12 = arith.constant 0 : index
    %c0_13 = arith.constant 0 : index
    %28 = vector.load %arg4[%c0_11, %c0_12, %c0_13] : memref<12x128x16xbf16, #tpu.memory_space<vmem>>, vector<1x128x16xbf16>
    %29 = vector.shape_cast %28 : vector<1x128x16xbf16> to vector<128x16xbf16>
    %cst_14 = arith.constant dense<0.000000e+00> : vector<3x16xf32>
    %30 = tpu.matmul %26, %29, %cst_14 {dimension_numbers = #tpu.dot_dimension_numbers<[1], [0], [0], [1], [0, 0, 1, 1], [], []>} : vector<3x128xbf16>, vector<128x16xbf16>, vector<3x16xf32> -> vector<3x16xf32>
    %c4 = arith.constant 4 : index
    %c0_15 = arith.constant 0 : index
    %c0_16 = arith.constant 0 : index
    %31 = vector.load %arg4[%c4, %c0_15, %c0_16] : memref<12x128x16xbf16, #tpu.memory_space<vmem>>, vector<1x128x16xbf16>
    %32 = vector.shape_cast %31 : vector<1x128x16xbf16> to vector<128x16xbf16>
    %cst_17 = arith.constant dense<0.000000e+00> : vector<3x16xf32>
    %33 = tpu.matmul %26, %32, %cst_17 {dimension_numbers = #tpu.dot_dimension_numbers<[1], [0], [0], [1], [0, 0, 1, 1], [], []>} : vector<3x128xbf16>, vector<128x16xbf16>, vector<3x16xf32> -> vector<3x16xf32>
    %c8 = arith.constant 8 : index
    %c0_18 = arith.constant 0 : index
    %c0_19 = arith.constant 0 : index
    %34 = vector.load %arg4[%c8, %c0_18, %c0_19] : memref<12x128x16xbf16, #tpu.memory_space<vmem>>, vector<1x128x16xbf16>
    %35 = vector.shape_cast %34 : vector<1x128x16xbf16> to vector<128x16xbf16>
    %cst_20 = arith.constant dense<0.000000e+00> : vector<3x16xf32>
    %36 = tpu.matmul %26, %35, %cst_20 {dimension_numbers = #tpu.dot_dimension_numbers<[1], [0], [0], [1], [0, 0, 1, 1], [], []>} : vector<3x128xbf16>, vector<128x16xbf16>, vector<3x16xf32> -> vector<3x16xf32>
    %37 = arith.truncf %30 : vector<3x16xf32> to vector<3x16xbf16>
    %38 = arith.truncf %33 : vector<3x16xf32> to vector<3x16xbf16>
    %cst_21 = arith.constant dense<0.000000e+00> : vector<3x3xf32>
    %39 = tpu.matmul %37, %38, %cst_21 {dimension_numbers = #tpu.dot_dimension_numbers<[1], [1], [0], [0], [0, 0, 1, 0], [], []>} : vector<3x16xbf16>, vector<3x16xbf16>, vector<3x3xf32> -> vector<3x3xf32>
    %cst_22 = arith.constant 2.500000e-01 : f32
    %40 = vector.broadcast %cst_22 : f32 to vector<3x3xf32>
    %41 = arith.mulf %39, %40 : vector<3x3xf32>
    %cst_23 = arith.constant dense<0xFF800000> : vector<3xf32>
    %42 = vector.multi_reduction <maximumf>, %41, %cst_23 [1] : vector<3x3xf32> to vector<3xf32>
    %43 = vector.shape_cast %42 : vector<3xf32> to vector<3x1xf32>
    %44 = vector.broadcast %43 : vector<3x1xf32> to vector<3x3xf32>
    %45 = arith.subf %41, %44 : vector<3x3xf32>
    %46 = math.exp %45 : vector<3x3xf32>
    %cst_24 = arith.constant dense<0.000000e+00> : vector<3xf32>
    %47 = vector.multi_reduction <add>, %46, %cst_24 [1] : vector<3x3xf32> to vector<3xf32>
    %48 = vector.shape_cast %47 : vector<3xf32> to vector<3x1xf32>
    %49 = vector.broadcast %48 : vector<3x1xf32> to vector<3x3xf32>
    %50 = arith.divf %46, %49 : vector<3x3xf32>
    %51 = arith.truncf %50 : vector<3x3xf32> to vector<3x3xbf16>
    %52 = arith.truncf %36 : vector<3x16xf32> to vector<3x16xbf16>
    %cst_25 = arith.constant dense<0.000000e+00> : vector<3x16xf32>
    %53 = tpu.matmul %51, %52, %cst_25 {dimension_numbers = #tpu.dot_dimension_numbers<[1], [0], [0], [1], [0, 0, 1, 1], [], []>} : vector<3x3xbf16>, vector<3x16xbf16>, vector<3x16xf32> -> vector<3x16xf32>
    %54 = arith.truncf %53 : vector<3x16xf32> to vector<3x16xbf16>
    %c0_26 = arith.constant 0 : index
    %c0_27 = arith.constant 0 : index
    %c0_28 = arith.constant 0 : index
    %55 = vector.load %arg5[%c0_26, %c0_27, %c0_28] : memref<4x16x128xbf16, #tpu.memory_space<vmem>>, vector<1x16x128xbf16>
    %56 = vector.shape_cast %55 : vector<1x16x128xbf16> to vector<16x128xbf16>
    %cst_29 = arith.constant dense<0.000000e+00> : vector<3x128xf32>
    %57 = tpu.matmul %54, %56, %cst_29 {dimension_numbers = #tpu.dot_dimension_numbers<[1], [0], [0], [1], [0, 0, 1, 1], [], []>} : vector<3x16xbf16>, vector<16x128xbf16>, vector<3x128xf32> -> vector<3x128xf32>
    %58 = arith.addf %27, %57 : vector<3x128xf32>
    %c1 = arith.constant 1 : index
    %c0_30 = arith.constant 0 : index
    %c0_31 = arith.constant 0 : index
    %59 = vector.load %arg4[%c1, %c0_30, %c0_31] : memref<12x128x16xbf16, #tpu.memory_space<vmem>>, vector<1x128x16xbf16>
    %60 = vector.shape_cast %59 : vector<1x128x16xbf16> to vector<128x16xbf16>
    %cst_32 = arith.constant dense<0.000000e+00> : vector<3x16xf32>
    %61 = tpu.matmul %26, %60, %cst_32 {dimension_numbers = #tpu.dot_dimension_numbers<[1], [0], [0], [1], [0, 0, 1, 1], [], []>} : vector<3x128xbf16>, vector<128x16xbf16>, vector<3x16xf32> -> vector<3x16xf32>
    %c5 = arith.constant 5 : index
    %c0_33 = arith.constant 0 : index
    %c0_34 = arith.constant 0 : index
    %62 = vector.load %arg4[%c5, %c0_33, %c0_34] : memref<12x128x16xbf16, #tpu.memory_space<vmem>>, vector<1x128x16xbf16>
    %63 = vector.shape_cast %62 : vector<1x128x16xbf16> to vector<128x16xbf16>
    %cst_35 = arith.constant dense<0.000000e+00> : vector<3x16xf32>
    %64 = tpu.matmul %26, %63, %cst_35 {dimension_numbers = #tpu.dot_dimension_numbers<[1], [0], [0], [1], [0, 0, 1, 1], [], []>} : vector<3x128xbf16>, vector<128x16xbf16>, vector<3x16xf32> -> vector<3x16xf32>
    %c9 = arith.constant 9 : index
    %c0_36 = arith.constant 0 : index
    %c0_37 = arith.constant 0 : index
    %65 = vector.load %arg4[%c9, %c0_36, %c0_37] : memref<12x128x16xbf16, #tpu.memory_space<vmem>>, vector<1x128x16xbf16>
    %66 = vector.shape_cast %65 : vector<1x128x16xbf16> to vector<128x16xbf16>
    %cst_38 = arith.constant dense<0.000000e+00> : vector<3x16xf32>
    %67 = tpu.matmul %26, %66, %cst_38 {dimension_numbers = #tpu.dot_dimension_numbers<[1], [0], [0], [1], [0, 0, 1, 1], [], []>} : vector<3x128xbf16>, vector<128x16xbf16>, vector<3x16xf32> -> vector<3x16xf32>
    %68 = arith.truncf %61 : vector<3x16xf32> to vector<3x16xbf16>
    %69 = arith.truncf %64 : vector<3x16xf32> to vector<3x16xbf16>
    %cst_39 = arith.constant dense<0.000000e+00> : vector<3x3xf32>
    %70 = tpu.matmul %68, %69, %cst_39 {dimension_numbers = #tpu.dot_dimension_numbers<[1], [1], [0], [0], [0, 0, 1, 0], [], []>} : vector<3x16xbf16>, vector<3x16xbf16>, vector<3x3xf32> -> vector<3x3xf32>
    %cst_40 = arith.constant 2.500000e-01 : f32
    %71 = vector.broadcast %cst_40 : f32 to vector<3x3xf32>
    %72 = arith.mulf %70, %71 : vector<3x3xf32>
    %cst_41 = arith.constant dense<0xFF800000> : vector<3xf32>
    %73 = vector.multi_reduction <maximumf>, %72, %cst_41 [1] : vector<3x3xf32> to vector<3xf32>
    %74 = vector.shape_cast %73 : vector<3xf32> to vector<3x1xf32>
    %75 = vector.broadcast %74 : vector<3x1xf32> to vector<3x3xf32>
    %76 = arith.subf %72, %75 : vector<3x3xf32>
    %77 = math.exp %76 : vector<3x3xf32>
    %cst_42 = arith.constant dense<0.000000e+00> : vector<3xf32>
    %78 = vector.multi_reduction <add>, %77, %cst_42 [1] : vector<3x3xf32> to vector<3xf32>
    %79 = vector.shape_cast %78 : vector<3xf32> to vector<3x1xf32>
    %80 = vector.broadcast %79 : vector<3x1xf32> to vector<3x3xf32>
    %81 = arith.divf %77, %80 : vector<3x3xf32>
    %82 = arith.truncf %81 : vector<3x3xf32> to vector<3x3xbf16>
    %83 = arith.truncf %67 : vector<3x16xf32> to vector<3x16xbf16>
    %cst_43 = arith.constant dense<0.000000e+00> : vector<3x16xf32>
    %84 = tpu.matmul %82, %83, %cst_43 {dimension_numbers = #tpu.dot_dimension_numbers<[1], [0], [0], [1], [0, 0, 1, 1], [], []>} : vector<3x3xbf16>, vector<3x16xbf16>, vector<3x16xf32> -> vector<3x16xf32>
    %85 = arith.truncf %84 : vector<3x16xf32> to vector<3x16xbf16>
    %c1_44 = arith.constant 1 : index
    %c0_45 = arith.constant 0 : index
    %c0_46 = arith.constant 0 : index
    %86 = vector.load %arg5[%c1_44, %c0_45, %c0_46] : memref<4x16x128xbf16, #tpu.memory_space<vmem>>, vector<1x16x128xbf16>
    %87 = vector.shape_cast %86 : vector<1x16x128xbf16> to vector<16x128xbf16>
    %cst_47 = arith.constant dense<0.000000e+00> : vector<3x128xf32>
    %88 = tpu.matmul %85, %87, %cst_47 {dimension_numbers = #tpu.dot_dimension_numbers<[1], [0], [0], [1], [0, 0, 1, 1], [], []>} : vector<3x16xbf16>, vector<16x128xbf16>, vector<3x128xf32> -> vector<3x128xf32>
    %89 = arith.addf %58, %88 : vector<3x128xf32>
    %c2 = arith.constant 2 : index
    %c0_48 = arith.constant 0 : index
    %c0_49 = arith.constant 0 : index
    %90 = vector.load %arg4[%c2, %c0_48, %c0_49] : memref<12x128x16xbf16, #tpu.memory_space<vmem>>, vector<1x128x16xbf16>
    %91 = vector.shape_cast %90 : vector<1x128x16xbf16> to vector<128x16xbf16>
    %cst_50 = arith.constant dense<0.000000e+00> : vector<3x16xf32>
    %92 = tpu.matmul %26, %91, %cst_50 {dimension_numbers = #tpu.dot_dimension_numbers<[1], [0], [0], [1], [0, 0, 1, 1], [], []>} : vector<3x128xbf16>, vector<128x16xbf16>, vector<3x16xf32> -> vector<3x16xf32>
    %c6 = arith.constant 6 : index
    %c0_51 = arith.constant 0 : index
    %c0_52 = arith.constant 0 : index
    %93 = vector.load %arg4[%c6, %c0_51, %c0_52] : memref<12x128x16xbf16, #tpu.memory_space<vmem>>, vector<1x128x16xbf16>
    %94 = vector.shape_cast %93 : vector<1x128x16xbf16> to vector<128x16xbf16>
    %cst_53 = arith.constant dense<0.000000e+00> : vector<3x16xf32>
    %95 = tpu.matmul %26, %94, %cst_53 {dimension_numbers = #tpu.dot_dimension_numbers<[1], [0], [0], [1], [0, 0, 1, 1], [], []>} : vector<3x128xbf16>, vector<128x16xbf16>, vector<3x16xf32> -> vector<3x16xf32>
    %c10 = arith.constant 10 : index
    %c0_54 = arith.constant 0 : index
    %c0_55 = arith.constant 0 : index
    %96 = vector.load %arg4[%c10, %c0_54, %c0_55] : memref<12x128x16xbf16, #tpu.memory_space<vmem>>, vector<1x128x16xbf16>
    %97 = vector.shape_cast %96 : vector<1x128x16xbf16> to vector<128x16xbf16>
    %cst_56 = arith.constant dense<0.000000e+00> : vector<3x16xf32>
    %98 = tpu.matmul %26, %97, %cst_56 {dimension_numbers = #tpu.dot_dimension_numbers<[1], [0], [0], [1], [0, 0, 1, 1], [], []>} : vector<3x128xbf16>, vector<128x16xbf16>, vector<3x16xf32> -> vector<3x16xf32>
    %99 = arith.truncf %92 : vector<3x16xf32> to vector<3x16xbf16>
    %100 = arith.truncf %95 : vector<3x16xf32> to vector<3x16xbf16>
    %cst_57 = arith.constant dense<0.000000e+00> : vector<3x3xf32>
    %101 = tpu.matmul %99, %100, %cst_57 {dimension_numbers = #tpu.dot_dimension_numbers<[1], [1], [0], [0], [0, 0, 1, 0], [], []>} : vector<3x16xbf16>, vector<3x16xbf16>, vector<3x3xf32> -> vector<3x3xf32>
    %cst_58 = arith.constant 2.500000e-01 : f32
    %102 = vector.broadcast %cst_58 : f32 to vector<3x3xf32>
    %103 = arith.mulf %101, %102 : vector<3x3xf32>
    %cst_59 = arith.constant dense<0xFF800000> : vector<3xf32>
    %104 = vector.multi_reduction <maximumf>, %103, %cst_59 [1] : vector<3x3xf32> to vector<3xf32>
    %105 = vector.shape_cast %104 : vector<3xf32> to vector<3x1xf32>
    %106 = vector.broadcast %105 : vector<3x1xf32> to vector<3x3xf32>
    %107 = arith.subf %103, %106 : vector<3x3xf32>
    %108 = math.exp %107 : vector<3x3xf32>
    %cst_60 = arith.constant dense<0.000000e+00> : vector<3xf32>
    %109 = vector.multi_reduction <add>, %108, %cst_60 [1] : vector<3x3xf32> to vector<3xf32>
    %110 = vector.shape_cast %109 : vector<3xf32> to vector<3x1xf32>
    %111 = vector.broadcast %110 : vector<3x1xf32> to vector<3x3xf32>
    %112 = arith.divf %108, %111 : vector<3x3xf32>
    %113 = arith.truncf %112 : vector<3x3xf32> to vector<3x3xbf16>
    %114 = arith.truncf %98 : vector<3x16xf32> to vector<3x16xbf16>
    %cst_61 = arith.constant dense<0.000000e+00> : vector<3x16xf32>
    %115 = tpu.matmul %113, %114, %cst_61 {dimension_numbers = #tpu.dot_dimension_numbers<[1], [0], [0], [1], [0, 0, 1, 1], [], []>} : vector<3x3xbf16>, vector<3x16xbf16>, vector<3x16xf32> -> vector<3x16xf32>
    %116 = arith.truncf %115 : vector<3x16xf32> to vector<3x16xbf16>
    %c2_62 = arith.constant 2 : index
    %c0_63 = arith.constant 0 : index
    %c0_64 = arith.constant 0 : index
    %117 = vector.load %arg5[%c2_62, %c0_63, %c0_64] : memref<4x16x128xbf16, #tpu.memory_space<vmem>>, vector<1x16x128xbf16>
    %118 = vector.shape_cast %117 : vector<1x16x128xbf16> to vector<16x128xbf16>
    %cst_65 = arith.constant dense<0.000000e+00> : vector<3x128xf32>
    %119 = tpu.matmul %116, %118, %cst_65 {dimension_numbers = #tpu.dot_dimension_numbers<[1], [0], [0], [1], [0, 0, 1, 1], [], []>} : vector<3x16xbf16>, vector<16x128xbf16>, vector<3x128xf32> -> vector<3x128xf32>
    %120 = arith.addf %89, %119 : vector<3x128xf32>
    %c3 = arith.constant 3 : index
    %c0_66 = arith.constant 0 : index
    %c0_67 = arith.constant 0 : index
    %121 = vector.load %arg4[%c3, %c0_66, %c0_67] : memref<12x128x16xbf16, #tpu.memory_space<vmem>>, vector<1x128x16xbf16>
    %122 = vector.shape_cast %121 : vector<1x128x16xbf16> to vector<128x16xbf16>
    %cst_68 = arith.constant dense<0.000000e+00> : vector<3x16xf32>
    %123 = tpu.matmul %26, %122, %cst_68 {dimension_numbers = #tpu.dot_dimension_numbers<[1], [0], [0], [1], [0, 0, 1, 1], [], []>} : vector<3x128xbf16>, vector<128x16xbf16>, vector<3x16xf32> -> vector<3x16xf32>
    %c7 = arith.constant 7 : index
    %c0_69 = arith.constant 0 : index
    %c0_70 = arith.constant 0 : index
    %124 = vector.load %arg4[%c7, %c0_69, %c0_70] : memref<12x128x16xbf16, #tpu.memory_space<vmem>>, vector<1x128x16xbf16>
    %125 = vector.shape_cast %124 : vector<1x128x16xbf16> to vector<128x16xbf16>
    %cst_71 = arith.constant dense<0.000000e+00> : vector<3x16xf32>
    %126 = tpu.matmul %26, %125, %cst_71 {dimension_numbers = #tpu.dot_dimension_numbers<[1], [0], [0], [1], [0, 0, 1, 1], [], []>} : vector<3x128xbf16>, vector<128x16xbf16>, vector<3x16xf32> -> vector<3x16xf32>
    %c11 = arith.constant 11 : index
    %c0_72 = arith.constant 0 : index
    %c0_73 = arith.constant 0 : index
    %127 = vector.load %arg4[%c11, %c0_72, %c0_73] : memref<12x128x16xbf16, #tpu.memory_space<vmem>>, vector<1x128x16xbf16>
    %128 = vector.shape_cast %127 : vector<1x128x16xbf16> to vector<128x16xbf16>
    %cst_74 = arith.constant dense<0.000000e+00> : vector<3x16xf32>
    %129 = tpu.matmul %26, %128, %cst_74 {dimension_numbers = #tpu.dot_dimension_numbers<[1], [0], [0], [1], [0, 0, 1, 1], [], []>} : vector<3x128xbf16>, vector<128x16xbf16>, vector<3x16xf32> -> vector<3x16xf32>
    %130 = arith.truncf %123 : vector<3x16xf32> to vector<3x16xbf16>
    %131 = arith.truncf %126 : vector<3x16xf32> to vector<3x16xbf16>
    %cst_75 = arith.constant dense<0.000000e+00> : vector<3x3xf32>
    %132 = tpu.matmul %130, %131, %cst_75 {dimension_numbers = #tpu.dot_dimension_numbers<[1], [1], [0], [0], [0, 0, 1, 0], [], []>} : vector<3x16xbf16>, vector<3x16xbf16>, vector<3x3xf32> -> vector<3x3xf32>
    %cst_76 = arith.constant 2.500000e-01 : f32
    %133 = vector.broadcast %cst_76 : f32 to vector<3x3xf32>
    %134 = arith.mulf %132, %133 : vector<3x3xf32>
    %cst_77 = arith.constant dense<0xFF800000> : vector<3xf32>
    %135 = vector.multi_reduction <maximumf>, %134, %cst_77 [1] : vector<3x3xf32> to vector<3xf32>
    %136 = vector.shape_cast %135 : vector<3xf32> to vector<3x1xf32>
    %137 = vector.broadcast %136 : vector<3x1xf32> to vector<3x3xf32>
    %138 = arith.subf %134, %137 : vector<3x3xf32>
    %139 = math.exp %138 : vector<3x3xf32>
    %cst_78 = arith.constant dense<0.000000e+00> : vector<3xf32>
    %140 = vector.multi_reduction <add>, %139, %cst_78 [1] : vector<3x3xf32> to vector<3xf32>
    %141 = vector.shape_cast %140 : vector<3xf32> to vector<3x1xf32>
    %142 = vector.broadcast %141 : vector<3x1xf32> to vector<3x3xf32>
    %143 = arith.divf %139, %142 : vector<3x3xf32>
    %144 = arith.truncf %143 : vector<3x3xf32> to vector<3x3xbf16>
    %145 = arith.truncf %129 : vector<3x16xf32> to vector<3x16xbf16>
    %cst_79 = arith.constant dense<0.000000e+00> : vector<3x16xf32>
    %146 = tpu.matmul %144, %145, %cst_79 {dimension_numbers = #tpu.dot_dimension_numbers<[1], [0], [0], [1], [0, 0, 1, 1], [], []>} : vector<3x3xbf16>, vector<3x16xbf16>, vector<3x16xf32> -> vector<3x16xf32>
    %147 = arith.truncf %146 : vector<3x16xf32> to vector<3x16xbf16>
    %c3_80 = arith.constant 3 : index
    %c0_81 = arith.constant 0 : index
    %c0_82 = arith.constant 0 : index
    %148 = vector.load %arg5[%c3_80, %c0_81, %c0_82] : memref<4x16x128xbf16, #tpu.memory_space<vmem>>, vector<1x16x128xbf16>
    %149 = vector.shape_cast %148 : vector<1x16x128xbf16> to vector<16x128xbf16>
    %cst_83 = arith.constant dense<0.000000e+00> : vector<3x128xf32>
    %150 = tpu.matmul %147, %149, %cst_83 {dimension_numbers = #tpu.dot_dimension_numbers<[1], [0], [0], [1], [0, 0, 1, 1], [], []>} : vector<3x16xbf16>, vector<16x128xbf16>, vector<3x128xf32> -> vector<3x128xf32>
    %151 = arith.addf %120, %150 : vector<3x128xf32>
    %152 = arith.addf %1, %151 : vector<3x128xf32>
    %c0_84 = arith.constant 0 : index
    %c0_85 = arith.constant 0 : index
    %153 = vector.load %arg6[%c0_84, %c0_85] : memref<1x128xf32, #tpu.memory_space<vmem>>, vector<1x128xf32>
    %154 = vector.broadcast %153 : vector<1x128xf32> to vector<3x128xf32>
    %155 = arith.addf %152, %154 : vector<3x128xf32>
    %c0_86 = arith.constant 0 : index
    %c0_87 = arith.constant 0 : index
    %156 = vector.load %arg7[%c0_86, %c0_87] : memref<1x128xf32, #tpu.memory_space<vmem>>, vector<1x128xf32>
    %c0_88 = arith.constant 0 : index
    %c0_89 = arith.constant 0 : index
    %157 = vector.load %arg8[%c0_88, %c0_89] : memref<1x128xf32, #tpu.memory_space<vmem>>, vector<1x128xf32>
    %cst_90 = arith.constant dense<0.000000e+00> : vector<3xf32>
    %158 = vector.multi_reduction <add>, %155, %cst_90 [1] : vector<3x128xf32> to vector<3xf32>
    %159 = vector.shape_cast %158 : vector<3xf32> to vector<3x1xf32>
    %cst_91 = arith.constant 1.280000e+02 : f32
    %160 = vector.broadcast %cst_91 : f32 to vector<3x1xf32>
    %161 = arith.divf %159, %160 : vector<3x1xf32>
    %162 = vector.broadcast %161 : vector<3x1xf32> to vector<3x128xf32>
    %163 = arith.subf %155, %162 : vector<3x128xf32>
    %164 = arith.mulf %163, %163 : vector<3x128xf32>
    %cst_92 = arith.constant dense<0.000000e+00> : vector<3xf32>
    %165 = vector.multi_reduction <add>, %164, %cst_92 [1] : vector<3x128xf32> to vector<3xf32>
    %166 = vector.shape_cast %165 : vector<3xf32> to vector<3x1xf32>
    %cst_93 = arith.constant 1.280000e+02 : f32
    %167 = vector.broadcast %cst_93 : f32 to vector<3x1xf32>
    %168 = arith.divf %166, %167 : vector<3x1xf32>
    %169 = vector.broadcast %161 : vector<3x1xf32> to vector<3x128xf32>
    %170 = arith.subf %155, %169 : vector<3x128xf32>
    %cst_94 = arith.constant 9.99999974E-6 : f32
    %171 = vector.broadcast %cst_94 : f32 to vector<3x1xf32>
    %172 = arith.addf %168, %171 : vector<3x1xf32>
    %173 = math.rsqrt %172 : vector<3x1xf32>
    %174 = vector.broadcast %173 : vector<3x1xf32> to vector<3x128xf32>
    %175 = arith.mulf %170, %174 : vector<3x128xf32>
    %176 = vector.broadcast %156 : vector<1x128xf32> to vector<3x128xf32>
    %177 = arith.mulf %175, %176 : vector<3x128xf32>
    %178 = vector.broadcast %157 : vector<1x128xf32> to vector<3x128xf32>
    %179 = arith.addf %177, %178 : vector<3x128xf32>
    %c0_95 = arith.constant 0 : index
    %c0_96 = arith.constant 0 : index
    %180 = vector.load %arg9[%c0_95, %c0_96] : memref<128x64xbf16, #tpu.memory_space<vmem>>, vector<128x64xbf16>
    %181 = arith.truncf %179 : vector<3x128xf32> to vector<3x128xbf16>
    %cst_97 = arith.constant dense<0.000000e+00> : vector<3x64xf32>
    %182 = tpu.matmul %181, %180, %cst_97 {dimension_numbers = #tpu.dot_dimension_numbers<[1], [0], [0], [1], [0, 0, 1, 1], [], []>} : vector<3x128xbf16>, vector<128x64xbf16>, vector<3x64xf32> -> vector<3x64xf32>
    %c0_98 = arith.constant 0 : index
    %c0_99 = arith.constant 0 : index
    %183 = vector.load %arg10[%c0_98, %c0_99] : memref<1x64xf32, #tpu.memory_space<vmem>>, vector<1x64xf32>
    %184 = vector.broadcast %183 : vector<1x64xf32> to vector<3x64xf32>
    %185 = arith.addf %182, %184 : vector<3x64xf32>
    %cst_100 = arith.constant 5.000000e-01 : f32
    %186 = vector.broadcast %cst_100 : f32 to vector<3x64xf32>
    %187 = arith.mulf %186, %185 : vector<3x64xf32>
    %cst_101 = arith.constant 0.707106769 : f32
    %188 = vector.broadcast %cst_101 : f32 to vector<3x64xf32>
    %189 = arith.mulf %185, %188 : vector<3x64xf32>
    %cst_102 = arith.constant 0.000000e+00 : f32
    %190 = vector.broadcast %cst_102 : f32 to vector<3x64xf32>
    %191 = arith.cmpf oge, %189, %190 : vector<3x64xf32>
    %cst_103 = arith.constant 1.000000e+00 : f32
    %cst_104 = arith.constant -1.000000e+00 : f32
    %192 = vector.broadcast %cst_103 : f32 to vector<3x64xf32>
    %193 = vector.broadcast %cst_104 : f32 to vector<3x64xf32>
    %194 = arith.select %191, %192, %193 : vector<3x64xi1>, vector<3x64xf32>
    %195 = math.absf %189 : vector<3x64xf32>
    %cst_105 = arith.constant 0.327591091 : f32
    %196 = vector.broadcast %cst_105 : f32 to vector<3x64xf32>
    %197 = arith.mulf %196, %195 : vector<3x64xf32>
    %cst_106 = arith.constant 1.000000e+00 : f32
    %198 = vector.broadcast %cst_106 : f32 to vector<3x64xf32>
    %199 = arith.addf %198, %197 : vector<3x64xf32>
    %cst_107 = arith.constant 1.000000e+00 : f32
    %200 = vector.broadcast %cst_107 : f32 to vector<3x64xf32>
    %201 = arith.divf %200, %199 : vector<3x64xf32>
    %cst_108 = arith.constant 1.06140542 : f32
    %202 = vector.broadcast %cst_108 : f32 to vector<3x64xf32>
    %203 = arith.mulf %201, %202 : vector<3x64xf32>
    %cst_109 = arith.constant -1.45315206 : f32
    %204 = vector.broadcast %cst_109 : f32 to vector<3x64xf32>
    %205 = arith.addf %204, %203 : vector<3x64xf32>
    %206 = arith.mulf %201, %205 : vector<3x64xf32>
    %cst_110 = arith.constant 1.42141378 : f32
    %207 = vector.broadcast %cst_110 : f32 to vector<3x64xf32>
    %208 = arith.addf %207, %206 : vector<3x64xf32>
    %209 = arith.mulf %201, %208 : vector<3x64xf32>
    %cst_111 = arith.constant -0.284496725 : f32
    %210 = vector.broadcast %cst_111 : f32 to vector<3x64xf32>
    %211 = arith.addf %210, %209 : vector<3x64xf32>
    %212 = arith.mulf %201, %211 : vector<3x64xf32>
    %cst_112 = arith.constant 0.254829586 : f32
    %213 = vector.broadcast %cst_112 : f32 to vector<3x64xf32>
    %214 = arith.addf %213, %212 : vector<3x64xf32>
    %215 = arith.mulf %201, %214 : vector<3x64xf32>
    %cst_113 = arith.constant 0.000000e+00 : f32
    %216 = vector.broadcast %cst_113 : f32 to vector<3x64xf32>
    %217 = arith.subf %216, %195 : vector<3x64xf32>
    %218 = arith.mulf %217, %195 : vector<3x64xf32>
    %219 = math.exp %218 : vector<3x64xf32>
    %220 = arith.mulf %215, %219 : vector<3x64xf32>
    %cst_114 = arith.constant 1.000000e+00 : f32
    %221 = vector.broadcast %cst_114 : f32 to vector<3x64xf32>
    %222 = arith.subf %221, %220 : vector<3x64xf32>
    %223 = arith.mulf %194, %222 : vector<3x64xf32>
    %cst_115 = arith.constant 1.000000e+00 : f32
    %224 = vector.broadcast %cst_115 : f32 to vector<3x64xf32>
    %225 = arith.addf %224, %223 : vector<3x64xf32>
    %226 = arith.mulf %187, %225 : vector<3x64xf32>
    %c0_116 = arith.constant 0 : index
    %c0_117 = arith.constant 0 : index
    %227 = vector.load %arg11[%c0_116, %c0_117] : memref<64x128xbf16, #tpu.memory_space<vmem>>, vector<64x128xbf16>
    %228 = arith.truncf %226 : vector<3x64xf32> to vector<3x64xbf16>
    %cst_118 = arith.constant dense<0.000000e+00> : vector<3x128xf32>
    %229 = tpu.matmul %228, %227, %cst_118 {dimension_numbers = #tpu.dot_dimension_numbers<[1], [0], [0], [1], [0, 0, 1, 1], [], []>} : vector<3x64xbf16>, vector<64x128xbf16>, vector<3x128xf32> -> vector<3x128xf32>
    %c0_119 = arith.constant 0 : index
    %c0_120 = arith.constant 0 : index
    %230 = vector.load %arg12[%c0_119, %c0_120] : memref<1x128xf32, #tpu.memory_space<vmem>>, vector<1x128xf32>
    %231 = vector.broadcast %230 : vector<1x128xf32> to vector<3x128xf32>
    %232 = arith.addf %229, %231 : vector<3x128xf32>
    %233 = arith.addf %155, %232 : vector<3x128xf32>
    %c0_121 = arith.constant 0 : index
    %c0_122 = arith.constant 0 : index
    %c0_123 = arith.constant 0 : index
    %234 = vector.load %arg13[%c0_121, %c0_122, %c0_123] : memref<1x3x128xf32, #tpu.memory_space<vmem>>, vector<1x3x128xf32>
    %235 = vector.shape_cast %234 : vector<1x3x128xf32> to vector<3x128xf32>
    %236 = vector.shape_cast %233 : vector<3x128xf32> to vector<1x3x128xf32>
    tpu.vector_store %arg13[%c0_121, %c0_122, %c0_123], %236 {strides = array<i32>} : memref<1x3x128xf32, #tpu.memory_space<vmem>>, vector<1x3x128xf32>,
    return
  }
  func.func @transform_0(%arg0: i32) -> (i32, i32, i32) {
    %c0_i32 = arith.constant 0 : i32
    %c0_i32_0 = arith.constant 0 : i32
    %c0_i32_1 = arith.constant 0 : i32
    return %arg0, %c0_i32, %c0_i32_0 : i32, i32, i32
  }
  func.func @transform_1(%arg0: i32) -> (i32, i32) {
    %c0_i32 = arith.constant 0 : i32
    %c0_i32_0 = arith.constant 0 : i32
    %c0_i32_1 = arith.constant 0 : i32
    return %c0_i32, %c0_i32_0 : i32, i32
  }
  func.func @transform_2(%arg0: i32) -> (i32, i32) {
    %c0_i32 = arith.constant 0 : i32
    %c0_i32_0 = arith.constant 0 : i32
    %c0_i32_1 = arith.constant 0 : i32
    return %c0_i32, %c0_i32_0 : i32, i32
  }
  func.func @transform_3(%arg0: i32) -> (i32, i32, i32) {
    %c0_i32 = arith.constant 0 : i32
    %c0_i32_0 = arith.constant 0 : i32
    %c0_i32_1 = arith.constant 0 : i32
    %c0_i32_2 = arith.constant 0 : i32
    return %c0_i32, %c0_i32_0, %c0_i32_1 : i32, i32, i32
  }
  func.func @transform_4(%arg0: i32) -> (i32, i32, i32) {
    %c0_i32 = arith.constant 0 : i32
    %c0_i32_0 = arith.constant 0 : i32
    %c0_i32_1 = arith.constant 0 : i32
    %c0_i32_2 = arith.constant 0 : i32
    return %c0_i32, %c0_i32_0, %c0_i32_1 : i32, i32, i32
  }
  func.func @transform_5(%arg0: i32) -> (i32, i32) {
    %c0_i32 = arith.constant 0 : i32
    %c0_i32_0 = arith.constant 0 : i32
    %c0_i32_1 = arith.constant 0 : i32
    return %c0_i32, %c0_i32_0 : i32, i32
  }
  func.func @transform_6(%arg0: i32) -> (i32, i32) {
    %c0_i32 = arith.constant 0 : i32
    %c0_i32_0 = arith.constant 0 : i32
    %c0_i32_1 = arith.constant 0 : i32
    return %c0_i32, %c0_i32_0 : i32, i32
  }
  func.func @transform_7(%arg0: i32) -> (i32, i32) {
    %c0_i32 = arith.constant 0 : i32
    %c0_i32_0 = arith.constant 0 : i32
    %c0_i32_1 = arith.constant 0 : i32
    return %c0_i32, %c0_i32_0 : i32, i32
  }
  func.func @transform_8(%arg0: i32) -> (i32, i32) {
    %c0_i32 = arith.constant 0 : i32
    %c0_i32_0 = arith.constant 0 : i32
    %c0_i32_1 = arith.constant 0 : i32
    return %c0_i32, %c0_i32_0 : i32, i32
  }
  func.func @transform_9(%arg0: i32) -> (i32, i32) {
    %c0_i32 = arith.constant 0 : i32
    %c0_i32_0 = arith.constant 0 : i32
    %c0_i32_1 = arith.constant 0 : i32
    return %c0_i32, %c0_i32_0 : i32, i32
  }
  func.func @transform_10(%arg0: i32) -> (i32, i32) {
    %c0_i32 = arith.constant 0 : i32
    %c0_i32_0 = arith.constant 0 : i32
    %c0_i32_1 = arith.constant 0 : i32
    return %c0_i32, %c0_i32_0 : i32, i32
  }
  func.func @transform_11(%arg0: i32) -> (i32, i32) {
    %c0_i32 = arith.constant 0 : i32
    %c0_i32_0 = arith.constant 0 : i32
    %c0_i32_1 = arith.constant 0 : i32
    return %c0_i32, %c0_i32_0 : i32, i32
  }
  func.func @transform_12(%arg0: i32) -> (i32, i32, i32) {
    %c0_i32 = arith.constant 0 : i32
    %c0_i32_0 = arith.constant 0 : i32
    %c0_i32_1 = arith.constant 0 : i32
    return %arg0, %c0_i32, %c0_i32_0 : i32, i32, i32
  }
}

module attributes {stable_mosaic.version = 11 : i64} {
  func.func @_head_kernel(%arg0: i32, %arg1: memref<2x128xf32, #tpu.memory_space<vmem>>, %arg2: memref<1x128xf32, #tpu.memory_space<vmem>>, %arg3: memref<1x128xf32, #tpu.memory_space<vmem>>, %arg4: memref<128x128xbf16, #tpu.memory_space<vmem>>, %arg5: memref<1x128xf32, #tpu.memory_space<vmem>>, %arg6: memref<2x128xf32, #tpu.memory_space<vmem>>) attributes {dimension_semantics = [#tpu.dimension_semantics<arbitrary>], iteration_bounds = array<i64: 1>, scalar_prefetch = 0 : i64, scratch_operands = 0 : i64, tpu.core_type = #tpu.core_type<tc>, window_params = [{pipeline_mode = #tpu.pipeline_mode<synchronous>, transform_indices = @transform_0, window_bounds = array<i64: 2, 128>}, {pipeline_mode = #tpu.pipeline_mode<synchronous>, transform_indices = @transform_1, window_bounds = array<i64: 1, 128>}, {pipeline_mode = #tpu.pipeline_mode<synchronous>, transform_indices = @transform_2, window_bounds = array<i64: 1, 128>}, {pipeline_mode = #tpu.pipeline_mode<synchronous>, transform_indices = @transform_3, window_bounds = array<i64: 128, 128>}, {pipeline_mode = #tpu.pipeline_mode<synchronous>, transform_indices = @transform_4, window_bounds = array<i64: 1, 128>}, {pipeline_mode = #tpu.pipeline_mode<synchronous>, transform_indices = @transform_5, window_bounds = array<i64: 2, 128>}]} {
    %c0 = arith.constant 0 : index
    %c0_0 = arith.constant 0 : index
    %0 = vector.load %arg1[%c0, %c0_0] : memref<2x128xf32, #tpu.memory_space<vmem>>, vector<2x128xf32>
    %c0_1 = arith.constant 0 : index
    %c0_2 = arith.constant 0 : index
    %1 = vector.load %arg2[%c0_1, %c0_2] : memref<1x128xf32, #tpu.memory_space<vmem>>, vector<1x128xf32>
    %c0_3 = arith.constant 0 : index
    %c0_4 = arith.constant 0 : index
    %2 = vector.load %arg3[%c0_3, %c0_4] : memref<1x128xf32, #tpu.memory_space<vmem>>, vector<1x128xf32>
    %cst = arith.constant dense<0.000000e+00> : vector<2xf32>
    %3 = vector.multi_reduction <add>, %0, %cst [1] : vector<2x128xf32> to vector<2xf32>
    %4 = vector.shape_cast %3 : vector<2xf32> to vector<2x1xf32>
    %cst_5 = arith.constant 1.280000e+02 : f32
    %5 = vector.broadcast %cst_5 : f32 to vector<2x1xf32>
    %6 = arith.divf %4, %5 : vector<2x1xf32>
    %7 = vector.broadcast %6 : vector<2x1xf32> to vector<2x128xf32>
    %8 = arith.subf %0, %7 : vector<2x128xf32>
    %9 = arith.mulf %8, %8 : vector<2x128xf32>
    %cst_6 = arith.constant dense<0.000000e+00> : vector<2xf32>
    %10 = vector.multi_reduction <add>, %9, %cst_6 [1] : vector<2x128xf32> to vector<2xf32>
    %11 = vector.shape_cast %10 : vector<2xf32> to vector<2x1xf32>
    %cst_7 = arith.constant 1.280000e+02 : f32
    %12 = vector.broadcast %cst_7 : f32 to vector<2x1xf32>
    %13 = arith.divf %11, %12 : vector<2x1xf32>
    %14 = vector.broadcast %6 : vector<2x1xf32> to vector<2x128xf32>
    %15 = arith.subf %0, %14 : vector<2x128xf32>
    %cst_8 = arith.constant 9.99999974E-6 : f32
    %16 = vector.broadcast %cst_8 : f32 to vector<2x1xf32>
    %17 = arith.addf %13, %16 : vector<2x1xf32>
    %18 = math.rsqrt %17 : vector<2x1xf32>
    %19 = vector.broadcast %18 : vector<2x1xf32> to vector<2x128xf32>
    %20 = arith.mulf %15, %19 : vector<2x128xf32>
    %21 = vector.broadcast %1 : vector<1x128xf32> to vector<2x128xf32>
    %22 = arith.mulf %20, %21 : vector<2x128xf32>
    %23 = vector.broadcast %2 : vector<1x128xf32> to vector<2x128xf32>
    %24 = arith.addf %22, %23 : vector<2x128xf32>
    %c0_9 = arith.constant 0 : index
    %c0_10 = arith.constant 0 : index
    %25 = vector.load %arg4[%c0_9, %c0_10] : memref<128x128xbf16, #tpu.memory_space<vmem>>, vector<128x128xbf16>
    %26 = arith.truncf %24 : vector<2x128xf32> to vector<2x128xbf16>
    %cst_11 = arith.constant dense<0.000000e+00> : vector<2x128xf32>
    %27 = tpu.matmul %26, %25, %cst_11 {dimension_numbers = #tpu.dot_dimension_numbers<[1], [0], [0], [1], [0, 0, 1, 1], [], []>} : vector<2x128xbf16>, vector<128x128xbf16>, vector<2x128xf32> -> vector<2x128xf32>
    %c0_12 = arith.constant 0 : index
    %c0_13 = arith.constant 0 : index
    %28 = vector.load %arg5[%c0_12, %c0_13] : memref<1x128xf32, #tpu.memory_space<vmem>>, vector<1x128xf32>
    %29 = vector.broadcast %28 : vector<1x128xf32> to vector<2x128xf32>
    %30 = arith.addf %27, %29 : vector<2x128xf32>
    %c0_14 = arith.constant 0 : index
    %c0_15 = arith.constant 0 : index
    %31 = vector.load %arg6[%c0_14, %c0_15] : memref<2x128xf32, #tpu.memory_space<vmem>>, vector<2x128xf32>
    tpu.vector_store %arg6[%c0_14, %c0_15], %30 {strides = array<i32>} : memref<2x128xf32, #tpu.memory_space<vmem>>, vector<2x128xf32>,
    return
  }
  func.func @transform_0(%arg0: i32) -> (i32, i32) {
    %c0_i32 = arith.constant 0 : i32
    %c0_i32_0 = arith.constant 0 : i32
    %c0_i32_1 = arith.constant 0 : i32
    return %c0_i32, %c0_i32_0 : i32, i32
  }
  func.func @transform_1(%arg0: i32) -> (i32, i32) {
    %c0_i32 = arith.constant 0 : i32
    %c0_i32_0 = arith.constant 0 : i32
    %c0_i32_1 = arith.constant 0 : i32
    return %c0_i32, %c0_i32_0 : i32, i32
  }
  func.func @transform_2(%arg0: i32) -> (i32, i32) {
    %c0_i32 = arith.constant 0 : i32
    %c0_i32_0 = arith.constant 0 : i32
    %c0_i32_1 = arith.constant 0 : i32
    return %c0_i32, %c0_i32_0 : i32, i32
  }
  func.func @transform_3(%arg0: i32) -> (i32, i32) {
    %c0_i32 = arith.constant 0 : i32
    %c0_i32_0 = arith.constant 0 : i32
    %c0_i32_1 = arith.constant 0 : i32
    return %c0_i32, %c0_i32_0 : i32, i32
  }
  func.func @transform_4(%arg0: i32) -> (i32, i32) {
    %c0_i32 = arith.constant 0 : i32
    %c0_i32_0 = arith.constant 0 : i32
    %c0_i32_1 = arith.constant 0 : i32
    return %c0_i32, %c0_i32_0 : i32, i32
  }
  func.func @transform_5(%arg0: i32) -> (i32, i32) {
    %c0_i32 = arith.constant 0 : i32
    %c0_i32_0 = arith.constant 0 : i32
    %c0_i32_1 = arith.constant 0 : i32
    return %c0_i32, %c0_i32_0 : i32, i32
  }
}

</mosaic_0001>

<bundles_post_ra>
// kernel: cst_forward.5
= control target key start
LH: loop header
LB: loop body
LE: loop exit
PB: predicated region body
PF: predicated region fallthrough
CT: control target
= control target key end

     0   :  { %s636_s27 = smov 0   ;;  %s699_s0 = inlined_call_operand.vmem [shape: f32[2,8,96], index: 0, kind: input, shape index: {}]   ;;  %s700_s1 = inlined_call_operand.vmem [shape: f32[1,96], index: 1, kind: input, shape index: {}]   ;;  %s701_s2 = inlined_call_operand.vmem [shape: f32[1,96], index: 2, kind: input, shape index: {}]   ;;  %s702_s3 = inlined_call_operand.vmem [shape: bf16[96,128], index: 3, kind: input, shape index: {}]   ;;  %s703_s4 = inlined_call_operand.vmem [shape: f32[1,128], index: 4, kind: input, shape index: {}]   ;;  %s704_s5 = inlined_call_operand.vmem [shape: f32[1,128], index: 5, kind: input, shape index: {}]   ;;  %s705_s6 = inlined_call_operand.vmem [shape: f32[1,128], index: 6, kind: input, shape index: {}]   ;;  %s706_s7 = inlined_call_operand.vmem [shape: f32[8,128], index: 7, kind: input, shape index: {}]   ;;  %s707_s8 = inlined_call_operand.vmem [shape: f32[2,8,128], index: 8, kind: output, shape index: {}]  }
   0x1 LB: > { %s517_s28 = sadd.s32 4294967295, %s587_s27   ;;  %p521_p0 = scmp.ge.s32.totalorder %s587_s27, 1  ;;  %s587_s27 = sphi %s636_s27, %s18_s27  }
   0x2   : > { %p261_p1 = scmp.lt.s32.totalorder %s587_s27, 3 }
   0x4   : > { %p262_p2 = pnand %p521_p0, %p261_p1 }
   0x5   : > { %p293_p3 = scmp.lt.s32.totalorder (!%p262_p2), %s517_s28, 1  ;;  %vm305_vm0 = vcmask (!%p262_p2), 785408   ;;  %v589_v2 = vmov (!%p262_p2), 0.0   ;;  %v571_v8 = vld [vmem:[%s702_s3] sm:$0xff] (!%p262_p2)   ;;  %v572_v9 = vld [vmem:[%s702_s3 + $0x8] sm:$0xff] (!%p262_p2)   ;;  %v573_v10 = vld [vmem:[%s702_s3 + $0x10] sm:$0xff] (!%p262_p2)  }
   0x6   : > { %265 = sbr.rel (%p262_p2) target bundleno = 860 (0x35c), region = 52  ;;  %545 = vmatprep.subr.bf16.mxu0 (!%p262_p2), %v589_v2  ;;  %v574_v11 = vld [vmem:[%s702_s3 + $0x18] sm:$0xff] (!%p262_p2)   ;;  %v575_v12 = vld [vmem:[%s702_s3 + $0x20] sm:$0xff] (!%p262_p2)   ;;  %v576_v13 = vld [vmem:[%s702_s3 + $0x28] sm:$0xff] (!%p262_p2)   ;;  %vm590_vm1 = vmmov (!%p262_p2), 0  }
   0x7   : > { %546 = vmatpush3.bf16.msra.mxu0 (!%p262_p2), %v571_v8  ;;  %557 = vmatprep.mubr.msk.bf16.mxu0 (!%p262_p2), %vm590_vm1, %v589_v2  ;;  %v524_v18 = vld [vmem:[%s700_s1] ss:$0 sm:$0xff] (!%p262_p2) }
   0x8   : > { %547 = vmatprep.subr.bf16.mxu0 (!%p262_p2), %v589_v2  ;;  %v525_v20 = vld [vmem:[%s701_s2] ss:$0 sm:$0xff] (!%p262_p2) }
   0x9   : > { %v526_v24 = vld [vmem:[%s703_s4] ss:$0 sm:$0xff] (!%p262_p2) }
   0xa   : > { %v534_v38 = vld [vmem:[%s704_s5] ss:$0 sm:$0xff] (!%p262_p2) }
   0xb   : > { %548 = vmatpush3.bf16.msra.mxu0 (!%p262_p2), %v572_v9  ;;  %v535_v40 = vld [vmem:[%s705_s6] ss:$0 sm:$0xff] (!%p262_p2) }
   0xc   : > { %549 = vmatprep.subr.bf16.mxu0 (!%p262_p2), %v589_v2  ;;  %v461_v42 = vld [vmem:[%s706_s7] sm:$0xff] (!%p262_p2) }
   0xd   : > { %s709_s28 = smov (!%p293_p3, %s517_s28), 1 }
   0xe   : > { %s522_s29 = sshll.u32 %s709_s28, 3 }
   0xf   : > { %s296_s10 = scalar_lea.vmem %s699_s0, %s522_s29  ;;  %550 = vmatpush3.bf16.msra.mxu0 %v573_v10  ;;  %s300_s18 = scalar_lea.vmem %s707_s8, %s522_s29 }
  0x10   : > { %v302_v0 = vld [vmem:[%s296_s10] sm:$0xff]  ;;  %551 = vmatprep.subr.bf16.mxu0 %v589_v2 }
  0x11   : > { %v306_v1 = vsel %vm305_vm0, %v302_v0, 0.0 }
  0x12   : > { %307 = vadd.xlane.f32.xlu0 %v306_v1 }
  0x13   : > { %552 = vmatpush3.bf16.msra.mxu0 %v574_v11 }
  0x14   : > { %553 = vmatprep.subr.bf16.mxu0 %v589_v2 }
  0x17   : > { %554 = vmatpush3.bf16.msra.mxu0 %v575_v12 }
  0x18   : > { %555 = vmatprep.subr.bf16.mxu0 %v589_v2 }
  0x1b   : > { %556 = vmatpush3.bf16.msra.mxu0 %v576_v13 }
  0x9f   : > { %v308_v3 = vpop.xlane.xlu0 %307 }
  0xa0   : > { %v310_v4 = vmul.f32 0.010416667, %v308_v3 }
  0xa2   : > { %v311_v5 = vsub.f32 %v302_v0, %v310_v4 }
  0xa4   : > { %v312_v6 = vmul.f32 %v311_v5, %v311_v5 }
  0xa6   : > { %v313_v7 = vsel %vm305_vm0, %v312_v6, 0.0 }
  0xa7   : > { %314 = vadd.xlane.f32.xlu0 %v313_v7 }
 0x134   : > { %v315_v14 = vpop.xlane.xlu0 %314 }
 0x135   : > { %v316_v15 = vmul.f32 0.010416667, %v315_v14 }
 0x137   : > { %v317_v16 = vadd.f32 1e-05, %v316_v15 }
 0x139   : > { %577 = vrsqrt.f32 %v317_v16 }
 0x143   : > { %v578_v17 = vpop.eup %577 }
 0x144   : > { %v319_v19 = vmul.f32 %v578_v17, %v311_v5 }
 0x146   : > { %v326_v21 = vmul.f32 %v524_v18, %v319_v19 }
 0x148   : > { %v333_v22 = vadd.f32 %v525_v20, %v326_v21 }
 0x14a   : > { %v346_v23 = vpack.c.bf16 %v333_v22, %v333_v22 }
 0x14c   : > { %558 = vmatmul.mubr.msk.bf16.vlgmr.msra.gmra.mrb[0].mxu0 %vm305_vm0, %v346_v23 }
 0x21f   : > { %v427_v25 = vpop.f32.mrb[0].mxu0 }
 0x220   : > { %v428_v26 = vadd.f32 %v526_v24, %v427_v25  ;;  %v559_v27 = vpop.f32.mrb[1].mxu0 }
 0x221   : > { %v430_v28 = vpop.f32.mrb[2].mxu0 }
 0x222   : > { %435 = vadd.xlane.f32.xlu1 %v428_v26  ;;  %v560_v29 = vpop.f32.mrb[3].mxu0 }
 0x2af   : > { %v436_v30 = vpop.xlane.xlu1 %435 }
 0x2b0   : > { %v438_v31 = vmul.f32 0.0078125, %v436_v30 }
 0x2b2   : > { %v439_v32 = vsub.f32 %v428_v26, %v438_v31 }
 0x2b4   : > { %v440_v33 = vmul.f32 %v439_v32, %v439_v32 }
 0x2b6   : > { %441 = vadd.xlane.f32.xlu1 %v440_v33 }
 0x343   : > { %v442_v34 = vpop.xlane.xlu1 %441 }
 0x344   : > { %v443_v35 = vmul.f32 0.0078125, %v442_v34 }
 0x346   : > { %v444_v36 = vadd.f32 1e-05, %v443_v35 }
 0x348   : > { %579 = vrsqrt.f32 %v444_v36 }
 0x352   : > { %v580_v37 = vpop.eup %579 }
 0x353   : > { %v446_v39 = vmul.f32 %v580_v37, %v439_v32 }
 0x355   : > { %v453_v41 = vmul.f32 %v534_v38, %v446_v39 }
 0x357   : > { %v460_v43 = vadd.f32 %v535_v40, %v453_v41 }
 0x359   : > { %v462_v44 = vadd.f32 %v461_v42, %v460_v43 }
 0x35b   : > { %463 = vst [vmem:[%s300_s18] sm:$0xff] %v462_v44 }
 0x35c PF: > { %s18_s27 = sadd.s32 1, %s587_s27  }
 0x35d   : > { %p15_p4 = scmp.ge.s32.totalorder %s18_s27, 4  }
 0x35f   :  { %17 = sbr.rel (!%p15_p4) target bundleno = 1 (0x1), region = 82 }

// kernel: cst_forward.9
= control target key start
LH: loop header
LB: loop body
LE: loop exit
PB: predicated region body
PF: predicated region fallthrough
CT: control target
= control target key end

     0   :  { %vm25_vm0 = vcmask 1041408   ;;  %s341_s0 = inlined_call_operand.vmem [shape: f32[2,128], index: 0, kind: input, shape index: {}]   ;;  %s342_s1 = inlined_call_operand.vmem [shape: f32[1,128], index: 1, kind: input, shape index: {}]   ;;  %s343_s2 = inlined_call_operand.vmem [shape: f32[1,128], index: 2, kind: input, shape index: {}]   ;;  %s344_s3 = inlined_call_operand.vmem [shape: bf16[128,128], index: 3, kind: input, shape index: {}]   ;;  %s345_s4 = inlined_call_operand.vmem [shape: f32[1,128], index: 4, kind: input, shape index: {}]   ;;  %s346_s5 = inlined_call_operand.hbm [shape: f32[2,128], index: 5, kind: output, shape index: {}]  }
   0x1   :  { %v22_v0 = vld [vmem:[%s341_s0] sm:$0x3] }
   0x2   :  { %v26_v1 = vsel %vm25_vm0, %v22_v0, 0.0 }
   0x3   :  { %27 = vadd.xlane.f32.xlu0 %v26_v1 }
   0x4   :  { %10 = vsyncpa [#allocation3], 0  ;;  %v224_v2 = vld [vmem:[%s344_s3] sm:$0xff]   ;;  %v258_v3 = vmov 0.0   ;;  %v225_v4 = vld [vmem:[%s344_s3 + $0x8] sm:$0xff]   ;;  %vm259_vm1 = vmmov 0  }
   0x5   :  { %201 = vmatprep.subr.bf16.mxu0 %v258_v3  ;;  %v226_v10 = vld [vmem:[%s344_s3 + $0x10] sm:$0xff]   ;;  %v227_v11 = vld [vmem:[%s344_s3 + $0x18] sm:$0xff]   ;;  %v228_v12 = vld [vmem:[%s344_s3 + $0x20] sm:$0xff]   ;;  %217 = vmatprep.mubr.msk.bf16.mxu0 %vm259_vm1, %v258_v3  ;;  %s260_s15 = smov [#allocation2]  }
   0x6   :  { %202 = vmatpush3.bf16.msra.mxu0 %v224_v2  ;;  %v229_v13 = vld [vmem:[%s344_s3 + $0x28] sm:$0xff]   ;;  %v230_v14 = vld [vmem:[%s344_s3 + $0x30] sm:$0xff]   ;;  %v231_v15 = vld [vmem:[%s344_s3 + $0x38] sm:$0xff]   ;;  %s173_s16 = sshll.u32 %s260_s15, 4  ;;  %s174_s16 = int_to_ptr.vmem [resolvable:$true] %s173_s16 }
   0x7   :  { %203 = vmatprep.subr.bf16.mxu0 %v258_v3  ;;  %v181_v20 = vld [vmem:[%s342_s1] ss:$0 sm:$0xff]  ;;  %s234_s1 = scalar_lea.vmem %s174_s16, 32  ;;  %p239_p1 = scmp.lt.s32.totalorder %s174_s16, %s174_s16 }
   0x8   :  { %v182_v22 = vld [vmem:[%s343_s2] ss:$0 sm:$0xff]  ;;  %p235_p0 = scmp.ne.s32.totalorder %s174_s16, %s234_s1  ;;  %p240_p2 = scmp.lt.s32.totalorder %s234_s1, %s234_s1 }
   0x9   :  { %v183_v26 = vld [vmem:[%s345_s4] ss:$0 sm:$0xff] }
   0xa   :  { %204 = vmatpush3.bf16.msra.mxu0 %v225_v4  ;;  %p241_p3 = por %p240_p2, %p239_p1 }
   0xb   :  { %205 = vmatprep.subr.bf16.mxu0 %v258_v3 }
   0xc   :  { %p242_p4 = pnand %p241_p3, %p235_p0 }
   0xe   :  { %206 = vmatpush3.bf16.msra.mxu0 %v226_v10 }
   0xf   :  { %207 = vmatprep.subr.bf16.mxu0 %v258_v3 }
  0x12   :  { %208 = vmatpush3.bf16.msra.mxu0 %v227_v11 }
  0x13   :  { %209 = vmatprep.subr.bf16.mxu0 %v258_v3 }
  0x16   :  { %210 = vmatpush3.bf16.msra.mxu0 %v228_v12 }
  0x17   :  { %211 = vmatprep.subr.bf16.mxu0 %v258_v3 }
  0x1a   :  { %212 = vmatpush3.bf16.msra.mxu0 %v229_v13 }
  0x1b   :  { %213 = vmatprep.subr.bf16.mxu0 %v258_v3 }
  0x1e   :  { %214 = vmatpush3.bf16.msra.mxu0 %v230_v14 }
  0x1f   :  { %215 = vmatprep.subr.bf16.mxu0 %v258_v3 }
  0x22   :  { %216 = vmatpush3.bf16.msra.mxu0 %v231_v15 }
  0x90   :  { %v28_v5 = vpop.xlane.xlu0 %27 }
  0x91   :  { %v30_v6 = vmul.f32 0.0078125, %v28_v5 }
  0x93   :  { %v31_v7 = vsub.f32 %v22_v0, %v30_v6 }
  0x95   :  { %v32_v8 = vmul.f32 %v31_v7, %v31_v7 }
  0x97   :  { %v33_v9 = vsel %vm25_vm0, %v32_v8, 0.0 }
  0x98   :  { %34 = vadd.xlane.f32.xlu0 %v33_v9 }
 0x125   :  { %v35_v16 = vpop.xlane.xlu0 %34 }
 0x126   :  { %v36_v17 = vmul.f32 0.0078125, %v35_v16 }
 0x128   :  { %v37_v18 = vadd.f32 1e-05, %v36_v17 }
 0x12a   :  { %232 = vrsqrt.f32 %v37_v18 }
 0x134   :  { %v233_v19 = vpop.eup %232 }
 0x135   :  { %v39_v21 = vmul.f32 %v233_v19, %v31_v7 }
 0x137   :  { %v46_v23 = vmul.f32 %v181_v20, %v39_v21 }
 0x139   :  { %v53_v24 = vadd.f32 %v182_v22, %v46_v23 }
 0x13b   :  { %v70_v25 = vpack.c.bf16 %v53_v24, %v53_v24 }
 0x13d   :  { %218 = vmatmul.mubr.bf16.vlgmr.msra.gmra.mrb[0].mxu0 %v70_v25 }
 0x210   :  { %v160_v27 = vpop.f32.mrb[0].mxu0 }
 0x211   :  { %v161_v28 = vadd.f32 %v183_v26, %v160_v27  ;;  %v219_v29 = vpop.f32.mrb[1].mxu0 }
 0x212   :  { %v163_v30 = vpop.f32.mrb[2].mxu0 }
 0x213   :  { %166 = vst [vmem:[#allocation2] sm:$0x3] %v161_v28  ;;  %v220_v31 = vpop.f32.mrb[3].mxu0 }
 0x214   :  { %245 = shalt.err (!%p242_p4)
}
 0x215   :  { %s246_s4 = scalar_lea.hbm %s346_s5, 32 }
 0x216   :  { %p247_p5 = scmp.ne.s32.totalorder %s346_s5, %s246_s4  ;;  %p250_p6 = scmp.lt.u32.totalorder %s246_s4, %s346_s5 }
 0x218   :  { %p252_p7 = pnand %p250_p6, %p247_p5 }
 0x21a   :  { %255 = shalt.err (!%p252_p7)
}
 0x21b   :  { %176 = dma.vmem_to_hbm [thread:$0]  %s174_s16, 32, %s346_s5, [#allocation3]  }
 0x21c   :  { %256 = dma.done.wait [#allocation3], 32  }
 0x21d   :  { %257 = vsyncadd [#allocation3], 4294967264 }
 0x21e   :  { %180 = vsyncpa [#allocation3], 1 }

// kernel: cst_forward.6
= control target key start
LH: loop header
LB: loop body
LE: loop exit
PB: predicated region body
PF: predicated region fallthrough
CT: control target
= control target key end

     0   :  { %s3709_s21 = smov 0   ;;  %s4329_s0 = inlined_call_operand.vmem [shape: f32[4,5,128], index: 0, kind: input, shape index: {}]   ;;  %s4330_s1 = inlined_call_operand.vmem [shape: f32[1,128], index: 1, kind: input, shape index: {}]   ;;  %s4331_s2 = inlined_call_operand.vmem [shape: f32[1,128], index: 2, kind: input, shape index: {}]   ;;  %s4332_s3 = inlined_call_operand.vmem [shape: bf16[12,128,16], index: 3, kind: input, shape index: {}]   ;;  %s4333_s4 = inlined_call_operand.vmem [shape: bf16[4,16,128], index: 4, kind: input, shape index: {}]   ;;  %s4334_s5 = inlined_call_operand.vmem [shape: f32[1,128], index: 5, kind: input, shape index: {}]   ;;  %s4335_s6 = inlined_call_operand.vmem [shape: f32[1,128], index: 6, kind: input, shape index: {}]   ;;  %s4336_s7 = inlined_call_operand.vmem [shape: f32[1,128], index: 7, kind: input, shape index: {}]   ;;  %s4337_s8 = inlined_call_operand.vmem [shape: bf16[128,64], index: 8, kind: input, shape index: {}]   ;;  %s4338_s9 = inlined_call_operand.vmem [shape: f32[1,64], index: 9, kind: input, shape index: {}]   ;;  %s4339_s10 = inlined_call_operand.vmem [shape: bf16[64,128], index: 10, kind: input, shape index: {}]   ;;  %s4340_s11 = inlined_call_operand.vmem [shape: f32[1,128], index: 11, kind: input, shape index: {}]   ;;  %s4341_s12 = inlined_call_operand.vmem [shape: f32[4,5,128], index: 12, kind: output, shape index: {}]  }
   0x1 LB: > { %s2670_s22 = sadd.s32 4294967295, %s3638_s21   ;;  %p2674_p0 = scmp.ge.s32.totalorder %s3638_s21, 1  ;;  %s3638_s21 = sphi %s3709_s21, %s22_s21  }
   0x2   : > { %p361_p1 = scmp.lt.s32.totalorder %s3638_s21, 5 }
   0x4   : > { %p362_p2 = pnand %p2674_p0, %p361_p1 }
   0x5   : > { %p401_p3 = scmp.lt.s32.totalorder (!%p362_p2), %s2670_s22, 3  ;;  %vm413_vm0 = vcmask (!%p362_p2), 1044480   ;;  %v3495_v2 = vld [vmem:[%s4332_s3] sm:$0xff] (!%p362_p2)   ;;  %v3640_v4 = vmov (!%p362_p2), 0.0   ;;  %v3497_v5 = vld [vmem:[%s4332_s3 + $0x8] sm:$0xff] (!%p362_p2)   ;;  %v3499_v7 = vld [vmem:[%s4332_s3 + $0x10] sm:$0xff] (!%p362_p2)  }
   0x6   : > { %365 = sbr.rel (%p362_p2) target bundleno = 5067 (0x13cb), region = 68  ;;  %v3496_v3 = vld [vmem:[%s4332_s3 + $0x100] sm:$0xff] (!%p362_p2)   ;;  %3139 = vmatprep.subr.bf16.mxu0 (!%p362_p2), %v3640_v4  ;;  %3159 = vmatprep.subr.bf16.mxu1 (!%p362_p2), %v3640_v4  ;;  %v3498_v6 = vld [vmem:[%s4332_s3 + $0x108] sm:$0xff] (!%p362_p2)   ;;  %v3500_v13 = vld [vmem:[%s4332_s3 + $0x110] sm:$0xff] (!%p362_p2)   ;;  %vm3641_vm1 = vmmov (!%p362_p2), 0   ;;  %vm759_vm2 = vcmask (!%p362_p2), 130048  }
   0x7   : > { %3140 = vmatpush3.bf16.msra.mxu0 (!%p362_p2), %v3495_v2  ;;  %3160 = vmatpush3.bf16.msra.mxu1 (!%p362_p2), %v3496_v3  ;;  %v3501_v14 = vld [vmem:[%s4332_s3 + $0x18] sm:$0xff] (!%p362_p2)   ;;  %v3503_v16 = vld [vmem:[%s4332_s3 + $0x20] sm:$0xff] (!%p362_p2)   ;;  %v3505_v18 = vld [vmem:[%s4332_s3 + $0x28] sm:$0xff] (!%p362_p2)   ;;  %vm825_vm3 = vcmask (!%p362_p2), 1041408   ;;  %vm826_vm4 = vcmask (!%p362_p2), 1042432   ;;  %v3642_v61 = vmov (!%p362_p2), 65535  }
   0x8   : > { %3141 = vmatprep.subr.bf16.mxu0 (!%p362_p2), %v3640_v4  ;;  %3161 = vmatprep.subr.bf16.mxu1 (!%p362_p2), %v3640_v4  ;;  %v3502_v15 = vld [vmem:[%s4332_s3 + $0x118] sm:$0xff] (!%p362_p2)   ;;  %v3504_v17 = vld [vmem:[%s4332_s3 + $0x120] sm:$0xff] (!%p362_p2)   ;;  %v3506_v19 = vld [vmem:[%s4332_s3 + $0x128] sm:$0xff] (!%p362_p2)   ;;  %v827_v62 = vsel (!%p362_p2), %vm825_vm3, 4294967295, %v3642_v61  ;;  %vm807_vm5 = vcmask (!%p362_p2), 36864   ;;  %vm821_vm6 = vcmask (!%p362_p2), 39936  }
   0x9   : > { %v3507_v20 = vld [vmem:[%s4332_s3 + $0x30] sm:$0xff] (!%p362_p2)   ;;  %v3509_v22 = vld [vmem:[%s4332_s3 + $0x38] sm:$0xff] (!%p362_p2)   ;;  %3155 = vmatprep.mubr.msk.bf16.mxu0 (!%p362_p2), %vm3641_vm1, %v3640_v4  ;;  %3175 = vmatprep.mubr.msk.bf16.mxu1 (!%p362_p2), %vm3641_vm1, %v3640_v4  ;;  %v2677_v28 = vld [vmem:[%s4330_s1] ss:$0 sm:$0xff] (!%p362_p2)  ;;  %vm2571_vm8 = vcmask (!%p362_p2), 523264  }
   0xa   : > { %v3508_v21 = vld [vmem:[%s4332_s3 + $0x130] sm:$0xff] (!%p362_p2)   ;;  %v3510_v23 = vld [vmem:[%s4332_s3 + $0x138] sm:$0xff] (!%p362_p2)   ;;  %v2678_v30 = vld [vmem:[%s4331_s2] ss:$0 sm:$0xff] (!%p362_p2) }
   0xb   : > { %3142 = vmatpush3.bf16.msra.mxu0 (!%p362_p2), %v3497_v5  ;;  %3162 = vmatpush3.bf16.msra.mxu1 (!%p362_p2), %v3498_v6  ;;  %v3511_v33 = vld [vmem:[%s4332_s3 + $0x200] sm:$0xff] (!%p362_p2)   ;;  %v3512_v35 = vld [vmem:[%s4332_s3 + $0x208] sm:$0xff] (!%p362_p2)   ;;  %v3513_v36 = vld [vmem:[%s4332_s3 + $0x210] sm:$0xff] (!%p362_p2)  }
   0xc   : > { %3143 = vmatprep.subr.bf16.mxu0 (!%p362_p2), %v3640_v4  ;;  %3163 = vmatprep.subr.bf16.mxu1 (!%p362_p2), %v3640_v4  ;;  %v3514_v37 = vld [vmem:[%s4332_s3 + $0x218] sm:$0xff] (!%p362_p2)   ;;  %v3515_v38 = vld [vmem:[%s4332_s3 + $0x220] sm:$0xff] (!%p362_p2)   ;;  %v3516_v39 = vld [vmem:[%s4332_s3 + $0x228] sm:$0xff] (!%p362_p2)  }
   0xd   : > { %s4343_s22 = smov (!%p401_p3, %s2670_s22), 3  ;;  %v3517_v40 = vld [vmem:[%s4332_s3 + $0x230] sm:$0xff]   ;;  %v3518_v41 = vld [vmem:[%s4332_s3 + $0x238] sm:$0xff]   ;;  %v3519_v42 = vld [vmem:[%s4332_s3 + $0x140] sm:$0xff]  }
   0xe   : > { %s2675_s23 = sshll.u32 %s4343_s22, 3  ;;  %v3520_v43 = vld [vmem:[%s4332_s3 + $0x148] sm:$0xff]   ;;  %v3521_v44 = vld [vmem:[%s4332_s3 + $0x150] sm:$0xff]   ;;  %v3522_v45 = vld [vmem:[%s4332_s3 + $0x158] sm:$0xff]  }
   0xf   : > { %s3725_s26 = scalar_lea.vmem %s4329_s0, %s2675_s23  ;;  %3144 = vmatpush3.bf16.msra.mxu0 %v3499_v7  ;;  %3164 = vmatpush3.bf16.msra.mxu1 %v3500_v13  ;;  %v3523_v46 = vld [vmem:[%s4332_s3 + $0x160] sm:$0xff]   ;;  %v3524_v47 = vld [vmem:[%s4332_s3 + $0x168] sm:$0xff]   ;;  %v3525_v48 = vld [vmem:[%s4332_s3 + $0x170] sm:$0xff]  }
  0x10   : > { %v410_v0 = vld [vmem:[%s3725_s26] sm:$0x1f]  ;;  %3145 = vmatprep.subr.bf16.mxu0 %v3640_v4  ;;  %3165 = vmatprep.subr.bf16.mxu1 %v3640_v4  ;;  %v3526_v49 = vld [vmem:[%s4332_s3 + $0x178] sm:$0xff]   ;;  %v3549_v61 = vld [vmem:[%s4332_s3 + $0x1a8] sm:$0xff]  }
  0x11   : > { %v414_v1 = vsel %vm413_vm0, %v410_v0, 0.0 }
  0x12   : > { %415 = vadd.xlane.f32.xlu0 %v414_v1 }
  0x13   : > { %3146 = vmatpush3.bf16.msra.mxu0 %v3501_v14  ;;  %3166 = vmatpush3.bf16.msra.mxu1 %v3502_v15 }
  0x14   : > { %3147 = vmatprep.subr.bf16.mxu0 %v3640_v4  ;;  %3167 = vmatprep.subr.bf16.mxu1 %v3640_v4 }
  0x17   : > { %3148 = vmatpush3.bf16.msra.mxu0 %v3503_v16  ;;  %3168 = vmatpush3.bf16.msra.mxu1 %v3504_v17 }
  0x18   : > { %3149 = vmatprep.subr.bf16.mxu0 %v3640_v4  ;;  %3169 = vmatprep.subr.bf16.mxu1 %v3640_v4 }
  0x1b   : > { %3150 = vmatpush3.bf16.msra.mxu0 %v3505_v18  ;;  %3170 = vmatpush3.bf16.msra.mxu1 %v3506_v19 }
  0x1c   : > { %3151 = vmatprep.subr.bf16.mxu0 %v3640_v4  ;;  %3171 = vmatprep.subr.bf16.mxu1 %v3640_v4 }
  0x1f   : > { %3152 = vmatpush3.bf16.msra.mxu0 %v3507_v20  ;;  %3172 = vmatpush3.bf16.msra.mxu1 %v3508_v21 }
  0x20   : > { %3153 = vmatprep.subr.bf16.mxu0 %v3640_v4  ;;  %3173 = vmatprep.subr.bf16.mxu1 %v3640_v4 }
  0x23   : > { %3154 = vmatpush3.bf16.msra.mxu0 %v3509_v22  ;;  %3174 = vmatpush3.bf16.msra.mxu1 %v3510_v23 }
  0x24   : > { %3179 = vmatprep.subr.bf16.mxu0 %v3640_v4  ;;  %3199 = vmatprep.subr.bf16.mxu1 %v3640_v4 }
  0x9f   : > { %v416_v8 = vpop.xlane.xlu0 %415 }
  0xa0   : > { %v418_v9 = vmul.f32 0.0078125, %v416_v8 }
  0xa2   : > { %v419_v10 = vsub.f32 %v410_v0, %v418_v9  ;;  %v3889_v0 = vsel %vm826_vm4, %v827_v62, 0 }
  0xa4   : > { %v420_v11 = vmul.f32 %v419_v10, %v419_v10 }
  0xa6   : > { %v421_v12 = vsel %vm413_vm0, %v420_v11, 0.0 }
  0xa7   : > { %422 = vadd.xlane.f32.xlu0 %v421_v12 }
 0x134   : > { %v423_v24 = vpop.xlane.xlu0 %422 }
 0x135   : > { %v424_v25 = vmul.f32 0.0078125, %v423_v24 }
 0x137   : > { %v425_v26 = vadd.f32 1e-05, %v424_v25  ;;  %v3527_v25 = vld [vmem:[%s4332_s3 + $0x40] sm:$0xff]  }
 0x139   : > { %3607 = vrsqrt.f32 %v425_v26 }
 0x143   : > { %v3608_v27 = vpop.eup %3607 }
 0x144   : > { %v427_v29 = vmul.f32 %v3608_v27, %v419_v10  ;;  %v3528_v27 = vld [vmem:[%s4332_s3 + $0x48] sm:$0xff]  }
 0x146   : > { %v434_v31 = vmul.f32 %v2677_v28, %v427_v29  ;;  %v3529_v28 = vld [vmem:[%s4332_s3 + $0x50] sm:$0xff]   ;;  %v3530_v29 = vld [vmem:[%s4332_s3 + $0x58] sm:$0xff]  }
 0x148   : > { %v441_v32 = vadd.f32 %v2678_v30, %v434_v31  ;;  %v3531_v30 = vld [vmem:[%s4332_s3 + $0x60] sm:$0xff]   ;;  %v3532_v31 = vld [vmem:[%s4332_s3 + $0x68] sm:$0xff]  }
 0x14a   : > { %v3809_v34 = vpack.c.bf16 %v441_v32, %v441_v32  ;;  %v3533_v32 = vld [vmem:[%s4332_s3 + $0x70] sm:$0xff]  }
 0x14c   : > { %3156 = vmatmul.mubr.bf16.vlgmr.msra.gmra.mrb[0].mxu0 %v3809_v34  ;;  %3176 = vmatmul.mubr.bf16.vlgmr.msra.gmra.mrb[0].mxu1 %v3809_v34 }
 0x14d   : > { %3180 = vmatpush3.bf16.msra.mxu0 %v3511_v33  ;;  %3195 = vmatprep.mubr.msk.bf16.mxu0 %vm3641_vm1, %v3640_v4  ;;  %v3534_v33 = vld [vmem:[%s4332_s3 + $0x78] sm:$0xff]  }
 0x14e   : > { %3181 = vmatprep.subr.bf16.mxu0 %v3640_v4  ;;  %3201 = vmatprep.mubr.msk.bf16.mxu1 %vm3641_vm1, %v3640_v4 }
 0x151   : > { %3182 = vmatpush3.bf16.msra.mxu0 %v3512_v35  ;;  %v3535_v35 = vld [vmem:[%s4332_s3 + $0x240] sm:$0xff]  }
 0x152   : > { %3183 = vmatprep.subr.bf16.mxu0 %v3640_v4 }
 0x155   : > { %3184 = vmatpush3.bf16.msra.mxu0 %v3513_v36  ;;  %v3536_v36 = vld [vmem:[%s4332_s3 + $0x248] sm:$0xff]  }
 0x156   : > { %3185 = vmatprep.subr.bf16.mxu0 %v3640_v4 }
 0x159   : > { %3186 = vmatpush3.bf16.msra.mxu0 %v3514_v37  ;;  %v3537_v37 = vld [vmem:[%s4332_s3 + $0x250] sm:$0xff]  }
 0x15a   : > { %3187 = vmatprep.subr.bf16.mxu0 %v3640_v4 }
 0x15d   : > { %3188 = vmatpush3.bf16.msra.mxu0 %v3515_v38  ;;  %v3538_v38 = vld [vmem:[%s4332_s3 + $0x258] sm:$0xff]  }
 0x15e   : > { %3189 = vmatprep.subr.bf16.mxu0 %v3640_v4 }
 0x161   : > { %3190 = vmatpush3.bf16.msra.mxu0 %v3516_v39  ;;  %v3539_v39 = vld [vmem:[%s4332_s3 + $0x260] sm:$0xff]  }
 0x162   : > { %3191 = vmatprep.subr.bf16.mxu0 %v3640_v4 }
 0x165   : > { %3192 = vmatpush3.bf16.msra.mxu0 %v3517_v40  ;;  %v3540_v40 = vld [vmem:[%s4332_s3 + $0x268] sm:$0xff]  }
 0x166   : > { %3193 = vmatprep.subr.bf16.mxu0 %v3640_v4 }
 0x169   : > { %3194 = vmatpush3.bf16.msra.mxu0 %v3518_v41  ;;  %v3541_v41 = vld [vmem:[%s4332_s3 + $0x270] sm:$0xff]  }
 0x16a   : > { %3231 = vmatprep.subr.bf16.mxu0 %v3640_v4 }
 0x16c   : > { %3196 = vmatmul.mubr.bf16.vlgmr.msra.gmra.mrb[4].mxu0 %v3809_v34 }
 0x16d   : > { %3232 = vmatpush3.bf16.msra.mxu0 %v3519_v42  ;;  %3247 = vmatprep.mubr.msk.bf16.mxu0 %vm3641_vm1, %v3640_v4  ;;  %v3542_v42 = vld [vmem:[%s4332_s3 + $0x278] sm:$0xff]  }
 0x16e   : > { %3233 = vmatprep.subr.bf16.mxu0 %v3640_v4 }
 0x171   : > { %3234 = vmatpush3.bf16.msra.mxu0 %v3520_v43 }
 0x172   : > { %3235 = vmatprep.subr.bf16.mxu0 %v3640_v4 }
 0x175   : > { %3236 = vmatpush3.bf16.msra.mxu0 %v3521_v44 }
 0x176   : > { %3237 = vmatprep.subr.bf16.mxu0 %v3640_v4 }
 0x179   : > { %3238 = vmatpush3.bf16.msra.mxu0 %v3522_v45 }
 0x17a   : > { %3239 = vmatprep.subr.bf16.mxu0 %v3640_v4 }
 0x17d   : > { %3240 = vmatpush3.bf16.msra.mxu0 %v3523_v46 }
 0x17e   : > { %3241 = vmatprep.subr.bf16.mxu0 %v3640_v4 }
 0x181   : > { %3242 = vmatpush3.bf16.msra.mxu0 %v3524_v47 }
 0x182   : > { %3243 = vmatprep.subr.bf16.mxu0 %v3640_v4 }
 0x185   : > { %3244 = vmatpush3.bf16.msra.mxu0 %v3525_v48 }
 0x186   : > { %3245 = vmatprep.subr.bf16.mxu0 %v3640_v4 }
 0x189   : > { %3246 = vmatpush3.bf16.msra.mxu0 %v3526_v49 }
 0x18a   : > { %3277 = vmatprep.subr.bf16.mxu0 %v3640_v4 }
 0x18c   : > { %3248 = vmatmul.mubr.bf16.vlgmr.msra.gmra.mrb[8].mxu0 %v3809_v34 }
 0x18d   : > { %3279 = vmatprep.mubr.msk.bf16.mxu0 %vm3641_vm1, %v3640_v4 }
 0x21f   : > { %v541_v50 = vpop.f32.mrb[0].mxu0  ;;  %v646_v51 = vpop.f32.mrb[0].mxu1 }
 0x220   : > { %v758_v52 = vpack.c.bf16 %v646_v51, %v646_v51  ;;  %v3157_v53 = vpop.f32.mrb[1].mxu0  ;;  %v3177_v54 = vpop.f32.mrb[1].mxu1  ;;  %v757_v60 = vpack.c.bf16 %v541_v50, %v541_v50  ;;  %v3543_v50 = vld [vmem:[%s4333_s4] sm:$0xff]  }
 0x221   : > { %v544_v55 = vpop.f32.mrb[2].mxu0  ;;  %v649_v56 = vpop.f32.mrb[2].mxu1 }
 0x222   : > { %v764_v57 = vsel %vm759_vm2, %v758_v52, 0  ;;  %v3158_v58 = vpop.f32.mrb[3].mxu0  ;;  %v3178_v59 = vpop.f32.mrb[3].mxu1  ;;  %v3544_v55 = vld [vmem:[%s4332_s3 + $0x180] sm:$0xff]  }
 0x223   : > { %3200 = vmatpush3.bf16.xpose.msra.mxu1 %v764_v57  ;;  %v3545_v57 = vld [vmem:[%s4332_s3 + $0x188] sm:$0xff]   ;;  %v3546_v58 = vld [vmem:[%s4332_s3 + $0x190] sm:$0xff]   ;;  %v3547_v59 = vld [vmem:[%s4332_s3 + $0x198] sm:$0xff]  }
 0x224   : > { %3205 = vmatprep.subr.bf16.mxu1 %v3640_v4 }
 0x22a   : > { %3202 = vmatmul.mubr.msk.bf16.vlgmr.msra.gmra.mrb[4].mxu1 %vm759_vm2, %v757_v60  ;;  %v3548_v60 = vld [vmem:[%s4332_s3 + $0x1a0] sm:$0xff]  }
 0x22b   : > { %3207 = vmatprep.mubr.msk.bf16.mxu1 %vm3641_vm1, %v3640_v4 }
 0x23f   : > { %v751_v63 = vpop.f32.mrb[4].mxu0 }
 0x240   : > { %v820_v1 = vpack.c.bf16 %v751_v63, %v751_v63  ;;  %v3197_v2 = vpop.f32.mrb[5].mxu0  ;;  %v3550_v63 = vld [vmem:[%s4332_s3 + $0x1b0] sm:$0xff]  }
 0x241   : > { %v754_v3 = vpop.f32.mrb[6].mxu0 }
 0x242   : > { %v830_v5 = vand.u32 %v3889_v0, %v820_v1  ;;  %v3198_v6 = vpop.f32.mrb[7].mxu0 }
 0x244   : > { %3206 = vmatpush3.bf16.msra.mxu1 %v830_v5 }
 0x245   : > { %3211 = vmatprep.subr.bf16.mxu1 %v3640_v4 }
 0x25f   : > { %v3893_v7 = vpop.f32.mrb[8].mxu0 }
 0x260   : > { %v3249_v8 = vpop.f32.mrb[9].mxu0  ;;  %v1191_v43 = vpack.c.bf16 %v3893_v7, %v3893_v7  ;;  %v3551_v7 = vld [vmem:[%s4332_s3 + $0x1b8] sm:$0xff]  }
 0x261   : > { %v1082_v9 = vpop.f32.mrb[10].mxu0 }
 0x262   : > { %v3250_v10 = vpop.f32.mrb[11].mxu0  ;;  %v1196_v44 = vsel %vm759_vm2, %v1191_v43, 0  ;;  %v3556_v43 = vld [vmem:[%s4332_s3 + $0x98] sm:$0xff]  }
 0x2fd   : > { %v800_v11 = vpop.f32.mrb[4].mxu1 }
 0x2fe   : > { %v806_v12 = vmul.f32 0.25, %v800_v11  ;;  %v3203_v13 = vpop.f32.mrb[5].mxu1 }
 0x2ff   : > { %v803_v14 = vpop.f32.mrb[6].mxu1 }
 0x300   : > { %v3204_v15 = vpop.f32.mrb[7].mxu1  ;;  %v808_v16 = vsel %vm807_vm5, %v806_v12, -inf }
 0x301   : > { %809 = vmax.xlane.f32.xlu1 %v808_v16 }
 0x38e   : > { %v810_v17 = vpop.xlane.xlu1 %809 }
 0x38f   : > { %v811_v18 = vsub.f32 %v806_v12, %v810_v17 }
 0x391   : > { %v812_v19 = vmul.f32 1.442695, %v811_v18 }
 0x393   : > { %3609 = vpow2.f32 %v812_v19 }
 0x39d   : > { %v3610_v20 = vpop.eup %3609 }
 0x39e   : > { %v814_v21 = vsel %vm807_vm5, %v3610_v20, 0.0 }
 0x39f   : > { %815 = vadd.xlane.f32.xlu1 %v814_v21 }
 0x42c   : > { %v816_v22 = vpop.xlane.xlu1 %815 }
 0x42d   : > { %3611 = vrcp.f32 %v816_v22 }
 0x437   : > { %v3612_v23 = vpop.eup %3611 }
 0x438   : > { %v818_v24 = vmul.f32 %v3612_v23, %v3610_v20 }
 0x43a   : > { %v819_v26 = vpack.c.bf16 %v818_v24, %v818_v24 }
 0x43c   : > { %3208 = vmatmul.mubr.msk.bf16.vlgmr.msra.gmra.mrb[8].mxu1 %vm821_vm6, %v819_v26 }
 0x43d   : > { %3212 = vmatpush3.bf16.msra.mxu1 %v3527_v25  ;;  %3227 = vmatprep.mubr.msk.bf16.mxu1 %vm3641_vm1, %v3640_v4 }
 0x43e   : > { %3213 = vmatprep.subr.bf16.mxu1 %v3640_v4 }
 0x441   : > { %3214 = vmatpush3.bf16.msra.mxu1 %v3528_v27 }
 0x442   : > { %3215 = vmatprep.subr.bf16.mxu1 %v3640_v4 }
 0x445   : > { %3216 = vmatpush3.bf16.msra.mxu1 %v3529_v28 }
 0x446   : > { %3217 = vmatprep.subr.bf16.mxu1 %v3640_v4 }
 0x449   : > { %3218 = vmatpush3.bf16.msra.mxu1 %v3530_v29 }
 0x44a   : > { %3219 = vmatprep.subr.bf16.mxu1 %v3640_v4 }
 0x44d   : > { %3220 = vmatpush3.bf16.msra.mxu1 %v3531_v30 }
 0x44e   : > { %3221 = vmatprep.subr.bf16.mxu1 %v3640_v4 }
 0x451   : > { %3222 = vmatpush3.bf16.msra.mxu1 %v3532_v31 }
 0x452   : > { %3223 = vmatprep.subr.bf16.mxu1 %v3640_v4 }
 0x455   : > { %3224 = vmatpush3.bf16.msra.mxu1 %v3533_v32  ;;  %v3552_v32 = vld [vmem:[%s4333_s4 + $0x8] sm:$0xff]  }
 0x456   : > { %3225 = vmatprep.subr.bf16.mxu1 %v3640_v4 }
 0x459   : > { %3226 = vmatpush3.bf16.msra.mxu1 %v3534_v33 }
 0x45a   : > { %3251 = vmatprep.subr.bf16.mxu1 %v3640_v4 }
 0x45c   : > { %3228 = vmatmul.mubr.bf16.vlgmr.msra.gmra.mrb[12].mxu1 %v3809_v34 }
 0x45d   : > { %3252 = vmatpush3.bf16.msra.mxu1 %v3535_v35  ;;  %3267 = vmatprep.mubr.msk.bf16.mxu1 %vm3641_vm1, %v3640_v4 }
 0x45e   : > { %3253 = vmatprep.subr.bf16.mxu1 %v3640_v4 }
 0x461   : > { %3254 = vmatpush3.bf16.msra.mxu1 %v3536_v36  ;;  %v3553_v36 = vld [vmem:[%s4332_s3 + $0x80] sm:$0xff]  }
 0x462   : > { %3255 = vmatprep.subr.bf16.mxu1 %v3640_v4 }
 0x465   : > { %3256 = vmatpush3.bf16.msra.mxu1 %v3537_v37 }
 0x466   : > { %3257 = vmatprep.subr.bf16.mxu1 %v3640_v4 }
 0x469   : > { %3258 = vmatpush3.bf16.msra.mxu1 %v3538_v38 }
 0x46a   : > { %3259 = vmatprep.subr.bf16.mxu1 %v3640_v4 }
 0x46d   : > { %3260 = vmatpush3.bf16.msra.mxu1 %v3539_v39 }
 0x46e   : > { %3261 = vmatprep.subr.bf16.mxu1 %v3640_v4 }
 0x471   : > { %3262 = vmatpush3.bf16.msra.mxu1 %v3540_v40 }
 0x472   : > { %3263 = vmatprep.subr.bf16.mxu1 %v3640_v4 }
 0x475   : > { %3264 = vmatpush3.bf16.msra.mxu1 %v3541_v41  ;;  %v3554_v41 = vld [vmem:[%s4332_s3 + $0x88] sm:$0xff]  }
 0x476   : > { %3265 = vmatprep.subr.bf16.mxu1 %v3640_v4 }
 0x479   : > { %3266 = vmatpush3.bf16.msra.mxu1 %v3542_v42  ;;  %v3555_v42 = vld [vmem:[%s4332_s3 + $0x90] sm:$0xff]  }
 0x47a   : > { %3271 = vmatprep.subr.bf16.mxu1 %v3640_v4 }
 0x47c   : > { %3268 = vmatmul.mubr.bf16.vlgmr.msra.gmra.mrb[16].mxu1 %v3809_v34 }
 0x47d   : > { %3273 = vmatprep.mubr.msk.bf16.mxu1 %vm3641_vm1, %v3640_v4 }
 0x482   : > { %3272 = vmatpush3.bf16.xpose.msra.mxu1 %v1196_v44  ;;  %v3557_v44 = vld [vmem:[%s4332_s3 + $0xa0] sm:$0xff]  }
 0x483   : > { %3289 = vmatprep.subr.bf16.mxu1 %v3640_v4 }
 0x50f   : > { %v866_v45 = vpop.f32.mrb[8].mxu1 }
 0x510   : > { %v3209_v46 = vpop.f32.mrb[9].mxu1  ;;  %v872_v56 = vpack.c.bf16 %v866_v45, %v866_v45  ;;  %v3558_v45 = vld [vmem:[%s4332_s3 + $0xa8] sm:$0xff]  }
 0x511   : > { %v869_v47 = vpop.f32.mrb[10].mxu1  ;;  %v3559_v46 = vld [vmem:[%s4332_s3 + $0xb0] sm:$0xff]  }
 0x512   : > { %v3210_v48 = vpop.f32.mrb[11].mxu1  ;;  %v3560_v47 = vld [vmem:[%s4332_s3 + $0xb8] sm:$0xff]  }
 0x513   : > { %v3561_v48 = vld [vmem:[%s4332_s3 + $0x280] sm:$0xff]  }
 0x52f   : > { %v974_v49 = vpop.f32.mrb[12].mxu1 }
 0x530   : > { %v1190_v51 = vpack.c.bf16 %v974_v49, %v974_v49  ;;  %v3229_v52 = vpop.f32.mrb[13].mxu1  ;;  %v3562_v49 = vld [vmem:[%s4332_s3 + $0x288] sm:$0xff]  }
 0x531   : > { %v977_v53 = vpop.f32.mrb[14].mxu1  ;;  %v3565_v52 = vld [vmem:[%s4332_s3 + $0x2a0] sm:$0xff]  }
 0x532   : > { %v3230_v54 = vpop.f32.mrb[15].mxu1  ;;  %3274 = vmatmul.mubr.msk.bf16.vlgmr.msra.gmra.mrb[20].mxu1 %vm759_vm2, %v1190_v51  ;;  %v3564_v51 = vld [vmem:[%s4332_s3 + $0x298] sm:$0xff]   ;;  %v3566_v53 = vld [vmem:[%s4332_s3 + $0x2a8] sm:$0xff]  }
 0x533   : > { %3290 = vmatpush3.bf16.msra.mxu1 %v3543_v50  ;;  %3291 = vmatprep.mubr.msk.bf16.mxu1 %vm3641_vm1, %v3640_v4  ;;  %v3563_v50 = vld [vmem:[%s4332_s3 + $0x290] sm:$0xff]  }
 0x534   : > { %3315 = vmatprep.subr.bf16.mxu1 %v3640_v4  ;;  %v3567_v54 = vld [vmem:[%s4332_s3 + $0x2b0] sm:$0xff]  }
 0x53a   : > { %3292 = vmatmul.mubr.msk.bf16.vlgmr.msra.gmra.mrb[24].mxu1 %vm759_vm2, %v872_v56  ;;  %v3569_v56 = vld [vmem:[%s4332_s3 + $0x1c0] sm:$0xff]  }
 0x53b   : > { %3316 = vmatpush3.bf16.msra.mxu1 %v3544_v55  ;;  %3331 = vmatprep.mubr.msk.bf16.mxu1 %vm3641_vm1, %v3640_v4  ;;  %v3568_v55 = vld [vmem:[%s4332_s3 + $0x2b8] sm:$0xff]  }
 0x53c   : > { %3317 = vmatprep.subr.bf16.mxu1 %v3640_v4 }
 0x53f   : > { %3318 = vmatpush3.bf16.msra.mxu1 %v3545_v57  ;;  %v3570_v57 = vld [vmem:[%s4332_s3 + $0x1c8] sm:$0xff]  }
 0x540   : > { %3319 = vmatprep.subr.bf16.mxu1 %v3640_v4 }
 0x543   : > { %3320 = vmatpush3.bf16.msra.mxu1 %v3546_v58  ;;  %v3571_v58 = vld [vmem:[%s4332_s3 + $0x1d0] sm:$0xff]  }
 0x544   : > { %3321 = vmatprep.subr.bf16.mxu1 %v3640_v4 }
 0x547   : > { %3322 = vmatpush3.bf16.msra.mxu1 %v3547_v59  ;;  %v3572_v59 = vld [vmem:[%s4332_s3 + $0x1d8] sm:$0xff]  }
 0x548   : > { %3323 = vmatprep.subr.bf16.mxu1 %v3640_v4 }
 0x54b   : > { %3324 = vmatpush3.bf16.msra.mxu1 %v3548_v60  ;;  %v3573_v60 = vld [vmem:[%s4332_s3 + $0x1e0] sm:$0xff]  }
 0x54c   : > { %3325 = vmatprep.subr.bf16.mxu1 %v3640_v4 }
 0x54f   : > { %3326 = vmatpush3.bf16.msra.mxu1 %v3549_v61  ;;  %v1184_v62 = vpop.f32.mrb[16].mxu1  ;;  %v3574_v61 = vld [vmem:[%s4332_s3 + $0x1e8] sm:$0xff]  }
 0x550   : > { %v1251_v1 = vpack.c.bf16 %v1184_v62, %v1184_v62  ;;  %v3269_v2 = vpop.f32.mrb[17].mxu1  ;;  %3327 = vmatprep.subr.bf16.mxu1 %v3640_v4  ;;  %v3575_v62 = vld [vmem:[%s4332_s3 + $0x1f0] sm:$0xff]  }
 0x551   : > { %v1187_v3 = vpop.f32.mrb[18].mxu1 }
 0x552   : > { %v1256_v5 = vand.u32 %v1251_v1, %v3889_v0  ;;  %v3270_v6 = vpop.f32.mrb[19].mxu1 }
 0x553   : > { %3328 = vmatpush3.bf16.msra.mxu1 %v3550_v63  ;;  %v3576_v63 = vld [vmem:[%s4332_s3 + $0x1f8] sm:$0xff]  }
 0x554   : > { %3278 = vmatpush3.bf16.msra.mxu0 %v1256_v5  ;;  %3329 = vmatprep.subr.bf16.mxu1 %v3640_v4 }
 0x555   : > { %3283 = vmatprep.subr.bf16.mxu0 %v3640_v4 }
 0x557   : > { %3330 = vmatpush3.bf16.msra.mxu1 %v3551_v7 }
 0x558   : > { %3355 = vmatprep.subr.bf16.mxu1 %v3640_v4 }
 0x55a   : > { %3332 = vmatmul.mubr.bf16.vlgmr.msra.gmra.mrb[28].mxu1 %v3809_v34 }
 0x55b   : > { %3357 = vmatprep.mubr.msk.bf16.mxu1 %vm3641_vm1, %v3640_v4 }
 0x605   : > { %v1232_v8 = vpop.f32.mrb[20].mxu1 }
 0x606   : > { %v1238_v9 = vmul.f32 0.25, %v1232_v8  ;;  %v3275_v10 = vpop.f32.mrb[21].mxu1 }
 0x607   : > { %v1235_v11 = vpop.f32.mrb[22].mxu1 }
 0x608   : > { %v3276_v12 = vpop.f32.mrb[23].mxu1  ;;  %v1239_v13 = vsel %vm807_vm5, %v1238_v9, -inf }
 0x609   : > { %1240 = vmax.xlane.f32.xlu0 %v1239_v13 }
 0x60d   : > { %v4022_v14 = vpop.f32.mrb[24].mxu1 }
 0x60e   : > { %v3293_v15 = vpop.f32.mrb[25].mxu1 }
 0x60f   : > { %v1397_v16 = vpop.f32.mrb[26].mxu1 }
 0x610   : > { %v3294_v17 = vpop.f32.mrb[27].mxu1 }
 0x62d   : > { %v1604_v18 = vpop.f32.mrb[28].mxu1 }
 0x62e   : > { %v1716_v19 = vpack.c.bf16 %v1604_v18, %v1604_v18  ;;  %v3333_v20 = vpop.f32.mrb[29].mxu1 }
 0x62f   : > { %v1607_v21 = vpop.f32.mrb[30].mxu1 }
 0x630   : > { %v1721_v22 = vsel %vm759_vm2, %v1716_v19, 0  ;;  %v3334_v23 = vpop.f32.mrb[31].mxu1 }
 0x631   : > { %3356 = vmatpush3.bf16.xpose.msra.mxu1 %v1721_v22 }
 0x632   : > { %3361 = vmatprep.subr.bf16.mxu1 %v3640_v4 }
 0x696   : > { %v1241_v24 = vpop.xlane.xlu0 %1240 }
 0x697   : > { %v1242_v25 = vsub.f32 %v1238_v9, %v1241_v24 }
 0x699   : > { %v1243_v26 = vmul.f32 1.442695, %v1242_v25 }
 0x69b   : > { %3613 = vpow2.f32 %v1243_v26 }
 0x6a5   : > { %v3614_v27 = vpop.eup %3613 }
 0x6a6   : > { %v1245_v28 = vsel %vm807_vm5, %v3614_v27, 0.0 }
 0x6a7   : > { %1246 = vadd.xlane.f32.xlu1 %v1245_v28 }
 0x734   : > { %v1247_v29 = vpop.xlane.xlu1 %1246 }
 0x735   : > { %3615 = vrcp.f32 %v1247_v29 }
 0x73f   : > { %v3616_v30 = vpop.eup %3615 }
 0x740   : > { %v1249_v31 = vmul.f32 %v3616_v30, %v3614_v27 }
 0x742   : > { %v1250_v33 = vpack.c.bf16 %v1249_v31, %v1249_v31 }
 0x744   : > { %3280 = vmatmul.mubr.msk.bf16.vlgmr.msra.gmra.mrb[12].mxu0 %vm821_vm6, %v1250_v33 }
 0x745   : > { %3284 = vmatpush3.bf16.msra.mxu0 %v3552_v32  ;;  %3285 = vmatprep.mubr.msk.bf16.mxu0 %vm3641_vm1, %v3640_v4 }
 0x746   : > { %3295 = vmatprep.subr.bf16.mxu0 %v3640_v4 }
 0x817   : > { %v1292_v35 = vpop.f32.mrb[12].mxu0 }
 0x818   : > { %v1298_v37 = vpack.c.bf16 %v1292_v35, %v1292_v35  ;;  %v3281_v38 = vpop.f32.mrb[13].mxu0 }
 0x819   : > { %v1295_v39 = vpop.f32.mrb[14].mxu0 }
 0x81a   : > { %v3282_v40 = vpop.f32.mrb[15].mxu0  ;;  %3286 = vmatmul.mubr.msk.bf16.vlgmr.msra.gmra.mrb[16].mxu0 %vm759_vm2, %v1298_v37  ;;  %v3577_v39 = vld [vmem:[%s4333_s4 + $0x10] sm:$0xff]  }
 0x81b   : > { %3296 = vmatpush3.bf16.msra.mxu0 %v3553_v36  ;;  %3311 = vmatprep.mubr.msk.bf16.mxu0 %vm3641_vm1, %v3640_v4 }
 0x81c   : > { %3297 = vmatprep.subr.bf16.mxu0 %v3640_v4 }
 0x81f   : > { %3298 = vmatpush3.bf16.msra.mxu0 %v3554_v41 }
 0x820   : > { %3299 = vmatprep.subr.bf16.mxu0 %v3640_v4 }
 0x823   : > { %3300 = vmatpush3.bf16.msra.mxu0 %v3555_v42  ;;  %v3578_v42 = vld [vmem:[%s4332_s3 + $0xc0] sm:$0xff]  }
 0x824   : > { %3301 = vmatprep.subr.bf16.mxu0 %v3640_v4 }
 0x827   : > { %3302 = vmatpush3.bf16.msra.mxu0 %v3556_v43 }
 0x828   : > { %3303 = vmatprep.subr.bf16.mxu0 %v3640_v4 }
 0x82b   : > { %3304 = vmatpush3.bf16.msra.mxu0 %v3557_v44 }
 0x82c   : > { %3305 = vmatprep.subr.bf16.mxu0 %v3640_v4 }
 0x82f   : > { %3306 = vmatpush3.bf16.msra.mxu0 %v3558_v45 }
 0x830   : > { %3307 = vmatprep.subr.bf16.mxu0 %v3640_v4 }
 0x833   : > { %3308 = vmatpush3.bf16.msra.mxu0 %v3559_v46 }
 0x834   : > { %3309 = vmatprep.subr.bf16.mxu0 %v3640_v4 }
 0x837   : > { %3310 = vmatpush3.bf16.msra.mxu0 %v3560_v47  ;;  %v3579_v47 = vld [vmem:[%s4332_s3 + $0xc8] sm:$0xff]  }
 0x838   : > { %3335 = vmatprep.subr.bf16.mxu0 %v3640_v4 }
 0x83a   : > { %3312 = vmatmul.mubr.bf16.vlgmr.msra.gmra.mrb[20].mxu0 %v3809_v34 }
 0x83b   : > { %3336 = vmatpush3.bf16.msra.mxu0 %v3561_v48  ;;  %3351 = vmatprep.mubr.msk.bf16.mxu0 %vm3641_vm1, %v3640_v4  ;;  %v3580_v48 = vld [vmem:[%s4332_s3 + $0xd0] sm:$0xff]  }
 0x83c   : > { %3337 = vmatprep.subr.bf16.mxu0 %v3640_v4 }
 0x83f   : > { %3338 = vmatpush3.bf16.msra.mxu0 %v3562_v49  ;;  %v3581_v49 = vld [vmem:[%s4332_s3 + $0xd8] sm:$0xff]  }
 0x840   : > { %3339 = vmatprep.subr.bf16.mxu0 %v3640_v4 }
 0x843   : > { %3340 = vmatpush3.bf16.msra.mxu0 %v3563_v50  ;;  %v3582_v50 = vld [vmem:[%s4332_s3 + $0xe0] sm:$0xff]  }
 0x844   : > { %3341 = vmatprep.subr.bf16.mxu0 %v3640_v4 }
 0x847   : > { %3342 = vmatpush3.bf16.msra.mxu0 %v3564_v51  ;;  %v3583_v51 = vld [vmem:[%s4332_s3 + $0xe8] sm:$0xff]  }
 0x848   : > { %3343 = vmatprep.subr.bf16.mxu0 %v3640_v4 }
 0x84b   : > { %3344 = vmatpush3.bf16.msra.mxu0 %v3565_v52  ;;  %v3584_v52 = vld [vmem:[%s4332_s3 + $0xf0] sm:$0xff]  }
 0x84c   : > { %3345 = vmatprep.subr.bf16.mxu0 %v3640_v4 }
 0x84f   : > { %3346 = vmatpush3.bf16.msra.mxu0 %v3566_v53  ;;  %v3585_v53 = vld [vmem:[%s4332_s3 + $0xf8] sm:$0xff]  }
 0x850   : > { %3347 = vmatprep.subr.bf16.mxu0 %v3640_v4 }
 0x853   : > { %3348 = vmatpush3.bf16.msra.mxu0 %v3567_v54  ;;  %v3586_v54 = vld [vmem:[%s4332_s3 + $0x2c0] sm:$0xff]  }
 0x854   : > { %3349 = vmatprep.subr.bf16.mxu0 %v3640_v4 }
 0x857   : > { %3350 = vmatpush3.bf16.msra.mxu0 %v3568_v55  ;;  %v3587_v55 = vld [vmem:[%s4332_s3 + $0x2c8] sm:$0xff]  }
 0x858   : > { %3393 = vmatprep.subr.bf16.mxu0 %v3640_v4 }
 0x85a   : > { %3352 = vmatmul.mubr.bf16.vlgmr.msra.gmra.mrb[24].mxu0 %v3809_v34 }
 0x85b   : > { %3394 = vmatpush3.bf16.msra.mxu0 %v3569_v56  ;;  %3409 = vmatprep.mubr.msk.bf16.mxu0 %vm3641_vm1, %v3640_v4  ;;  %v3588_v56 = vld [vmem:[%s4332_s3 + $0x2d0] sm:$0xff]  }
 0x85c   : > { %3395 = vmatprep.subr.bf16.mxu0 %v3640_v4 }
 0x85f   : > { %3396 = vmatpush3.bf16.msra.mxu0 %v3570_v57  ;;  %v3589_v57 = vld [vmem:[%s4332_s3 + $0x2d8] sm:$0xff]  }
 0x860   : > { %3397 = vmatprep.subr.bf16.mxu0 %v3640_v4 }
 0x863   : > { %3398 = vmatpush3.bf16.msra.mxu0 %v3571_v58  ;;  %v3590_v58 = vld [vmem:[%s4332_s3 + $0x2e0] sm:$0xff]  }
 0x864   : > { %3399 = vmatprep.subr.bf16.mxu0 %v3640_v4 }
 0x867   : > { %3400 = vmatpush3.bf16.msra.mxu0 %v3572_v59  ;;  %v3591_v59 = vld [vmem:[%s4332_s3 + $0x2e8] sm:$0xff]  }
 0x868   : > { %3401 = vmatprep.subr.bf16.mxu0 %v3640_v4 }
 0x86b   : > { %3402 = vmatpush3.bf16.msra.mxu0 %v3573_v60  ;;  %v3592_v60 = vld [vmem:[%s4332_s3 + $0x2f0] sm:$0xff]  }
 0x86c   : > { %3403 = vmatprep.subr.bf16.mxu0 %v3640_v4 }
 0x86f   : > { %3404 = vmatpush3.bf16.msra.mxu0 %v3574_v61  ;;  %v3593_v61 = vld [vmem:[%s4332_s3 + $0x2f8] sm:$0xff]  }
 0x870   : > { %3405 = vmatprep.subr.bf16.mxu0 %v3640_v4 }
 0x873   : > { %3406 = vmatpush3.bf16.msra.mxu0 %v3575_v62 }
 0x874   : > { %3407 = vmatprep.subr.bf16.mxu0 %v3640_v4 }
 0x877   : > { %3408 = vmatpush3.bf16.msra.mxu0 %v3576_v63 }
 0x878   : > { %3433 = vmatprep.subr.bf16.mxu0 %v3640_v4 }
 0x87a   : > { %3410 = vmatmul.mubr.bf16.vlgmr.msra.gmra.mrb[28].mxu0 %v3809_v34 }
 0x87b   : > { %3435 = vmatprep.mubr.msk.bf16.mxu0 %vm3641_vm1, %v3640_v4 }
 0x8ed   : > { %v1345_v1 = vpop.f32.mrb[16].mxu0 }
 0x8ee   : > { %v4143_v2 = vadd.f32 %v4022_v14, %v1345_v1  ;;  %v3287_v3 = vpop.f32.mrb[17].mxu0 }
 0x8ef   : > { %v1348_v5 = vpop.f32.mrb[18].mxu0 }
 0x8f0   : > { %v3288_v6 = vpop.f32.mrb[19].mxu0 }
 0x90d   : > { %v1499_v7 = vpop.f32.mrb[20].mxu0 }
 0x90e   : > { %v1715_v8 = vpack.c.bf16 %v1499_v7, %v1499_v7  ;;  %v3313_v9 = vpop.f32.mrb[21].mxu0 }
 0x90f   : > { %v1502_v10 = vpop.f32.mrb[22].mxu0 }
 0x910   : > { %v3314_v11 = vpop.f32.mrb[23].mxu0  ;;  %3358 = vmatmul.mubr.msk.bf16.vlgmr.msra.gmra.mrb[32].mxu1 %vm759_vm2, %v1715_v8 }
 0x911   : > { %3363 = vmatprep.mubr.msk.bf16.mxu1 %vm3641_vm1, %v3640_v4 }
 0x92d   : > { %v1709_v12 = vpop.f32.mrb[24].mxu0 }
 0x92e   : > { %v1776_v13 = vpack.c.bf16 %v1709_v12, %v1709_v12  ;;  %v3353_v15 = vpop.f32.mrb[25].mxu0 }
 0x92f   : > { %v1712_v16 = vpop.f32.mrb[26].mxu0 }
 0x930   : > { %v1781_v14 = vand.u32 %v1776_v13, %v3889_v0  ;;  %v3354_v17 = vpop.f32.mrb[27].mxu0 }
 0x932   : > { %3362 = vmatpush3.bf16.msra.mxu1 %v1781_v14 }
 0x933   : > { %3367 = vmatprep.subr.bf16.mxu1 %v3640_v4 }
 0x94d   : > { %v2081_v18 = vpop.f32.mrb[28].mxu0 }
 0x94e   : > { %v2193_v19 = vpack.c.bf16 %v2081_v18, %v2081_v18  ;;  %v3411_v20 = vpop.f32.mrb[29].mxu0 }
 0x94f   : > { %v2084_v21 = vpop.f32.mrb[30].mxu0 }
 0x950   : > { %v2198_v22 = vsel %vm759_vm2, %v2193_v19, 0  ;;  %v3412_v23 = vpop.f32.mrb[31].mxu0 }
 0x951   : > { %3434 = vmatpush3.bf16.xpose.msra.mxu0 %v2198_v22 }
 0x952   : > { %3439 = vmatprep.subr.bf16.mxu0 %v3640_v4 }
 0x9e3   : > { %v1757_v24 = vpop.f32.mrb[32].mxu1 }
 0x9e4   : > { %v1763_v25 = vmul.f32 0.25, %v1757_v24  ;;  %v3359_v26 = vpop.f32.mrb[33].mxu1 }
 0x9e5   : > { %v1760_v27 = vpop.f32.mrb[34].mxu1 }
 0x9e6   : > { %v3360_v28 = vpop.f32.mrb[35].mxu1  ;;  %v1764_v29 = vsel %vm807_vm5, %v1763_v25, -inf }
 0x9e7   : > { %1765 = vmax.xlane.f32.xlu0 %v1764_v29  ;;  %v3594_v28 = vld [vmem:[%s4333_s4 + $0x18] sm:$0xff]  }
 0xa74   : > { %v1766_v30 = vpop.xlane.xlu0 %1765 }
 0xa75   : > { %v1767_v31 = vsub.f32 %v1763_v25, %v1766_v30 }
 0xa77   : > { %v1768_v32 = vmul.f32 1.442695, %v1767_v31 }
 0xa79   : > { %3617 = vpow2.f32 %v1768_v32 }
 0xa83   : > { %v3618_v33 = vpop.eup %3617 }
 0xa84   : > { %v1770_v35 = vsel %vm807_vm5, %v3618_v33, 0.0 }
 0xa85   : > { %1771 = vadd.xlane.f32.xlu1 %v1770_v35 }
 0xb12   : > { %v1772_v36 = vpop.xlane.xlu1 %1771 }
 0xb13   : > { %3619 = vrcp.f32 %v1772_v36 }
 0xb1d   : > { %v3620_v37 = vpop.eup %3619 }
 0xb1e   : > { %v1774_v38 = vmul.f32 %v3620_v37, %v3618_v33 }
 0xb20   : > { %v1775_v40 = vpack.c.bf16 %v1774_v38, %v1774_v38 }
 0xb22   : > { %3364 = vmatmul.mubr.msk.bf16.vlgmr.msra.gmra.mrb[36].mxu1 %vm821_vm6, %v1775_v40 }
 0xb23   : > { %3368 = vmatpush3.bf16.msra.mxu1 %v3577_v39  ;;  %3369 = vmatprep.mubr.msk.bf16.mxu1 %vm3641_vm1, %v3640_v4  ;;  %v2973_v39 = vld [vmem:[%s4334_s5] ss:$0 sm:$0xff] }
 0xb24   : > { %3373 = vmatprep.subr.bf16.mxu1 %v3640_v4 }
 0xbf5   : > { %v1817_v41 = vpop.f32.mrb[36].mxu1 }
 0xbf6   : > { %v1823_v43 = vpack.c.bf16 %v1817_v41, %v1817_v41  ;;  %v3365_v44 = vpop.f32.mrb[37].mxu1  ;;  %v3631_v41 = vld [vmem:[%s3725_s26] sm:$0x1f]  ;;  %s408_s26 = scalar_lea.vmem %s4341_s12, %s2675_s23 }
 0xbf7   : > { %v1820_v45 = vpop.f32.mrb[38].mxu1 }
 0xbf8   : > { %v3366_v46 = vpop.f32.mrb[39].mxu1  ;;  %3370 = vmatmul.mubr.msk.bf16.vlgmr.msra.gmra.mrb[40].mxu1 %vm759_vm2, %v1823_v43 }
 0xbf9   : > { %3374 = vmatpush3.bf16.msra.mxu1 %v3578_v42  ;;  %3389 = vmatprep.mubr.msk.bf16.mxu1 %vm3641_vm1, %v3640_v4  ;;  %v3595_v46 = vld [vmem:[%s4337_s8] sm:$0xff]  }
 0xbfa   : > { %3375 = vmatprep.subr.bf16.mxu1 %v3640_v4 }
 0xbfd   : > { %3376 = vmatpush3.bf16.msra.mxu1 %v3579_v47  ;;  %v3596_v47 = vld [vmem:[%s4337_s8 + $0x8] sm:$0xff]  }
 0xbfe   : > { %3377 = vmatprep.subr.bf16.mxu1 %v3640_v4 }
 0xc01   : > { %3378 = vmatpush3.bf16.msra.mxu1 %v3580_v48 }
 0xc02   : > { %3379 = vmatprep.subr.bf16.mxu1 %v3640_v4 }
 0xc05   : > { %3380 = vmatpush3.bf16.msra.mxu1 %v3581_v49 }
 0xc06   : > { %3381 = vmatprep.subr.bf16.mxu1 %v3640_v4 }
 0xc09   : > { %3382 = vmatpush3.bf16.msra.mxu1 %v3582_v50 }
 0xc0a   : > { %3383 = vmatprep.subr.bf16.mxu1 %v3640_v4 }
 0xc0d   : > { %3384 = vmatpush3.bf16.msra.mxu1 %v3583_v51 }
 0xc0e   : > { %3385 = vmatprep.subr.bf16.mxu1 %v3640_v4 }
 0xc11   : > { %3386 = vmatpush3.bf16.msra.mxu1 %v3584_v52 }
 0xc12   : > { %3387 = vmatprep.subr.bf16.mxu1 %v3640_v4 }
 0xc15   : > { %3388 = vmatpush3.bf16.msra.mxu1 %v3585_v53  ;;  %v3597_v53 = vld [vmem:[%s4337_s8 + $0x10] sm:$0xff]  }
 0xc16   : > { %3413 = vmatprep.subr.bf16.mxu1 %v3640_v4 }
 0xc18   : > { %3390 = vmatmul.mubr.bf16.vlgmr.msra.gmra.mrb[44].mxu1 %v3809_v34 }
 0xc19   : > { %3414 = vmatpush3.bf16.msra.mxu1 %v3586_v54  ;;  %3429 = vmatprep.mubr.msk.bf16.mxu1 %vm3641_vm1, %v3640_v4  ;;  %v3598_v54 = vld [vmem:[%s4337_s8 + $0x18] sm:$0xff]  }
 0xc1a   : > { %3415 = vmatprep.subr.bf16.mxu1 %v3640_v4 }
 0xc1d   : > { %3416 = vmatpush3.bf16.msra.mxu1 %v3587_v55  ;;  %v3599_v55 = vld [vmem:[%s4337_s8 + $0x20] sm:$0xff]  }
 0xc1e   : > { %3417 = vmatprep.subr.bf16.mxu1 %v3640_v4 }
 0xc21   : > { %3418 = vmatpush3.bf16.msra.mxu1 %v3588_v56  ;;  %v3600_v56 = vld [vmem:[%s4337_s8 + $0x28] sm:$0xff]  }
 0xc22   : > { %3419 = vmatprep.subr.bf16.mxu1 %v3640_v4 }
 0xc25   : > { %3420 = vmatpush3.bf16.msra.mxu1 %v3589_v57  ;;  %v3601_v57 = vld [vmem:[%s4337_s8 + $0x30] sm:$0xff]  }
 0xc26   : > { %3421 = vmatprep.subr.bf16.mxu1 %v3640_v4 }
 0xc29   : > { %3422 = vmatpush3.bf16.msra.mxu1 %v3590_v58  ;;  %v3602_v58 = vld [vmem:[%s4337_s8 + $0x38] sm:$0xff]  }
 0xc2a   : > { %3423 = vmatprep.subr.bf16.mxu1 %v3640_v4 }
 0xc2d   : > { %3424 = vmatpush3.bf16.msra.mxu1 %v3591_v59 }
 0xc2e   : > { %3425 = vmatprep.subr.bf16.mxu1 %v3640_v4 }
 0xc31   : > { %3426 = vmatpush3.bf16.msra.mxu1 %v3592_v60 }
 0xc32   : > { %3427 = vmatprep.subr.bf16.mxu1 %v3640_v4 }
 0xc35   : > { %3428 = vmatpush3.bf16.msra.mxu1 %v3593_v61 }
 0xc36   : > { %3471 = vmatprep.subr.bf16.mxu1 %v3640_v4 }
 0xc38   : > { %3430 = vmatmul.mubr.bf16.vlgmr.msra.gmra.mrb[48].mxu1 %v3809_v34 }
 0xc39   : > { %3479 = vmatprep.mubr.msk.bf16.mxu1 %vm3641_vm1, %v3640_v4 }
 0xccb   : > { %v1870_v62 = vpop.f32.mrb[40].mxu1 }
 0xccc   : > { %v1876_v63 = vadd.f32 %v1870_v62, %v4143_v2  ;;  %v3371_v1 = vpop.f32.mrb[41].mxu1 }
 0xccd   : > { %v1873_v3 = vpop.f32.mrb[42].mxu1 }
 0xcce   : > { %v3372_v5 = vpop.f32.mrb[43].mxu1  ;;  %v2975_v3 = vld [vmem:[%s4336_s7] ss:$0 sm:$0xff] }
 0xceb   : > { %v1976_v6 = vpop.f32.mrb[44].mxu1 }
 0xcec   : > { %v2192_v7 = vpack.c.bf16 %v1976_v6, %v1976_v6  ;;  %v3391_v8 = vpop.f32.mrb[45].mxu1 }
 0xced   : > { %v1979_v9 = vpop.f32.mrb[46].mxu1  ;;  %v3603_v8 = vld [vmem:[%s4339_s10] sm:$0xff]  }
 0xcee   : > { %v3392_v10 = vpop.f32.mrb[47].mxu1  ;;  %3436 = vmatmul.mubr.msk.bf16.vlgmr.msra.gmra.mrb[32].mxu0 %vm759_vm2, %v2192_v7  ;;  %3472 = vmatpush3.bf16.msra.mxu1 %v3603_v8  ;;  %v3604_v9 = vld [vmem:[%s4339_s10 + $0x8] sm:$0xff]  }
 0xcef   : > { %3441 = vmatprep.mubr.msk.bf16.mxu0 %vm3641_vm1, %v3640_v4  ;;  %3473 = vmatprep.subr.bf16.mxu1 %v3640_v4  ;;  %v3605_v10 = vld [vmem:[%s4339_s10 + $0x10] sm:$0xff]  }
 0xcf2   : > { %3474 = vmatpush3.bf16.msra.mxu1 %v3604_v9 }
 0xcf3   : > { %3475 = vmatprep.subr.bf16.mxu1 %v3640_v4 }
 0xcf6   : > { %3476 = vmatpush3.bf16.msra.mxu1 %v3605_v10 }
 0xcf7   : > { %3477 = vmatprep.subr.bf16.mxu1 %v3640_v4 }
 0xd0b   : > { %v2186_v34 = vpop.f32.mrb[48].mxu1 }
 0xd0c   : > { %v2253_v11 = vpack.c.bf16 %v2186_v34, %v2186_v34  ;;  %v3431_v12 = vpop.f32.mrb[49].mxu1  ;;  %v3606_v34 = vld [vmem:[%s4339_s10 + $0x18] sm:$0xff]  }
 0xd0d   : > { %v2189_v13 = vpop.f32.mrb[50].mxu1  ;;  %3478 = vmatpush3.bf16.msra.mxu1 %v3606_v34 }
 0xd0e   : > { %v2258_v15 = vand.u32 %v2253_v11, %v3889_v0  ;;  %v3432_v2 = vpop.f32.mrb[51].mxu1  ;;  %v2976_v11 = vld [vmem:[%s4338_s9] ss:$0 sm:$0xff] }
 0xd10   : > { %3440 = vmatpush3.bf16.msra.mxu0 %v2258_v15 }
 0xd11   : > { %3445 = vmatprep.subr.bf16.mxu0 %v3640_v4 }
 0xdc1   : > { %v2234_v16 = vpop.f32.mrb[32].mxu0 }
 0xdc2   : > { %v2240_v14 = vmul.f32 0.25, %v2234_v16  ;;  %v3437_v17 = vpop.f32.mrb[33].mxu0 }
 0xdc3   : > { %v2237_v18 = vpop.f32.mrb[34].mxu0 }
 0xdc4   : > { %v3438_v19 = vpop.f32.mrb[35].mxu0  ;;  %v2241_v20 = vsel %vm807_vm5, %v2240_v14, -inf }
 0xdc5   : > { %2242 = vmax.xlane.f32.xlu0 %v2241_v20 }
 0xe52   : > { %v2243_v21 = vpop.xlane.xlu0 %2242 }
 0xe53   : > { %v2244_v22 = vsub.f32 %v2240_v14, %v2243_v21 }
 0xe55   : > { %v2245_v23 = vmul.f32 1.442695, %v2244_v22 }
 0xe57   : > { %3621 = vpow2.f32 %v2245_v23 }
 0xe61   : > { %v3622_v24 = vpop.eup %3621 }
 0xe62   : > { %v2247_v25 = vsel %vm807_vm5, %v3622_v24, 0.0 }
 0xe63   : > { %2248 = vadd.xlane.f32.xlu1 %v2247_v25 }
 0xef0   : > { %v2249_v0 = vpop.xlane.xlu1 %2248 }
 0xef1   : > { %3623 = vrcp.f32 %v2249_v0 }
 0xefb   : > { %v3624_v26 = vpop.eup %3623 }
 0xefc   : > { %v2251_v27 = vmul.f32 %v3624_v26, %v3622_v24 }
 0xefe   : > { %v2252_v29 = vpack.c.bf16 %v2251_v27, %v2251_v27 }
 0xf00   : > { %3442 = vmatmul.mubr.msk.bf16.vlgmr.msra.gmra.mrb[36].mxu0 %vm821_vm6, %v2252_v29 }
 0xf01   : > { %3446 = vmatpush3.bf16.msra.mxu0 %v3594_v28  ;;  %3447 = vmatprep.mubr.msk.bf16.mxu0 %vm3641_vm1, %v3640_v4 }
 0xf02   : > { %3451 = vmatprep.subr.bf16.mxu0 %v3640_v4 }
 0xfd3   : > { %v2294_v30 = vpop.f32.mrb[36].mxu0 }
 0xfd4   : > { %v2300_v31 = vpack.c.bf16 %v2294_v30, %v2294_v30  ;;  %v3443_v32 = vpop.f32.mrb[37].mxu0 }
 0xfd5   : > { %v2297_v33 = vpop.f32.mrb[38].mxu0 }
 0xfd6   : > { %v3444_v35 = vpop.f32.mrb[39].mxu0  ;;  %3448 = vmatmul.mubr.msk.bf16.vlgmr.msra.gmra.mrb[40].mxu0 %vm759_vm2, %v2300_v31 }
 0xfd7   : > { %3467 = vmatprep.mubr.msk.bf16.mxu0 %vm3641_vm1, %v3640_v4  ;;  %3452 = vmatpush3.bf16.msra.mxu0 %v3595_v46  ;;  %v3643_v35 = vmov -1.0  }
 0xfd8   : > { %3453 = vmatprep.subr.bf16.mxu0 %v3640_v4 }
 0xfdb   : > { %3454 = vmatpush3.bf16.msra.mxu0 %v3596_v47 }
 0xfdc   : > { %3455 = vmatprep.subr.bf16.mxu0 %v3640_v4 }
 0xfdf   : > { %3456 = vmatpush3.bf16.msra.mxu0 %v3597_v53 }
 0xfe0   : > { %3457 = vmatprep.subr.bf16.mxu0 %v3640_v4 }
 0xfe3   : > { %3458 = vmatpush3.bf16.msra.mxu0 %v3598_v54 }
 0xfe4   : > { %3459 = vmatprep.subr.bf16.mxu0 %v3640_v4 }
 0xfe7   : > { %3460 = vmatpush3.bf16.msra.mxu0 %v3599_v55 }
 0xfe8   : > { %3461 = vmatprep.subr.bf16.mxu0 %v3640_v4 }
 0xfeb   : > { %3462 = vmatpush3.bf16.msra.mxu0 %v3600_v56 }
 0xfec   : > { %3463 = vmatprep.subr.bf16.mxu0 %v3640_v4 }
 0xfef   : > { %3464 = vmatpush3.bf16.msra.mxu0 %v3601_v57 }
 0xff0   : > { %3465 = vmatprep.subr.bf16.mxu0 %v3640_v4 }
 0xff3   : > { %3466 = vmatpush3.bf16.msra.mxu0 %v3602_v58 }
0x10a9   : > { %v2347_v36 = vpop.f32.mrb[40].mxu0 }
0x10aa   : > { %v2353_v37 = vadd.f32 %v2347_v36, %v1876_v63  ;;  %v3449_v38 = vpop.f32.mrb[41].mxu0  ;;  %v2974_v63 = vld [vmem:[%s4335_s6] ss:$0 sm:$0xff] }
0x10ab   : > { %v2350_v40 = vpop.f32.mrb[42].mxu0 }
0x10ac   : > { %v2354_v42 = vadd.f32 %v3631_v41, %v2353_v37  ;;  %v3450_v43 = vpop.f32.mrb[43].mxu0 }
0x10ae   : > { %v4256_v44 = vadd.f32 %v2973_v39, %v2354_v42  ;;  %v2985_v42 = vld [vmem:[%s4340_s11] ss:$0 sm:$0xff] }
0x10b0   : > { %v2365_v45 = vsel %vm413_vm0, %v4256_v44, 0.0 }
0x10b1   : > { %2366 = vadd.xlane.f32.xlu0 %v2365_v45 }
0x113e   : > { %v2367_v48 = vpop.xlane.xlu0 %2366 }
0x113f   : > { %v2368_v49 = vmul.f32 0.0078125, %v2367_v48 }
0x1141   : > { %v2369_v50 = vsub.f32 %v4256_v44, %v2368_v49 }
0x1143   : > { %v2370_v51 = vmul.f32 %v2369_v50, %v2369_v50 }
0x1145   : > { %v2371_v52 = vsel %vm413_vm0, %v2370_v51, 0.0 }
0x1146   : > { %2372 = vadd.xlane.f32.xlu1 %v2371_v52 }
0x11d3   : > { %v2373_v59 = vpop.xlane.xlu1 %2372 }
0x11d4   : > { %v2374_v60 = vmul.f32 0.0078125, %v2373_v59 }
0x11d6   : > { %v2375_v61 = vadd.f32 1e-05, %v2374_v60 }
0x11d8   : > { %3625 = vrsqrt.f32 %v2375_v61 }
0x11e2   : > { %v3626_v62 = vpop.eup %3625 }
0x11e3   : > { %v2377_v1 = vmul.f32 %v3626_v62, %v2369_v50 }
0x11e5   : > { %v2384_v5 = vmul.f32 %v2974_v63, %v2377_v1 }
0x11e7   : > { %v2391_v6 = vadd.f32 %v2975_v3, %v2384_v5 }
0x11e9   : > { %v2408_v7 = vpack.c.bf16 %v2391_v6, %v2391_v6 }
0x11eb   : > { %3468 = vmatmul.mubr.bf16.vlgmr.msra.gmra.mrb[44].mxu0 %v2408_v7 }
0x12be   : > { %v2498_v12 = vpop.f32.mrb[44].mxu0 }
0x12bf   : > { %v2499_v13 = vadd.f32 %v2976_v11, %v2498_v12  ;;  %v3469_v15 = vpop.f32.mrb[45].mxu0 }
0x12c0   : > { %v2501_v2 = vpop.f32.mrb[46].mxu0 }
0x12c1   : > { %v2505_v16 = vmul.f32 0.70710677, %v2499_v13  ;;  %v3470_v14 = vpop.f32.mrb[47].mxu0  ;;  %v2504_v38 = vmul.f32 0.5, %v2499_v13 }
0x12c3   : > { %v2508_v17 = vand.u32 2147483647, %v2505_v16  ;;  %vm2506_vm7 = vcmp.ge.f32.partialorder %v2505_v16, 0.0 }
0x12c4   : > { %v2507_v36 = vsel %vm2506_vm7, 1.0, %v3643_v35 }
0x12c5   : > { %v2509_v18 = vmul.f32 0.3275911, %v2508_v17  ;;  %v2522_v4 = vsub.f32 0.0, %v2508_v17 }
0x12c7   : > { %v2510_v19 = vadd.f32 1.0, %v2509_v18  ;;  %v2523_v21 = vmul.f32 %v2522_v4, %v2508_v17 }
0x12c9   : > { %3627 = vrcp.f32 %v2510_v19  ;;  %v2524_v24 = vmul.f32 1.442695, %v2523_v21 }
0x12cb   : > { %3629 = vpow2.f32 %v2524_v24 }
0x12d3   : > { %v3628_v20 = vpop.eup %3627 }
0x12d4   : > { %v2513_v22 = vmul.f32 1.0614054, %v3628_v20 }
0x12d5   : > { %v3630_v31 = vpop.eup %3629 }
0x12d6   : > { %v2514_v23 = vadd.f32 -1.4531521, %v2513_v22 }
0x12d8   : > { %v2515_v25 = vmul.f32 %v3628_v20, %v2514_v23 }
0x12da   : > { %v2516_v0 = vadd.f32 1.4214138, %v2515_v25 }
0x12dc   : > { %v2517_v26 = vmul.f32 %v3628_v20, %v2516_v0 }
0x12de   : > { %v2518_v27 = vadd.f32 -0.28449672, %v2517_v26 }
0x12e0   : > { %v2519_v28 = vmul.f32 %v3628_v20, %v2518_v27 }
0x12e2   : > { %v2520_v29 = vadd.f32 0.2548296, %v2519_v28 }
0x12e4   : > { %v2521_v30 = vmul.f32 %v3628_v20, %v2520_v29 }
0x12e6   : > { %v2526_v32 = vmul.f32 %v3630_v31, %v2521_v30 }
0x12e8   : > { %v2527_v33 = vsub.f32 1.0, %v2526_v32 }
0x12ea   : > { %v2528_v37 = vmul.f32 %v2527_v33, %v2507_v36 }
0x12ec   : > { %v2529_v39 = vadd.f32 1.0, %v2528_v37 }
0x12ee   : > { %v2530_v40 = vmul.f32 %v2529_v39, %v2504_v38 }
0x12f0   : > { %v2539_v41 = vpack.c.bf16 %v2530_v40, %v2530_v40 }
0x12f2   : > { %3480 = vmatmul.mubr.msk.bf16.vlgmr.msra.gmra.mrb[52].mxu1 %vm2571_vm8, %v2539_v41 }
0x13c5   : > { %v2609_v43 = vpop.f32.mrb[52].mxu1 }
0x13c6   : > { %v2610_v45 = vadd.f32 %v2985_v42, %v2609_v43  ;;  %v3481_v46 = vpop.f32.mrb[53].mxu1 }
0x13c7   : > { %v2612_v47 = vpop.f32.mrb[54].mxu1 }
0x13c8   : > { %v2615_v48 = vadd.f32 %v2610_v45, %v4256_v44  ;;  %v3482_v49 = vpop.f32.mrb[55].mxu1 }
0x13ca   : > { %2616 = vst [vmem:[%s408_s26] sm:$0x1f] %v2615_v48 }
0x13cb PF: > { %s22_s21 = sadd.s32 1, %s3638_s21  }
0x13cc   : > { %p19_p4 = scmp.ge.s32.totalorder %s22_s21, 6  }
0x13ce   :  { %21 = sbr.rel (!%p19_p4) target bundleno = 1 (0x1), region = 112 }

// kernel: cst_forward.8
= control target key start
LH: loop header
LB: loop body
LE: loop exit
PB: predicated region body
PF: predicated region fallthrough
CT: control target
= control target key end

     0   :  { %s3709_s21 = smov 0   ;;  %s4329_s0 = inlined_call_operand.vmem [shape: f32[2,3,128], index: 0, kind: input, shape index: {}]   ;;  %s4330_s1 = inlined_call_operand.vmem [shape: f32[1,128], index: 1, kind: input, shape index: {}]   ;;  %s4331_s2 = inlined_call_operand.vmem [shape: f32[1,128], index: 2, kind: input, shape index: {}]   ;;  %s4332_s3 = inlined_call_operand.vmem [shape: bf16[12,128,16], index: 3, kind: input, shape index: {}]   ;;  %s4333_s4 = inlined_call_operand.vmem [shape: bf16[4,16,128], index: 4, kind: input, shape index: {}]   ;;  %s4334_s5 = inlined_call_operand.vmem [shape: f32[1,128], index: 5, kind: input, shape index: {}]   ;;  %s4335_s6 = inlined_call_operand.vmem [shape: f32[1,128], index: 6, kind: input, shape index: {}]   ;;  %s4336_s7 = inlined_call_operand.vmem [shape: f32[1,128], index: 7, kind: input, shape index: {}]   ;;  %s4337_s8 = inlined_call_operand.vmem [shape: bf16[128,64], index: 8, kind: input, shape index: {}]   ;;  %s4338_s9 = inlined_call_operand.vmem [shape: f32[1,64], index: 9, kind: input, shape index: {}]   ;;  %s4339_s10 = inlined_call_operand.vmem [shape: bf16[64,128], index: 10, kind: input, shape index: {}]   ;;  %s4340_s11 = inlined_call_operand.vmem [shape: f32[1,128], index: 11, kind: input, shape index: {}]   ;;  %s4341_s12 = inlined_call_operand.vmem [shape: f32[2,3,128], index: 12, kind: output, shape index: {}]  }
   0x1 LB: > { %s2670_s22 = sadd.s32 4294967295, %s3638_s21   ;;  %p2674_p0 = scmp.ge.s32.totalorder %s3638_s21, 1  ;;  %s3638_s21 = sphi %s3709_s21, %s22_s21  }
   0x2   : > { %p361_p1 = scmp.lt.s32.totalorder %s3638_s21, 3 }
   0x4   : > { %p362_p2 = pnand %p2674_p0, %p361_p1 }
   0x5   : > { %p401_p3 = scmp.lt.s32.totalorder (!%p362_p2), %s2670_s22, 1  ;;  %vm413_vm0 = vcmask (!%p362_p2), 1042432   ;;  %v3495_v2 = vld [vmem:[%s4332_s3] sm:$0xff] (!%p362_p2)   ;;  %v3640_v4 = vmov (!%p362_p2), 0.0   ;;  %v3497_v5 = vld [vmem:[%s4332_s3 + $0x8] sm:$0xff] (!%p362_p2)   ;;  %v3499_v7 = vld [vmem:[%s4332_s3 + $0x10] sm:$0xff] (!%p362_p2)  }
   0x6   : > { %365 = sbr.rel (%p362_p2) target bundleno = 5067 (0x13cb), region = 68  ;;  %v3496_v3 = vld [vmem:[%s4332_s3 + $0x100] sm:$0xff] (!%p362_p2)   ;;  %3139 = vmatprep.subr.bf16.mxu0 (!%p362_p2), %v3640_v4  ;;  %3159 = vmatprep.subr.bf16.mxu1 (!%p362_p2), %v3640_v4  ;;  %v3498_v6 = vld [vmem:[%s4332_s3 + $0x108] sm:$0xff] (!%p362_p2)   ;;  %v3500_v13 = vld [vmem:[%s4332_s3 + $0x110] sm:$0xff] (!%p362_p2)   ;;  %vm3641_vm1 = vmmov (!%p362_p2), 0   ;;  %vm759_vm2 = vcmask (!%p362_p2), 130048  }
   0x7   : > { %3140 = vmatpush3.bf16.msra.mxu0 (!%p362_p2), %v3495_v2  ;;  %3160 = vmatpush3.bf16.msra.mxu1 (!%p362_p2), %v3496_v3  ;;  %v3501_v14 = vld [vmem:[%s4332_s3 + $0x18] sm:$0xff] (!%p362_p2)   ;;  %v3503_v16 = vld [vmem:[%s4332_s3 + $0x20] sm:$0xff] (!%p362_p2)   ;;  %v3505_v18 = vld [vmem:[%s4332_s3 + $0x28] sm:$0xff] (!%p362_p2)   ;;  %vm825_vm3 = vcmask (!%p362_p2), 1040384   ;;  %vm826_vm4 = vcmask (!%p362_p2), 1041408   ;;  %v3642_v61 = vmov (!%p362_p2), 65535  }
   0x8   : > { %3141 = vmatprep.subr.bf16.mxu0 (!%p362_p2), %v3640_v4  ;;  %3161 = vmatprep.subr.bf16.mxu1 (!%p362_p2), %v3640_v4  ;;  %v3502_v15 = vld [vmem:[%s4332_s3 + $0x118] sm:$0xff] (!%p362_p2)   ;;  %v3504_v17 = vld [vmem:[%s4332_s3 + $0x120] sm:$0xff] (!%p362_p2)   ;;  %v3506_v19 = vld [vmem:[%s4332_s3 + $0x128] sm:$0xff] (!%p362_p2)   ;;  %v827_v62 = vsel (!%p362_p2), %vm825_vm3, 4294967295, %v3642_v61  ;;  %vm807_vm5 = vcmask (!%p362_p2), 18432   ;;  %vm821_vm6 = vcmask (!%p362_p2), 23552  }
   0x9   : > { %v3507_v20 = vld [vmem:[%s4332_s3 + $0x30] sm:$0xff] (!%p362_p2)   ;;  %v3509_v22 = vld [vmem:[%s4332_s3 + $0x38] sm:$0xff] (!%p362_p2)   ;;  %3155 = vmatprep.mubr.msk.bf16.mxu0 (!%p362_p2), %vm3641_vm1, %v3640_v4  ;;  %3175 = vmatprep.mubr.msk.bf16.mxu1 (!%p362_p2), %vm3641_vm1, %v3640_v4  ;;  %v2677_v28 = vld [vmem:[%s4330_s1] ss:$0 sm:$0xff] (!%p362_p2)  ;;  %vm2571_vm8 = vcmask (!%p362_p2), 523264  }
   0xa   : > { %v3508_v21 = vld [vmem:[%s4332_s3 + $0x130] sm:$0xff] (!%p362_p2)   ;;  %v3510_v23 = vld [vmem:[%s4332_s3 + $0x138] sm:$0xff] (!%p362_p2)   ;;  %v2678_v30 = vld [vmem:[%s4331_s2] ss:$0 sm:$0xff] (!%p362_p2) }
   0xb   : > { %3142 = vmatpush3.bf16.msra.mxu0 (!%p362_p2), %v3497_v5  ;;  %3162 = vmatpush3.bf16.msra.mxu1 (!%p362_p2), %v3498_v6  ;;  %v3511_v33 = vld [vmem:[%s4332_s3 + $0x200] sm:$0xff] (!%p362_p2)   ;;  %v3512_v35 = vld [vmem:[%s4332_s3 + $0x208] sm:$0xff] (!%p362_p2)   ;;  %v3513_v36 = vld [vmem:[%s4332_s3 + $0x210] sm:$0xff] (!%p362_p2)  }
   0xc   : > { %3143 = vmatprep.subr.bf16.mxu0 (!%p362_p2), %v3640_v4  ;;  %3163 = vmatprep.subr.bf16.mxu1 (!%p362_p2), %v3640_v4  ;;  %v3514_v37 = vld [vmem:[%s4332_s3 + $0x218] sm:$0xff] (!%p362_p2)   ;;  %v3515_v38 = vld [vmem:[%s4332_s3 + $0x220] sm:$0xff] (!%p362_p2)   ;;  %v3516_v39 = vld [vmem:[%s4332_s3 + $0x228] sm:$0xff] (!%p362_p2)  }
   0xd   : > { %s4343_s22 = smov (!%p401_p3, %s2670_s22), 1  ;;  %v3517_v40 = vld [vmem:[%s4332_s3 + $0x230] sm:$0xff]   ;;  %v3518_v41 = vld [vmem:[%s4332_s3 + $0x238] sm:$0xff]   ;;  %v3519_v42 = vld [vmem:[%s4332_s3 + $0x140] sm:$0xff]  }
   0xe   : > { %s2675_s23 = sshll.u32 %s4343_s22, 2  ;;  %v3520_v43 = vld [vmem:[%s4332_s3 + $0x148] sm:$0xff]   ;;  %v3521_v44 = vld [vmem:[%s4332_s3 + $0x150] sm:$0xff]   ;;  %v3522_v45 = vld [vmem:[%s4332_s3 + $0x158] sm:$0xff]  }
   0xf   : > { %s3725_s26 = scalar_lea.vmem %s4329_s0, %s2675_s23  ;;  %3144 = vmatpush3.bf16.msra.mxu0 %v3499_v7  ;;  %3164 = vmatpush3.bf16.msra.mxu1 %v3500_v13  ;;  %v3523_v46 = vld [vmem:[%s4332_s3 + $0x160] sm:$0xff]   ;;  %v3524_v47 = vld [vmem:[%s4332_s3 + $0x168] sm:$0xff]   ;;  %v3525_v48 = vld [vmem:[%s4332_s3 + $0x170] sm:$0xff]  }
  0x10   : > { %v410_v0 = vld [vmem:[%s3725_s26] sm:$0x7]  ;;  %3145 = vmatprep.subr.bf16.mxu0 %v3640_v4  ;;  %3165 = vmatprep.subr.bf16.mxu1 %v3640_v4  ;;  %v3526_v49 = vld [vmem:[%s4332_s3 + $0x178] sm:$0xff]   ;;  %v3549_v61 = vld [vmem:[%s4332_s3 + $0x1a8] sm:$0xff]  }
  0x11   : > { %v414_v1 = vsel %vm413_vm0, %v410_v0, 0.0 }
  0x12   : > { %415 = vadd.xlane.f32.xlu0 %v414_v1 }
  0x13   : > { %3146 = vmatpush3.bf16.msra.mxu0 %v3501_v14  ;;  %3166 = vmatpush3.bf16.msra.mxu1 %v3502_v15 }
  0x14   : > { %3147 = vmatprep.subr.bf16.mxu0 %v3640_v4  ;;  %3167 = vmatprep.subr.bf16.mxu1 %v3640_v4 }
  0x17   : > { %3148 = vmatpush3.bf16.msra.mxu0 %v3503_v16  ;;  %3168 = vmatpush3.bf16.msra.mxu1 %v3504_v17 }
  0x18   : > { %3149 = vmatprep.subr.bf16.mxu0 %v3640_v4  ;;  %3169 = vmatprep.subr.bf16.mxu1 %v3640_v4 }
  0x1b   : > { %3150 = vmatpush3.bf16.msra.mxu0 %v3505_v18  ;;  %3170 = vmatpush3.bf16.msra.mxu1 %v3506_v19 }
  0x1c   : > { %3151 = vmatprep.subr.bf16.mxu0 %v3640_v4  ;;  %3171 = vmatprep.subr.bf16.mxu1 %v3640_v4 }
  0x1f   : > { %3152 = vmatpush3.bf16.msra.mxu0 %v3507_v20  ;;  %3172 = vmatpush3.bf16.msra.mxu1 %v3508_v21 }
  0x20   : > { %3153 = vmatprep.subr.bf16.mxu0 %v3640_v4  ;;  %3173 = vmatprep.subr.bf16.mxu1 %v3640_v4 }
  0x23   : > { %3154 = vmatpush3.bf16.msra.mxu0 %v3509_v22  ;;  %3174 = vmatpush3.bf16.msra.mxu1 %v3510_v23 }
  0x24   : > { %3179 = vmatprep.subr.bf16.mxu0 %v3640_v4  ;;  %3199 = vmatprep.subr.bf16.mxu1 %v3640_v4 }
  0x9f   : > { %v416_v8 = vpop.xlane.xlu0 %415 }
  0xa0   : > { %v418_v9 = vmul.f32 0.0078125, %v416_v8 }
  0xa2   : > { %v419_v10 = vsub.f32 %v410_v0, %v418_v9  ;;  %v3889_v0 = vsel %vm826_vm4, %v827_v62, 0 }
  0xa4   : > { %v420_v11 = vmul.f32 %v419_v10, %v419_v10 }
  0xa6   : > { %v421_v12 = vsel %vm413_vm0, %v420_v11, 0.0 }
  0xa7   : > { %422 = vadd.xlane.f32.xlu0 %v421_v12 }
 0x134   : > { %v423_v24 = vpop.xlane.xlu0 %422 }
 0x135   : > { %v424_v25 = vmul.f32 0.0078125, %v423_v24 }
 0x137   : > { %v425_v26 = vadd.f32 1e-05, %v424_v25  ;;  %v3527_v25 = vld [vmem:[%s4332_s3 + $0x40] sm:$0xff]  }
 0x139   : > { %3607 = vrsqrt.f32 %v425_v26 }
 0x143   : > { %v3608_v27 = vpop.eup %3607 }
 0x144   : > { %v427_v29 = vmul.f32 %v3608_v27, %v419_v10  ;;  %v3528_v27 = vld [vmem:[%s4332_s3 + $0x48] sm:$0xff]  }
 0x146   : > { %v434_v31 = vmul.f32 %v2677_v28, %v427_v29  ;;  %v3529_v28 = vld [vmem:[%s4332_s3 + $0x50] sm:$0xff]   ;;  %v3530_v29 = vld [vmem:[%s4332_s3 + $0x58] sm:$0xff]  }
 0x148   : > { %v441_v32 = vadd.f32 %v2678_v30, %v434_v31  ;;  %v3531_v30 = vld [vmem:[%s4332_s3 + $0x60] sm:$0xff]   ;;  %v3532_v31 = vld [vmem:[%s4332_s3 + $0x68] sm:$0xff]  }
 0x14a   : > { %v3809_v34 = vpack.c.bf16 %v441_v32, %v441_v32  ;;  %v3533_v32 = vld [vmem:[%s4332_s3 + $0x70] sm:$0xff]  }
 0x14c   : > { %3156 = vmatmul.mubr.bf16.vlgmr.msra.gmra.mrb[0].mxu0 %v3809_v34  ;;  %3176 = vmatmul.mubr.bf16.vlgmr.msra.gmra.mrb[0].mxu1 %v3809_v34 }
 0x14d   : > { %3180 = vmatpush3.bf16.msra.mxu0 %v3511_v33  ;;  %3195 = vmatprep.mubr.msk.bf16.mxu0 %vm3641_vm1, %v3640_v4  ;;  %v3534_v33 = vld [vmem:[%s4332_s3 + $0x78] sm:$0xff]  }
 0x14e   : > { %3181 = vmatprep.subr.bf16.mxu0 %v3640_v4  ;;  %3201 = vmatprep.mubr.msk.bf16.mxu1 %vm3641_vm1, %v3640_v4 }
 0x151   : > { %3182 = vmatpush3.bf16.msra.mxu0 %v3512_v35  ;;  %v3535_v35 = vld [vmem:[%s4332_s3 + $0x240] sm:$0xff]  }
 0x152   : > { %3183 = vmatprep.subr.bf16.mxu0 %v3640_v4 }
 0x155   : > { %3184 = vmatpush3.bf16.msra.mxu0 %v3513_v36  ;;  %v3536_v36 = vld [vmem:[%s4332_s3 + $0x248] sm:$0xff]  }
 0x156   : > { %3185 = vmatprep.subr.bf16.mxu0 %v3640_v4 }
 0x159   : > { %3186 = vmatpush3.bf16.msra.mxu0 %v3514_v37  ;;  %v3537_v37 = vld [vmem:[%s4332_s3 + $0x250] sm:$0xff]  }
 0x15a   : > { %3187 = vmatprep.subr.bf16.mxu0 %v3640_v4 }
 0x15d   : > { %3188 = vmatpush3.bf16.msra.mxu0 %v3515_v38  ;;  %v3538_v38 = vld [vmem:[%s4332_s3 + $0x258] sm:$0xff]  }
 0x15e   : > { %3189 = vmatprep.subr.bf16.mxu0 %v3640_v4 }
 0x161   : > { %3190 = vmatpush3.bf16.msra.mxu0 %v3516_v39  ;;  %v3539_v39 = vld [vmem:[%s4332_s3 + $0x260] sm:$0xff]  }
 0x162   : > { %3191 = vmatprep.subr.bf16.mxu0 %v3640_v4 }
 0x165   : > { %3192 = vmatpush3.bf16.msra.mxu0 %v3517_v40  ;;  %v3540_v40 = vld [vmem:[%s4332_s3 + $0x268] sm:$0xff]  }
 0x166   : > { %3193 = vmatprep.subr.bf16.mxu0 %v3640_v4 }
 0x169   : > { %3194 = vmatpush3.bf16.msra.mxu0 %v3518_v41  ;;  %v3541_v41 = vld [vmem:[%s4332_s3 + $0x270] sm:$0xff]  }
 0x16a   : > { %3231 = vmatprep.subr.bf16.mxu0 %v3640_v4 }
 0x16c   : > { %3196 = vmatmul.mubr.bf16.vlgmr.msra.gmra.mrb[4].mxu0 %v3809_v34 }
 0x16d   : > { %3232 = vmatpush3.bf16.msra.mxu0 %v3519_v42  ;;  %3247 = vmatprep.mubr.msk.bf16.mxu0 %vm3641_vm1, %v3640_v4  ;;  %v3542_v42 = vld [vmem:[%s4332_s3 + $0x278] sm:$0xff]  }
 0x16e   : > { %3233 = vmatprep.subr.bf16.mxu0 %v3640_v4 }
 0x171   : > { %3234 = vmatpush3.bf16.msra.mxu0 %v3520_v43 }
 0x172   : > { %3235 = vmatprep.subr.bf16.mxu0 %v3640_v4 }
 0x175   : > { %3236 = vmatpush3.bf16.msra.mxu0 %v3521_v44 }
 0x176   : > { %3237 = vmatprep.subr.bf16.mxu0 %v3640_v4 }
 0x179   : > { %3238 = vmatpush3.bf16.msra.mxu0 %v3522_v45 }
 0x17a   : > { %3239 = vmatprep.subr.bf16.mxu0 %v3640_v4 }
 0x17d   : > { %3240 = vmatpush3.bf16.msra.mxu0 %v3523_v46 }
 0x17e   : > { %3241 = vmatprep.subr.bf16.mxu0 %v3640_v4 }
 0x181   : > { %3242 = vmatpush3.bf16.msra.mxu0 %v3524_v47 }
 0x182   : > { %3243 = vmatprep.subr.bf16.mxu0 %v3640_v4 }
 0x185   : > { %3244 = vmatpush3.bf16.msra.mxu0 %v3525_v48 }
 0x186   : > { %3245 = vmatprep.subr.bf16.mxu0 %v3640_v4 }
 0x189   : > { %3246 = vmatpush3.bf16.msra.mxu0 %v3526_v49 }
 0x18a   : > { %3277 = vmatprep.subr.bf16.mxu0 %v3640_v4 }
 0x18c   : > { %3248 = vmatmul.mubr.bf16.vlgmr.msra.gmra.mrb[8].mxu0 %v3809_v34 }
 0x18d   : > { %3279 = vmatprep.mubr.msk.bf16.mxu0 %vm3641_vm1, %v3640_v4 }
 0x21f   : > { %v541_v50 = vpop.f32.mrb[0].mxu0  ;;  %v646_v51 = vpop.f32.mrb[0].mxu1 }
 0x220   : > { %v758_v52 = vpack.c.bf16 %v646_v51, %v646_v51  ;;  %v3157_v53 = vpop.f32.mrb[1].mxu0  ;;  %v3177_v54 = vpop.f32.mrb[1].mxu1  ;;  %v757_v60 = vpack.c.bf16 %v541_v50, %v541_v50  ;;  %v3543_v50 = vld [vmem:[%s4333_s4] sm:$0xff]  }
 0x221   : > { %v544_v55 = vpop.f32.mrb[2].mxu0  ;;  %v649_v56 = vpop.f32.mrb[2].mxu1 }
 0x222   : > { %v764_v57 = vsel %vm759_vm2, %v758_v52, 0  ;;  %v3158_v58 = vpop.f32.mrb[3].mxu0  ;;  %v3178_v59 = vpop.f32.mrb[3].mxu1  ;;  %v3544_v55 = vld [vmem:[%s4332_s3 + $0x180] sm:$0xff]  }
 0x223   : > { %3200 = vmatpush3.bf16.xpose.msra.mxu1 %v764_v57  ;;  %v3545_v57 = vld [vmem:[%s4332_s3 + $0x188] sm:$0xff]   ;;  %v3546_v58 = vld [vmem:[%s4332_s3 + $0x190] sm:$0xff]   ;;  %v3547_v59 = vld [vmem:[%s4332_s3 + $0x198] sm:$0xff]  }
 0x224   : > { %3205 = vmatprep.subr.bf16.mxu1 %v3640_v4 }
 0x22a   : > { %3202 = vmatmul.mubr.msk.bf16.vlgmr.msra.gmra.mrb[4].mxu1 %vm759_vm2, %v757_v60  ;;  %v3548_v60 = vld [vmem:[%s4332_s3 + $0x1a0] sm:$0xff]  }
 0x22b   : > { %3207 = vmatprep.mubr.msk.bf16.mxu1 %vm3641_vm1, %v3640_v4 }
 0x23f   : > { %v751_v63 = vpop.f32.mrb[4].mxu0 }
 0x240   : > { %v820_v1 = vpack.c.bf16 %v751_v63, %v751_v63  ;;  %v3197_v2 = vpop.f32.mrb[5].mxu0  ;;  %v3550_v63 = vld [vmem:[%s4332_s3 + $0x1b0] sm:$0xff]  }
 0x241   : > { %v754_v3 = vpop.f32.mrb[6].mxu0 }
 0x242   : > { %v830_v5 = vand.u32 %v3889_v0, %v820_v1  ;;  %v3198_v6 = vpop.f32.mrb[7].mxu0 }
 0x244   : > { %3206 = vmatpush3.bf16.msra.mxu1 %v830_v5 }
 0x245   : > { %3211 = vmatprep.subr.bf16.mxu1 %v3640_v4 }
 0x25f   : > { %v3893_v7 = vpop.f32.mrb[8].mxu0 }
 0x260   : > { %v3249_v8 = vpop.f32.mrb[9].mxu0  ;;  %v1191_v43 = vpack.c.bf16 %v3893_v7, %v3893_v7  ;;  %v3551_v7 = vld [vmem:[%s4332_s3 + $0x1b8] sm:$0xff]  }
 0x261   : > { %v1082_v9 = vpop.f32.mrb[10].mxu0 }
 0x262   : > { %v3250_v10 = vpop.f32.mrb[11].mxu0  ;;  %v1196_v44 = vsel %vm759_vm2, %v1191_v43, 0  ;;  %v3556_v43 = vld [vmem:[%s4332_s3 + $0x98] sm:$0xff]  }
 0x2fd   : > { %v800_v11 = vpop.f32.mrb[4].mxu1 }
 0x2fe   : > { %v806_v12 = vmul.f32 0.25, %v800_v11  ;;  %v3203_v13 = vpop.f32.mrb[5].mxu1 }
 0x2ff   : > { %v803_v14 = vpop.f32.mrb[6].mxu1 }
 0x300   : > { %v3204_v15 = vpop.f32.mrb[7].mxu1  ;;  %v808_v16 = vsel %vm807_vm5, %v806_v12, -inf }
 0x301   : > { %809 = vmax.xlane.f32.xlu1 %v808_v16 }
 0x38e   : > { %v810_v17 = vpop.xlane.xlu1 %809 }
 0x38f   : > { %v811_v18 = vsub.f32 %v806_v12, %v810_v17 }
 0x391   : > { %v812_v19 = vmul.f32 1.442695, %v811_v18 }
 0x393   : > { %3609 = vpow2.f32 %v812_v19 }
 0x39d   : > { %v3610_v20 = vpop.eup %3609 }
 0x39e   : > { %v814_v21 = vsel %vm807_vm5, %v3610_v20, 0.0 }
 0x39f   : > { %815 = vadd.xlane.f32.xlu1 %v814_v21 }
 0x42c   : > { %v816_v22 = vpop.xlane.xlu1 %815 }
 0x42d   : > { %3611 = vrcp.f32 %v816_v22 }
 0x437   : > { %v3612_v23 = vpop.eup %3611 }
 0x438   : > { %v818_v24 = vmul.f32 %v3612_v23, %v3610_v20 }
 0x43a   : > { %v819_v26 = vpack.c.bf16 %v818_v24, %v818_v24 }
 0x43c   : > { %3208 = vmatmul.mubr.msk.bf16.vlgmr.msra.gmra.mrb[8].mxu1 %vm821_vm6, %v819_v26 }
 0x43d   : > { %3212 = vmatpush3.bf16.msra.mxu1 %v3527_v25  ;;  %3227 = vmatprep.mubr.msk.bf16.mxu1 %vm3641_vm1, %v3640_v4 }
 0x43e   : > { %3213 = vmatprep.subr.bf16.mxu1 %v3640_v4 }
 0x441   : > { %3214 = vmatpush3.bf16.msra.mxu1 %v3528_v27 }
 0x442   : > { %3215 = vmatprep.subr.bf16.mxu1 %v3640_v4 }
 0x445   : > { %3216 = vmatpush3.bf16.msra.mxu1 %v3529_v28 }
 0x446   : > { %3217 = vmatprep.subr.bf16.mxu1 %v3640_v4 }
 0x449   : > { %3218 = vmatpush3.bf16.msra.mxu1 %v3530_v29 }
 0x44a   : > { %3219 = vmatprep.subr.bf16.mxu1 %v3640_v4 }
 0x44d   : > { %3220 = vmatpush3.bf16.msra.mxu1 %v3531_v30 }
 0x44e   : > { %3221 = vmatprep.subr.bf16.mxu1 %v3640_v4 }
 0x451   : > { %3222 = vmatpush3.bf16.msra.mxu1 %v3532_v31 }
 0x452   : > { %3223 = vmatprep.subr.bf16.mxu1 %v3640_v4 }
 0x455   : > { %3224 = vmatpush3.bf16.msra.mxu1 %v3533_v32  ;;  %v3552_v32 = vld [vmem:[%s4333_s4 + $0x8] sm:$0xff]  }
 0x456   : > { %3225 = vmatprep.subr.bf16.mxu1 %v3640_v4 }
 0x459   : > { %3226 = vmatpush3.bf16.msra.mxu1 %v3534_v33 }
 0x45a   : > { %3251 = vmatprep.subr.bf16.mxu1 %v3640_v4 }
 0x45c   : > { %3228 = vmatmul.mubr.bf16.vlgmr.msra.gmra.mrb[12].mxu1 %v3809_v34 }
 0x45d   : > { %3252 = vmatpush3.bf16.msra.mxu1 %v3535_v35  ;;  %3267 = vmatprep.mubr.msk.bf16.mxu1 %vm3641_vm1, %v3640_v4 }
 0x45e   : > { %3253 = vmatprep.subr.bf16.mxu1 %v3640_v4 }
 0x461   : > { %3254 = vmatpush3.bf16.msra.mxu1 %v3536_v36  ;;  %v3553_v36 = vld [vmem:[%s4332_s3 + $0x80] sm:$0xff]  }
 0x462   : > { %3255 = vmatprep.subr.bf16.mxu1 %v3640_v4 }
 0x465   : > { %3256 = vmatpush3.bf16.msra.mxu1 %v3537_v37 }
 0x466   : > { %3257 = vmatprep.subr.bf16.mxu1 %v3640_v4 }
 0x469   : > { %3258 = vmatpush3.bf16.msra.mxu1 %v3538_v38 }
 0x46a   : > { %3259 = vmatprep.subr.bf16.mxu1 %v3640_v4 }
 0x46d   : > { %3260 = vmatpush3.bf16.msra.mxu1 %v3539_v39 }
 0x46e   : > { %3261 = vmatprep.subr.bf16.mxu1 %v3640_v4 }
 0x471   : > { %3262 = vmatpush3.bf16.msra.mxu1 %v3540_v40 }
 0x472   : > { %3263 = vmatprep.subr.bf16.mxu1 %v3640_v4 }
 0x475   : > { %3264 = vmatpush3.bf16.msra.mxu1 %v3541_v41  ;;  %v3554_v41 = vld [vmem:[%s4332_s3 + $0x88] sm:$0xff]  }
 0x476   : > { %3265 = vmatprep.subr.bf16.mxu1 %v3640_v4 }
 0x479   : > { %3266 = vmatpush3.bf16.msra.mxu1 %v3542_v42  ;;  %v3555_v42 = vld [vmem:[%s4332_s3 + $0x90] sm:$0xff]  }
 0x47a   : > { %3271 = vmatprep.subr.bf16.mxu1 %v3640_v4 }
 0x47c   : > { %3268 = vmatmul.mubr.bf16.vlgmr.msra.gmra.mrb[16].mxu1 %v3809_v34 }
 0x47d   : > { %3273 = vmatprep.mubr.msk.bf16.mxu1 %vm3641_vm1, %v3640_v4 }
 0x482   : > { %3272 = vmatpush3.bf16.xpose.msra.mxu1 %v1196_v44  ;;  %v3557_v44 = vld [vmem:[%s4332_s3 + $0xa0] sm:$0xff]  }
 0x483   : > { %3289 = vmatprep.subr.bf16.mxu1 %v3640_v4 }
 0x50f   : > { %v866_v45 = vpop.f32.mrb[8].mxu1 }
 0x510   : > { %v3209_v46 = vpop.f32.mrb[9].mxu1  ;;  %v872_v56 = vpack.c.bf16 %v866_v45, %v866_v45  ;;  %v3558_v45 = vld [vmem:[%s4332_s3 + $0xa8] sm:$0xff]  }
 0x511   : > { %v869_v47 = vpop.f32.mrb[10].mxu1  ;;  %v3559_v46 = vld [vmem:[%s4332_s3 + $0xb0] sm:$0xff]  }
 0x512   : > { %v3210_v48 = vpop.f32.mrb[11].mxu1  ;;  %v3560_v47 = vld [vmem:[%s4332_s3 + $0xb8] sm:$0xff]  }
 0x513   : > { %v3561_v48 = vld [vmem:[%s4332_s3 + $0x280] sm:$0xff]  }
 0x52f   : > { %v974_v49 = vpop.f32.mrb[12].mxu1 }
 0x530   : > { %v1190_v51 = vpack.c.bf16 %v974_v49, %v974_v49  ;;  %v3229_v52 = vpop.f32.mrb[13].mxu1  ;;  %v3562_v49 = vld [vmem:[%s4332_s3 + $0x288] sm:$0xff]  }
 0x531   : > { %v977_v53 = vpop.f32.mrb[14].mxu1  ;;  %v3565_v52 = vld [vmem:[%s4332_s3 + $0x2a0] sm:$0xff]  }
 0x532   : > { %v3230_v54 = vpop.f32.mrb[15].mxu1  ;;  %3274 = vmatmul.mubr.msk.bf16.vlgmr.msra.gmra.mrb[20].mxu1 %vm759_vm2, %v1190_v51  ;;  %v3564_v51 = vld [vmem:[%s4332_s3 + $0x298] sm:$0xff]   ;;  %v3566_v53 = vld [vmem:[%s4332_s3 + $0x2a8] sm:$0xff]  }
 0x533   : > { %3290 = vmatpush3.bf16.msra.mxu1 %v3543_v50  ;;  %3291 = vmatprep.mubr.msk.bf16.mxu1 %vm3641_vm1, %v3640_v4  ;;  %v3563_v50 = vld [vmem:[%s4332_s3 + $0x290] sm:$0xff]  }
 0x534   : > { %3315 = vmatprep.subr.bf16.mxu1 %v3640_v4  ;;  %v3567_v54 = vld [vmem:[%s4332_s3 + $0x2b0] sm:$0xff]  }
 0x53a   : > { %3292 = vmatmul.mubr.msk.bf16.vlgmr.msra.gmra.mrb[24].mxu1 %vm759_vm2, %v872_v56  ;;  %v3569_v56 = vld [vmem:[%s4332_s3 + $0x1c0] sm:$0xff]  }
 0x53b   : > { %3316 = vmatpush3.bf16.msra.mxu1 %v3544_v55  ;;  %3331 = vmatprep.mubr.msk.bf16.mxu1 %vm3641_vm1, %v3640_v4  ;;  %v3568_v55 = vld [vmem:[%s4332_s3 + $0x2b8] sm:$0xff]  }
 0x53c   : > { %3317 = vmatprep.subr.bf16.mxu1 %v3640_v4 }
 0x53f   : > { %3318 = vmatpush3.bf16.msra.mxu1 %v3545_v57  ;;  %v3570_v57 = vld [vmem:[%s4332_s3 + $0x1c8] sm:$0xff]  }
 0x540   : > { %3319 = vmatprep.subr.bf16.mxu1 %v3640_v4 }
 0x543   : > { %3320 = vmatpush3.bf16.msra.mxu1 %v3546_v58  ;;  %v3571_v58 = vld [vmem:[%s4332_s3 + $0x1d0] sm:$0xff]  }
 0x544   : > { %3321 = vmatprep.subr.bf16.mxu1 %v3640_v4 }
 0x547   : > { %3322 = vmatpush3.bf16.msra.mxu1 %v3547_v59  ;;  %v3572_v59 = vld [vmem:[%s4332_s3 + $0x1d8] sm:$0xff]  }
 0x548   : > { %3323 = vmatprep.subr.bf16.mxu1 %v3640_v4 }
 0x54b   : > { %3324 = vmatpush3.bf16.msra.mxu1 %v3548_v60  ;;  %v3573_v60 = vld [vmem:[%s4332_s3 + $0x1e0] sm:$0xff]  }
 0x54c   : > { %3325 = vmatprep.subr.bf16.mxu1 %v3640_v4 }
 0x54f   : > { %3326 = vmatpush3.bf16.msra.mxu1 %v3549_v61  ;;  %v1184_v62 = vpop.f32.mrb[16].mxu1  ;;  %v3574_v61 = vld [vmem:[%s4332_s3 + $0x1e8] sm:$0xff]  }
 0x550   : > { %v1251_v1 = vpack.c.bf16 %v1184_v62, %v1184_v62  ;;  %v3269_v2 = vpop.f32.mrb[17].mxu1  ;;  %3327 = vmatprep.subr.bf16.mxu1 %v3640_v4  ;;  %v3575_v62 = vld [vmem:[%s4332_s3 + $0x1f0] sm:$0xff]  }
 0x551   : > { %v1187_v3 = vpop.f32.mrb[18].mxu1 }
 0x552   : > { %v1256_v5 = vand.u32 %v1251_v1, %v3889_v0  ;;  %v3270_v6 = vpop.f32.mrb[19].mxu1 }
 0x553   : > { %3328 = vmatpush3.bf16.msra.mxu1 %v3550_v63  ;;  %v3576_v63 = vld [vmem:[%s4332_s3 + $0x1f8] sm:$0xff]  }
 0x554   : > { %3278 = vmatpush3.bf16.msra.mxu0 %v1256_v5  ;;  %3329 = vmatprep.subr.bf16.mxu1 %v3640_v4 }
 0x555   : > { %3283 = vmatprep.subr.bf16.mxu0 %v3640_v4 }
 0x557   : > { %3330 = vmatpush3.bf16.msra.mxu1 %v3551_v7 }
 0x558   : > { %3355 = vmatprep.subr.bf16.mxu1 %v3640_v4 }
 0x55a   : > { %3332 = vmatmul.mubr.bf16.vlgmr.msra.gmra.mrb[28].mxu1 %v3809_v34 }
 0x55b   : > { %3357 = vmatprep.mubr.msk.bf16.mxu1 %vm3641_vm1, %v3640_v4 }
 0x605   : > { %v1232_v8 = vpop.f32.mrb[20].mxu1 }
 0x606   : > { %v1238_v9 = vmul.f32 0.25, %v1232_v8  ;;  %v3275_v10 = vpop.f32.mrb[21].mxu1 }
 0x607   : > { %v1235_v11 = vpop.f32.mrb[22].mxu1 }
 0x608   : > { %v3276_v12 = vpop.f32.mrb[23].mxu1  ;;  %v1239_v13 = vsel %vm807_vm5, %v1238_v9, -inf }
 0x609   : > { %1240 = vmax.xlane.f32.xlu0 %v1239_v13 }
 0x60d   : > { %v4022_v14 = vpop.f32.mrb[24].mxu1 }
 0x60e   : > { %v3293_v15 = vpop.f32.mrb[25].mxu1 }
 0x60f   : > { %v1397_v16 = vpop.f32.mrb[26].mxu1 }
 0x610   : > { %v3294_v17 = vpop.f32.mrb[27].mxu1 }
 0x62d   : > { %v1604_v18 = vpop.f32.mrb[28].mxu1 }
 0x62e   : > { %v1716_v19 = vpack.c.bf16 %v1604_v18, %v1604_v18  ;;  %v3333_v20 = vpop.f32.mrb[29].mxu1 }
 0x62f   : > { %v1607_v21 = vpop.f32.mrb[30].mxu1 }
 0x630   : > { %v1721_v22 = vsel %vm759_vm2, %v1716_v19, 0  ;;  %v3334_v23 = vpop.f32.mrb[31].mxu1 }
 0x631   : > { %3356 = vmatpush3.bf16.xpose.msra.mxu1 %v1721_v22 }
 0x632   : > { %3361 = vmatprep.subr.bf16.mxu1 %v3640_v4 }
 0x696   : > { %v1241_v24 = vpop.xlane.xlu0 %1240 }
 0x697   : > { %v1242_v25 = vsub.f32 %v1238_v9, %v1241_v24 }
 0x699   : > { %v1243_v26 = vmul.f32 1.442695, %v1242_v25 }
 0x69b   : > { %3613 = vpow2.f32 %v1243_v26 }
 0x6a5   : > { %v3614_v27 = vpop.eup %3613 }
 0x6a6   : > { %v1245_v28 = vsel %vm807_vm5, %v3614_v27, 0.0 }
 0x6a7   : > { %1246 = vadd.xlane.f32.xlu1 %v1245_v28 }
 0x734   : > { %v1247_v29 = vpop.xlane.xlu1 %1246 }
 0x735   : > { %3615 = vrcp.f32 %v1247_v29 }
 0x73f   : > { %v3616_v30 = vpop.eup %3615 }
 0x740   : > { %v1249_v31 = vmul.f32 %v3616_v30, %v3614_v27 }
 0x742   : > { %v1250_v33 = vpack.c.bf16 %v1249_v31, %v1249_v31 }
 0x744   : > { %3280 = vmatmul.mubr.msk.bf16.vlgmr.msra.gmra.mrb[12].mxu0 %vm821_vm6, %v1250_v33 }
 0x745   : > { %3284 = vmatpush3.bf16.msra.mxu0 %v3552_v32  ;;  %3285 = vmatprep.mubr.msk.bf16.mxu0 %vm3641_vm1, %v3640_v4 }
 0x746   : > { %3295 = vmatprep.subr.bf16.mxu0 %v3640_v4 }
 0x817   : > { %v1292_v35 = vpop.f32.mrb[12].mxu0 }
 0x818   : > { %v1298_v37 = vpack.c.bf16 %v1292_v35, %v1292_v35  ;;  %v3281_v38 = vpop.f32.mrb[13].mxu0 }
 0x819   : > { %v1295_v39 = vpop.f32.mrb[14].mxu0 }
 0x81a   : > { %v3282_v40 = vpop.f32.mrb[15].mxu0  ;;  %3286 = vmatmul.mubr.msk.bf16.vlgmr.msra.gmra.mrb[16].mxu0 %vm759_vm2, %v1298_v37  ;;  %v3577_v39 = vld [vmem:[%s4333_s4 + $0x10] sm:$0xff]  }
 0x81b   : > { %3296 = vmatpush3.bf16.msra.mxu0 %v3553_v36  ;;  %3311 = vmatprep.mubr.msk.bf16.mxu0 %vm3641_vm1, %v3640_v4 }
 0x81c   : > { %3297 = vmatprep.subr.bf16.mxu0 %v3640_v4 }
 0x81f   : > { %3298 = vmatpush3.bf16.msra.mxu0 %v3554_v41 }
 0x820   : > { %3299 = vmatprep.subr.bf16.mxu0 %v3640_v4 }
 0x823   : > { %3300 = vmatpush3.bf16.msra.mxu0 %v3555_v42  ;;  %v3578_v42 = vld [vmem:[%s4332_s3 + $0xc0] sm:$0xff]  }
 0x824   : > { %3301 = vmatprep.subr.bf16.mxu0 %v3640_v4 }
 0x827   : > { %3302 = vmatpush3.bf16.msra.mxu0 %v3556_v43 }
 0x828   : > { %3303 = vmatprep.subr.bf16.mxu0 %v3640_v4 }
 0x82b   : > { %3304 = vmatpush3.bf16.msra.mxu0 %v3557_v44 }
 0x82c   : > { %3305 = vmatprep.subr.bf16.mxu0 %v3640_v4 }
 0x82f   : > { %3306 = vmatpush3.bf16.msra.mxu0 %v3558_v45 }
 0x830   : > { %3307 = vmatprep.subr.bf16.mxu0 %v3640_v4 }
 0x833   : > { %3308 = vmatpush3.bf16.msra.mxu0 %v3559_v46 }
 0x834   : > { %3309 = vmatprep.subr.bf16.mxu0 %v3640_v4 }
 0x837   : > { %3310 = vmatpush3.bf16.msra.mxu0 %v3560_v47  ;;  %v3579_v47 = vld [vmem:[%s4332_s3 + $0xc8] sm:$0xff]  }
 0x838   : > { %3335 = vmatprep.subr.bf16.mxu0 %v3640_v4 }
 0x83a   : > { %3312 = vmatmul.mubr.bf16.vlgmr.msra.gmra.mrb[20].mxu0 %v3809_v34 }
 0x83b   : > { %3336 = vmatpush3.bf16.msra.mxu0 %v3561_v48  ;;  %3351 = vmatprep.mubr.msk.bf16.mxu0 %vm3641_vm1, %v3640_v4  ;;  %v3580_v48 = vld [vmem:[%s4332_s3 + $0xd0] sm:$0xff]  }
 0x83c   : > { %3337 = vmatprep.subr.bf16.mxu0 %v3640_v4 }
 0x83f   : > { %3338 = vmatpush3.bf16.msra.mxu0 %v3562_v49  ;;  %v3581_v49 = vld [vmem:[%s4332_s3 + $0xd8] sm:$0xff]  }
 0x840   : > { %3339 = vmatprep.subr.bf16.mxu0 %v3640_v4 }
 0x843   : > { %3340 = vmatpush3.bf16.msra.mxu0 %v3563_v50  ;;  %v3582_v50 = vld [vmem:[%s4332_s3 + $0xe0] sm:$0xff]  }
 0x844   : > { %3341 = vmatprep.subr.bf16.mxu0 %v3640_v4 }
 0x847   : > { %3342 = vmatpush3.bf16.msra.mxu0 %v3564_v51  ;;  %v3583_v51 = vld [vmem:[%s4332_s3 + $0xe8] sm:$0xff]  }
 0x848   : > { %3343 = vmatprep.subr.bf16.mxu0 %v3640_v4 }
 0x84b   : > { %3344 = vmatpush3.bf16.msra.mxu0 %v3565_v52  ;;  %v3584_v52 = vld [vmem:[%s4332_s3 + $0xf0] sm:$0xff]  }
 0x84c   : > { %3345 = vmatprep.subr.bf16.mxu0 %v3640_v4 }
 0x84f   : > { %3346 = vmatpush3.bf16.msra.mxu0 %v3566_v53  ;;  %v3585_v53 = vld [vmem:[%s4332_s3 + $0xf8] sm:$0xff]  }
 0x850   : > { %3347 = vmatprep.subr.bf16.mxu0 %v3640_v4 }
 0x853   : > { %3348 = vmatpush3.bf16.msra.mxu0 %v3567_v54  ;;  %v3586_v54 = vld [vmem:[%s4332_s3 + $0x2c0] sm:$0xff]  }
 0x854   : > { %3349 = vmatprep.subr.bf16.mxu0 %v3640_v4 }
 0x857   : > { %3350 = vmatpush3.bf16.msra.mxu0 %v3568_v55  ;;  %v3587_v55 = vld [vmem:[%s4332_s3 + $0x2c8] sm:$0xff]  }
 0x858   : > { %3393 = vmatprep.subr.bf16.mxu0 %v3640_v4 }
 0x85a   : > { %3352 = vmatmul.mubr.bf16.vlgmr.msra.gmra.mrb[24].mxu0 %v3809_v34 }
 0x85b   : > { %3394 = vmatpush3.bf16.msra.mxu0 %v3569_v56  ;;  %3409 = vmatprep.mubr.msk.bf16.mxu0 %vm3641_vm1, %v3640_v4  ;;  %v3588_v56 = vld [vmem:[%s4332_s3 + $0x2d0] sm:$0xff]  }
 0x85c   : > { %3395 = vmatprep.subr.bf16.mxu0 %v3640_v4 }
 0x85f   : > { %3396 = vmatpush3.bf16.msra.mxu0 %v3570_v57  ;;  %v3589_v57 = vld [vmem:[%s4332_s3 + $0x2d8] sm:$0xff]  }
 0x860   : > { %3397 = vmatprep.subr.bf16.mxu0 %v3640_v4 }
 0x863   : > { %3398 = vmatpush3.bf16.msra.mxu0 %v3571_v58  ;;  %v3590_v58 = vld [vmem:[%s4332_s3 + $0x2e0] sm:$0xff]  }
 0x864   : > { %3399 = vmatprep.subr.bf16.mxu0 %v3640_v4 }
 0x867   : > { %3400 = vmatpush3.bf16.msra.mxu0 %v3572_v59  ;;  %v3591_v59 = vld [vmem:[%s4332_s3 + $0x2e8] sm:$0xff]  }
 0x868   : > { %3401 = vmatprep.subr.bf16.mxu0 %v3640_v4 }
 0x86b   : > { %3402 = vmatpush3.bf16.msra.mxu0 %v3573_v60  ;;  %v3592_v60 = vld [vmem:[%s4332_s3 + $0x2f0] sm:$0xff]  }
 0x86c   : > { %3403 = vmatprep.subr.bf16.mxu0 %v3640_v4 }
 0x86f   : > { %3404 = vmatpush3.bf16.msra.mxu0 %v3574_v61  ;;  %v3593_v61 = vld [vmem:[%s4332_s3 + $0x2f8] sm:$0xff]  }
 0x870   : > { %3405 = vmatprep.subr.bf16.mxu0 %v3640_v4 }
 0x873   : > { %3406 = vmatpush3.bf16.msra.mxu0 %v3575_v62 }
 0x874   : > { %3407 = vmatprep.subr.bf16.mxu0 %v3640_v4 }
 0x877   : > { %3408 = vmatpush3.bf16.msra.mxu0 %v3576_v63 }
 0x878   : > { %3433 = vmatprep.subr.bf16.mxu0 %v3640_v4 }
 0x87a   : > { %3410 = vmatmul.mubr.bf16.vlgmr.msra.gmra.mrb[28].mxu0 %v3809_v34 }
 0x87b   : > { %3435 = vmatprep.mubr.msk.bf16.mxu0 %vm3641_vm1, %v3640_v4 }
 0x8ed   : > { %v1345_v1 = vpop.f32.mrb[16].mxu0 }
 0x8ee   : > { %v4143_v2 = vadd.f32 %v4022_v14, %v1345_v1  ;;  %v3287_v3 = vpop.f32.mrb[17].mxu0 }
 0x8ef   : > { %v1348_v5 = vpop.f32.mrb[18].mxu0 }
 0x8f0   : > { %v3288_v6 = vpop.f32.mrb[19].mxu0 }
 0x90d   : > { %v1499_v7 = vpop.f32.mrb[20].mxu0 }
 0x90e   : > { %v1715_v8 = vpack.c.bf16 %v1499_v7, %v1499_v7  ;;  %v3313_v9 = vpop.f32.mrb[21].mxu0 }
 0x90f   : > { %v1502_v10 = vpop.f32.mrb[22].mxu0 }
 0x910   : > { %v3314_v11 = vpop.f32.mrb[23].mxu0  ;;  %3358 = vmatmul.mubr.msk.bf16.vlgmr.msra.gmra.mrb[32].mxu1 %vm759_vm2, %v1715_v8 }
 0x911   : > { %3363 = vmatprep.mubr.msk.bf16.mxu1 %vm3641_vm1, %v3640_v4 }
 0x92d   : > { %v1709_v12 = vpop.f32.mrb[24].mxu0 }
 0x92e   : > { %v1776_v13 = vpack.c.bf16 %v1709_v12, %v1709_v12  ;;  %v3353_v15 = vpop.f32.mrb[25].mxu0 }
 0x92f   : > { %v1712_v16 = vpop.f32.mrb[26].mxu0 }
 0x930   : > { %v1781_v14 = vand.u32 %v1776_v13, %v3889_v0  ;;  %v3354_v17 = vpop.f32.mrb[27].mxu0 }
 0x932   : > { %3362 = vmatpush3.bf16.msra.mxu1 %v1781_v14 }
 0x933   : > { %3367 = vmatprep.subr.bf16.mxu1 %v3640_v4 }
 0x94d   : > { %v2081_v18 = vpop.f32.mrb[28].mxu0 }
 0x94e   : > { %v2193_v19 = vpack.c.bf16 %v2081_v18, %v2081_v18  ;;  %v3411_v20 = vpop.f32.mrb[29].mxu0 }
 0x94f   : > { %v2084_v21 = vpop.f32.mrb[30].mxu0 }
 0x950   : > { %v2198_v22 = vsel %vm759_vm2, %v2193_v19, 0  ;;  %v3412_v23 = vpop.f32.mrb[31].mxu0 }
 0x951   : > { %3434 = vmatpush3.bf16.xpose.msra.mxu0 %v2198_v22 }
 0x952   : > { %3439 = vmatprep.subr.bf16.mxu0 %v3640_v4 }
 0x9e3   : > { %v1757_v24 = vpop.f32.mrb[32].mxu1 }
 0x9e4   : > { %v1763_v25 = vmul.f32 0.25, %v1757_v24  ;;  %v3359_v26 = vpop.f32.mrb[33].mxu1 }
 0x9e5   : > { %v1760_v27 = vpop.f32.mrb[34].mxu1 }
 0x9e6   : > { %v3360_v28 = vpop.f32.mrb[35].mxu1  ;;  %v1764_v29 = vsel %vm807_vm5, %v1763_v25, -inf }
 0x9e7   : > { %1765 = vmax.xlane.f32.xlu0 %v1764_v29  ;;  %v3594_v28 = vld [vmem:[%s4333_s4 + $0x18] sm:$0xff]  }
 0xa74   : > { %v1766_v30 = vpop.xlane.xlu0 %1765 }
 0xa75   : > { %v1767_v31 = vsub.f32 %v1763_v25, %v1766_v30 }
 0xa77   : > { %v1768_v32 = vmul.f32 1.442695, %v1767_v31 }
 0xa79   : > { %3617 = vpow2.f32 %v1768_v32 }
 0xa83   : > { %v3618_v33 = vpop.eup %3617 }
 0xa84   : > { %v1770_v35 = vsel %vm807_vm5, %v3618_v33, 0.0 }
 0xa85   : > { %1771 = vadd.xlane.f32.xlu1 %v1770_v35 }
 0xb12   : > { %v1772_v36 = vpop.xlane.xlu1 %1771 }
 0xb13   : > { %3619 = vrcp.f32 %v1772_v36 }
 0xb1d   : > { %v3620_v37 = vpop.eup %3619 }
 0xb1e   : > { %v1774_v38 = vmul.f32 %v3620_v37, %v3618_v33 }
 0xb20   : > { %v1775_v40 = vpack.c.bf16 %v1774_v38, %v1774_v38 }
 0xb22   : > { %3364 = vmatmul.mubr.msk.bf16.vlgmr.msra.gmra.mrb[36].mxu1 %vm821_vm6, %v1775_v40 }
 0xb23   : > { %3368 = vmatpush3.bf16.msra.mxu1 %v3577_v39  ;;  %3369 = vmatprep.mubr.msk.bf16.mxu1 %vm3641_vm1, %v3640_v4  ;;  %v2973_v39 = vld [vmem:[%s4334_s5] ss:$0 sm:$0xff] }
 0xb24   : > { %3373 = vmatprep.subr.bf16.mxu1 %v3640_v4 }
 0xbf5   : > { %v1817_v41 = vpop.f32.mrb[36].mxu1 }
 0xbf6   : > { %v1823_v43 = vpack.c.bf16 %v1817_v41, %v1817_v41  ;;  %v3365_v44 = vpop.f32.mrb[37].mxu1  ;;  %v3631_v41 = vld [vmem:[%s3725_s26] sm:$0x7]  ;;  %s408_s26 = scalar_lea.vmem %s4341_s12, %s2675_s23 }
 0xbf7   : > { %v1820_v45 = vpop.f32.mrb[38].mxu1 }
 0xbf8   : > { %v3366_v46 = vpop.f32.mrb[39].mxu1  ;;  %3370 = vmatmul.mubr.msk.bf16.vlgmr.msra.gmra.mrb[40].mxu1 %vm759_vm2, %v1823_v43 }
 0xbf9   : > { %3374 = vmatpush3.bf16.msra.mxu1 %v3578_v42  ;;  %3389 = vmatprep.mubr.msk.bf16.mxu1 %vm3641_vm1, %v3640_v4  ;;  %v3595_v46 = vld [vmem:[%s4337_s8] sm:$0xff]  }
 0xbfa   : > { %3375 = vmatprep.subr.bf16.mxu1 %v3640_v4 }
 0xbfd   : > { %3376 = vmatpush3.bf16.msra.mxu1 %v3579_v47  ;;  %v3596_v47 = vld [vmem:[%s4337_s8 + $0x8] sm:$0xff]  }
 0xbfe   : > { %3377 = vmatprep.subr.bf16.mxu1 %v3640_v4 }
 0xc01   : > { %3378 = vmatpush3.bf16.msra.mxu1 %v3580_v48 }
 0xc02   : > { %3379 = vmatprep.subr.bf16.mxu1 %v3640_v4 }
 0xc05   : > { %3380 = vmatpush3.bf16.msra.mxu1 %v3581_v49 }
 0xc06   : > { %3381 = vmatprep.subr.bf16.mxu1 %v3640_v4 }
 0xc09   : > { %3382 = vmatpush3.bf16.msra.mxu1 %v3582_v50 }
 0xc0a   : > { %3383 = vmatprep.subr.bf16.mxu1 %v3640_v4 }
 0xc0d   : > { %3384 = vmatpush3.bf16.msra.mxu1 %v3583_v51 }
 0xc0e   : > { %3385 = vmatprep.subr.bf16.mxu1 %v3640_v4 }
 0xc11   : > { %3386 = vmatpush3.bf16.msra.mxu1 %v3584_v52 }
 0xc12   : > { %3387 = vmatprep.subr.bf16.mxu1 %v3640_v4 }
 0xc15   : > { %3388 = vmatpush3.bf16.msra.mxu1 %v3585_v53  ;;  %v3597_v53 = vld [vmem:[%s4337_s8 + $0x10] sm:$0xff]  }
 0xc16   : > { %3413 = vmatprep.subr.bf16.mxu1 %v3640_v4 }
 0xc18   : > { %3390 = vmatmul.mubr.bf16.vlgmr.msra.gmra.mrb[44].mxu1 %v3809_v34 }
 0xc19   : > { %3414 = vmatpush3.bf16.msra.mxu1 %v3586_v54  ;;  %3429 = vmatprep.mubr.msk.bf16.mxu1 %vm3641_vm1, %v3640_v4  ;;  %v3598_v54 = vld [vmem:[%s4337_s8 + $0x18] sm:$0xff]  }
 0xc1a   : > { %3415 = vmatprep.subr.bf16.mxu1 %v3640_v4 }
 0xc1d   : > { %3416 = vmatpush3.bf16.msra.mxu1 %v3587_v55  ;;  %v3599_v55 = vld [vmem:[%s4337_s8 + $0x20] sm:$0xff]  }
 0xc1e   : > { %3417 = vmatprep.subr.bf16.mxu1 %v3640_v4 }
 0xc21   : > { %3418 = vmatpush3.bf16.msra.mxu1 %v3588_v56  ;;  %v3600_v56 = vld [vmem:[%s4337_s8 + $0x28] sm:$0xff]  }
 0xc22   : > { %3419 = vmatprep.subr.bf16.mxu1 %v3640_v4 }
 0xc25   : > { %3420 = vmatpush3.bf16.msra.mxu1 %v3589_v57  ;;  %v3601_v57 = vld [vmem:[%s4337_s8 + $0x30] sm:$0xff]  }
 0xc26   : > { %3421 = vmatprep.subr.bf16.mxu1 %v3640_v4 }
 0xc29   : > { %3422 = vmatpush3.bf16.msra.mxu1 %v3590_v58  ;;  %v3602_v58 = vld [vmem:[%s4337_s8 + $0x38] sm:$0xff]  }
 0xc2a   : > { %3423 = vmatprep.subr.bf16.mxu1 %v3640_v4 }
 0xc2d   : > { %3424 = vmatpush3.bf16.msra.mxu1 %v3591_v59 }
 0xc2e   : > { %3425 = vmatprep.subr.bf16.mxu1 %v3640_v4 }
 0xc31   : > { %3426 = vmatpush3.bf16.msra.mxu1 %v3592_v60 }
 0xc32   : > { %3427 = vmatprep.subr.bf16.mxu1 %v3640_v4 }
 0xc35   : > { %3428 = vmatpush3.bf16.msra.mxu1 %v3593_v61 }
 0xc36   : > { %3471 = vmatprep.subr.bf16.mxu1 %v3640_v4 }
 0xc38   : > { %3430 = vmatmul.mubr.bf16.vlgmr.msra.gmra.mrb[48].mxu1 %v3809_v34 }
 0xc39   : > { %3479 = vmatprep.mubr.msk.bf16.mxu1 %vm3641_vm1, %v3640_v4 }
 0xccb   : > { %v1870_v62 = vpop.f32.mrb[40].mxu1 }
 0xccc   : > { %v1876_v63 = vadd.f32 %v1870_v62, %v4143_v2  ;;  %v3371_v1 = vpop.f32.mrb[41].mxu1 }
 0xccd   : > { %v1873_v3 = vpop.f32.mrb[42].mxu1 }
 0xcce   : > { %v3372_v5 = vpop.f32.mrb[43].mxu1  ;;  %v2975_v3 = vld [vmem:[%s4336_s7] ss:$0 sm:$0xff] }
 0xceb   : > { %v1976_v6 = vpop.f32.mrb[44].mxu1 }
 0xcec   : > { %v2192_v7 = vpack.c.bf16 %v1976_v6, %v1976_v6  ;;  %v3391_v8 = vpop.f32.mrb[45].mxu1 }
 0xced   : > { %v1979_v9 = vpop.f32.mrb[46].mxu1  ;;  %v3603_v8 = vld [vmem:[%s4339_s10] sm:$0xff]  }
 0xcee   : > { %v3392_v10 = vpop.f32.mrb[47].mxu1  ;;  %3436 = vmatmul.mubr.msk.bf16.vlgmr.msra.gmra.mrb[32].mxu0 %vm759_vm2, %v2192_v7  ;;  %3472 = vmatpush3.bf16.msra.mxu1 %v3603_v8  ;;  %v3604_v9 = vld [vmem:[%s4339_s10 + $0x8] sm:$0xff]  }
 0xcef   : > { %3441 = vmatprep.mubr.msk.bf16.mxu0 %vm3641_vm1, %v3640_v4  ;;  %3473 = vmatprep.subr.bf16.mxu1 %v3640_v4  ;;  %v3605_v10 = vld [vmem:[%s4339_s10 + $0x10] sm:$0xff]  }
 0xcf2   : > { %3474 = vmatpush3.bf16.msra.mxu1 %v3604_v9 }
 0xcf3   : > { %3475 = vmatprep.subr.bf16.mxu1 %v3640_v4 }
 0xcf6   : > { %3476 = vmatpush3.bf16.msra.mxu1 %v3605_v10 }
 0xcf7   : > { %3477 = vmatprep.subr.bf16.mxu1 %v3640_v4 }
 0xd0b   : > { %v2186_v34 = vpop.f32.mrb[48].mxu1 }
 0xd0c   : > { %v2253_v11 = vpack.c.bf16 %v2186_v34, %v2186_v34  ;;  %v3431_v12 = vpop.f32.mrb[49].mxu1  ;;  %v3606_v34 = vld [vmem:[%s4339_s10 + $0x18] sm:$0xff]  }
 0xd0d   : > { %v2189_v13 = vpop.f32.mrb[50].mxu1  ;;  %3478 = vmatpush3.bf16.msra.mxu1 %v3606_v34 }
 0xd0e   : > { %v2258_v15 = vand.u32 %v2253_v11, %v3889_v0  ;;  %v3432_v2 = vpop.f32.mrb[51].mxu1  ;;  %v2976_v11 = vld [vmem:[%s4338_s9] ss:$0 sm:$0xff] }
 0xd10   : > { %3440 = vmatpush3.bf16.msra.mxu0 %v2258_v15 }
 0xd11   : > { %3445 = vmatprep.subr.bf16.mxu0 %v3640_v4 }
 0xdc1   : > { %v2234_v16 = vpop.f32.mrb[32].mxu0 }
 0xdc2   : > { %v2240_v14 = vmul.f32 0.25, %v2234_v16  ;;  %v3437_v17 = vpop.f32.mrb[33].mxu0 }
 0xdc3   : > { %v2237_v18 = vpop.f32.mrb[34].mxu0 }
 0xdc4   : > { %v3438_v19 = vpop.f32.mrb[35].mxu0  ;;  %v2241_v20 = vsel %vm807_vm5, %v2240_v14, -inf }
 0xdc5   : > { %2242 = vmax.xlane.f32.xlu0 %v2241_v20 }
 0xe52   : > { %v2243_v21 = vpop.xlane.xlu0 %2242 }
 0xe53   : > { %v2244_v22 = vsub.f32 %v2240_v14, %v2243_v21 }
 0xe55   : > { %v2245_v23 = vmul.f32 1.442695, %v2244_v22 }
 0xe57   : > { %3621 = vpow2.f32 %v2245_v23 }
 0xe61   : > { %v3622_v24 = vpop.eup %3621 }
 0xe62   : > { %v2247_v25 = vsel %vm807_vm5, %v3622_v24, 0.0 }
 0xe63   : > { %2248 = vadd.xlane.f32.xlu1 %v2247_v25 }
 0xef0   : > { %v2249_v0 = vpop.xlane.xlu1 %2248 }
 0xef1   : > { %3623 = vrcp.f32 %v2249_v0 }
 0xefb   : > { %v3624_v26 = vpop.eup %3623 }
 0xefc   : > { %v2251_v27 = vmul.f32 %v3624_v26, %v3622_v24 }
 0xefe   : > { %v2252_v29 = vpack.c.bf16 %v2251_v27, %v2251_v27 }
 0xf00   : > { %3442 = vmatmul.mubr.msk.bf16.vlgmr.msra.gmra.mrb[36].mxu0 %vm821_vm6, %v2252_v29 }
 0xf01   : > { %3446 = vmatpush3.bf16.msra.mxu0 %v3594_v28  ;;  %3447 = vmatprep.mubr.msk.bf16.mxu0 %vm3641_vm1, %v3640_v4 }
 0xf02   : > { %3451 = vmatprep.subr.bf16.mxu0 %v3640_v4 }
 0xfd3   : > { %v2294_v30 = vpop.f32.mrb[36].mxu0 }
 0xfd4   : > { %v2300_v31 = vpack.c.bf16 %v2294_v30, %v2294_v30  ;;  %v3443_v32 = vpop.f32.mrb[37].mxu0 }
 0xfd5   : > { %v2297_v33 = vpop.f32.mrb[38].mxu0 }
 0xfd6   : > { %v3444_v35 = vpop.f32.mrb[39].mxu0  ;;  %3448 = vmatmul.mubr.msk.bf16.vlgmr.msra.gmra.mrb[40].mxu0 %vm759_vm2, %v2300_v31 }
 0xfd7   : > { %3467 = vmatprep.mubr.msk.bf16.mxu0 %vm3641_vm1, %v3640_v4  ;;  %3452 = vmatpush3.bf16.msra.mxu0 %v3595_v46  ;;  %v3643_v35 = vmov -1.0  }
 0xfd8   : > { %3453 = vmatprep.subr.bf16.mxu0 %v3640_v4 }
 0xfdb   : > { %3454 = vmatpush3.bf16.msra.mxu0 %v3596_v47 }
 0xfdc   : > { %3455 = vmatprep.subr.bf16.mxu0 %v3640_v4 }
 0xfdf   : > { %3456 = vmatpush3.bf16.msra.mxu0 %v3597_v53 }
 0xfe0   : > { %3457 = vmatprep.subr.bf16.mxu0 %v3640_v4 }
 0xfe3   : > { %3458 = vmatpush3.bf16.msra.mxu0 %v3598_v54 }
 0xfe4   : > { %3459 = vmatprep.subr.bf16.mxu0 %v3640_v4 }
 0xfe7   : > { %3460 = vmatpush3.bf16.msra.mxu0 %v3599_v55 }
 0xfe8   : > { %3461 = vmatprep.subr.bf16.mxu0 %v3640_v4 }
 0xfeb   : > { %3462 = vmatpush3.bf16.msra.mxu0 %v3600_v56 }
 0xfec   : > { %3463 = vmatprep.subr.bf16.mxu0 %v3640_v4 }
 0xfef   : > { %3464 = vmatpush3.bf16.msra.mxu0 %v3601_v57 }
 0xff0   : > { %3465 = vmatprep.subr.bf16.mxu0 %v3640_v4 }
 0xff3   : > { %3466 = vmatpush3.bf16.msra.mxu0 %v3602_v58 }
0x10a9   : > { %v2347_v36 = vpop.f32.mrb[40].mxu0 }
0x10aa   : > { %v2353_v37 = vadd.f32 %v2347_v36, %v1876_v63  ;;  %v3449_v38 = vpop.f32.mrb[41].mxu0  ;;  %v2974_v63 = vld [vmem:[%s4335_s6] ss:$0 sm:$0xff] }
0x10ab   : > { %v2350_v40 = vpop.f32.mrb[42].mxu0 }
0x10ac   : > { %v2354_v42 = vadd.f32 %v3631_v41, %v2353_v37  ;;  %v3450_v43 = vpop.f32.mrb[43].mxu0 }
0x10ae   : > { %v4256_v44 = vadd.f32 %v2973_v39, %v2354_v42  ;;  %v2985_v42 = vld [vmem:[%s4340_s11] ss:$0 sm:$0xff] }
0x10b0   : > { %v2365_v45 = vsel %vm413_vm0, %v4256_v44, 0.0 }
0x10b1   : > { %2366 = vadd.xlane.f32.xlu0 %v2365_v45 }
0x113e   : > { %v2367_v48 = vpop.xlane.xlu0 %2366 }
0x113f   : > { %v2368_v49 = vmul.f32 0.0078125, %v2367_v48 }
0x1141   : > { %v2369_v50 = vsub.f32 %v4256_v44, %v2368_v49 }
0x1143   : > { %v2370_v51 = vmul.f32 %v2369_v50, %v2369_v50 }
0x1145   : > { %v2371_v52 = vsel %vm413_vm0, %v2370_v51, 0.0 }
0x1146   : > { %2372 = vadd.xlane.f32.xlu1 %v2371_v52 }
0x11d3   : > { %v2373_v59 = vpop.xlane.xlu1 %2372 }
0x11d4   : > { %v2374_v60 = vmul.f32 0.0078125, %v2373_v59 }
0x11d6   : > { %v2375_v61 = vadd.f32 1e-05, %v2374_v60 }
0x11d8   : > { %3625 = vrsqrt.f32 %v2375_v61 }
0x11e2   : > { %v3626_v62 = vpop.eup %3625 }
0x11e3   : > { %v2377_v1 = vmul.f32 %v3626_v62, %v2369_v50 }
0x11e5   : > { %v2384_v5 = vmul.f32 %v2974_v63, %v2377_v1 }
0x11e7   : > { %v2391_v6 = vadd.f32 %v2975_v3, %v2384_v5 }
0x11e9   : > { %v2408_v7 = vpack.c.bf16 %v2391_v6, %v2391_v6 }
0x11eb   : > { %3468 = vmatmul.mubr.bf16.vlgmr.msra.gmra.mrb[44].mxu0 %v2408_v7 }
0x12be   : > { %v2498_v12 = vpop.f32.mrb[44].mxu0 }
0x12bf   : > { %v2499_v13 = vadd.f32 %v2976_v11, %v2498_v12  ;;  %v3469_v15 = vpop.f32.mrb[45].mxu0 }
0x12c0   : > { %v2501_v2 = vpop.f32.mrb[46].mxu0 }
0x12c1   : > { %v2505_v16 = vmul.f32 0.70710677, %v2499_v13  ;;  %v3470_v14 = vpop.f32.mrb[47].mxu0  ;;  %v2504_v38 = vmul.f32 0.5, %v2499_v13 }
0x12c3   : > { %v2508_v17 = vand.u32 2147483647, %v2505_v16  ;;  %vm2506_vm7 = vcmp.ge.f32.partialorder %v2505_v16, 0.0 }
0x12c4   : > { %v2507_v36 = vsel %vm2506_vm7, 1.0, %v3643_v35 }
0x12c5   : > { %v2509_v18 = vmul.f32 0.3275911, %v2508_v17  ;;  %v2522_v4 = vsub.f32 0.0, %v2508_v17 }
0x12c7   : > { %v2510_v19 = vadd.f32 1.0, %v2509_v18  ;;  %v2523_v21 = vmul.f32 %v2522_v4, %v2508_v17 }
0x12c9   : > { %3627 = vrcp.f32 %v2510_v19  ;;  %v2524_v24 = vmul.f32 1.442695, %v2523_v21 }
0x12cb   : > { %3629 = vpow2.f32 %v2524_v24 }
0x12d3   : > { %v3628_v20 = vpop.eup %3627 }
0x12d4   : > { %v2513_v22 = vmul.f32 1.0614054, %v3628_v20 }
0x12d5   : > { %v3630_v31 = vpop.eup %3629 }
0x12d6   : > { %v2514_v23 = vadd.f32 -1.4531521, %v2513_v22 }
0x12d8   : > { %v2515_v25 = vmul.f32 %v3628_v20, %v2514_v23 }
0x12da   : > { %v2516_v0 = vadd.f32 1.4214138, %v2515_v25 }
0x12dc   : > { %v2517_v26 = vmul.f32 %v3628_v20, %v2516_v0 }
0x12de   : > { %v2518_v27 = vadd.f32 -0.28449672, %v2517_v26 }
0x12e0   : > { %v2519_v28 = vmul.f32 %v3628_v20, %v2518_v27 }
0x12e2   : > { %v2520_v29 = vadd.f32 0.2548296, %v2519_v28 }
0x12e4   : > { %v2521_v30 = vmul.f32 %v3628_v20, %v2520_v29 }
0x12e6   : > { %v2526_v32 = vmul.f32 %v3630_v31, %v2521_v30 }
0x12e8   : > { %v2527_v33 = vsub.f32 1.0, %v2526_v32 }
0x12ea   : > { %v2528_v37 = vmul.f32 %v2527_v33, %v2507_v36 }
0x12ec   : > { %v2529_v39 = vadd.f32 1.0, %v2528_v37 }
0x12ee   : > { %v2530_v40 = vmul.f32 %v2529_v39, %v2504_v38 }
0x12f0   : > { %v2539_v41 = vpack.c.bf16 %v2530_v40, %v2530_v40 }
0x12f2   : > { %3480 = vmatmul.mubr.msk.bf16.vlgmr.msra.gmra.mrb[52].mxu1 %vm2571_vm8, %v2539_v41 }
0x13c5   : > { %v2609_v43 = vpop.f32.mrb[52].mxu1 }
0x13c6   : > { %v2610_v45 = vadd.f32 %v2985_v42, %v2609_v43  ;;  %v3481_v46 = vpop.f32.mrb[53].mxu1 }
0x13c7   : > { %v2612_v47 = vpop.f32.mrb[54].mxu1 }
0x13c8   : > { %v2615_v48 = vadd.f32 %v2610_v45, %v4256_v44  ;;  %v3482_v49 = vpop.f32.mrb[55].mxu1 }
0x13ca   : > { %2616 = vst [vmem:[%s408_s26] sm:$0x7] %v2615_v48 }
0x13cb PF: > { %s22_s21 = sadd.s32 1, %s3638_s21  }
0x13cc   : > { %p19_p4 = scmp.ge.s32.totalorder %s22_s21, 4  }
0x13ce   :  { %21 = sbr.rel (!%p19_p4) target bundleno = 1 (0x1), region = 112 }

// kernel: cst_forward.7
= control target key start
LH: loop header
LB: loop body
LE: loop exit
PB: predicated region body
PF: predicated region fallthrough
CT: control target
= control target key end

     0   :  { %v8026_v0 = vmov 0.0   ;;  %vm8027_vm0 = vmmov 0   ;;  %vm109_vm1 = vcmask 1041409   ;;  %vm112_vm2 = vcmask 1042434   ;;  %s10023_s1 = inlined_call_operand.vmem [shape: bf16[128,128], index: 1, kind: input, shape index: {}]   ;;  %s10024_s0 = inlined_call_operand.vmem [shape: f32[4,5,128], index: 0, kind: input, shape index: {}]   ;;  %s10025_s2 = inlined_call_operand.vmem [shape: f32[1,128], index: 2, kind: input, shape index: {}]   ;;  %s10026_s5 = inlined_call_operand.vmem [shape: bf16[128,384], index: 5, kind: input, shape index: {}]   ;;  %s10027_s3 = inlined_call_operand.vmem [shape: f32[1,128], index: 3, kind: input, shape index: {}]   ;;  %s10028_s4 = inlined_call_operand.vmem [shape: f32[1,128], index: 4, kind: input, shape index: {}]   ;;  %s10029_s7 = inlined_call_operand.vmem [shape: bf16[128,128], index: 7, kind: input, shape index: {}]   ;;  %s10030_s6 = inlined_call_operand.vmem [shape: f32[1,384], index: 6, kind: input, shape index: {}]   ;;  %s10031_s8 = inlined_call_operand.vmem [shape: f32[1,128], index: 8, kind: input, shape index: {}]   ;;  %s10032_s11 = inlined_call_operand.vmem [shape: bf16[128,384], index: 11, kind: input, shape index: {}]   ;;  %s10033_s9 = inlined_call_operand.vmem [shape: f32[1,128], index: 9, kind: input, shape index: {}]   ;;  %s10034_s10 = inlined_call_operand.vmem [shape: f32[1,128], index: 10, kind: input, shape index: {}]   ;;  %s10035_s13 = inlined_call_operand.vmem [shape: bf16[128,128], index: 13, kind: input, shape index: {}]   ;;  %s10036_s12 = inlined_call_operand.vmem [shape: f32[1,384], index: 12, kind: input, shape index: {}]   ;;  %s10037_s14 = inlined_call_operand.vmem [shape: f32[1,128], index: 14, kind: input, shape index: {}]   ;;  %s10038_s17 = inlined_call_operand.vmem [shape: bf16[128,512], index: 17, kind: input, shape index: {}]   ;;  %s10039_s15 = inlined_call_operand.vmem [shape: f32[1,128], index: 15, kind: input, shape index: {}]   ;;  %s10040_s16 = inlined_call_operand.vmem [shape: f32[1,128], index: 16, kind: input, shape index: {}]   ;;  %s10041_s19 = inlined_call_operand.vmem [shape: bf16[512,128], index: 19, kind: input, shape index: {}]   ;;  %s10042_s18 = inlined_call_operand.vmem [shape: f32[1,512], index: 18, kind: input, shape index: {}]   ;;  %s10043_s20 = inlined_call_operand.vmem [shape: f32[1,128], index: 20, kind: input, shape index: {}]   ;;  %s10044_s21 = inlined_call_operand.vmem [shape: f32[4,5,128], index: 21, kind: output, shape index: {}]  }
   0x1   :  { %10048 = sst [smem:[#allocation2_spill]] %s10023_s1  ;;  %7077 = vmatprep.subr.bf16.mxu0 %v8026_v0  ;;  %7093 = vmatprep.mubr.msk.bf16.mxu0 %vm8027_vm0, %v8026_v0  ;;  %vm115_vm3 = vcmask 1043459   ;;  %vm209_vm4 = vcmask 1043456   ;;  %v8028_v59 = vmov 0   ;;  %vm532_vm5 = vcmask 1041408  }
   0x2   :  { %10049 = sst [smem:[#allocation3_spill]] %s10024_s0  ;;  %s10054_s26 = sld [smem:[#allocation2_spill]]  ;;  %448 = vmatprep.mubr.bf16.mxu1 %v8028_v59  ;;  %vm601_vm6 = vcmask 1043458   ;;  %vm794_vm7 = vcmask 1044480   ;;  %vm798_vm8 = vcmask 1045504   ;;  %vm1368_vm9 = vcmask 1044484  }
   0x3   :  { %10050 = sst [smem:[#allocation4_spill]] %s10025_s2  ;;  %s10055_s30 = sld [smem:[#allocation3_spill]]  ;;  %vm1370_vm10 = vcmask 1045509  }
   0x4   :  { %10051 = sst [smem:[#allocation5_spill]] %s10026_s5  ;;  %s10056_s2 = sld [smem:[#allocation4_spill]] }
   0x5   :  { %10052 = sst [smem:[#allocation6_spill]] %s10027_s3  ;;  %s10057_s27 = sld [smem:[#allocation5_spill]] }
   0x6   :  { %10053 = sst [smem:[#allocation7_spill]] %s10028_s4  ;;  %s10058_s24 = sld [smem:[#allocation6_spill]] }
   0x8   :  { %v7301_v1 = vld [vmem:[%s10054_s26] sm:$0xff]   ;;  %v7302_v2 = vld [vmem:[%s10054_s26 + $0x8] sm:$0xff]   ;;  %v7303_v3 = vld [vmem:[%s10054_s26 + $0x10] sm:$0xff]  }
   0x9   :  { %7078 = vmatpush3.bf16.msra.mxu0 %v7301_v1  ;;  %v70_v4 = vld [vmem:[%s10055_s30 + $0x8] sm:$0x1f]  ;;  %v71_v5 = vld [vmem:[%s10055_s30 + $0x10] sm:$0x1f]  ;;  %v8163_v6 = vld [vmem:[%s10055_s30] sm:$0x1f] }
   0xa   :  { %7079 = vmatprep.subr.bf16.mxu0 %v8026_v0  ;;  %v90_v7 = vpack.c.bf16 %v70_v4, %v70_v4  ;;  %v7304_v8 = vld [vmem:[%s10054_s26 + $0x18] sm:$0xff]   ;;  %v91_v10 = vpack.c.bf16 %v71_v5, %v71_v5  ;;  %v89_v11 = vpack.c.bf16 %v8163_v6, %v8163_v6  ;;  %v7305_v13 = vld [vmem:[%s10054_s26 + $0x20] sm:$0xff]   ;;  %v7306_v18 = vld [vmem:[%s10054_s26 + $0x28] sm:$0xff]  }
   0xb   :  { %v72_v9 = vld [vmem:[%s10055_s30 + $0x18] sm:$0x1f]  ;;  %v7307_v22 = vld [vmem:[%s10054_s26 + $0x30] sm:$0xff]   ;;  %v6331_v28 = vld [vmem:[%s10056_s2] ss:$0 sm:$0xff] }
   0xc   :  { %v105_v12 = vunpack.c.l.b16 %v90_v7  ;;  %v92_v14 = vpack.c.bf16 %v72_v9, %v72_v9  ;;  %v106_v15 = vunpack.c.l.b16 %v91_v10  ;;  %v104_v16 = vunpack.c.l.b16 %v89_v11  ;;  %v7308_v25 = vld [vmem:[%s10054_s26 + $0x38] sm:$0xff]   ;;  %v7309_v35 = vld [vmem:[%s10057_s27 + $0x4] ss:$12 sps:$4 sm:$0xff]   ;;  %v7311_v36 = vld [vmem:[%s10057_s27] ss:$12 sps:$4 sm:$0xff]  }
   0xd   :  { %7080 = vmatpush3.bf16.msra.mxu0 %v7302_v2  ;;  %416 = vmatprep.subr.bf16.mxu1 %v7309_v35  ;;  %v7312_v37 = vld [vmem:[%s10057_s27 + $0x8] ss:$12 sps:$4 sm:$0xff]   ;;  %v7315_v39 = vld [vmem:[%s10057_s27 + $0x18] ss:$12 sps:$4 sm:$0xff]   ;;  %v7316_v40 = vld [vmem:[%s10057_s27 + $0x20] ss:$12 sps:$4 sm:$0xff]  }
   0xe   :  { %7081 = vmatprep.subr.bf16.mxu0 %v8026_v0  ;;  %v108_v17 = vrot.slane %v105_v12, 7  ;;  %v107_v19 = vunpack.c.l.b16 %v92_v14  ;;  %v111_v20 = vrot.slane %v106_v15, 6  ;;  %417 = vmatpush1.bf16.msra.mxu1 %v7311_v36  ;;  %v7313_v38 = vld [vmem:[%s10057_s27 + $0x1c] ss:$12 sps:$4 sm:$0xff]   ;;  %v7317_v41 = vld [vmem:[%s10057_s27 + $0x34] ss:$12 sps:$4 sm:$0xff]  }
   0xf   :  { %418 = vmatprep.subr.bf16.mxu1 %v7313_v38  ;;  %v7319_v47 = vld [vmem:[%s10057_s27 + $0x30] ss:$12 sps:$4 sm:$0xff]   ;;  %v7320_v48 = vld [vmem:[%s10057_s27 + $0x38] ss:$12 sps:$4 sm:$0xff]   ;;  %v7323_v50 = vld [vmem:[%s10057_s27 + $0x48] ss:$12 sps:$4 sm:$0xff]  }
  0x10   :  { %v110_v21 = vsel %vm109_vm1, %v108_v17, %v104_v16  ;;  %v114_v23 = vrot.slane %v107_v19, 5  ;;  %v7321_v49 = vld [vmem:[%s10057_s27 + $0x4c] ss:$12 sps:$4 sm:$0xff]   ;;  %v7324_v51 = vld [vmem:[%s10057_s27 + $0x50] ss:$12 sps:$4 sm:$0xff]   ;;  %v7345_v17 = vld [vmem:[%s10029_s7 + $0x20] sm:$0xff]  }
  0x11   :  { %7082 = vmatpush3.bf16.msra.mxu0 %v7303_v3  ;;  %v113_v24 = vsel %vm112_vm2, %v111_v20, %v110_v21  ;;  %v7325_v52 = vld [vmem:[%s10057_s27 + $0x64] ss:$12 sps:$4 sm:$0xff]   ;;  %v7327_v53 = vld [vmem:[%s10057_s27 + $0x60] ss:$12 sps:$4 sm:$0xff]   ;;  %v7328_v54 = vld [vmem:[%s10057_s27 + $0x68] ss:$12 sps:$4 sm:$0xff]   ;;  %v273_v21 = vlaneseq }
  0x12   :  { %7083 = vmatprep.subr.bf16.mxu0 %v8026_v0  ;;  %v116_v26 = vsel %vm115_vm3, %v114_v23, %v113_v24  ;;  %419 = vmatpush1.bf16.msra.mxu1 %v7315_v39  ;;  %v7329_v55 = vld [vmem:[%s10057_s27 + $0x7c] ss:$12 sps:$4 sm:$0xff]   ;;  %v7331_v56 = vld [vmem:[%s10057_s27 + $0x78] ss:$12 sps:$4 sm:$0xff]   ;;  %v7332_v57 = vld [vmem:[%s10057_s27 + $0x80] ss:$12 sps:$4 sm:$0xff]  }
  0x13   :  { %v117_v27 = vpack.c.b16 %v116_v26, %v116_v26  ;;  %420 = vmatprep.subr.bf16.mxu1 %v7317_v41  ;;  %v7333_v58 = vld [vmem:[%s10057_s27 + $0x94] ss:$12 sps:$4 sm:$0xff]   ;;  %v7335_v60 = vld [vmem:[%s10057_s27 + $0x90] ss:$12 sps:$4 sm:$0xff]   ;;  %v7336_v61 = vld [vmem:[%s10057_s27 + $0x98] ss:$12 sps:$4 sm:$0xff]  }
  0x14   :  { %v7337_v62 = vld [vmem:[%s10057_s27 + $0xac] ss:$12 sps:$4 sm:$0xff]   ;;  %v7339_v63 = vld [vmem:[%s10057_s27 + $0xa8] ss:$12 sps:$4 sm:$0xff]   ;;  %v7340_v1 = vld [vmem:[%s10057_s27 + $0xb0] ss:$12 sps:$4 sm:$0xff]  }
  0x15   :  { %7084 = vmatpush3.bf16.msra.mxu0 %v7304_v8  ;;  %v6340_v7 = vld [vmem:[%s10058_s24] ss:$0 sm:$0xff]  ;;  %s10059_s27 = sld [smem:[#allocation7_spill]]  ;;  %v7342_v14 = vld [vmem:[%s10029_s7 + $0x8] sm:$0xff]   ;;  %v7343_v15 = vld [vmem:[%s10029_s7 + $0x10] sm:$0xff]  }
  0x16   :  { %7085 = vmatprep.subr.bf16.mxu0 %v8026_v0  ;;  %421 = vmatpush1.bf16.msra.mxu1 %v7319_v47  ;;  %v7344_v16 = vld [vmem:[%s10029_s7 + $0x18] sm:$0xff]   ;;  %v7347_v19 = vld [vmem:[%s10029_s7 + $0x30] sm:$0xff]   ;;  %v8029_v23 = vmov 1966171168   ;;  %v8335_v26 = vld [vmem:[%s10030_s6] sm:$0x7] }
  0x17   :  { %422 = vmatprep.subr.bf16.mxu1 %v7321_v49  ;;  %v7348_v20 = vld [vmem:[%s10029_s7 + $0x38] sm:$0xff]   ;;  %v499_v24 = vunpack.c.l.s4 %v8029_v23 }
  0x19   :  { %7086 = vmatpush3.bf16.msra.mxu0 %v7305_v13  ;;  %v7341_v13 = vld [vmem:[%s10029_s7] sm:$0xff]  }
  0x1a   :  { %7087 = vmatprep.subr.bf16.mxu0 %v8026_v0  ;;  %423 = vmatpush1.bf16.msra.mxu1 %v7323_v50 }
  0x1b   :  { %424 = vmatprep.subr.bf16.mxu1 %v7325_v52  ;;  %v6341_v9 = vld [vmem:[%s10059_s27] ss:$0 sm:$0xff] }
  0x1d   :  { %7088 = vmatpush3.bf16.msra.mxu0 %v7306_v18  ;;  %v7346_v18 = vld [vmem:[%s10029_s7 + $0x28] sm:$0xff]  }
  0x1e   :  { %7089 = vmatprep.subr.bf16.mxu0 %v8026_v0  ;;  %425 = vmatpush1.bf16.msra.mxu1 %v7327_v53 }
  0x1f   :  { %426 = vmatprep.subr.bf16.mxu1 %v7329_v55 }
  0x21   :  { %7090 = vmatpush3.bf16.msra.mxu0 %v7307_v22  ;;  %v8327_v22 = vshrl.u32 %v273_v21, 7 }
  0x22   :  { %7091 = vmatprep.subr.bf16.mxu0 %v8026_v0  ;;  %427 = vmatpush1.bf16.msra.mxu1 %v7331_v56 }
  0x23   :  { %428 = vmatprep.subr.bf16.mxu1 %v7333_v58 }
  0x25   :  { %7092 = vmatpush3.bf16.msra.mxu0 %v7308_v25  ;;  %v8330_v25 = vsub.s32 0, %v8327_v22 }
  0x26   :  { %7097 = vmatprep.subr.bf16.mxu0 %v8026_v0  ;;  %429 = vmatpush1.bf16.msra.mxu1 %v7335_v60 }
  0x27   :  { %430 = vmatprep.subr.bf16.mxu1 %v7337_v62 }
  0x28   :  { %7094 = vmatmul.mubr.bf16.vlgmr.msra.gmra.mrb[0].mxu0 %v117_v27  ;;  %v500_v27 = vunpack.c.0.s8 %v499_v24 }
  0x29   :  { %7113 = vmatprep.mubr.msk.bf16.mxu0 %vm8027_vm0, %v8026_v0  ;;  %7098 = vmatpush3.bf16.msra.mxu0 %v7312_v37 }
  0x2a   :  { %7099 = vmatprep.subr.bf16.mxu0 %v8026_v0  ;;  %431 = vmatpush1.bf16.msra.mxu1 %v7339_v63 }
  0x2b   :  { %7117 = vmatprep.subr.bf16.mxu1 %v8026_v0 }
  0x2d   :  { %7100 = vmatpush3.bf16.msra.mxu0 %v7316_v40 }
  0x2e   :  { %7101 = vmatprep.subr.bf16.mxu0 %v8026_v0 }
  0x31   :  { %7102 = vmatpush3.bf16.msra.mxu0 %v7320_v48 }
  0x32   :  { %7103 = vmatprep.subr.bf16.mxu0 %v8026_v0 }
  0x35   :  { %7104 = vmatpush3.bf16.msra.mxu0 %v7324_v51 }
  0x36   :  { %7105 = vmatprep.subr.bf16.mxu0 %v8026_v0 }
  0x39   :  { %7106 = vmatpush3.bf16.msra.mxu0 %v7328_v54 }
  0x3a   :  { %7107 = vmatprep.subr.bf16.mxu0 %v8026_v0 }
  0x3d   :  { %7108 = vmatpush3.bf16.msra.mxu0 %v7332_v57 }
  0x3e   :  { %7109 = vmatprep.subr.bf16.mxu0 %v8026_v0 }
  0x41   :  { %7110 = vmatpush3.bf16.msra.mxu0 %v7336_v61 }
  0x42   :  { %7111 = vmatprep.subr.bf16.mxu0 %v8026_v0 }
  0x45   :  { %7112 = vmatpush3.bf16.msra.mxu0 %v7340_v1 }
  0xfb   :  { %v201_v29 = vpop.f32.mrb[0].mxu0 }
  0xfc   :  { %v8199_v30 = vadd.f32 %v6331_v28, %v201_v29  ;;  %v7095_v31 = vpop.f32.mrb[1].mxu0  ;;  %v276_v28 = vrot.slane %v8335_v26, %v8330_v25  ;;  %v8340_v29 = vsub.s32 %v500_v27, %v8327_v22 }
  0xfd   :  { %v204_v32 = vpop.f32.mrb[2].mxu0  ;;  %v8343_v31 = vsub.s32 1, %v8327_v22 }
  0xfe   :  { %v7096_v33 = vpop.f32.mrb[3].mxu0  ;;  %v210_v34 = vsel %vm209_vm4, %v8199_v30, 0.0 }
  0xff   :  { %211 = vadd.xlane.f32.xlu0 %v210_v34  ;;  %v280_v40 = vrot.slane %v8335_v26, %v8343_v31 }
 0x18c   :  { %v212_v42 = vpop.xlane.xlu0 %211 }
 0x18d   :  { %v214_v43 = vmul.f32 0.0078125, %v212_v42 }
 0x18f   :  { %v215_v44 = vsub.f32 %v8199_v30, %v214_v43 }
 0x191   :  { %v216_v45 = vmul.f32 %v215_v44, %v215_v44 }
 0x193   :  { %v217_v46 = vsel %vm209_vm4, %v216_v45, 0.0 }
 0x194   :  { %218 = vadd.xlane.f32.xlu0 %v217_v46 }
 0x221   :  { %v219_v2 = vpop.xlane.xlu0 %218 }
 0x222   :  { %v220_v3 = vmul.f32 0.0078125, %v219_v2 }
 0x224   :  { %v221_v4 = vadd.f32 1e-05, %v220_v3 }
 0x226   :  { %7829 = vrsqrt.f32 %v221_v4 }
 0x230   :  { %v7830_v5 = vpop.eup %7829 }
 0x231   :  { %v223_v8 = vmul.f32 %v7830_v5, %v215_v44 }
 0x233   :  { %v230_v10 = vmul.f32 %v6340_v7, %v223_v8 }
 0x235   :  { %v237_v11 = vadd.f32 %v6341_v9, %v230_v10 }
 0x237   :  { %v270_v12 = vpack.c.bf16 %v237_v11, %v237_v11 }
 0x239   :  { %449 = vmatmul.mubr.bf16.vlgmr.msra.gmra.mrb[0].mxu1 %v270_v12  ;;  %7114 = vmatmul.mubr.bf16.vlgmr.msra.gmra.mrb[4].mxu0 %v270_v12 }
 0x23a   :  { %7133 = vmatprep.mubr.msk.bf16.mxu1 %vm8027_vm0, %v8026_v0  ;;  %1036 = vmatprep.mubr.bf16.mxu0 %v8028_v59 }
 0x23b   :  { %7118 = vmatpush3.bf16.msra.mxu1 %v7341_v13 }
 0x23c   :  { %7119 = vmatprep.subr.bf16.mxu1 %v8026_v0 }
 0x23f   :  { %7120 = vmatpush3.bf16.msra.mxu1 %v7342_v14 }
 0x240   :  { %7121 = vmatprep.subr.bf16.mxu1 %v8026_v0 }
 0x243   :  { %7122 = vmatpush3.bf16.msra.mxu1 %v7343_v15 }
 0x244   :  { %7123 = vmatprep.subr.bf16.mxu1 %v8026_v0 }
 0x247   :  { %7124 = vmatpush3.bf16.msra.mxu1 %v7344_v16 }
 0x248   :  { %7125 = vmatprep.subr.bf16.mxu1 %v8026_v0 }
 0x24b   :  { %7126 = vmatpush3.bf16.msra.mxu1 %v7345_v17 }
 0x24c   :  { %7127 = vmatprep.subr.bf16.mxu1 %v8026_v0 }
 0x24f   :  { %7128 = vmatpush3.bf16.msra.mxu1 %v7346_v18 }
 0x250   :  { %7129 = vmatprep.subr.bf16.mxu1 %v8026_v0 }
 0x253   :  { %7130 = vmatpush3.bf16.msra.mxu1 %v7347_v19 }
 0x254   :  { %7131 = vmatprep.subr.bf16.mxu1 %v8026_v0 }
 0x257   :  { %7132 = vmatpush3.bf16.msra.mxu1 %v7348_v20 }
 0x258   :  { %7137 = vmatprep.subr.bf16.mxu1 %v8026_v0 }
 0x30c   :  { %v450_v32 = vpop.f32.mrb[0].mxu1  ;;  %v8345_v33 = vpop.f32.mrb[4].mxu0 }
 0x30d   :  { %v451_v34 = vadd.f32 %v450_v32, %v276_v28  ;;  %v452_v35 = vpop.f32.mrb[1].mxu1  ;;  %v7115_v36 = vpop.f32.mrb[5].mxu0 }
 0x30e   :  { %v454_v37 = vpop.f32.mrb[2].mxu1  ;;  %v494_v38 = vpop.f32.mrb[6].mxu0  ;;  %v453_v48 = vadd.f32 %v452_v35, %v280_v40 }
 0x30f   :  { %v504_v39 = vrot.slane %v451_v34, %v8340_v29  ;;  %v455_v41 = vpop.f32.mrb[3].mxu1  ;;  %v7116_v42 = vpop.f32.mrb[7].mxu0 }
 0x311   :  { %v505_v43 = vcombine.high %v504_v39, %v504_v39  ;;  %v512_v44 = vrot.slane %v504_v39, %v8340_v29 }
 0x313   :  { %v519_v45 = vrot.slane %v505_v43, %v8340_v29  ;;  %v523_v46 = vrot.slane %v512_v44, %v8330_v25  ;;  %v587_v47 = vcombine.high %v512_v44, %v512_v44 }
 0x315   :  { %v527_v49 = vrot.slane %v519_v45, %v8330_v25  ;;  %v588_v50 = vcombine.high %v519_v45, %v519_v45  ;;  %v592_v51 = vrot.slane %v587_v47, %v8330_v25  ;;  %v530_v52 = vmul.f32 %v523_v46, %v453_v48 }
 0x317   :  { %v531_v53 = vmul.f32 %v527_v49, %v453_v48  ;;  %v533_v54 = vsel %vm532_vm5, %v530_v52, -inf  ;;  %v596_v55 = vrot.slane %v588_v50, %v8330_v25  ;;  %v599_v56 = vmul.f32 %v592_v51, %v453_v48 }
 0x318   :  { %v534_v57 = vrot.slane %v533_v54, 4 }
 0x319   :  { %v540_v58 = vsel %vm532_vm5, %v531_v53, -inf  ;;  %v600_v60 = vmul.f32 %v596_v55, %v453_v48  ;;  %v602_v61 = vsel %vm601_vm6, %v599_v56, -inf }
 0x31a   :  { %v535_v62 = vmax.f32 %v533_v54, %v534_v57  ;;  %v541_v63 = vrot.slane %v540_v58, 4  ;;  %v603_v1 = vrot.slane %v602_v61, 4 }
 0x31b   :  { %v609_v2 = vsel %vm601_vm6, %v600_v60, -inf }
 0x31c   :  { %v536_v3 = vrot.slane %v535_v62, 2  ;;  %v542_v4 = vmax.f32 %v540_v58, %v541_v63  ;;  %v604_v5 = vmax.f32 %v602_v61, %v603_v1  ;;  %v610_v7 = vrot.slane %v609_v2, 4 }
 0x31e   :  { %v537_v8 = vmax.f32 %v535_v62, %v536_v3  ;;  %v543_v9 = vrot.slane %v542_v4, 2  ;;  %v605_v10 = vrot.slane %v604_v5, 2  ;;  %v611_v11 = vmax.f32 %v609_v2, %v610_v7 }
 0x320   :  { %v538_v12 = vrot.slane %v537_v8, 1  ;;  %v544_v13 = vmax.f32 %v542_v4, %v543_v9  ;;  %v606_v14 = vmax.f32 %v604_v5, %v605_v10  ;;  %v612_v15 = vrot.slane %v611_v11, 2 }
 0x321   :  { %v8363_v10 = vsub.s32 2, %v8327_v22 }
 0x322   :  { %v539_v16 = vmax.f32 %v537_v8, %v538_v12  ;;  %v545_v17 = vrot.slane %v544_v13, 1  ;;  %v607_v18 = vrot.slane %v606_v14, 1  ;;  %v613_v19 = vmax.f32 %v611_v11, %v612_v15 }
 0x324   :  { %v546_v20 = vmax.f32 %v544_v13, %v545_v17  ;;  %v547_v21 = vsub.f32 %v530_v52, %v539_v16  ;;  %v608_v23 = vmax.f32 %v606_v14, %v607_v18  ;;  %v614_v24 = vrot.slane %v613_v19, 1 }
 0x325   :  { %v284_v13 = vrot.slane %v8335_v26, %v8363_v10 }
 0x326   :  { %v548_v27 = vsub.f32 %v531_v53, %v546_v20  ;;  %v549_v28 = vmul.f32 1.442695, %v547_v21  ;;  %v615_v32 = vmax.f32 %v613_v19, %v614_v24  ;;  %v616_v34 = vsub.f32 %v599_v56, %v608_v23 }
 0x327   :  { %v492_v15 = vadd.f32 %v8345_v33, %v284_v13 }
 0x328   :  { %7831 = vpow2.f32 %v549_v28  ;;  %v551_v35 = vmul.f32 1.442695, %v548_v27  ;;  %v617_v36 = vsub.f32 %v600_v60, %v615_v32  ;;  %v618_v37 = vmul.f32 1.442695, %v616_v34 }
 0x32a   :  { %7833 = vpow2.f32 %v551_v35  ;;  %v620_v38 = vmul.f32 1.442695, %v617_v36 }
 0x32b   :  { %7835 = vpow2.f32 %v618_v37 }
 0x32c   :  { %7837 = vpow2.f32 %v620_v38 }
 0x332   :  { %v7832_v39 = vpop.eup %7831 }
 0x333   :  { %v553_v40 = vsel %vm532_vm5, %v7832_v39, 0.0 }
 0x334   :  { %v7834_v41 = vpop.eup %7833  ;;  %v554_v42 = vrot.slane %v553_v40, 4 }
 0x335   :  { %v7836_v43 = vpop.eup %7835  ;;  %v560_v44 = vsel %vm532_vm5, %v7834_v41, 0.0 }
 0x336   :  { %v7838_v45 = vpop.eup %7837  ;;  %v555_v46 = vadd.f32 %v554_v42, %v553_v40  ;;  %v561_v47 = vrot.slane %v560_v44, 4  ;;  %v624_v48 = vrot.slane %v7836_v43, 2 }
 0x337   :  { %v625_v49 = vrot.slane %v7838_v45, 2 }
 0x338   :  { %v556_v50 = vrot.slane %v555_v46, 2  ;;  %v562_v51 = vadd.f32 %v561_v47, %v560_v44  ;;  %v628_v52 = vsel %vm532_vm5, %v624_v48, 0.0 }
 0x339   :  { %v629_v53 = vrot.slane %v628_v52, 4  ;;  %v635_v54 = vsel %vm532_vm5, %v625_v49, 0.0 }
 0x33a   :  { %v557_v55 = vadd.f32 %v556_v50, %v555_v46  ;;  %v563_v56 = vrot.slane %v562_v51, 2  ;;  %v636_v57 = vrot.slane %v635_v54, 4 }
 0x33b   :  { %v630_v58 = vadd.f32 %v629_v53, %v628_v52 }
 0x33c   :  { %v558_v60 = vrot.slane %v557_v55, 1  ;;  %v564_v61 = vadd.f32 %v563_v56, %v562_v51  ;;  %v637_v62 = vadd.f32 %v636_v57, %v635_v54 }
 0x33d   :  { %v631_v63 = vrot.slane %v630_v58, 2 }
 0x33e   :  { %v559_v1 = vadd.f32 %v558_v60, %v557_v55  ;;  %v565_v2 = vrot.slane %v564_v61, 1  ;;  %v638_v3 = vrot.slane %v637_v62, 2 }
 0x33f   :  { %v632_v4 = vadd.f32 %v631_v63, %v630_v58 }
 0x340   :  { %v566_v5 = vadd.f32 %v565_v2, %v564_v61  ;;  %7839 = vrcp.f32 %v559_v1  ;;  %v639_v7 = vadd.f32 %v638_v3, %v637_v62 }
 0x341   :  { %v633_v8 = vrot.slane %v632_v4, 1 }
 0x342   :  { %7841 = vrcp.f32 %v566_v5  ;;  %v640_v9 = vrot.slane %v639_v7, 1  ;;  %v6374_v5 = vld [vmem:[%s10031_s8] ss:$0 sm:$0xff] }
 0x343   :  { %v634_v11 = vadd.f32 %v633_v8, %v632_v4 }
 0x344   :  { %v641_v12 = vadd.f32 %v640_v9, %v639_v7 }
 0x345   :  { %7843 = vrcp.f32 %v634_v11 }
 0x346   :  { %7845 = vrcp.f32 %v641_v12 }
 0x34a   :  { %v7840_v14 = vpop.eup %7839 }
 0x34b   :  { %v568_v16 = vmul.f32 %v7840_v14, %v7832_v39 }
 0x34c   :  { %v7842_v17 = vpop.eup %7841 }
 0x34d   :  { %v570_v18 = vmul.f32 %v7842_v17, %v7834_v41  ;;  %v571_v19 = vmul.f32 %v568_v16, %v492_v15  ;;  %v7351_v16 = vld [vmem:[%s10032_s11 + $0x4] ss:$12 sps:$4 sm:$0xff]   ;;  %v7352_v17 = vld [vmem:[%s10032_s11 + $0x8] ss:$12 sps:$4 sm:$0xff]  }
 0x34e   :  { %1004 = vmatprep.subr.bf16.mxu0 %v7351_v16 }
 0x34f   :  { %v7844_v20 = vpop.eup %7843  ;;  %v572_v21 = vmul.f32 %v570_v18, %v492_v15  ;;  %v573_v23 = vsel %vm532_vm5, %v571_v19, 0.0  ;;  %v7355_v18 = vld [vmem:[%s10032_s11 + $0x1c] ss:$12 sps:$4 sm:$0xff]   ;;  %v7356_v19 = vld [vmem:[%s10032_s11 + $0x20] ss:$12 sps:$4 sm:$0xff]  }
 0x350   :  { %v7846_v24 = vpop.eup %7845  ;;  %v643_v27 = vmul.f32 %v7844_v20, %v7836_v43  ;;  %v574_v28 = vrot.slane %v573_v23, 4  ;;  %v7359_v20 = vld [vmem:[%s10032_s11 + $0x34] ss:$12 sps:$4 sm:$0xff]  }
 0x351   :  { %v645_v32 = vmul.f32 %v7846_v24, %v7838_v45  ;;  %v580_v34 = vsel %vm532_vm5, %v572_v21, 0.0  ;;  %v7357_v21 = vld [vmem:[%s10032_s11 + $0x30] ss:$12 sps:$4 sm:$0xff]  }
 0x352   :  { %v575_v35 = vadd.f32 %v574_v28, %v573_v23  ;;  %v581_v36 = vrot.slane %v580_v34, 4  ;;  %v646_v26 = vmul.f32 %v643_v27, %v492_v15 }
 0x353   :  { %v647_v37 = vmul.f32 %v645_v32, %v492_v15 }
 0x354   :  { %v576_v38 = vrot.slane %v575_v35, 2  ;;  %v582_v33 = vadd.f32 %v581_v36, %v580_v34  ;;  %v650_v39 = vrot.slane %v646_v26, 2  ;;  %v7360_v34 = vld [vmem:[%s10032_s11 + $0x38] ss:$12 sps:$4 sm:$0xff]   ;;  %v7361_v36 = vld [vmem:[%s10032_s11 + $0x48] ss:$12 sps:$4 sm:$0xff]  }
 0x355   :  { %v651_v40 = vrot.slane %v647_v37, 2  ;;  %v7364_v26 = vld [vmem:[%s10032_s11 + $0x50] ss:$12 sps:$4 sm:$0xff]  }
 0x356   :  { %v577_v41 = vadd.f32 %v576_v38, %v575_v35  ;;  %v583_v42 = vrot.slane %v582_v33, 2  ;;  %v654_v44 = vsel %vm532_vm5, %v650_v39, 0.0  ;;  %v7363_v35 = vld [vmem:[%s10032_s11 + $0x4c] ss:$12 sps:$4 sm:$0xff]   ;;  %v7367_v37 = vld [vmem:[%s10032_s11 + $0x64] ss:$12 sps:$4 sm:$0xff]  }
 0x357   :  { %v655_v46 = vrot.slane %v654_v44, 4  ;;  %v661_v47 = vsel %vm532_vm5, %v651_v40, 0.0  ;;  %v7365_v38 = vld [vmem:[%s10032_s11 + $0x60] ss:$12 sps:$4 sm:$0xff]   ;;  %v7371_v39 = vld [vmem:[%s10032_s11 + $0x7c] ss:$12 sps:$4 sm:$0xff]  }
 0x358   :  { %v578_v43 = vrot.slane %v577_v41, 1  ;;  %v584_v48 = vadd.f32 %v583_v42, %v582_v33  ;;  %v662_v45 = vrot.slane %v661_v47, 4  ;;  %v7368_v33 = vld [vmem:[%s10032_s11 + $0x68] ss:$12 sps:$4 sm:$0xff]   ;;  %v7369_v40 = vld [vmem:[%s10032_s11 + $0x78] ss:$12 sps:$4 sm:$0xff]  }
 0x359   :  { %v656_v49 = vadd.f32 %v655_v46, %v654_v44  ;;  %v7375_v42 = vld [vmem:[%s10032_s11 + $0x94] ss:$12 sps:$4 sm:$0xff]   ;;  %v7373_v44 = vld [vmem:[%s10032_s11 + $0x90] ss:$12 sps:$4 sm:$0xff]   ;;  %v7376_v46 = vld [vmem:[%s10032_s11 + $0x98] ss:$12 sps:$4 sm:$0xff]  }
 0x35a   :  { %v585_v50 = vrot.slane %v584_v48, 1  ;;  %v663_v51 = vadd.f32 %v662_v45, %v661_v47  ;;  %v579_v53 = vadd.f32 %v578_v43, %v577_v41  ;;  %v7372_v41 = vld [vmem:[%s10032_s11 + $0x80] ss:$12 sps:$4 sm:$0xff]   ;;  %v7377_v43 = vld [vmem:[%s10032_s11 + $0xa8] ss:$12 sps:$4 sm:$0xff]  }
 0x35b   :  { %v657_v52 = vrot.slane %v656_v49, 2  ;;  %v7379_v47 = vld [vmem:[%s10032_s11 + $0xac] ss:$12 sps:$4 sm:$0xff]  }
 0x35c   :  { %v586_v54 = vadd.f32 %v585_v50, %v584_v48  ;;  %v664_v55 = vrot.slane %v663_v51, 2  ;;  %v7380_v48 = vld [vmem:[%s10032_s11 + $0xb0] ss:$12 sps:$4 sm:$0xff]  }
 0x35d   :  { %v658_v56 = vadd.f32 %v657_v52, %v656_v49  ;;  %v6375_v52 = vld [vmem:[%s10033_s9] ss:$0 sm:$0xff] }
 0x35e   :  { %v665_v57 = vadd.f32 %v664_v55, %v663_v51  ;;  %v670_v58 = vsel %vm109_vm1, %v586_v54, %v579_v53  ;;  %v6376_v54 = vld [vmem:[%s10034_s10] ss:$0 sm:$0xff] }
 0x35f   :  { %v659_v60 = vrot.slane %v658_v56, 1 }
 0x360   :  { %v666_v61 = vrot.slane %v665_v57, 1 }
 0x361   :  { %v660_v62 = vadd.f32 %v659_v60, %v658_v56  ;;  %v7382_v60 = vld [vmem:[%s10035_s13 + $0x8] sm:$0xff]  }
 0x362   :  { %v667_v63 = vadd.f32 %v666_v61, %v665_v57  ;;  %v7383_v61 = vld [vmem:[%s10035_s13 + $0x10] sm:$0xff]  }
 0x364   :  { %v674_v1 = vsel %vm115_vm3, %v667_v63, %v660_v62  ;;  %v7384_v62 = vld [vmem:[%s10035_s13 + $0x18] sm:$0xff]   ;;  %v7385_v63 = vld [vmem:[%s10035_s13 + $0x20] sm:$0xff]  }
 0x365   :  { %v676_v2 = vsel %vm532_vm5, %v670_v58, %v674_v1  ;;  %v7381_v58 = vld [vmem:[%s10035_s13] sm:$0xff]   ;;  %v7386_v1 = vld [vmem:[%s10035_s13 + $0x28] sm:$0xff]  }
 0x366   :  { %v693_v3 = vpack.c.bf16 %v676_v2, %v676_v2  ;;  %v7387_v2 = vld [vmem:[%s10035_s13 + $0x30] sm:$0xff]  }
 0x368   :  { %7134 = vmatmul.mubr.bf16.vlgmr.msra.gmra.mrb[4].mxu1 %v693_v3  ;;  %v7388_v3 = vld [vmem:[%s10035_s13 + $0x38] sm:$0xff]  }
 0x369   :  { %7153 = vmatprep.mubr.msk.bf16.mxu1 %vm8027_vm0, %v8026_v0  ;;  %7138 = vmatpush3.bf16.msra.mxu1 %v7352_v17 }
 0x36a   :  { %7139 = vmatprep.subr.bf16.mxu1 %v8026_v0 }
 0x36d   :  { %7140 = vmatpush3.bf16.msra.mxu1 %v7356_v19 }
 0x36e   :  { %7141 = vmatprep.subr.bf16.mxu1 %v8026_v0 }
 0x371   :  { %7142 = vmatpush3.bf16.msra.mxu1 %v7360_v34 }
 0x372   :  { %7143 = vmatprep.subr.bf16.mxu1 %v8026_v0 }
 0x375   :  { %7144 = vmatpush3.bf16.msra.mxu1 %v7364_v26 }
 0x376   :  { %7145 = vmatprep.subr.bf16.mxu1 %v8026_v0 }
 0x379   :  { %7146 = vmatpush3.bf16.msra.mxu1 %v7368_v33 }
 0x37a   :  { %7147 = vmatprep.subr.bf16.mxu1 %v8026_v0 }
 0x37d   :  { %7148 = vmatpush3.bf16.msra.mxu1 %v7372_v41 }
 0x37e   :  { %7149 = vmatprep.subr.bf16.mxu1 %v8026_v0 }
 0x381   :  { %7150 = vmatpush3.bf16.msra.mxu1 %v7376_v46 }
 0x382   :  { %7151 = vmatprep.subr.bf16.mxu1 %v8026_v0 }
 0x385   :  { %7152 = vmatpush3.bf16.msra.mxu1 %v7380_v48 }
 0x43b   :  { %v776_v4 = vpop.f32.mrb[4].mxu1 }
 0x43c   :  { %v782_v7 = vadd.f32 %v776_v4, %v8199_v30  ;;  %v7135_v8 = vpop.f32.mrb[5].mxu1  ;;  %v7349_v30 = vld [vmem:[%s10032_s11] ss:$12 sps:$4 sm:$0xff]  }
 0x43d   :  { %v779_v9 = vpop.f32.mrb[6].mxu1  ;;  %1005 = vmatpush1.bf16.msra.mxu0 %v7349_v30  ;;  %v859_v4 = vld [vmem:[%s10036_s12] sm:$0x7] }
 0x43e   :  { %v8381_v11 = vadd.f32 %v6374_v5, %v782_v7  ;;  %v7136_v12 = vpop.f32.mrb[7].mxu1  ;;  %1006 = vmatprep.subr.bf16.mxu0 %v7355_v18  ;;  %v864_v5 = vrot.slane %v859_v4, %v8330_v25  ;;  %v872_v7 = vrot.slane %v859_v4, %v8363_v10 }
 0x440   :  { %v792_v13 = vrot.slane %v8381_v11, 3 }
 0x442   :  { %v8386_v14 = vsel %vm794_vm7, %v8163_v6, %v792_v13  ;;  %v7353_v6 = vld [vmem:[%s10032_s11 + $0x18] ss:$12 sps:$4 sm:$0xff]  }
 0x443   :  { %v799_v15 = vsel %vm798_vm8, %v8386_v14, 0.0  ;;  %1007 = vmatpush1.bf16.msra.mxu0 %v7353_v6 }
 0x444   :  { %800 = vadd.xlane.f32.xlu1 %v799_v15  ;;  %1008 = vmatprep.subr.bf16.mxu0 %v7359_v20 }
 0x447   :  { %1009 = vmatpush1.bf16.msra.mxu0 %v7357_v21  ;;  %v868_v21 = vrot.slane %v859_v4, %v8343_v31 }
 0x448   :  { %1010 = vmatprep.subr.bf16.mxu0 %v7363_v35 }
 0x44b   :  { %1011 = vmatpush1.bf16.msra.mxu0 %v7361_v36 }
 0x44c   :  { %1012 = vmatprep.subr.bf16.mxu0 %v7367_v37 }
 0x44f   :  { %1013 = vmatpush1.bf16.msra.mxu0 %v7365_v38 }
 0x450   :  { %1014 = vmatprep.subr.bf16.mxu0 %v7371_v39 }
 0x453   :  { %1015 = vmatpush1.bf16.msra.mxu0 %v7369_v40 }
 0x454   :  { %1016 = vmatprep.subr.bf16.mxu0 %v7375_v42 }
 0x457   :  { %1017 = vmatpush1.bf16.msra.mxu0 %v7373_v44 }
 0x458   :  { %1018 = vmatprep.subr.bf16.mxu0 %v7379_v47 }
 0x45b   :  { %1019 = vmatpush1.bf16.msra.mxu0 %v7377_v43 }
 0x45c   :  { %7157 = vmatprep.subr.bf16.mxu0 %v8026_v0 }
 0x4d1   :  { %v801_v23 = vpop.xlane.xlu1 %800 }
 0x4d2   :  { %v802_v24 = vmul.f32 0.0078125, %v801_v23 }
 0x4d4   :  { %v803_v27 = vsub.f32 %v8386_v14, %v802_v24 }
 0x4d6   :  { %v804_v28 = vmul.f32 %v803_v27, %v803_v27 }
 0x4d8   :  { %v805_v32 = vsel %vm798_vm8, %v804_v28, 0.0 }
 0x4d9   :  { %806 = vadd.xlane.f32.xlu1 %v805_v32 }
 0x566   :  { %v807_v45 = vpop.xlane.xlu1 %806 }
 0x567   :  { %v808_v49 = vmul.f32 0.0078125, %v807_v45 }
 0x569   :  { %v809_v50 = vadd.f32 1e-05, %v808_v49 }
 0x56b   :  { %7847 = vrsqrt.f32 %v809_v50 }
 0x575   :  { %v7848_v51 = vpop.eup %7847 }
 0x576   :  { %v811_v53 = vmul.f32 %v7848_v51, %v803_v27 }
 0x578   :  { %v818_v55 = vmul.f32 %v6375_v52, %v811_v53 }
 0x57a   :  { %v825_v56 = vadd.f32 %v6376_v54, %v818_v55 }
 0x57c   :  { %v858_v57 = vpack.c.bf16 %v825_v56, %v825_v56 }
 0x57e   :  { %1037 = vmatmul.mubr.bf16.vlgmr.msra.gmra.mrb[8].mxu0 %v858_v57  ;;  %7154 = vmatmul.mubr.bf16.vlgmr.msra.gmra.mrb[8].mxu1 %v858_v57 }
 0x57f   :  { %7173 = vmatprep.mubr.msk.bf16.mxu0 %vm8027_vm0, %v8026_v0  ;;  %1747 = vmatprep.mubr.bf16.mxu1 %v8028_v59 }
 0x580   :  { %7158 = vmatpush3.bf16.msra.mxu0 %v7381_v58 }
 0x581   :  { %7159 = vmatprep.subr.bf16.mxu0 %v8026_v0 }
 0x584   :  { %7160 = vmatpush3.bf16.msra.mxu0 %v7382_v60 }
 0x585   :  { %7161 = vmatprep.subr.bf16.mxu0 %v8026_v0 }
 0x588   :  { %7162 = vmatpush3.bf16.msra.mxu0 %v7383_v61 }
 0x589   :  { %7163 = vmatprep.subr.bf16.mxu0 %v8026_v0 }
 0x58c   :  { %7164 = vmatpush3.bf16.msra.mxu0 %v7384_v62 }
 0x58d   :  { %7165 = vmatprep.subr.bf16.mxu0 %v8026_v0 }
 0x590   :  { %7166 = vmatpush3.bf16.msra.mxu0 %v7385_v63 }
 0x591   :  { %7167 = vmatprep.subr.bf16.mxu0 %v8026_v0 }
 0x594   :  { %7168 = vmatpush3.bf16.msra.mxu0 %v7386_v1 }
 0x595   :  { %7169 = vmatprep.subr.bf16.mxu0 %v8026_v0 }
 0x598   :  { %7170 = vmatpush3.bf16.msra.mxu0 %v7387_v2 }
 0x599   :  { %7171 = vmatprep.subr.bf16.mxu0 %v8026_v0 }
 0x59c   :  { %7172 = vmatpush3.bf16.msra.mxu0 %v7388_v3 }
 0x651   :  { %v1038_v8 = vpop.f32.mrb[8].mxu0  ;;  %v1079_v9 = vpop.f32.mrb[8].mxu1 }
 0x652   :  { %v1039_v12 = vadd.f32 %v1038_v8, %v864_v5  ;;  %v8517_v13 = vadd.f32 %v1079_v9, %v872_v7  ;;  %v1040_v15 = vpop.f32.mrb[9].mxu0  ;;  %v7155_v30 = vpop.f32.mrb[9].mxu1 }
 0x653   :  { %v1042_v16 = vpop.f32.mrb[10].mxu0  ;;  %v1082_v17 = vpop.f32.mrb[10].mxu1  ;;  %v1041_v26 = vadd.f32 %v1040_v15, %v868_v21 }
 0x654   :  { %v1086_v6 = vcombine.high %v1039_v12, %v1039_v12  ;;  %v1093_v18 = vrot.slane %v1039_v12, %v8340_v29  ;;  %v1043_v19 = vpop.f32.mrb[11].mxu0  ;;  %v7156_v20 = vpop.f32.mrb[11].mxu1 }
 0x656   :  { %v1100_v23 = vrot.slane %v1086_v6, %v8340_v29  ;;  %v1101_v24 = vcombine.high %v1093_v18, %v1093_v18  ;;  %v1109_v27 = vrot.slane %v1093_v18, %v8340_v29 }
 0x658   :  { %v1102_v28 = vcombine.high %v1100_v23, %v1100_v23  ;;  %v1116_v32 = vrot.slane %v1100_v23, %v8340_v29  ;;  %v1123_v34 = vrot.slane %v1101_v24, %v8340_v29  ;;  %v1131_v35 = vcombine.high %v1109_v27, %v1109_v27 }
 0x659   :  { %v1136_v36 = vrot.slane %v1109_v27, %v8330_v25 }
 0x65a   :  { %v1130_v37 = vrot.slane %v1102_v28, %v8340_v29  ;;  %v1132_v38 = vcombine.high %v1123_v34, %v1123_v34  ;;  %v1140_v33 = vrot.slane %v1123_v34, %v8330_v25  ;;  %v1144_v39 = vrot.slane %v1131_v35, %v8330_v25 }
 0x65b   :  { %v1152_v40 = vrot.slane %v1116_v32, %v8330_v25  ;;  %v1163_v41 = vmul.f32 %v1136_v36, %v1041_v26 }
 0x65c   :  { %v1148_v42 = vrot.slane %v1132_v38, %v8330_v25  ;;  %v1156_v44 = vrot.slane %v1130_v37, %v8330_v25  ;;  %v1164_v46 = vmul.f32 %v1140_v33, %v1041_v26  ;;  %v1165_v47 = vmul.f32 %v1144_v39, %v1041_v26 }
 0x65d   :  { %v1167_v43 = vmul.f32 %v1152_v40, %v1041_v26  ;;  %v1169_v48 = vsel %vm798_vm8, %v1163_v41, -inf }
 0x65e   :  { %v1166_v45 = vmul.f32 %v1148_v42, %v1041_v26  ;;  %v1168_v49 = vmul.f32 %v1156_v44, %v1041_v26  ;;  %v1170_v50 = vrot.slane %v1169_v48, 4  ;;  %v1176_v51 = vsel %vm798_vm8, %v1164_v46, -inf }
 0x65f   :  { %v1177_v52 = vrot.slane %v1176_v51, 4  ;;  %v1183_v53 = vsel %vm798_vm8, %v1165_v47, -inf  ;;  %v1197_v54 = vsel %vm798_vm8, %v1167_v43, -inf }
 0x660   :  { %v1171_v55 = vmax.f32 %v1169_v48, %v1170_v50  ;;  %v1184_v56 = vrot.slane %v1183_v53, 4  ;;  %v1190_v57 = vsel %vm798_vm8, %v1166_v45, -inf  ;;  %v1198_v58 = vrot.slane %v1197_v54, 4 }
 0x661   :  { %v1178_v60 = vmax.f32 %v1176_v51, %v1177_v52  ;;  %v1191_v61 = vrot.slane %v1190_v57, 4  ;;  %v1204_v62 = vsel %vm798_vm8, %v1168_v49, -inf }
 0x662   :  { %v1172_v63 = vrot.slane %v1171_v55, 2  ;;  %v1185_v1 = vmax.f32 %v1183_v53, %v1184_v56  ;;  %v1199_v2 = vmax.f32 %v1197_v54, %v1198_v58  ;;  %v1205_v3 = vrot.slane %v1204_v62, 4 }
 0x663   :  { %v1179_v4 = vrot.slane %v1178_v60, 2  ;;  %v1192_v5 = vmax.f32 %v1190_v57, %v1191_v61 }
 0x664   :  { %v1173_v7 = vmax.f32 %v1171_v55, %v1172_v63  ;;  %v1186_v8 = vrot.slane %v1185_v1, 2  ;;  %v1200_v9 = vrot.slane %v1199_v2, 2  ;;  %v1206_v12 = vmax.f32 %v1204_v62, %v1205_v3 }
 0x665   :  { %v1180_v15 = vmax.f32 %v1178_v60, %v1179_v4  ;;  %v1193_v30 = vrot.slane %v1192_v5, 2 }
 0x666   :  { %v1174_v16 = vrot.slane %v1173_v7, 1  ;;  %v1187_v17 = vmax.f32 %v1185_v1, %v1186_v8  ;;  %v1201_v6 = vmax.f32 %v1199_v2, %v1200_v9  ;;  %v1207_v18 = vrot.slane %v1206_v12, 2 }
 0x667   :  { %v1181_v19 = vrot.slane %v1180_v15, 1  ;;  %v1194_v20 = vmax.f32 %v1192_v5, %v1193_v30 }
 0x668   :  { %v1175_v21 = vmax.f32 %v1173_v7, %v1174_v16  ;;  %v1188_v23 = vrot.slane %v1187_v17, 1  ;;  %v1202_v24 = vrot.slane %v1201_v6, 1  ;;  %v1208_v27 = vmax.f32 %v1206_v12, %v1207_v18 }
 0x669   :  { %v1182_v28 = vmax.f32 %v1180_v15, %v1181_v19  ;;  %v1195_v32 = vrot.slane %v1194_v20, 1 }
 0x66a   :  { %v1189_v34 = vmax.f32 %v1187_v17, %v1188_v23  ;;  %v1203_v35 = vmax.f32 %v1201_v6, %v1202_v24  ;;  %v1209_v36 = vrot.slane %v1208_v27, 1  ;;  %v1211_v26 = vsub.f32 %v1163_v41, %v1175_v21 }
 0x66b   :  { %v1196_v37 = vmax.f32 %v1194_v20, %v1195_v32  ;;  %v1212_v38 = vsub.f32 %v1164_v46, %v1182_v28 }
 0x66c   :  { %v1210_v33 = vmax.f32 %v1208_v27, %v1209_v36  ;;  %v1213_v39 = vsub.f32 %v1165_v47, %v1189_v34  ;;  %v1215_v40 = vsub.f32 %v1167_v43, %v1203_v35  ;;  %v1217_v42 = vmul.f32 1.442695, %v1211_v26 }
 0x66d   :  { %v1214_v44 = vsub.f32 %v1166_v45, %v1196_v37  ;;  %v1219_v48 = vmul.f32 1.442695, %v1212_v38 }
 0x66e   :  { %v1216_v50 = vsub.f32 %v1168_v49, %v1210_v33  ;;  %7849 = vpow2.f32 %v1217_v42  ;;  %v1221_v51 = vmul.f32 1.442695, %v1213_v39  ;;  %v1225_v52 = vmul.f32 1.442695, %v1215_v40 }
 0x66f   :  { %7851 = vpow2.f32 %v1219_v48  ;;  %v1223_v53 = vmul.f32 1.442695, %v1214_v44 }
 0x670   :  { %7853 = vpow2.f32 %v1221_v51  ;;  %v1227_v54 = vmul.f32 1.442695, %v1216_v50 }
 0x671   :  { %7855 = vpow2.f32 %v1223_v53 }
 0x672   :  { %7857 = vpow2.f32 %v1225_v52 }
 0x673   :  { %7859 = vpow2.f32 %v1227_v54 }
 0x678   :  { %v7850_v41 = vpop.eup %7849 }
 0x679   :  { %v7852_v55 = vpop.eup %7851  ;;  %v1229_v46 = vsel %vm798_vm8, %v7850_v41, 0.0 }
 0x67a   :  { %v7854_v47 = vpop.eup %7853  ;;  %v1230_v43 = vrot.slane %v1229_v46, 4  ;;  %v1236_v45 = vsel %vm798_vm8, %v7852_v55, 0.0 }
 0x67b   :  { %v7856_v56 = vpop.eup %7855  ;;  %v1237_v49 = vrot.slane %v1236_v45, 4  ;;  %v1243_v57 = vsel %vm798_vm8, %v7854_v47, 0.0 }
 0x67c   :  { %v7858_v58 = vpop.eup %7857  ;;  %v1231_v60 = vadd.f32 %v1230_v43, %v1229_v46  ;;  %v1244_v61 = vrot.slane %v1243_v57, 4  ;;  %v1250_v62 = vsel %vm798_vm8, %v7856_v56, 0.0 }
 0x67d   :  { %v7860_v63 = vpop.eup %7859  ;;  %v1238_v1 = vadd.f32 %v1237_v49, %v1236_v45  ;;  %v1251_v2 = vrot.slane %v1250_v62, 4  ;;  %v1257_v3 = vsel %vm798_vm8, %v7858_v58, 0.0 }
 0x67e   :  { %v1232_v4 = vrot.slane %v1231_v60, 2  ;;  %v1245_v5 = vadd.f32 %v1244_v61, %v1243_v57  ;;  %v1258_v7 = vrot.slane %v1257_v3, 4  ;;  %v1264_v8 = vsel %vm798_vm8, %v7860_v63, 0.0 }
 0x67f   :  { %v1239_v9 = vrot.slane %v1238_v1, 2  ;;  %v1252_v12 = vadd.f32 %v1251_v2, %v1250_v62  ;;  %v1265_v15 = vrot.slane %v1264_v8, 4 }
 0x680   :  { %v1233_v30 = vadd.f32 %v1232_v4, %v1231_v60  ;;  %v1246_v16 = vrot.slane %v1245_v5, 2  ;;  %v1259_v17 = vadd.f32 %v1258_v7, %v1257_v3 }
 0x681   :  { %v1240_v6 = vadd.f32 %v1239_v9, %v1238_v1  ;;  %v1253_v18 = vrot.slane %v1252_v12, 2  ;;  %v1266_v19 = vadd.f32 %v1265_v15, %v1264_v8 }
 0x682   :  { %v1234_v20 = vrot.slane %v1233_v30, 1  ;;  %v1247_v21 = vadd.f32 %v1246_v16, %v1245_v5  ;;  %v1260_v23 = vrot.slane %v1259_v17, 2 }
 0x683   :  { %v1241_v24 = vrot.slane %v1240_v6, 1  ;;  %v1254_v27 = vadd.f32 %v1253_v18, %v1252_v12  ;;  %v1267_v28 = vrot.slane %v1266_v19, 2 }
 0x684   :  { %v1235_v32 = vadd.f32 %v1234_v20, %v1233_v30  ;;  %v1248_v34 = vrot.slane %v1247_v21, 1  ;;  %v1261_v35 = vadd.f32 %v1260_v23, %v1259_v17 }
 0x685   :  { %v1242_v36 = vadd.f32 %v1241_v24, %v1240_v6  ;;  %v1255_v26 = vrot.slane %v1254_v27, 1  ;;  %v1268_v37 = vadd.f32 %v1267_v28, %v1266_v19 }
 0x686   :  { %v1249_v38 = vadd.f32 %v1248_v34, %v1247_v21  ;;  %v1262_v33 = vrot.slane %v1261_v35, 1  ;;  %7861 = vrcp.f32 %v1235_v32 }
 0x687   :  { %v1256_v39 = vadd.f32 %v1255_v26, %v1254_v27  ;;  %7863 = vrcp.f32 %v1242_v36  ;;  %v1269_v40 = vrot.slane %v1268_v37, 1 }
 0x688   :  { %7865 = vrcp.f32 %v1249_v38  ;;  %v1263_v42 = vadd.f32 %v1262_v33, %v1261_v35 }
 0x689   :  { %v1270_v44 = vadd.f32 %v1269_v40, %v1268_v37  ;;  %7867 = vrcp.f32 %v1256_v39 }
 0x68a   :  { %7869 = vrcp.f32 %v1263_v42 }
 0x68b   :  { %7871 = vrcp.f32 %v1270_v44 }
 0x690   :  { %v7862_v48 = vpop.eup %7861 }
 0x691   :  { %v7864_v50 = vpop.eup %7863  ;;  %v1272_v51 = vmul.f32 %v7862_v48, %v7850_v41 }
 0x692   :  { %v7866_v52 = vpop.eup %7865  ;;  %v1274_v53 = vmul.f32 %v7864_v50, %v7852_v55 }
 0x693   :  { %v7868_v54 = vpop.eup %7867  ;;  %v1276_v46 = vmul.f32 %v7866_v52, %v7854_v47  ;;  %v1283_v43 = vmul.f32 %v1272_v51, %v8517_v13 }
 0x694   :  { %v7870_v45 = vpop.eup %7869  ;;  %v1278_v49 = vmul.f32 %v7868_v54, %v7856_v56  ;;  %v1284_v57 = vmul.f32 %v1274_v53, %v8517_v13 }
 0x695   :  { %v7872_v60 = vpop.eup %7871  ;;  %v1280_v61 = vmul.f32 %v7870_v45, %v7858_v58  ;;  %v1285_v62 = vmul.f32 %v1276_v46, %v8517_v13  ;;  %v1289_v1 = vsel %vm798_vm8, %v1283_v43, 0.0 }
 0x696   :  { %v1282_v2 = vmul.f32 %v7872_v60, %v7860_v63  ;;  %v1286_v3 = vmul.f32 %v1278_v49, %v8517_v13  ;;  %v1290_v41 = vrot.slane %v1289_v1, 4  ;;  %v1296_v55 = vsel %vm798_vm8, %v1284_v57, 0.0 }
 0x697   :  { %v1287_v47 = vmul.f32 %v1280_v61, %v8517_v13  ;;  %v1297_v4 = vrot.slane %v1296_v55, 4  ;;  %v1303_v5 = vsel %vm798_vm8, %v1285_v62, 0.0 }
 0x698   :  { %v1288_v56 = vmul.f32 %v1282_v2, %v8517_v13  ;;  %v1291_v7 = vadd.f32 %v1290_v41, %v1289_v1  ;;  %v1304_v8 = vrot.slane %v1303_v5, 4  ;;  %v1310_v58 = vsel %vm798_vm8, %v1286_v3, 0.0 }
 0x699   :  { %v1298_v9 = vadd.f32 %v1297_v4, %v1296_v55  ;;  %v1311_v12 = vrot.slane %v1310_v58, 4  ;;  %v1317_v63 = vsel %vm798_vm8, %v1287_v47, 0.0 }
 0x69a   :  { %v1292_v15 = vrot.slane %v1291_v7, 2  ;;  %v1305_v30 = vadd.f32 %v1304_v8, %v1303_v5  ;;  %v1318_v16 = vrot.slane %v1317_v63, 4  ;;  %v1324_v17 = vsel %vm798_vm8, %v1288_v56, 0.0  ;;  %v6409_v8 = vld [vmem:[%s10037_s14] ss:$0 sm:$0xff] }
 0x69b   :  { %v1299_v6 = vrot.slane %v1298_v9, 2  ;;  %v1312_v18 = vadd.f32 %v1311_v12, %v1310_v58  ;;  %v1325_v19 = vrot.slane %v1324_v17, 4 }
 0x69c   :  { %v1293_v20 = vadd.f32 %v1292_v15, %v1291_v7  ;;  %v1306_v21 = vrot.slane %v1305_v30, 2  ;;  %v1319_v23 = vadd.f32 %v1318_v16, %v1317_v63  ;;  %v2178_v63 = vrot.slane %v8381_v11, 4 }
 0x69d   :  { %v1300_v13 = vadd.f32 %v1299_v6, %v1298_v9  ;;  %v1313_v24 = vrot.slane %v1312_v18, 2  ;;  %v1326_v27 = vadd.f32 %v1325_v19, %v1324_v17  ;;  %v8023_v17 = vld [vmem:[%s10055_s30 + $0x8] sm:$0x1f]  ;;  %v7391_v19 = vld [vmem:[%s10038_s17 + $0x4] ss:$16 sps:$4 sm:$0xff]  }
 0x69e   :  { %v1294_v28 = vrot.slane %v1293_v20, 1  ;;  %v1307_v32 = vadd.f32 %v1306_v21, %v1305_v30  ;;  %v1320_v34 = vrot.slane %v1319_v23, 2  ;;  %v8575_v6 = vsel %vm794_vm7, %v8023_v17, %v2178_v63  ;;  %v7394_v21 = vld [vmem:[%s10038_s17 + $0xc] ss:$16 sps:$4 sm:$0xff]   ;;  %1715 = vmatprep.subr.bf16.mxu1 %v7391_v19  ;;  %v7437_v17 = vld [vmem:[%s10041_s19 + $0x40] sm:$0xff]  }
 0x69f   :  { %v1301_v35 = vrot.slane %v1300_v13, 1  ;;  %v1314_v36 = vadd.f32 %v1313_v24, %v1312_v18  ;;  %v1327_v26 = vrot.slane %v1326_v27, 2  ;;  %v7389_v18 = vld [vmem:[%s10038_s17] ss:$16 sps:$4 sm:$0xff]   ;;  %1756 = vmatprep.subr.bf16.mxu0 %v7394_v21  ;;  %v7398_v24 = vld [vmem:[%s10038_s17 + $0x28] ss:$16 sps:$4 sm:$0xff]  }
 0x6a0   :  { %v1295_v37 = vadd.f32 %v1294_v28, %v1293_v20  ;;  %v1308_v38 = vrot.slane %v1307_v32, 1  ;;  %v1321_v33 = vadd.f32 %v1320_v34, %v1319_v23  ;;  %v7392_v20 = vld [vmem:[%s10038_s17 + $0x8] ss:$16 sps:$4 sm:$0xff]   ;;  %v7395_v23 = vld [vmem:[%s10038_s17 + $0x20] ss:$16 sps:$4 sm:$0xff]   ;;  %1716 = vmatpush1.bf16.msra.mxu1 %v7389_v18 }
 0x6a1   :  { %v1302_v39 = vadd.f32 %v1301_v35, %v1300_v13  ;;  %v1315_v40 = vrot.slane %v1314_v36, 1  ;;  %v1328_v42 = vadd.f32 %v1327_v26, %v1326_v27  ;;  %v7397_v13 = vld [vmem:[%s10038_s17 + $0x24] ss:$16 sps:$4 sm:$0xff]   ;;  %v7400_v27 = vld [vmem:[%s10038_s17 + $0x2c] ss:$16 sps:$4 sm:$0xff]  }
 0x6a2   :  { %v1309_v44 = vadd.f32 %v1308_v38, %v1307_v32  ;;  %v1322_v48 = vrot.slane %v1321_v33, 1  ;;  %v1347_v50 = vpack.c.bf16 %v1295_v37, %v1295_v37  ;;  %1717 = vmatprep.subr.bf16.mxu1 %v7397_v13  ;;  %v7401_v28 = vld [vmem:[%s10038_s17 + $0x40] ss:$16 sps:$4 sm:$0xff]   ;;  %v7403_v32 = vld [vmem:[%s10038_s17 + $0x44] ss:$16 sps:$4 sm:$0xff]   ;;  %v7442_v21 = vld [vmem:[%s10041_s19 + $0xc8] sm:$0xff]  }
 0x6a3   :  { %v1316_v51 = vadd.f32 %v1315_v40, %v1314_v36  ;;  %v1329_v52 = vrot.slane %v1328_v42, 1  ;;  %v1348_v53 = vpack.c.bf16 %v1302_v39, %v1302_v39  ;;  %v7404_v34 = vld [vmem:[%s10038_s17 + $0x48] ss:$16 sps:$4 sm:$0xff]   ;;  %v7406_v35 = vld [vmem:[%s10038_s17 + $0x4c] ss:$16 sps:$4 sm:$0xff]   ;;  %v7439_v18 = vld [vmem:[%s10041_s19] sm:$0xff]  }
 0x6a4   :  { %v1323_v54 = vadd.f32 %v1322_v48, %v1321_v33  ;;  %v1349_v46 = vpack.c.bf16 %v1309_v44, %v1309_v44  ;;  %v1359_v49 = vunpack.c.l.b16 %v1347_v50  ;;  %1718 = vmatpush1.bf16.msra.mxu1 %v7395_v23  ;;  %v7407_v50 = vld [vmem:[%s10038_s17 + $0x60] ss:$16 sps:$4 sm:$0xff]   ;;  %v7443_v23 = vld [vmem:[%s10041_s19 + $0x8] sm:$0xff]  }
 0x6a5   :  { %v1330_v43 = vadd.f32 %v1329_v52, %v1328_v42  ;;  %v1350_v45 = vpack.c.bf16 %v1316_v51, %v1316_v51  ;;  %v1360_v57 = vunpack.c.l.b16 %v1348_v53  ;;  %1719 = vmatprep.subr.bf16.mxu1 %v7403_v32  ;;  %v7409_v51 = vld [vmem:[%s10038_s17 + $0x64] ss:$16 sps:$4 sm:$0xff]   ;;  %v7410_v52 = vld [vmem:[%s10038_s17 + $0x68] ss:$16 sps:$4 sm:$0xff]   ;;  %v7412_v53 = vld [vmem:[%s10038_s17 + $0x6c] ss:$16 sps:$4 sm:$0xff]  }
 0x6a6   :  { %v1351_v60 = vpack.c.bf16 %v1323_v54, %v1323_v54  ;;  %v1361_v61 = vunpack.c.l.b16 %v1349_v46  ;;  %v7413_v54 = vld [vmem:[%s10038_s17 + $0x80] ss:$16 sps:$4 sm:$0xff]   ;;  %v7415_v46 = vld [vmem:[%s10038_s17 + $0x84] ss:$16 sps:$4 sm:$0xff]   ;;  %v7444_v13 = vld [vmem:[%s10041_s19 + $0x88] sm:$0xff]  }
 0x6a7   :  { %v1352_v62 = vpack.c.bf16 %v1330_v43, %v1330_v43  ;;  %v1362_v1 = vunpack.c.l.b16 %v1350_v45  ;;  %v1365_v2 = vsel %vm109_vm1, %v1360_v57, %v1359_v49  ;;  %v7416_v43 = vld [vmem:[%s10038_s17 + $0x88] ss:$16 sps:$4 sm:$0xff]   ;;  %v7418_v45 = vld [vmem:[%s10038_s17 + $0x8c] ss:$16 sps:$4 sm:$0xff]   ;;  %v7421_v49 = vld [vmem:[%s10038_s17 + $0xa4] ss:$16 sps:$4 sm:$0xff]  }
 0x6a8   :  { %v1363_v3 = vunpack.c.l.b16 %v1351_v60  ;;  %v1366_v41 = vsel %vm112_vm2, %v1361_v61, %v1365_v2  ;;  %1720 = vmatpush1.bf16.msra.mxu1 %v7401_v28  ;;  %v7424_v57 = vld [vmem:[%s10038_s17 + $0xac] ss:$16 sps:$4 sm:$0xff]   ;;  %v7419_v60 = vld [vmem:[%s10038_s17 + $0xa0] ss:$16 sps:$4 sm:$0xff]   ;;  %v7422_v61 = vld [vmem:[%s10038_s17 + $0xa8] ss:$16 sps:$4 sm:$0xff]  }
 0x6a9   :  { %v1364_v55 = vunpack.c.l.b16 %v1352_v62  ;;  %v1367_v47 = vsel %vm115_vm3, %v1362_v1, %v1366_v41  ;;  %1721 = vmatprep.subr.bf16.mxu1 %v7409_v51  ;;  %v7427_v62 = vld [vmem:[%s10038_s17 + $0xc4] ss:$16 sps:$4 sm:$0xff]   ;;  %v7430_v1 = vld [vmem:[%s10038_s17 + $0xcc] ss:$16 sps:$4 sm:$0xff]   ;;  %v7425_v2 = vld [vmem:[%s10038_s17 + $0xc0] ss:$16 sps:$4 sm:$0xff]  }
 0x6aa   :  { %v1369_v4 = vsel %vm1368_vm9, %v1363_v3, %v1367_v47  ;;  %v7428_v3 = vld [vmem:[%s10038_s17 + $0xc8] ss:$16 sps:$4 sm:$0xff]   ;;  %v7433_v41 = vld [vmem:[%s10038_s17 + $0xe4] ss:$16 sps:$4 sm:$0xff]   ;;  %v7431_v47 = vld [vmem:[%s10038_s17 + $0xe0] ss:$16 sps:$4 sm:$0xff]  }
 0x6ab   :  { %v1371_v5 = vsel %vm1370_vm10, %v1364_v55, %v1369_v4  ;;  %v7436_v55 = vld [vmem:[%s10038_s17 + $0xec] ss:$16 sps:$4 sm:$0xff]   ;;  %v7434_v4 = vld [vmem:[%s10038_s17 + $0xe8] ss:$16 sps:$4 sm:$0xff]   ;;  %v7440_v19 = vld [vmem:[%s10041_s19 + $0x80] sm:$0xff]  }
 0x6ac   :  { %v1372_v56 = vpack.c.b16 %v1371_v5, %v1371_v5  ;;  %1722 = vmatpush1.bf16.msra.mxu1 %v7407_v50  ;;  %v7447_v28 = vld [vmem:[%s10041_s19 + $0x10] sm:$0xff]   ;;  %v7460_v50 = vld [vmem:[%s10041_s19 + $0xa8] sm:$0xff]  }
 0x6ad   :  { %1723 = vmatprep.subr.bf16.mxu1 %v7415_v46  ;;  %v7448_v32 = vld [vmem:[%s10041_s19 + $0x90] sm:$0xff]   ;;  %v7465_v46 = vld [vmem:[%s10041_s19 + $0x78] sm:$0xff]  }
 0x6ae   :  { %7174 = vmatmul.mubr.bf16.vlgmr.msra.gmra.mrb[12].mxu0 %v1372_v56  ;;  %v7461_v51 = vld [vmem:[%s10041_s19 + $0x70] sm:$0xff]  }
 0x6af   :  { %1788 = vmatprep.mubr.bf16.mxu0 %v8028_v59  ;;  %1757 = vmatpush1.bf16.msra.mxu0 %v7392_v20  ;;  %v7441_v20 = vld [vmem:[%s10041_s19 + $0x48] sm:$0xff]  }
 0x6b0   :  { %1758 = vmatprep.subr.bf16.mxu0 %v7400_v27  ;;  %1724 = vmatpush1.bf16.msra.mxu1 %v7413_v54  ;;  %v7446_v27 = vld [vmem:[%s10041_s19 + $0xd0] sm:$0xff]  }
 0x6b1   :  { %1725 = vmatprep.subr.bf16.mxu1 %v7421_v49  ;;  %v7464_v54 = vld [vmem:[%s10041_s19 + $0xb0] sm:$0xff]   ;;  %v7468_v49 = vld [vmem:[%s10041_s19 + $0xb8] sm:$0xff]  }
 0x6b3   :  { %1759 = vmatpush1.bf16.msra.mxu0 %v7398_v24  ;;  %v7445_v24 = vld [vmem:[%s10041_s19 + $0x50] sm:$0xff]  }
 0x6b4   :  { %1760 = vmatprep.subr.bf16.mxu0 %v7406_v35  ;;  %1726 = vmatpush1.bf16.msra.mxu1 %v7419_v60  ;;  %v7450_v35 = vld [vmem:[%s10041_s19 + $0xd8] sm:$0xff]   ;;  %v1533_v60 = vld [vmem:[%s10042_s18] sm:$0xf] }
 0x6b5   :  { %1727 = vmatprep.subr.bf16.mxu1 %v7427_v62  ;;  %v1538_v62 = vrot.slane %v1533_v60, %v8330_v25 }
 0x6b7   :  { %1761 = vmatpush1.bf16.msra.mxu0 %v7404_v34  ;;  %v7449_v34 = vld [vmem:[%s10041_s19 + $0x58] sm:$0xff]  }
 0x6b8   :  { %1762 = vmatprep.subr.bf16.mxu0 %v7412_v53  ;;  %1728 = vmatpush1.bf16.msra.mxu1 %v7425_v2  ;;  %v7463_v53 = vld [vmem:[%s10041_s19 + $0x30] sm:$0xff]   ;;  %v1542_v2 = vrot.slane %v1533_v60, %v8343_v31 }
 0x6b9   :  { %1729 = vmatprep.subr.bf16.mxu1 %v7433_v41 }
 0x6bb   :  { %1763 = vmatpush1.bf16.msra.mxu0 %v7410_v52  ;;  %v7462_v52 = vld [vmem:[%s10041_s19 + $0xf0] sm:$0xff]  }
 0x6bc   :  { %1764 = vmatprep.subr.bf16.mxu0 %v7418_v45  ;;  %1730 = vmatpush1.bf16.msra.mxu1 %v7431_v47  ;;  %v7467_v45 = vld [vmem:[%s10041_s19 + $0x38] sm:$0xff]  }
 0x6bd   :  { %6847 = vmatprep.subr.bf16.mxu1 %v7437_v17 }
 0x6bf   :  { %1765 = vmatpush1.bf16.msra.mxu0 %v7416_v43  ;;  %v7466_v43 = vld [vmem:[%s10041_s19 + $0xf8] sm:$0xff]  }
 0x6c0   :  { %1766 = vmatprep.subr.bf16.mxu0 %v7424_v57  ;;  %v7471_v57 = vld [vmem:[%s10032_s11 + $0x4] ss:$12 sps:$4 sm:$0xff]  }
 0x6c3   :  { %1767 = vmatpush1.bf16.msra.mxu0 %v7422_v61  ;;  %v8793_v61 = vsub.s32 3, %v8327_v22 }
 0x6c4   :  { %1768 = vmatprep.subr.bf16.mxu0 %v7430_v1  ;;  %v1546_v1 = vrot.slane %v1533_v60, %v8363_v10 }
 0x6c7   :  { %1769 = vmatpush1.bf16.msra.mxu0 %v7428_v3  ;;  %v1550_v3 = vrot.slane %v1533_v60, %v8793_v61  ;;  %v7479_v60 = vld [vmem:[%s10032_s11 + $0x34] ss:$12 sps:$4 sm:$0xff]  }
 0x6c8   :  { %1770 = vmatprep.subr.bf16.mxu0 %v7436_v55 }
 0x6cb   :  { %1771 = vmatpush1.bf16.msra.mxu0 %v7434_v4 }
 0x781   :  { %v1456_v7 = vpop.f32.mrb[12].mxu0 }
 0x782   :  { %v1462_v58 = vadd.f32 %v1456_v7, %v8386_v14  ;;  %v7175_v9 = vpop.f32.mrb[13].mxu0  ;;  %v2183_v14 = vsel %vm798_vm8, %v8575_v6, 0.0 }
 0x783   :  { %v1459_v12 = vpop.f32.mrb[14].mxu0 }
 0x784   :  { %v8567_v15 = vadd.f32 %v6409_v8, %v1462_v58  ;;  %v7176_v30 = vpop.f32.mrb[15].mxu0  ;;  %v6410_v58 = vld [vmem:[%s10039_s15] ss:$0 sm:$0xff] }
 0x785   :  { %v6411_v12 = vld [vmem:[%s10040_s16] ss:$0 sm:$0xff] }
 0x786   :  { %v1473_v16 = vsel %vm794_vm7, %v8567_v15, 0.0 }
 0x787   :  { %1474 = vadd.xlane.f32.xlu0 %v1473_v16 }
 0x78b   :  { %2184 = vadd.xlane.f32.xlu0 %v2183_v14  ;;  %v7438_v14 = vld [vmem:[%s10041_s19 + $0xc0] sm:$0xff]  }
 0x78c   :  { %6869 = vmatprep.subr.bf16.mxu0 %v7438_v14 }
 0x814   :  { %v1475_v36 = vpop.xlane.xlu0 %1474 }
 0x815   :  { %v1476_v26 = vmul.f32 0.0078125, %v1475_v36  ;;  %v7451_v36 = vld [vmem:[%s10041_s19 + $0x18] sm:$0xff]  }
 0x817   :  { %v1477_v37 = vsub.f32 %v8567_v15, %v1476_v26  ;;  %v7452_v26 = vld [vmem:[%s10041_s19 + $0x98] sm:$0xff]  }
 0x818   :  { %v2185_v38 = vpop.xlane.xlu0 %2184 }
 0x819   :  { %v2186_v33 = vmul.f32 0.0078125, %v2185_v38  ;;  %v1478_v39 = vmul.f32 %v1477_v37, %v1477_v37  ;;  %v7454_v38 = vld [vmem:[%s10041_s19 + $0xe0] sm:$0xff]  }
 0x81b   :  { %v8617_v40 = vsub.f32 %v8575_v6, %v2186_v33  ;;  %v1479_v42 = vsel %vm794_vm7, %v1478_v39, 0.0  ;;  %v7455_v33 = vld [vmem:[%s10041_s19 + $0x20] sm:$0xff]  }
 0x81c   :  { %1480 = vadd.xlane.f32.xlu1 %v1479_v42  ;;  %v7456_v39 = vld [vmem:[%s10041_s19 + $0xa0] sm:$0xff]   ;;  %v7457_v42 = vld [vmem:[%s10041_s19 + $0x68] sm:$0xff]  }
 0x81d   :  { %v2188_v44 = vmul.f32 %v8617_v40, %v8617_v40 }
 0x81f   :  { %v2189_v48 = vsel %vm798_vm8, %v2188_v44, 0.0  ;;  %v7458_v44 = vld [vmem:[%s10041_s19 + $0xe8] sm:$0xff]  }
 0x820   :  { %2190 = vadd.xlane.f32.xlu1 %v2189_v48  ;;  %v7459_v48 = vld [vmem:[%s10041_s19 + $0x28] sm:$0xff]  }
 0x8a9   :  { %v1481_v5 = vpop.xlane.xlu1 %1480 }
 0x8aa   :  { %v1482_v56 = vmul.f32 0.0078125, %v1481_v5 }
 0x8ac   :  { %v1483_v7 = vadd.f32 1e-05, %v1482_v56 }
 0x8ae   :  { %7873 = vrsqrt.f32 %v1483_v7 }
 0x8b8   :  { %v7874_v8 = vpop.eup %7873 }
 0x8b9   :  { %v1485_v9 = vmul.f32 %v7874_v8, %v1477_v37  ;;  %v7453_v37 = vld [vmem:[%s10041_s19 + $0x60] sm:$0xff]  }
 0x8bb   :  { %v1492_v63 = vmul.f32 %v6410_v58, %v1485_v9 }
 0x8bd   :  { %v1499_v30 = vadd.f32 %v6411_v12, %v1492_v63 }
 0x8bf   :  { %v1532_v16 = vpack.c.bf16 %v1499_v30, %v1499_v30 }
 0x8c1   :  { %1748 = vmatmul.mubr.bf16.vlgmr.msra.gmra.mrb[12].mxu1 %v1532_v16  ;;  %1789 = vmatmul.mubr.bf16.vlgmr.msra.gmra.mrb[16].mxu0 %v1532_v16 }
 0x8c2   :  { %6848 = vmatpush3.bf16.msra.mxu1 %v7439_v18  ;;  %6870 = vmatpush3.bf16.msra.mxu0 %v7440_v19 }
 0x8c3   :  { %6849 = vmatprep.subr.bf16.mxu1 %v7441_v20  ;;  %6871 = vmatprep.subr.bf16.mxu0 %v7442_v21 }
 0x8c6   :  { %6850 = vmatpush3.bf16.msra.mxu1 %v7443_v23  ;;  %6872 = vmatpush3.bf16.msra.mxu0 %v7444_v13 }
 0x8c7   :  { %6851 = vmatprep.subr.bf16.mxu1 %v7445_v24  ;;  %6873 = vmatprep.subr.bf16.mxu0 %v7446_v27 }
 0x8ca   :  { %6852 = vmatpush3.bf16.msra.mxu1 %v7447_v28  ;;  %6874 = vmatpush3.bf16.msra.mxu0 %v7448_v32 }
 0x8cb   :  { %6853 = vmatprep.subr.bf16.mxu1 %v7449_v34  ;;  %6875 = vmatprep.subr.bf16.mxu0 %v7450_v35 }
 0x8ce   :  { %6854 = vmatpush3.bf16.msra.mxu1 %v7451_v36  ;;  %6876 = vmatpush3.bf16.msra.mxu0 %v7452_v26 }
 0x8cf   :  { %6855 = vmatprep.subr.bf16.mxu1 %v7453_v37  ;;  %6877 = vmatprep.subr.bf16.mxu0 %v7454_v38  ;;  %v2191_v37 = vpop.xlane.xlu1 %2190 }
 0x8d2   :  { %6856 = vmatpush3.bf16.msra.mxu1 %v7455_v33  ;;  %6878 = vmatpush3.bf16.msra.mxu0 %v7456_v39 }
 0x8d3   :  { %6857 = vmatprep.subr.bf16.mxu1 %v7457_v42  ;;  %6879 = vmatprep.subr.bf16.mxu0 %v7458_v44 }
 0x8d6   :  { %6858 = vmatpush3.bf16.msra.mxu1 %v7459_v48  ;;  %6880 = vmatpush3.bf16.msra.mxu0 %v7460_v50  ;;  %v2192_v48 = vmul.f32 0.0078125, %v2191_v37 }
 0x8d7   :  { %6859 = vmatprep.subr.bf16.mxu1 %v7461_v51  ;;  %6881 = vmatprep.subr.bf16.mxu0 %v7462_v52  ;;  %v7469_v51 = vld [vmem:[%s10032_s11] ss:$12 sps:$4 sm:$0xff]  }
 0x8da   :  { %6860 = vmatpush3.bf16.msra.mxu1 %v7463_v53  ;;  %6882 = vmatpush3.bf16.msra.mxu0 %v7464_v54  ;;  %v7472_v54 = vld [vmem:[%s10032_s11 + $0x8] ss:$12 sps:$4 sm:$0xff]  }
 0x8db   :  { %6861 = vmatprep.subr.bf16.mxu1 %v7465_v46  ;;  %6883 = vmatprep.subr.bf16.mxu0 %v7466_v43  ;;  %v7475_v46 = vld [vmem:[%s10032_s11 + $0x1c] ss:$12 sps:$4 sm:$0xff]  }
 0x8de   :  { %6862 = vmatpush3.bf16.msra.mxu1 %v7467_v45  ;;  %6884 = vmatpush3.bf16.msra.mxu0 %v7468_v49  ;;  %v2193_v45 = vadd.f32 1e-05, %v2192_v48  ;;  %v7473_v49 = vld [vmem:[%s10032_s11 + $0x18] ss:$12 sps:$4 sm:$0xff]  }
 0x8df   :  { %2388 = vmatprep.subr.bf16.mxu1 %v7471_v57  ;;  %7177 = vmatprep.subr.bf16.mxu0 %v8026_v0  ;;  %v7476_v57 = vld [vmem:[%s10032_s11 + $0x20] ss:$12 sps:$4 sm:$0xff]  }
 0x994   :  { %v1749_v41 = vpop.f32.mrb[12].mxu1  ;;  %v1790_v55 = vpop.f32.mrb[16].mxu0 }
 0x995   :  { %v1750_v47 = vadd.f32 %v1749_v41, %v1538_v62  ;;  %v1791_v4 = vadd.f32 %v1790_v55, %v1546_v1  ;;  %v1751_v5 = vpop.f32.mrb[13].mxu1  ;;  %v1792_v56 = vpop.f32.mrb[17].mxu0  ;;  %v7477_v62 = vld [vmem:[%s10032_s11 + $0x30] ss:$12 sps:$4 sm:$0xff]   ;;  %v7480_v1 = vld [vmem:[%s10032_s11 + $0x38] ss:$12 sps:$4 sm:$0xff]  }
 0x996   :  { %v1752_v7 = vadd.f32 %v1751_v5, %v1542_v2  ;;  %v1793_v8 = vadd.f32 %v1792_v56, %v1550_v3  ;;  %v1753_v58 = vpop.f32.mrb[14].mxu1  ;;  %v1794_v9 = vpop.f32.mrb[18].mxu0  ;;  %v7483_v2 = vld [vmem:[%s10032_s11 + $0x4c] ss:$12 sps:$4 sm:$0xff]   ;;  %v7481_v3 = vld [vmem:[%s10032_s11 + $0x48] ss:$12 sps:$4 sm:$0xff]  }
 0x997   :  { %v6444_v22 = vmul.f32 -1.702, %v1750_v47  ;;  %v6446_v12 = vmul.f32 -1.702, %v1791_v4  ;;  %v1754_v63 = vpop.f32.mrb[15].mxu1  ;;  %v1795_v30 = vpop.f32.mrb[19].mxu0 }
 0x998   :  { %v6445_v16 = vmul.f32 -1.702, %v1752_v7  ;;  %v6447_v17 = vmul.f32 -1.702, %v1793_v8  ;;  %v7484_v41 = vld [vmem:[%s10032_s11 + $0x50] ss:$12 sps:$4 sm:$0xff]  }
 0x999   :  { %v1805_v14 = vmul.f32 1.442695, %v6444_v22  ;;  %v1809_v18 = vmul.f32 1.442695, %v6446_v12  ;;  %v7487_v55 = vld [vmem:[%s10032_s11 + $0x64] ss:$12 sps:$4 sm:$0xff]  }
 0x99a   :  { %v1807_v19 = vmul.f32 1.442695, %v6445_v16  ;;  %v1811_v20 = vmul.f32 1.442695, %v6447_v17  ;;  %v7491_v5 = vld [vmem:[%s10032_s11 + $0x7c] ss:$12 sps:$4 sm:$0xff]  }
 0x99b   :  { %7875 = vpow2.f32 %v1805_v14  ;;  %v7495_v58 = vld [vmem:[%s10032_s11 + $0x94] ss:$12 sps:$4 sm:$0xff]   ;;  %v7493_v12 = vld [vmem:[%s10032_s11 + $0x90] ss:$12 sps:$4 sm:$0xff]   ;;  %v7496_v63 = vld [vmem:[%s10032_s11 + $0x98] ss:$12 sps:$4 sm:$0xff]  }
 0x99c   :  { %7877 = vpow2.f32 %v1809_v18  ;;  %v6481_v22 = vld [vmem:[%s10033_s9] ss:$0 sm:$0xff]  ;;  %v7497_v17 = vld [vmem:[%s10032_s11 + $0xa8] ss:$12 sps:$4 sm:$0xff]   ;;  %v7500_v14 = vld [vmem:[%s10032_s11 + $0xb0] ss:$12 sps:$4 sm:$0xff]  }
 0x99d   :  { %7879 = vpow2.f32 %v1807_v19  ;;  %v6482_v16 = vld [vmem:[%s10034_s10] ss:$0 sm:$0xff] }
 0x99e   :  { %7881 = vpow2.f32 %v1811_v20  ;;  %v7501_v20 = vld [vmem:[%s10035_s13] sm:$0xff]  }
 0x9a5   :  { %v7876_v21 = vpop.eup %7875 }
 0x9a6   :  { %v7878_v23 = vpop.eup %7877  ;;  %v1813_v13 = vadd.f32 1.0, %v7876_v21  ;;  %v7502_v21 = vld [vmem:[%s10035_s13 + $0x8] sm:$0xff]  }
 0x9a7   :  { %v7880_v24 = vpop.eup %7879  ;;  %v1815_v27 = vadd.f32 1.0, %v7878_v23  ;;  %v7503_v23 = vld [vmem:[%s10035_s13 + $0x10] sm:$0xff]  }
 0x9a8   :  { %v7882_v28 = vpop.eup %7881  ;;  %7883 = vrcp.f32 %v1813_v13  ;;  %v1814_v32 = vadd.f32 1.0, %v7880_v24  ;;  %v7504_v13 = vld [vmem:[%s10035_s13 + $0x18] sm:$0xff]   ;;  %v7505_v24 = vld [vmem:[%s10035_s13 + $0x20] sm:$0xff]  }
 0x9a9   :  { %7885 = vrcp.f32 %v1815_v27  ;;  %v1816_v34 = vadd.f32 1.0, %v7882_v28  ;;  %v7506_v27 = vld [vmem:[%s10035_s13 + $0x28] sm:$0xff]   ;;  %v7507_v28 = vld [vmem:[%s10035_s13 + $0x30] sm:$0xff]  }
 0x9aa   :  { %7887 = vrcp.f32 %v1814_v32  ;;  %v7508_v32 = vld [vmem:[%s10035_s13 + $0x38] sm:$0xff]  }
 0x9ab   :  { %7889 = vrcp.f32 %v1816_v34 }
 0x9ac   :  { %7891 = vrsqrt.f32 %v2193_v45 }
 0x9b2   :  { %v7884_v35 = vpop.eup %7883 }
 0x9b3   :  { %v7886_v36 = vpop.eup %7885  ;;  %v1825_v38 = vmul.f32 %v7884_v35, %v1750_v47  ;;  %v7485_v47 = vld [vmem:[%s10032_s11 + $0x60] ss:$12 sps:$4 sm:$0xff]  }
 0x9b4   :  { %v7888_v26 = vpop.eup %7887  ;;  %v1827_v39 = vmul.f32 %v7886_v36, %v1791_v4  ;;  %v7488_v4 = vld [vmem:[%s10032_s11 + $0x68] ss:$12 sps:$4 sm:$0xff]   ;;  %v6448_v36 = vld [vmem:[%s10043_s20] ss:$0 sm:$0xff] }
 0x9b5   :  { %v7890_v33 = vpop.eup %7889  ;;  %v1826_v42 = vmul.f32 %v7888_v26, %v1752_v7  ;;  %v1893_v52 = vpack.c.bf16 %v1825_v38, %v1825_v38  ;;  %v7489_v7 = vld [vmem:[%s10032_s11 + $0x78] ss:$12 sps:$4 sm:$0xff]  }
 0x9b6   :  { %v1828_v44 = vmul.f32 %v7890_v33, %v1793_v8  ;;  %v1895_v43 = vpack.c.bf16 %v1827_v39, %v1827_v39  ;;  %v7892_v56 = vpop.eup %7891  ;;  %v7492_v8 = vld [vmem:[%s10032_s11 + $0x80] ss:$12 sps:$4 sm:$0xff]  }
 0x9b7   :  { %v1894_v50 = vpack.c.bf16 %v1826_v42, %v1826_v42  ;;  %v2195_v9 = vmul.f32 %v7892_v56, %v8617_v40  ;;  %v7499_v40 = vld [vmem:[%s10032_s11 + $0xac] ss:$12 sps:$4 sm:$0xff]  }
 0x9b8   :  { %v1896_v53 = vpack.c.bf16 %v1828_v44, %v1828_v44 }
 0x9b9   :  { %2128 = vmatprep.mubr.bf16.mxu1 %v1894_v50  ;;  %v2202_v30 = vmul.f32 %v6481_v22, %v2195_v9 }
 0x9ba   :  { %2168 = vmatprep.mubr.bf16.mxu0 %v1896_v53  ;;  %2129 = vmatmul.mubr.bf16.vlgmr.msra.gmra.mrb[16].mxu1 %v1893_v52  ;;  %v2243_v53 = vld [vmem:[%s10036_s12] sm:$0x7] }
 0x9bb   :  { %2169 = vmatmul.mubr.bf16.vlgmr.msra.gmra.mrb[20].mxu0 %v1895_v43  ;;  %2389 = vmatpush1.bf16.msra.mxu1 %v7469_v51  ;;  %v2209_v18 = vadd.f32 %v6482_v16, %v2202_v30 }
 0x9bc   :  { %7178 = vmatpush3.bf16.msra.mxu0 %v7472_v54  ;;  %2390 = vmatprep.subr.bf16.mxu1 %v7475_v46  ;;  %v2248_v54 = vrot.slane %v2243_v53, %v8330_v25  ;;  %v2256_v46 = vrot.slane %v2243_v53, %v8363_v10 }
 0x9bd   :  { %7179 = vmatprep.subr.bf16.mxu0 %v8026_v0  ;;  %2420 = vmatprep.mubr.bf16.mxu1 %v8028_v59  ;;  %v2242_v19 = vpack.c.bf16 %v2209_v18, %v2209_v18 }
 0x9be   :  { %7193 = vmatprep.mubr.msk.bf16.mxu0 %vm8027_vm0, %v8026_v0 }
 0x9bf   :  { %2391 = vmatpush1.bf16.msra.mxu1 %v7473_v49 }
 0x9c0   :  { %7180 = vmatpush3.bf16.msra.mxu0 %v7476_v57  ;;  %2392 = vmatprep.subr.bf16.mxu1 %v7479_v60 }
 0x9c1   :  { %7181 = vmatprep.subr.bf16.mxu0 %v8026_v0 }
 0x9c3   :  { %2393 = vmatpush1.bf16.msra.mxu1 %v7477_v62 }
 0x9c4   :  { %7182 = vmatpush3.bf16.msra.mxu0 %v7480_v1  ;;  %2394 = vmatprep.subr.bf16.mxu1 %v7483_v2 }
 0x9c5   :  { %7183 = vmatprep.subr.bf16.mxu0 %v8026_v0 }
 0x9c7   :  { %2395 = vmatpush1.bf16.msra.mxu1 %v7481_v3 }
 0x9c8   :  { %7184 = vmatpush3.bf16.msra.mxu0 %v7484_v41  ;;  %2396 = vmatprep.subr.bf16.mxu1 %v7487_v55  ;;  %v2252_v55 = vrot.slane %v2243_v53, %v8343_v31 }
 0x9c9   :  { %7185 = vmatprep.subr.bf16.mxu0 %v8026_v0 }
 0x9cb   :  { %2397 = vmatpush1.bf16.msra.mxu1 %v7485_v47 }
 0x9cc   :  { %7186 = vmatpush3.bf16.msra.mxu0 %v7488_v4  ;;  %2398 = vmatprep.subr.bf16.mxu1 %v7491_v5 }
 0x9cd   :  { %7187 = vmatprep.subr.bf16.mxu0 %v8026_v0 }
 0x9cf   :  { %2399 = vmatpush1.bf16.msra.mxu1 %v7489_v7 }
 0x9d0   :  { %7188 = vmatpush3.bf16.msra.mxu0 %v7492_v8  ;;  %2400 = vmatprep.subr.bf16.mxu1 %v7495_v58 }
 0x9d1   :  { %7189 = vmatprep.subr.bf16.mxu0 %v8026_v0 }
 0x9d3   :  { %2401 = vmatpush1.bf16.msra.mxu1 %v7493_v12 }
 0x9d4   :  { %7190 = vmatpush3.bf16.msra.mxu0 %v7496_v63  ;;  %2402 = vmatprep.subr.bf16.mxu1 %v7499_v40 }
 0x9d5   :  { %7191 = vmatprep.subr.bf16.mxu0 %v8026_v0 }
 0x9d7   :  { %2403 = vmatpush1.bf16.msra.mxu1 %v7497_v17 }
 0x9d8   :  { %7192 = vmatpush3.bf16.msra.mxu0 %v7500_v14  ;;  %7197 = vmatprep.subr.bf16.mxu1 %v8026_v0 }
 0x9da   :  { %2421 = vmatmul.mubr.bf16.vlgmr.msra.gmra.mrb[20].mxu1 %v2242_v19 }
 0x9db   :  { %7194 = vmatmul.mubr.bf16.vlgmr.msra.gmra.mrb[24].mxu0 %v2242_v19  ;;  %7213 = vmatprep.mubr.msk.bf16.mxu1 %vm8027_vm0, %v8026_v0 }
 0x9dc   :  { %3129 = vmatprep.mubr.bf16.mxu0 %v8028_v59  ;;  %7198 = vmatpush3.bf16.msra.mxu1 %v7501_v20 }
 0x9dd   :  { %7199 = vmatprep.subr.bf16.mxu1 %v8026_v0 }
 0x9e0   :  { %7200 = vmatpush3.bf16.msra.mxu1 %v7502_v21 }
 0x9e1   :  { %7201 = vmatprep.subr.bf16.mxu1 %v8026_v0 }
 0x9e4   :  { %7202 = vmatpush3.bf16.msra.mxu1 %v7503_v23 }
 0x9e5   :  { %7203 = vmatprep.subr.bf16.mxu1 %v8026_v0 }
 0x9e8   :  { %7204 = vmatpush3.bf16.msra.mxu1 %v7504_v13 }
 0x9e9   :  { %7205 = vmatprep.subr.bf16.mxu1 %v8026_v0 }
 0x9ec   :  { %7206 = vmatpush3.bf16.msra.mxu1 %v7505_v24 }
 0x9ed   :  { %7207 = vmatprep.subr.bf16.mxu1 %v8026_v0 }
 0x9f0   :  { %7208 = vmatpush3.bf16.msra.mxu1 %v7506_v27 }
 0x9f1   :  { %7209 = vmatprep.subr.bf16.mxu1 %v8026_v0 }
 0x9f4   :  { %7210 = vmatpush3.bf16.msra.mxu1 %v7507_v28 }
 0x9f5   :  { %7211 = vmatprep.subr.bf16.mxu1 %v8026_v0 }
 0x9f8   :  { %7212 = vmatpush3.bf16.msra.mxu1 %v7508_v32 }
 0xa8d   :  { %v6863_v34 = vpop.f32.mrb[16].mxu1 }
 0xa8e   :  { %v6885_v35 = vpop.f32.mrb[20].mxu0  ;;  %v6864_v26 = vpop.f32.mrb[17].mxu1 }
 0xa8f   :  { %v6865_v37 = vadd.f32 %v6864_v26, %v6863_v34  ;;  %v6886_v38 = vpop.f32.mrb[21].mxu0  ;;  %v6866_v33 = vpop.f32.mrb[18].mxu1 }
 0xa90   :  { %v6887_v39 = vadd.f32 %v6886_v38, %v6885_v35  ;;  %v6888_v42 = vpop.f32.mrb[22].mxu0  ;;  %v6867_v44 = vpop.f32.mrb[19].mxu1 }
 0xa91   :  { %v2131_v48 = vadd.f32 %v6865_v37, %v6448_v36  ;;  %v6889_v50 = vpop.f32.mrb[23].mxu0 }
 0xa93   :  { %v2171_v51 = vadd.f32 %v6887_v39, %v2131_v48 }
 0xa95   :  { %v2176_v52 = vadd.f32 %v2171_v51, %v8567_v15 }
 0xa97   :  { %2177 = vst [vmem:[%s10044_s21] sm:$0x1f] %v2176_v52 }
 0xaad   :  { %v2422_v43 = vpop.f32.mrb[20].mxu1 }
 0xaae   :  { %v2423_v45 = vadd.f32 %v2422_v43, %v2248_v54  ;;  %v2463_v49 = vpop.f32.mrb[24].mxu0  ;;  %v2424_v57 = vpop.f32.mrb[21].mxu1 }
 0xaaf   :  { %v8932_v60 = vadd.f32 %v2463_v49, %v2256_v46  ;;  %v7195_v62 = vpop.f32.mrb[25].mxu0  ;;  %v2426_v15 = vpop.f32.mrb[22].mxu1  ;;  %v2425_v12 = vadd.f32 %v2424_v57, %v2252_v55 }
 0xab0   :  { %v2470_v1 = vcombine.high %v2423_v45, %v2423_v45  ;;  %v2477_v2 = vrot.slane %v2423_v45, %v8340_v29  ;;  %v2466_v3 = vpop.f32.mrb[26].mxu0  ;;  %v2427_v41 = vpop.f32.mrb[23].mxu1 }
 0xab1   :  { %v7196_v47 = vpop.f32.mrb[27].mxu0 }
 0xab2   :  { %v2484_v4 = vrot.slane %v2470_v1, %v8340_v29  ;;  %v2485_v5 = vcombine.high %v2477_v2, %v2477_v2  ;;  %v2493_v56 = vrot.slane %v2477_v2, %v8340_v29 }
 0xab4   :  { %v2486_v7 = vcombine.high %v2484_v4, %v2484_v4  ;;  %v2500_v8 = vrot.slane %v2484_v4, %v8340_v29  ;;  %v2507_v58 = vrot.slane %v2485_v5, %v8340_v29  ;;  %v2515_v9 = vcombine.high %v2493_v56, %v2493_v56 }
 0xab5   :  { %v2520_v22 = vrot.slane %v2493_v56, %v8330_v25 }
 0xab6   :  { %v2514_v63 = vrot.slane %v2486_v7, %v8340_v29  ;;  %v2516_v40 = vcombine.high %v2507_v58, %v2507_v58  ;;  %v2524_v30 = vrot.slane %v2507_v58, %v8330_v25  ;;  %v2528_v16 = vrot.slane %v2515_v9, %v8330_v25 }
 0xab7   :  { %v2536_v17 = vrot.slane %v2500_v8, %v8330_v25  ;;  %v2547_v14 = vmul.f32 %v2520_v22, %v2425_v12 }
 0xab8   :  { %v2532_v18 = vrot.slane %v2516_v40, %v8330_v25  ;;  %v2540_v19 = vrot.slane %v2514_v63, %v8330_v25  ;;  %v2548_v20 = vmul.f32 %v2524_v30, %v2425_v12  ;;  %v2549_v21 = vmul.f32 %v2528_v16, %v2425_v12 }
 0xab9   :  { %v2551_v23 = vmul.f32 %v2536_v17, %v2425_v12  ;;  %v2553_v13 = vsel %vm798_vm8, %v2547_v14, -inf }
 0xaba   :  { %v2550_v24 = vmul.f32 %v2532_v18, %v2425_v12  ;;  %v2552_v27 = vmul.f32 %v2540_v19, %v2425_v12  ;;  %v2554_v28 = vrot.slane %v2553_v13, 4  ;;  %v2560_v32 = vsel %vm798_vm8, %v2548_v20, -inf }
 0xabb   :  { %v2561_v34 = vrot.slane %v2560_v32, 4  ;;  %v2567_v35 = vsel %vm798_vm8, %v2549_v21, -inf  ;;  %v2581_v36 = vsel %vm798_vm8, %v2551_v23, -inf }
 0xabc   :  { %v2555_v26 = vmax.f32 %v2553_v13, %v2554_v28  ;;  %v2568_v37 = vrot.slane %v2567_v35, 4  ;;  %v2574_v38 = vsel %vm798_vm8, %v2550_v24, -inf  ;;  %v2582_v33 = vrot.slane %v2581_v36, 4 }
 0xabd   :  { %v2562_v39 = vmax.f32 %v2560_v32, %v2561_v34  ;;  %v2575_v42 = vrot.slane %v2574_v38, 4  ;;  %v2588_v44 = vsel %vm798_vm8, %v2552_v27, -inf }
 0xabe   :  { %v2556_v48 = vrot.slane %v2555_v26, 2  ;;  %v2569_v50 = vmax.f32 %v2567_v35, %v2568_v37  ;;  %v2583_v51 = vmax.f32 %v2581_v36, %v2582_v33  ;;  %v2589_v52 = vrot.slane %v2588_v44, 4 }
 0xabf   :  { %v2563_v53 = vrot.slane %v2562_v39, 2  ;;  %v2576_v54 = vmax.f32 %v2574_v38, %v2575_v42 }
 0xac0   :  { %v2557_v46 = vmax.f32 %v2555_v26, %v2556_v48  ;;  %v2570_v43 = vrot.slane %v2569_v50, 2  ;;  %v2584_v45 = vrot.slane %v2583_v51, 2  ;;  %v2590_v49 = vmax.f32 %v2588_v44, %v2589_v52 }
 0xac1   :  { %v2564_v57 = vmax.f32 %v2562_v39, %v2563_v53  ;;  %v2577_v62 = vrot.slane %v2576_v54, 2 }
 0xac2   :  { %v2558_v15 = vrot.slane %v2557_v46, 1  ;;  %v2571_v1 = vmax.f32 %v2569_v50, %v2570_v43  ;;  %v2585_v2 = vmax.f32 %v2583_v51, %v2584_v45  ;;  %v2591_v3 = vrot.slane %v2590_v49, 2 }
 0xac3   :  { %v2565_v41 = vrot.slane %v2564_v57, 1  ;;  %v2578_v55 = vmax.f32 %v2576_v54, %v2577_v62 }
 0xac4   :  { %v2559_v47 = vmax.f32 %v2557_v46, %v2558_v15  ;;  %v2572_v4 = vrot.slane %v2571_v1, 1  ;;  %v2586_v5 = vrot.slane %v2585_v2, 1  ;;  %v2592_v56 = vmax.f32 %v2590_v49, %v2591_v3 }
 0xac5   :  { %v2566_v7 = vmax.f32 %v2564_v57, %v2565_v41  ;;  %v2579_v8 = vrot.slane %v2578_v55, 1 }
 0xac6   :  { %v2573_v58 = vmax.f32 %v2571_v1, %v2572_v4  ;;  %v2587_v9 = vmax.f32 %v2585_v2, %v2586_v5  ;;  %v2593_v22 = vrot.slane %v2592_v56, 1  ;;  %v2595_v12 = vsub.f32 %v2547_v14, %v2559_v47 }
 0xac7   :  { %v2580_v63 = vmax.f32 %v2578_v55, %v2579_v8  ;;  %v2596_v40 = vsub.f32 %v2548_v20, %v2566_v7 }
 0xac8   :  { %v2594_v30 = vmax.f32 %v2592_v56, %v2593_v22  ;;  %v2597_v16 = vsub.f32 %v2549_v21, %v2573_v58  ;;  %v2599_v17 = vsub.f32 %v2551_v23, %v2587_v9  ;;  %v2601_v18 = vmul.f32 1.442695, %v2595_v12 }
 0xac9   :  { %v2598_v19 = vsub.f32 %v2550_v24, %v2580_v63  ;;  %v2603_v13 = vmul.f32 1.442695, %v2596_v40 }
 0xaca   :  { %v2600_v28 = vsub.f32 %v2552_v27, %v2594_v30  ;;  %7893 = vpow2.f32 %v2601_v18  ;;  %v2605_v32 = vmul.f32 1.442695, %v2597_v16  ;;  %v2609_v34 = vmul.f32 1.442695, %v2599_v17 }
 0xacb   :  { %7895 = vpow2.f32 %v2603_v13  ;;  %v2607_v35 = vmul.f32 1.442695, %v2598_v19 }
 0xacc   :  { %7897 = vpow2.f32 %v2605_v32  ;;  %v2611_v36 = vmul.f32 1.442695, %v2600_v28 }
 0xacd   :  { %7899 = vpow2.f32 %v2607_v35 }
 0xace   :  { %7901 = vpow2.f32 %v2609_v34 }
 0xacf   :  { %7903 = vpow2.f32 %v2611_v36 }
 0xad4   :  { %v7894_v14 = vpop.eup %7893 }
 0xad5   :  { %v7896_v26 = vpop.eup %7895  ;;  %v2613_v20 = vsel %vm798_vm8, %v7894_v14, 0.0 }
 0xad6   :  { %v7898_v21 = vpop.eup %7897  ;;  %v2614_v23 = vrot.slane %v2613_v20, 4  ;;  %v2620_v24 = vsel %vm798_vm8, %v7896_v26, 0.0 }
 0xad7   :  { %v7900_v37 = vpop.eup %7899  ;;  %v2621_v27 = vrot.slane %v2620_v24, 4  ;;  %v2627_v38 = vsel %vm798_vm8, %v7898_v21, 0.0 }
 0xad8   :  { %v7902_v33 = vpop.eup %7901  ;;  %v2615_v39 = vadd.f32 %v2614_v23, %v2613_v20  ;;  %v2628_v42 = vrot.slane %v2627_v38, 4  ;;  %v2634_v44 = vsel %vm798_vm8, %v7900_v37, 0.0 }
 0xad9   :  { %v7904_v48 = vpop.eup %7903  ;;  %v2622_v50 = vadd.f32 %v2621_v27, %v2620_v24  ;;  %v2635_v51 = vrot.slane %v2634_v44, 4  ;;  %v2641_v52 = vsel %vm798_vm8, %v7902_v33, 0.0 }
 0xada   :  { %v2616_v53 = vrot.slane %v2615_v39, 2  ;;  %v2629_v54 = vadd.f32 %v2628_v42, %v2627_v38  ;;  %v2642_v46 = vrot.slane %v2641_v52, 4  ;;  %v2648_v43 = vsel %vm798_vm8, %v7904_v48, 0.0 }
 0xadb   :  { %v2623_v45 = vrot.slane %v2622_v50, 2  ;;  %v2636_v49 = vadd.f32 %v2635_v51, %v2634_v44  ;;  %v2649_v57 = vrot.slane %v2648_v43, 4 }
 0xadc   :  { %v2617_v62 = vadd.f32 %v2616_v53, %v2615_v39  ;;  %v2630_v15 = vrot.slane %v2629_v54, 2  ;;  %v2643_v1 = vadd.f32 %v2642_v46, %v2641_v52 }
 0xadd   :  { %v2624_v2 = vadd.f32 %v2623_v45, %v2622_v50  ;;  %v2637_v3 = vrot.slane %v2636_v49, 2  ;;  %v2650_v41 = vadd.f32 %v2649_v57, %v2648_v43 }
 0xade   :  { %v2618_v55 = vrot.slane %v2617_v62, 1  ;;  %v2631_v47 = vadd.f32 %v2630_v15, %v2629_v54  ;;  %v2644_v4 = vrot.slane %v2643_v1, 2 }
 0xadf   :  { %v2625_v5 = vrot.slane %v2624_v2, 1  ;;  %v2638_v56 = vadd.f32 %v2637_v3, %v2636_v49  ;;  %v2651_v7 = vrot.slane %v2650_v41, 2 }
 0xae0   :  { %v2619_v8 = vadd.f32 %v2618_v55, %v2617_v62  ;;  %v2632_v58 = vrot.slane %v2631_v47, 1  ;;  %v2645_v9 = vadd.f32 %v2644_v4, %v2643_v1 }
 0xae1   :  { %v2626_v22 = vadd.f32 %v2625_v5, %v2624_v2  ;;  %v2639_v12 = vrot.slane %v2638_v56, 1  ;;  %v2652_v63 = vadd.f32 %v2651_v7, %v2650_v41 }
 0xae2   :  { %v2633_v40 = vadd.f32 %v2632_v58, %v2631_v47  ;;  %v2646_v30 = vrot.slane %v2645_v9, 1  ;;  %7905 = vrcp.f32 %v2619_v8 }
 0xae3   :  { %v2640_v16 = vadd.f32 %v2639_v12, %v2638_v56  ;;  %7907 = vrcp.f32 %v2626_v22  ;;  %v2653_v17 = vrot.slane %v2652_v63, 1 }
 0xae4   :  { %7909 = vrcp.f32 %v2633_v40  ;;  %v2647_v18 = vadd.f32 %v2646_v30, %v2645_v9 }
 0xae5   :  { %v2654_v19 = vadd.f32 %v2653_v17, %v2652_v63  ;;  %7911 = vrcp.f32 %v2640_v16 }
 0xae6   :  { %7913 = vrcp.f32 %v2647_v18 }
 0xae7   :  { %7915 = vrcp.f32 %v2654_v19 }
 0xaec   :  { %v7906_v13 = vpop.eup %7905 }
 0xaed   :  { %v7908_v28 = vpop.eup %7907  ;;  %v2656_v32 = vmul.f32 %v7906_v13, %v7894_v14 }
 0xaee   :  { %v7910_v34 = vpop.eup %7909  ;;  %v2658_v35 = vmul.f32 %v7908_v28, %v7896_v26 }
 0xaef   :  { %v7912_v36 = vpop.eup %7911  ;;  %v2660_v20 = vmul.f32 %v7910_v34, %v7898_v21  ;;  %v2667_v23 = vmul.f32 %v2656_v32, %v8932_v60 }
 0xaf0   :  { %v7914_v24 = vpop.eup %7913  ;;  %v2662_v27 = vmul.f32 %v7912_v36, %v7900_v37  ;;  %v2668_v38 = vmul.f32 %v2658_v35, %v8932_v60 }
 0xaf1   :  { %v7916_v39 = vpop.eup %7915  ;;  %v2664_v42 = vmul.f32 %v7914_v24, %v7902_v33  ;;  %v2669_v44 = vmul.f32 %v2660_v20, %v8932_v60  ;;  %v2673_v50 = vsel %vm798_vm8, %v2667_v23, 0.0 }
 0xaf2   :  { %v2666_v51 = vmul.f32 %v7916_v39, %v7904_v48  ;;  %v2670_v52 = vmul.f32 %v2662_v27, %v8932_v60  ;;  %v2674_v14 = vrot.slane %v2673_v50, 4  ;;  %v2680_v26 = vsel %vm798_vm8, %v2668_v38, 0.0 }
 0xaf3   :  { %v2671_v21 = vmul.f32 %v2664_v42, %v8932_v60  ;;  %v2681_v53 = vrot.slane %v2680_v26, 4  ;;  %v2687_v54 = vsel %vm798_vm8, %v2669_v44, 0.0 }
 0xaf4   :  { %v2672_v37 = vmul.f32 %v2666_v51, %v8932_v60  ;;  %v2675_v46 = vadd.f32 %v2674_v14, %v2673_v50  ;;  %v2688_v43 = vrot.slane %v2687_v54, 4  ;;  %v2694_v33 = vsel %vm798_vm8, %v2670_v52, 0.0 }
 0xaf5   :  { %v2682_v45 = vadd.f32 %v2681_v53, %v2680_v26  ;;  %v2695_v49 = vrot.slane %v2694_v33, 4  ;;  %v2701_v48 = vsel %vm798_vm8, %v2671_v21, 0.0 }
 0xaf6   :  { %v2676_v57 = vrot.slane %v2675_v46, 2  ;;  %v2689_v62 = vadd.f32 %v2688_v43, %v2687_v54  ;;  %v2702_v15 = vrot.slane %v2701_v48, 4  ;;  %v2708_v1 = vsel %vm798_vm8, %v2672_v37, 0.0  ;;  %v6515_v43 = vld [vmem:[%s10037_s14] ss:$0 sm:$0xff] }
 0xaf7   :  { %v2683_v2 = vrot.slane %v2682_v45, 2  ;;  %v2696_v3 = vadd.f32 %v2695_v49, %v2694_v33  ;;  %v2709_v41 = vrot.slane %v2708_v1, 4 }
 0xaf8   :  { %v2677_v55 = vadd.f32 %v2676_v57, %v2675_v46  ;;  %v2690_v47 = vrot.slane %v2689_v62, 2  ;;  %v2703_v4 = vadd.f32 %v2702_v15, %v2701_v48  ;;  %v3561_v48 = vrot.slane %v8381_v11, 5 }
 0xaf9   :  { %v2684_v60 = vadd.f32 %v2683_v2, %v2682_v45  ;;  %v2697_v5 = vrot.slane %v2696_v3, 2  ;;  %v2710_v56 = vadd.f32 %v2709_v41, %v2708_v1  ;;  %v8024_v1 = vld [vmem:[%s10055_s30 + $0x10] sm:$0x1f] }
 0xafa   :  { %v2678_v7 = vrot.slane %v2677_v55, 1  ;;  %v2691_v8 = vadd.f32 %v2690_v47, %v2689_v62  ;;  %v2704_v58 = vrot.slane %v2703_v4, 2  ;;  %v8990_v2 = vsel %vm794_vm7, %v8024_v1, %v3561_v48  ;;  %v7511_v41 = vld [vmem:[%s10038_s17 + $0x4] ss:$16 sps:$4 sm:$0xff]   ;;  %v7514_v47 = vld [vmem:[%s10038_s17 + $0xc] ss:$16 sps:$4 sm:$0xff]  }
 0xafb   :  { %v2685_v9 = vrot.slane %v2684_v60, 1  ;;  %v2698_v22 = vadd.f32 %v2697_v5, %v2696_v3  ;;  %v2711_v12 = vrot.slane %v2710_v56, 2  ;;  %v7509_v3 = vld [vmem:[%s10038_s17] ss:$16 sps:$4 sm:$0xff]   ;;  %3097 = vmatprep.subr.bf16.mxu0 %v7511_v41  ;;  %3138 = vmatprep.subr.bf16.mxu1 %v7514_v47  ;;  %v7562_v47 = vld [vmem:[%s10041_s19 + $0xc8] sm:$0xff]  }
 0xafc   :  { %v2679_v63 = vadd.f32 %v2678_v7, %v2677_v55  ;;  %v2692_v40 = vrot.slane %v2691_v8, 1  ;;  %v2705_v30 = vadd.f32 %v2704_v58, %v2703_v4  ;;  %v7512_v55 = vld [vmem:[%s10038_s17 + $0x8] ss:$16 sps:$4 sm:$0xff]   ;;  %v7517_v4 = vld [vmem:[%s10038_s17 + $0x24] ss:$16 sps:$4 sm:$0xff]   ;;  %3098 = vmatpush1.bf16.msra.mxu0 %v7509_v3 }
 0xafd   :  { %v2686_v16 = vadd.f32 %v2685_v9, %v2684_v60  ;;  %v2699_v17 = vrot.slane %v2698_v22, 1  ;;  %v2712_v18 = vadd.f32 %v2711_v12, %v2710_v56  ;;  %v7520_v60 = vld [vmem:[%s10038_s17 + $0x2c] ss:$16 sps:$4 sm:$0xff]   ;;  %v7515_v5 = vld [vmem:[%s10038_s17 + $0x20] ss:$16 sps:$4 sm:$0xff]   ;;  %3099 = vmatprep.subr.bf16.mxu0 %v7517_v4 }
 0xafe   :  { %v2693_v19 = vadd.f32 %v2692_v40, %v2691_v8  ;;  %v2706_v13 = vrot.slane %v2705_v30, 1  ;;  %v2731_v28 = vpack.c.bf16 %v2679_v63, %v2679_v63  ;;  %v7518_v56 = vld [vmem:[%s10038_s17 + $0x28] ss:$16 sps:$4 sm:$0xff]   ;;  %v7523_v7 = vld [vmem:[%s10038_s17 + $0x44] ss:$16 sps:$4 sm:$0xff]  }
 0xaff   :  { %v2700_v32 = vadd.f32 %v2699_v17, %v2698_v22  ;;  %v2713_v34 = vrot.slane %v2712_v18, 1  ;;  %v2732_v35 = vpack.c.bf16 %v2686_v16, %v2686_v16  ;;  %v7526_v8 = vld [vmem:[%s10038_s17 + $0x4c] ss:$16 sps:$4 sm:$0xff]   ;;  %v7521_v58 = vld [vmem:[%s10038_s17 + $0x40] ss:$16 sps:$4 sm:$0xff]  }
 0xb00   :  { %v2707_v36 = vadd.f32 %v2706_v13, %v2705_v30  ;;  %v2733_v20 = vpack.c.bf16 %v2693_v19, %v2693_v19  ;;  %v2743_v27 = vunpack.c.l.b16 %v2731_v28  ;;  %3100 = vmatpush1.bf16.msra.mxu0 %v7515_v5  ;;  %v7524_v9 = vld [vmem:[%s10038_s17 + $0x48] ss:$16 sps:$4 sm:$0xff]   ;;  %v7527_v28 = vld [vmem:[%s10038_s17 + $0x60] ss:$16 sps:$4 sm:$0xff]  }
 0xb01   :  { %v2714_v23 = vadd.f32 %v2713_v34, %v2712_v18  ;;  %v2734_v24 = vpack.c.bf16 %v2700_v32, %v2700_v32  ;;  %v2744_v38 = vunpack.c.l.b16 %v2732_v35  ;;  %3101 = vmatprep.subr.bf16.mxu0 %v7523_v7  ;;  %v7529_v32 = vld [vmem:[%s10038_s17 + $0x64] ss:$16 sps:$4 sm:$0xff]   ;;  %v7530_v34 = vld [vmem:[%s10038_s17 + $0x68] ss:$16 sps:$4 sm:$0xff]   ;;  %v7532_v35 = vld [vmem:[%s10038_s17 + $0x6c] ss:$16 sps:$4 sm:$0xff]  }
 0xb02   :  { %v2735_v39 = vpack.c.bf16 %v2707_v36, %v2707_v36  ;;  %v2745_v42 = vunpack.c.l.b16 %v2733_v20  ;;  %v7533_v36 = vld [vmem:[%s10038_s17 + $0x80] ss:$16 sps:$4 sm:$0xff]   ;;  %v7535_v20 = vld [vmem:[%s10038_s17 + $0x84] ss:$16 sps:$4 sm:$0xff]   ;;  %v7563_v4 = vld [vmem:[%s10041_s19 + $0x8] sm:$0xff]  }
 0xb03   :  { %v2736_v44 = vpack.c.bf16 %v2714_v23, %v2714_v23  ;;  %v2746_v50 = vunpack.c.l.b16 %v2734_v24  ;;  %v2749_v51 = vsel %vm109_vm1, %v2744_v38, %v2743_v27  ;;  %v7536_v23 = vld [vmem:[%s10038_s17 + $0x88] ss:$16 sps:$4 sm:$0xff]   ;;  %v7538_v24 = vld [vmem:[%s10038_s17 + $0x8c] ss:$16 sps:$4 sm:$0xff]   ;;  %v7541_v27 = vld [vmem:[%s10038_s17 + $0xa4] ss:$16 sps:$4 sm:$0xff]  }
 0xb04   :  { %v2747_v52 = vunpack.c.l.b16 %v2735_v39  ;;  %v2750_v14 = vsel %vm112_vm2, %v2745_v42, %v2749_v51  ;;  %3102 = vmatpush1.bf16.msra.mxu0 %v7521_v58  ;;  %v7544_v38 = vld [vmem:[%s10038_s17 + $0xac] ss:$16 sps:$4 sm:$0xff]   ;;  %v7539_v39 = vld [vmem:[%s10038_s17 + $0xa0] ss:$16 sps:$4 sm:$0xff]   ;;  %v7542_v42 = vld [vmem:[%s10038_s17 + $0xa8] ss:$16 sps:$4 sm:$0xff]  }
 0xb05   :  { %v2748_v26 = vunpack.c.l.b16 %v2736_v44  ;;  %v2751_v21 = vsel %vm115_vm3, %v2746_v50, %v2750_v14  ;;  %3103 = vmatprep.subr.bf16.mxu0 %v7529_v32  ;;  %v7547_v44 = vld [vmem:[%s10038_s17 + $0xc4] ss:$16 sps:$4 sm:$0xff]   ;;  %v7550_v50 = vld [vmem:[%s10038_s17 + $0xcc] ss:$16 sps:$4 sm:$0xff]   ;;  %v7545_v51 = vld [vmem:[%s10038_s17 + $0xc0] ss:$16 sps:$4 sm:$0xff]  }
 0xb06   :  { %v2752_v53 = vsel %vm1368_vm9, %v2747_v52, %v2751_v21  ;;  %v7548_v52 = vld [vmem:[%s10038_s17 + $0xc8] ss:$16 sps:$4 sm:$0xff]   ;;  %v7553_v14 = vld [vmem:[%s10038_s17 + $0xe4] ss:$16 sps:$4 sm:$0xff]   ;;  %v7551_v21 = vld [vmem:[%s10038_s17 + $0xe0] ss:$16 sps:$4 sm:$0xff]  }
 0xb07   :  { %v2753_v54 = vsel %vm1370_vm10, %v2748_v26, %v2752_v53  ;;  %v7556_v26 = vld [vmem:[%s10038_s17 + $0xec] ss:$16 sps:$4 sm:$0xff]   ;;  %v7554_v53 = vld [vmem:[%s10038_s17 + $0xe8] ss:$16 sps:$4 sm:$0xff]   ;;  %v7557_v1 = vld [vmem:[%s10041_s19 + $0x40] sm:$0xff]  }
 0xb08   :  { %v2754_v37 = vpack.c.b16 %v2753_v54, %v2753_v54  ;;  %3104 = vmatpush1.bf16.msra.mxu0 %v7527_v28  ;;  %v7559_v3 = vld [vmem:[%s10041_s19] sm:$0xff]   ;;  %v7565_v5 = vld [vmem:[%s10041_s19 + $0x50] sm:$0xff]   ;;  %v7569_v58 = vld [vmem:[%s10041_s19 + $0x58] sm:$0xff]  }
 0xb09   :  { %3105 = vmatprep.subr.bf16.mxu0 %v7535_v20  ;;  %v7560_v41 = vld [vmem:[%s10041_s19 + $0x80] sm:$0xff]   ;;  %v7567_v7 = vld [vmem:[%s10041_s19 + $0x10] sm:$0xff]   ;;  %v7580_v28 = vld [vmem:[%s10041_s19 + $0xa8] sm:$0xff]  }
 0xb0a   :  { %7214 = vmatmul.mubr.bf16.vlgmr.msra.gmra.mrb[24].mxu1 %v2754_v37  ;;  %v7581_v32 = vld [vmem:[%s10041_s19 + $0x70] sm:$0xff]   ;;  %v7585_v20 = vld [vmem:[%s10041_s19 + $0x78] sm:$0xff]  }
 0xb0b   :  { %3170 = vmatprep.mubr.bf16.mxu1 %v8028_v59  ;;  %3139 = vmatpush1.bf16.msra.mxu1 %v7512_v55  ;;  %v7561_v55 = vld [vmem:[%s10041_s19 + $0x48] sm:$0xff]  }
 0xb0c   :  { %3140 = vmatprep.subr.bf16.mxu1 %v7520_v60  ;;  %3106 = vmatpush1.bf16.msra.mxu0 %v7533_v36  ;;  %v7564_v60 = vld [vmem:[%s10041_s19 + $0x88] sm:$0xff]   ;;  %v7584_v36 = vld [vmem:[%s10041_s19 + $0xb0] sm:$0xff]  }
 0xb0d   :  { %3107 = vmatprep.subr.bf16.mxu0 %v7541_v27  ;;  %v7588_v27 = vld [vmem:[%s10041_s19 + $0xb8] sm:$0xff]  }
 0xb0f   :  { %3141 = vmatpush1.bf16.msra.mxu1 %v7518_v56  ;;  %v7566_v56 = vld [vmem:[%s10041_s19 + $0xd0] sm:$0xff]  }
 0xb10   :  { %3142 = vmatprep.subr.bf16.mxu1 %v7526_v8  ;;  %3108 = vmatpush1.bf16.msra.mxu0 %v7539_v39  ;;  %v7568_v8 = vld [vmem:[%s10041_s19 + $0x90] sm:$0xff]   ;;  %v2915_v39 = vld [vmem:[%s10042_s18] sm:$0xf] }
 0xb11   :  { %3109 = vmatprep.subr.bf16.mxu0 %v7547_v44  ;;  %v2928_v44 = vrot.slane %v2915_v39, %v8363_v10 }
 0xb13   :  { %3143 = vmatpush1.bf16.msra.mxu1 %v7524_v9  ;;  %v7570_v9 = vld [vmem:[%s10041_s19 + $0xd8] sm:$0xff]  }
 0xb14   :  { %3144 = vmatprep.subr.bf16.mxu1 %v7532_v35  ;;  %3110 = vmatpush1.bf16.msra.mxu0 %v7545_v51  ;;  %v7583_v35 = vld [vmem:[%s10041_s19 + $0x30] sm:$0xff]   ;;  %v2932_v51 = vrot.slane %v2915_v39, %v8793_v61 }
 0xb15   :  { %3111 = vmatprep.subr.bf16.mxu0 %v7553_v14 }
 0xb17   :  { %3145 = vmatpush1.bf16.msra.mxu1 %v7530_v34  ;;  %v7582_v34 = vld [vmem:[%s10041_s19 + $0xf0] sm:$0xff]  }
 0xb18   :  { %3146 = vmatprep.subr.bf16.mxu1 %v7538_v24  ;;  %3112 = vmatpush1.bf16.msra.mxu0 %v7551_v21  ;;  %v7587_v24 = vld [vmem:[%s10041_s19 + $0x38] sm:$0xff]  }
 0xb19   :  { %6909 = vmatprep.subr.bf16.mxu0 %v7557_v1 }
 0xb1b   :  { %3147 = vmatpush1.bf16.msra.mxu1 %v7536_v23  ;;  %v7586_v23 = vld [vmem:[%s10041_s19 + $0xf8] sm:$0xff]  }
 0xb1c   :  { %3148 = vmatprep.subr.bf16.mxu1 %v7544_v38  ;;  %v7591_v38 = vld [vmem:[%s10032_s11 + $0x4] ss:$12 sps:$4 sm:$0xff]  }
 0xb1f   :  { %3149 = vmatpush1.bf16.msra.mxu1 %v7542_v42  ;;  %v2920_v42 = vrot.slane %v2915_v39, %v8330_v25 }
 0xb20   :  { %3150 = vmatprep.subr.bf16.mxu1 %v7550_v50  ;;  %v2924_v50 = vrot.slane %v2915_v39, %v8343_v31  ;;  %v7599_v39 = vld [vmem:[%s10032_s11 + $0x34] ss:$12 sps:$4 sm:$0xff]  }
 0xb23   :  { %3151 = vmatpush1.bf16.msra.mxu1 %v7548_v52 }
 0xb24   :  { %3152 = vmatprep.subr.bf16.mxu1 %v7556_v26 }
 0xb27   :  { %3153 = vmatpush1.bf16.msra.mxu1 %v7554_v53 }
 0xbdd   :  { %v2838_v46 = vpop.f32.mrb[24].mxu1 }
 0xbde   :  { %v2844_v33 = vadd.f32 %v2838_v46, %v8575_v6  ;;  %v7215_v45 = vpop.f32.mrb[25].mxu1  ;;  %v3566_v6 = vsel %vm798_vm8, %v8990_v2, 0.0 }
 0xbdf   :  { %v2841_v49 = vpop.f32.mrb[26].mxu1 }
 0xbe0   :  { %v8982_v57 = vadd.f32 %v6515_v43, %v2844_v33  ;;  %v7216_v62 = vpop.f32.mrb[27].mxu1  ;;  %v6516_v33 = vld [vmem:[%s10039_s15] ss:$0 sm:$0xff] }
 0xbe1   :  { %v6517_v49 = vld [vmem:[%s10040_s16] ss:$0 sm:$0xff] }
 0xbe2   :  { %v2855_v15 = vsel %vm794_vm7, %v8982_v57, 0.0 }
 0xbe3   :  { %2856 = vadd.xlane.f32.xlu0 %v2855_v15 }
 0xbe7   :  { %3567 = vadd.xlane.f32.xlu0 %v3566_v6  ;;  %v7558_v6 = vld [vmem:[%s10041_s19 + $0xc0] sm:$0xff]  }
 0xbe8   :  { %6931 = vmatprep.subr.bf16.mxu1 %v7558_v6 }
 0xc70   :  { %v2857_v22 = vpop.xlane.xlu0 %2856 }
 0xc71   :  { %v2858_v12 = vmul.f32 0.0078125, %v2857_v22  ;;  %v7571_v22 = vld [vmem:[%s10041_s19 + $0x18] sm:$0xff]  }
 0xc73   :  { %v2859_v63 = vsub.f32 %v8982_v57, %v2858_v12  ;;  %v7572_v12 = vld [vmem:[%s10041_s19 + $0x98] sm:$0xff]  }
 0xc74   :  { %v3568_v40 = vpop.xlane.xlu0 %3567 }
 0xc75   :  { %v3569_v30 = vmul.f32 0.0078125, %v3568_v40  ;;  %v2860_v16 = vmul.f32 %v2859_v63, %v2859_v63  ;;  %v7574_v40 = vld [vmem:[%s10041_s19 + $0xe0] sm:$0xff]  }
 0xc77   :  { %v9032_v17 = vsub.f32 %v8990_v2, %v3569_v30  ;;  %v2861_v18 = vsel %vm794_vm7, %v2860_v16, 0.0  ;;  %v7575_v30 = vld [vmem:[%s10041_s19 + $0x20] sm:$0xff]  }
 0xc78   :  { %2862 = vadd.xlane.f32.xlu1 %v2861_v18  ;;  %v7576_v16 = vld [vmem:[%s10041_s19 + $0xa0] sm:$0xff]   ;;  %v7577_v18 = vld [vmem:[%s10041_s19 + $0x68] sm:$0xff]  }
 0xc79   :  { %v3571_v19 = vmul.f32 %v9032_v17, %v9032_v17 }
 0xc7b   :  { %v3572_v13 = vsel %vm798_vm8, %v3571_v19, 0.0  ;;  %v7578_v19 = vld [vmem:[%s10041_s19 + $0xe8] sm:$0xff]  }
 0xc7c   :  { %3573 = vadd.xlane.f32.xlu1 %v3572_v13  ;;  %v7579_v13 = vld [vmem:[%s10041_s19 + $0x28] sm:$0xff]  }
 0xd05   :  { %v2863_v54 = vpop.xlane.xlu1 %2862 }
 0xd06   :  { %v2864_v37 = vmul.f32 0.0078125, %v2863_v54 }
 0xd08   :  { %v2865_v46 = vadd.f32 1e-05, %v2864_v37 }
 0xd0a   :  { %7917 = vrsqrt.f32 %v2865_v46 }
 0xd14   :  { %v7918_v43 = vpop.eup %7917 }
 0xd15   :  { %v2867_v45 = vmul.f32 %v7918_v43, %v2859_v63  ;;  %v7573_v63 = vld [vmem:[%s10041_s19 + $0x60] sm:$0xff]  }
 0xd17   :  { %v2874_v48 = vmul.f32 %v6516_v33, %v2867_v45 }
 0xd19   :  { %v2881_v62 = vadd.f32 %v6517_v49, %v2874_v48 }
 0xd1b   :  { %v2914_v15 = vpack.c.bf16 %v2881_v62, %v2881_v62 }
 0xd1d   :  { %3130 = vmatmul.mubr.bf16.vlgmr.msra.gmra.mrb[28].mxu0 %v2914_v15  ;;  %3171 = vmatmul.mubr.bf16.vlgmr.msra.gmra.mrb[28].mxu1 %v2914_v15 }
 0xd1e   :  { %6910 = vmatpush3.bf16.msra.mxu0 %v7559_v3  ;;  %6932 = vmatpush3.bf16.msra.mxu1 %v7560_v41 }
 0xd1f   :  { %6911 = vmatprep.subr.bf16.mxu0 %v7561_v55  ;;  %6933 = vmatprep.subr.bf16.mxu1 %v7562_v47 }
 0xd22   :  { %6912 = vmatpush3.bf16.msra.mxu0 %v7563_v4  ;;  %6934 = vmatpush3.bf16.msra.mxu1 %v7564_v60 }
 0xd23   :  { %6913 = vmatprep.subr.bf16.mxu0 %v7565_v5  ;;  %6935 = vmatprep.subr.bf16.mxu1 %v7566_v56 }
 0xd26   :  { %6914 = vmatpush3.bf16.msra.mxu0 %v7567_v7  ;;  %6936 = vmatpush3.bf16.msra.mxu1 %v7568_v8 }
 0xd27   :  { %6915 = vmatprep.subr.bf16.mxu0 %v7569_v58  ;;  %6937 = vmatprep.subr.bf16.mxu1 %v7570_v9 }
 0xd2a   :  { %6916 = vmatpush3.bf16.msra.mxu0 %v7571_v22  ;;  %6938 = vmatpush3.bf16.msra.mxu1 %v7572_v12 }
 0xd2b   :  { %6917 = vmatprep.subr.bf16.mxu0 %v7573_v63  ;;  %6939 = vmatprep.subr.bf16.mxu1 %v7574_v40  ;;  %v3574_v63 = vpop.xlane.xlu1 %3573 }
 0xd2e   :  { %6918 = vmatpush3.bf16.msra.mxu0 %v7575_v30  ;;  %6940 = vmatpush3.bf16.msra.mxu1 %v7576_v16 }
 0xd2f   :  { %6919 = vmatprep.subr.bf16.mxu0 %v7577_v18  ;;  %6941 = vmatprep.subr.bf16.mxu1 %v7578_v19 }
 0xd32   :  { %6920 = vmatpush3.bf16.msra.mxu0 %v7579_v13  ;;  %6942 = vmatpush3.bf16.msra.mxu1 %v7580_v28  ;;  %v3575_v13 = vmul.f32 0.0078125, %v3574_v63 }
 0xd33   :  { %6921 = vmatprep.subr.bf16.mxu0 %v7581_v32  ;;  %6943 = vmatprep.subr.bf16.mxu1 %v7582_v34  ;;  %v7589_v32 = vld [vmem:[%s10032_s11] ss:$12 sps:$4 sm:$0xff]  }
 0xd36   :  { %6922 = vmatpush3.bf16.msra.mxu0 %v7583_v35  ;;  %6944 = vmatpush3.bf16.msra.mxu1 %v7584_v36  ;;  %v7592_v36 = vld [vmem:[%s10032_s11 + $0x8] ss:$12 sps:$4 sm:$0xff]  }
 0xd37   :  { %6923 = vmatprep.subr.bf16.mxu0 %v7585_v20  ;;  %6945 = vmatprep.subr.bf16.mxu1 %v7586_v23  ;;  %v7595_v20 = vld [vmem:[%s10032_s11 + $0x1c] ss:$12 sps:$4 sm:$0xff]  }
 0xd3a   :  { %6924 = vmatpush3.bf16.msra.mxu0 %v7587_v24  ;;  %6946 = vmatpush3.bf16.msra.mxu1 %v7588_v27  ;;  %v3576_v24 = vadd.f32 1e-05, %v3575_v13  ;;  %v7593_v27 = vld [vmem:[%s10032_s11 + $0x18] ss:$12 sps:$4 sm:$0xff]  }
 0xd3b   :  { %7217 = vmatprep.subr.bf16.mxu1 %v8026_v0  ;;  %3771 = vmatprep.subr.bf16.mxu0 %v7591_v38  ;;  %v7596_v38 = vld [vmem:[%s10032_s11 + $0x20] ss:$12 sps:$4 sm:$0xff]  }
 0xdf0   :  { %v3131_v52 = vpop.f32.mrb[28].mxu0  ;;  %v3172_v14 = vpop.f32.mrb[28].mxu1 }
 0xdf1   :  { %v3132_v26 = vadd.f32 %v3131_v52, %v2920_v42  ;;  %v3173_v21 = vadd.f32 %v3172_v14, %v2928_v44  ;;  %v3133_v53 = vpop.f32.mrb[29].mxu0  ;;  %v3174_v54 = vpop.f32.mrb[29].mxu1  ;;  %v7597_v42 = vld [vmem:[%s10032_s11 + $0x30] ss:$12 sps:$4 sm:$0xff]   ;;  %v7600_v44 = vld [vmem:[%s10032_s11 + $0x38] ss:$12 sps:$4 sm:$0xff]  }
 0xdf2   :  { %v3134_v37 = vadd.f32 %v3133_v53, %v2924_v50  ;;  %v3175_v46 = vadd.f32 %v3174_v54, %v2932_v51  ;;  %v3135_v43 = vpop.f32.mrb[30].mxu0  ;;  %v3176_v33 = vpop.f32.mrb[30].mxu1  ;;  %v7603_v50 = vld [vmem:[%s10032_s11 + $0x4c] ss:$12 sps:$4 sm:$0xff]   ;;  %v7601_v51 = vld [vmem:[%s10032_s11 + $0x48] ss:$12 sps:$4 sm:$0xff]  }
 0xdf3   :  { %v6550_v45 = vmul.f32 -1.702, %v3132_v26  ;;  %v6552_v49 = vmul.f32 -1.702, %v3173_v21  ;;  %v3136_v48 = vpop.f32.mrb[31].mxu0  ;;  %v3177_v62 = vpop.f32.mrb[31].mxu1 }
 0xdf4   :  { %v6551_v15 = vmul.f32 -1.702, %v3134_v37  ;;  %v6553_v1 = vmul.f32 -1.702, %v3175_v46  ;;  %v7604_v52 = vld [vmem:[%s10032_s11 + $0x50] ss:$12 sps:$4 sm:$0xff]  }
 0xdf5   :  { %v3187_v6 = vmul.f32 1.442695, %v6550_v45  ;;  %v3191_v3 = vmul.f32 1.442695, %v6552_v49  ;;  %v7607_v14 = vld [vmem:[%s10032_s11 + $0x64] ss:$12 sps:$4 sm:$0xff]  }
 0xdf6   :  { %v3189_v41 = vmul.f32 1.442695, %v6551_v15  ;;  %v3193_v55 = vmul.f32 1.442695, %v6553_v1  ;;  %v7611_v53 = vld [vmem:[%s10032_s11 + $0x7c] ss:$12 sps:$4 sm:$0xff]  }
 0xdf7   :  { %7919 = vpow2.f32 %v3187_v6  ;;  %v7615_v43 = vld [vmem:[%s10032_s11 + $0x94] ss:$12 sps:$4 sm:$0xff]   ;;  %v7613_v49 = vld [vmem:[%s10032_s11 + $0x90] ss:$12 sps:$4 sm:$0xff]   ;;  %v7616_v48 = vld [vmem:[%s10032_s11 + $0x98] ss:$12 sps:$4 sm:$0xff]  }
 0xdf8   :  { %7921 = vpow2.f32 %v3191_v3  ;;  %v6588_v45 = vld [vmem:[%s10033_s9] ss:$0 sm:$0xff]  ;;  %v7617_v1 = vld [vmem:[%s10032_s11 + $0xa8] ss:$12 sps:$4 sm:$0xff]   ;;  %v7620_v6 = vld [vmem:[%s10032_s11 + $0xb0] ss:$12 sps:$4 sm:$0xff]  }
 0xdf9   :  { %7923 = vpow2.f32 %v3189_v41  ;;  %v6589_v15 = vld [vmem:[%s10034_s10] ss:$0 sm:$0xff] }
 0xdfa   :  { %7925 = vpow2.f32 %v3193_v55  ;;  %v7621_v55 = vld [vmem:[%s10035_s13] sm:$0xff]  }
 0xe01   :  { %v7920_v47 = vpop.eup %7919 }
 0xe02   :  { %v7922_v4 = vpop.eup %7921  ;;  %v3195_v60 = vadd.f32 1.0, %v7920_v47  ;;  %v7622_v47 = vld [vmem:[%s10035_s13 + $0x8] sm:$0xff]  }
 0xe03   :  { %v7924_v5 = vpop.eup %7923  ;;  %v3197_v56 = vadd.f32 1.0, %v7922_v4  ;;  %v7623_v4 = vld [vmem:[%s10035_s13 + $0x10] sm:$0xff]  }
 0xe04   :  { %v7926_v7 = vpop.eup %7925  ;;  %7927 = vrcp.f32 %v3195_v60  ;;  %v3196_v8 = vadd.f32 1.0, %v7924_v5  ;;  %v7624_v60 = vld [vmem:[%s10035_s13 + $0x18] sm:$0xff]   ;;  %v7625_v5 = vld [vmem:[%s10035_s13 + $0x20] sm:$0xff]  }
 0xe05   :  { %7929 = vrcp.f32 %v3197_v56  ;;  %v3198_v58 = vadd.f32 1.0, %v7926_v7  ;;  %v7626_v56 = vld [vmem:[%s10035_s13 + $0x28] sm:$0xff]   ;;  %v7627_v7 = vld [vmem:[%s10035_s13 + $0x30] sm:$0xff]  }
 0xe06   :  { %7931 = vrcp.f32 %v3196_v8  ;;  %v7628_v8 = vld [vmem:[%s10035_s13 + $0x38] sm:$0xff]  }
 0xe07   :  { %7933 = vrcp.f32 %v3198_v58 }
 0xe08   :  { %7935 = vrsqrt.f32 %v3576_v24 }
 0xe0e   :  { %v7928_v9 = vpop.eup %7927 }
 0xe0f   :  { %v7930_v22 = vpop.eup %7929  ;;  %v3207_v40 = vmul.f32 %v7928_v9, %v3132_v26  ;;  %v7605_v26 = vld [vmem:[%s10032_s11 + $0x60] ss:$12 sps:$4 sm:$0xff]  }
 0xe10   :  { %v7932_v12 = vpop.eup %7931  ;;  %v3209_v16 = vmul.f32 %v7930_v22, %v3173_v21  ;;  %v7608_v21 = vld [vmem:[%s10032_s11 + $0x68] ss:$12 sps:$4 sm:$0xff]   ;;  %v6554_v22 = vld [vmem:[%s10043_s20] ss:$0 sm:$0xff] }
 0xe11   :  { %v7934_v30 = vpop.eup %7933  ;;  %v3208_v18 = vmul.f32 %v7932_v12, %v3134_v37  ;;  %v3275_v34 = vpack.c.bf16 %v3207_v40, %v3207_v40  ;;  %v7609_v37 = vld [vmem:[%s10032_s11 + $0x78] ss:$12 sps:$4 sm:$0xff]  }
 0xe12   :  { %v3210_v19 = vmul.f32 %v7934_v30, %v3175_v46  ;;  %v3277_v23 = vpack.c.bf16 %v3209_v16, %v3209_v16  ;;  %v7936_v54 = vpop.eup %7935  ;;  %v7612_v46 = vld [vmem:[%s10032_s11 + $0x80] ss:$12 sps:$4 sm:$0xff]  }
 0xe13   :  { %v3276_v28 = vpack.c.bf16 %v3208_v18, %v3208_v18  ;;  %v3578_v33 = vmul.f32 %v7936_v54, %v9032_v17  ;;  %v7619_v17 = vld [vmem:[%s10032_s11 + $0xac] ss:$12 sps:$4 sm:$0xff]  }
 0xe14   :  { %v3278_v35 = vpack.c.bf16 %v3210_v19, %v3210_v19 }
 0xe15   :  { %3510 = vmatprep.mubr.bf16.mxu0 %v3276_v28  ;;  %v3585_v62 = vmul.f32 %v6588_v45, %v3578_v33 }
 0xe16   :  { %3550 = vmatprep.mubr.bf16.mxu1 %v3278_v35  ;;  %3511 = vmatmul.mubr.bf16.vlgmr.msra.gmra.mrb[32].mxu0 %v3275_v34  ;;  %v3626_v35 = vld [vmem:[%s10036_s12] sm:$0x7] }
 0xe17   :  { %3551 = vmatmul.mubr.bf16.vlgmr.msra.gmra.mrb[32].mxu1 %v3277_v23  ;;  %3772 = vmatpush1.bf16.msra.mxu0 %v7589_v32  ;;  %v3592_v3 = vadd.f32 %v6589_v15, %v3585_v62 }
 0xe18   :  { %7218 = vmatpush3.bf16.msra.mxu1 %v7592_v36  ;;  %3773 = vmatprep.subr.bf16.mxu0 %v7595_v20  ;;  %v3631_v36 = vrot.slane %v3626_v35, %v8330_v25  ;;  %v3639_v20 = vrot.slane %v3626_v35, %v8363_v10 }
 0xe19   :  { %7219 = vmatprep.subr.bf16.mxu1 %v8026_v0  ;;  %3803 = vmatprep.mubr.bf16.mxu0 %v8028_v59  ;;  %v3625_v41 = vpack.c.bf16 %v3592_v3, %v3592_v3 }
 0xe1a   :  { %7233 = vmatprep.mubr.msk.bf16.mxu1 %vm8027_vm0, %v8026_v0 }
 0xe1b   :  { %3774 = vmatpush1.bf16.msra.mxu0 %v7593_v27 }
 0xe1c   :  { %7220 = vmatpush3.bf16.msra.mxu1 %v7596_v38  ;;  %3775 = vmatprep.subr.bf16.mxu0 %v7599_v39 }
 0xe1d   :  { %7221 = vmatprep.subr.bf16.mxu1 %v8026_v0 }
 0xe1f   :  { %3776 = vmatpush1.bf16.msra.mxu0 %v7597_v42 }
 0xe20   :  { %7222 = vmatpush3.bf16.msra.mxu1 %v7600_v44  ;;  %3777 = vmatprep.subr.bf16.mxu0 %v7603_v50 }
 0xe21   :  { %7223 = vmatprep.subr.bf16.mxu1 %v8026_v0 }
 0xe23   :  { %3778 = vmatpush1.bf16.msra.mxu0 %v7601_v51 }
 0xe24   :  { %7224 = vmatpush3.bf16.msra.mxu1 %v7604_v52  ;;  %3779 = vmatprep.subr.bf16.mxu0 %v7607_v14  ;;  %v3635_v14 = vrot.slane %v3626_v35, %v8343_v31 }
 0xe25   :  { %7225 = vmatprep.subr.bf16.mxu1 %v8026_v0 }
 0xe27   :  { %3780 = vmatpush1.bf16.msra.mxu0 %v7605_v26 }
 0xe28   :  { %7226 = vmatpush3.bf16.msra.mxu1 %v7608_v21  ;;  %3781 = vmatprep.subr.bf16.mxu0 %v7611_v53 }
 0xe29   :  { %7227 = vmatprep.subr.bf16.mxu1 %v8026_v0 }
 0xe2b   :  { %3782 = vmatpush1.bf16.msra.mxu0 %v7609_v37 }
 0xe2c   :  { %7228 = vmatpush3.bf16.msra.mxu1 %v7612_v46  ;;  %3783 = vmatprep.subr.bf16.mxu0 %v7615_v43 }
 0xe2d   :  { %7229 = vmatprep.subr.bf16.mxu1 %v8026_v0 }
 0xe2f   :  { %3784 = vmatpush1.bf16.msra.mxu0 %v7613_v49 }
 0xe30   :  { %7230 = vmatpush3.bf16.msra.mxu1 %v7616_v48  ;;  %3785 = vmatprep.subr.bf16.mxu0 %v7619_v17 }
 0xe31   :  { %7231 = vmatprep.subr.bf16.mxu1 %v8026_v0 }
 0xe33   :  { %3786 = vmatpush1.bf16.msra.mxu0 %v7617_v1 }
 0xe34   :  { %7232 = vmatpush3.bf16.msra.mxu1 %v7620_v6  ;;  %7237 = vmatprep.subr.bf16.mxu0 %v8026_v0 }
 0xe36   :  { %3804 = vmatmul.mubr.bf16.vlgmr.msra.gmra.mrb[36].mxu0 %v3625_v41 }
 0xe37   :  { %7234 = vmatmul.mubr.bf16.vlgmr.msra.gmra.mrb[36].mxu1 %v3625_v41  ;;  %7253 = vmatprep.mubr.msk.bf16.mxu0 %vm8027_vm0, %v8026_v0 }
 0xe38   :  { %4512 = vmatprep.mubr.bf16.mxu1 %v8028_v59  ;;  %7238 = vmatpush3.bf16.msra.mxu0 %v7621_v55 }
 0xe39   :  { %7239 = vmatprep.subr.bf16.mxu0 %v8026_v0 }
 0xe3c   :  { %7240 = vmatpush3.bf16.msra.mxu0 %v7622_v47 }
 0xe3d   :  { %7241 = vmatprep.subr.bf16.mxu0 %v8026_v0 }
 0xe40   :  { %7242 = vmatpush3.bf16.msra.mxu0 %v7623_v4 }
 0xe41   :  { %7243 = vmatprep.subr.bf16.mxu0 %v8026_v0 }
 0xe44   :  { %7244 = vmatpush3.bf16.msra.mxu0 %v7624_v60 }
 0xe45   :  { %7245 = vmatprep.subr.bf16.mxu0 %v8026_v0 }
 0xe48   :  { %7246 = vmatpush3.bf16.msra.mxu0 %v7625_v5 }
 0xe49   :  { %7247 = vmatprep.subr.bf16.mxu0 %v8026_v0 }
 0xe4c   :  { %7248 = vmatpush3.bf16.msra.mxu0 %v7626_v56 }
 0xe4d   :  { %7249 = vmatprep.subr.bf16.mxu0 %v8026_v0 }
 0xe50   :  { %7250 = vmatpush3.bf16.msra.mxu0 %v7627_v7 }
 0xe51   :  { %7251 = vmatprep.subr.bf16.mxu0 %v8026_v0 }
 0xe54   :  { %7252 = vmatpush3.bf16.msra.mxu0 %v7628_v8 }
 0xee9   :  { %v6925_v58 = vpop.f32.mrb[32].mxu0 }
 0xeea   :  { %v6947_v9 = vpop.f32.mrb[32].mxu1  ;;  %v6926_v12 = vpop.f32.mrb[33].mxu0 }
 0xeeb   :  { %v6927_v63 = vadd.f32 %v6926_v12, %v6925_v58  ;;  %v6948_v40 = vpop.f32.mrb[33].mxu1  ;;  %v6928_v30 = vpop.f32.mrb[34].mxu0 }
 0xeec   :  { %v6949_v16 = vadd.f32 %v6948_v40, %v6947_v9  ;;  %v6950_v18 = vpop.f32.mrb[34].mxu1  ;;  %v6929_v19 = vpop.f32.mrb[35].mxu0 }
 0xeed   :  { %v3513_v13 = vadd.f32 %v6927_v63, %v6554_v22  ;;  %v6951_v28 = vpop.f32.mrb[35].mxu1 }
 0xeef   :  { %v3553_v32 = vadd.f32 %v6949_v16, %v3513_v13 }
 0xef1   :  { %v3558_v34 = vadd.f32 %v3553_v32, %v8982_v57 }
 0xef3   :  { %6587 = vst [vmem:[%s10044_s21 + $0x8] sm:$0x1f] %v3558_v34 }
 0xf09   :  { %v3805_v23 = vpop.f32.mrb[36].mxu0 }
 0xf0a   :  { %v3806_v24 = vadd.f32 %v3805_v23, %v3631_v36  ;;  %v3846_v27 = vpop.f32.mrb[36].mxu1  ;;  %v3807_v38 = vpop.f32.mrb[37].mxu0 }
 0xf0b   :  { %v9344_v39 = vadd.f32 %v3846_v27, %v3639_v20  ;;  %v7235_v42 = vpop.f32.mrb[37].mxu1  ;;  %v3809_v57 = vpop.f32.mrb[38].mxu0  ;;  %v3808_v49 = vadd.f32 %v3807_v38, %v3635_v14 }
 0xf0c   :  { %v3853_v44 = vcombine.high %v3806_v24, %v3806_v24  ;;  %v3860_v50 = vrot.slane %v3806_v24, %v8340_v29  ;;  %v3849_v51 = vpop.f32.mrb[38].mxu1  ;;  %v3810_v52 = vpop.f32.mrb[39].mxu0 }
 0xf0d   :  { %v7236_v26 = vpop.f32.mrb[39].mxu1 }
 0xf0e   :  { %v3867_v21 = vrot.slane %v3853_v44, %v8340_v29  ;;  %v3868_v53 = vcombine.high %v3860_v50, %v3860_v50  ;;  %v3876_v54 = vrot.slane %v3860_v50, %v8340_v29 }
 0xf10   :  { %v3869_v37 = vcombine.high %v3867_v21, %v3867_v21  ;;  %v3883_v46 = vrot.slane %v3867_v21, %v8340_v29  ;;  %v3890_v43 = vrot.slane %v3868_v53, %v8340_v29  ;;  %v3898_v33 = vcombine.high %v3876_v54, %v3876_v54 }
 0xf11   :  { %v3903_v45 = vrot.slane %v3876_v54, %v8330_v25 }
 0xf12   :  { %v3897_v48 = vrot.slane %v3869_v37, %v8340_v29  ;;  %v3899_v17 = vcombine.high %v3890_v43, %v3890_v43  ;;  %v3907_v62 = vrot.slane %v3890_v43, %v8330_v25  ;;  %v3911_v15 = vrot.slane %v3898_v33, %v8330_v25 }
 0xf13   :  { %v3919_v1 = vrot.slane %v3883_v46, %v8330_v25  ;;  %v3930_v6 = vmul.f32 %v3903_v45, %v3808_v49 }
 0xf14   :  { %v3915_v3 = vrot.slane %v3899_v17, %v8330_v25  ;;  %v3923_v41 = vrot.slane %v3897_v48, %v8330_v25  ;;  %v3931_v55 = vmul.f32 %v3907_v62, %v3808_v49  ;;  %v3932_v47 = vmul.f32 %v3911_v15, %v3808_v49 }
 0xf15   :  { %v3934_v4 = vmul.f32 %v3919_v1, %v3808_v49  ;;  %v3936_v60 = vsel %vm798_vm8, %v3930_v6, -inf }
 0xf16   :  { %v3933_v5 = vmul.f32 %v3915_v3, %v3808_v49  ;;  %v3935_v56 = vmul.f32 %v3923_v41, %v3808_v49  ;;  %v3937_v7 = vrot.slane %v3936_v60, 4  ;;  %v3943_v8 = vsel %vm798_vm8, %v3931_v55, -inf }
 0xf17   :  { %v3944_v58 = vrot.slane %v3943_v8, 4  ;;  %v3950_v9 = vsel %vm798_vm8, %v3932_v47, -inf  ;;  %v3964_v22 = vsel %vm798_vm8, %v3934_v4, -inf }
 0xf18   :  { %v3938_v12 = vmax.f32 %v3936_v60, %v3937_v7  ;;  %v3951_v63 = vrot.slane %v3950_v9, 4  ;;  %v3957_v40 = vsel %vm798_vm8, %v3933_v5, -inf  ;;  %v3965_v30 = vrot.slane %v3964_v22, 4 }
 0xf19   :  { %v3945_v16 = vmax.f32 %v3943_v8, %v3944_v58  ;;  %v3958_v18 = vrot.slane %v3957_v40, 4  ;;  %v3971_v19 = vsel %vm798_vm8, %v3935_v56, -inf }
 0xf1a   :  { %v3939_v13 = vrot.slane %v3938_v12, 2  ;;  %v3952_v28 = vmax.f32 %v3950_v9, %v3951_v63  ;;  %v3966_v32 = vmax.f32 %v3964_v22, %v3965_v30  ;;  %v3972_v34 = vrot.slane %v3971_v19, 4 }
 0xf1b   :  { %v3946_v35 = vrot.slane %v3945_v16, 2  ;;  %v3959_v36 = vmax.f32 %v3957_v40, %v3958_v18 }
 0xf1c   :  { %v3940_v20 = vmax.f32 %v3938_v12, %v3939_v13  ;;  %v3953_v23 = vrot.slane %v3952_v28, 2  ;;  %v3967_v24 = vrot.slane %v3966_v32, 2  ;;  %v3973_v27 = vmax.f32 %v3971_v19, %v3972_v34 }
 0xf1d   :  { %v3947_v38 = vmax.f32 %v3945_v16, %v3946_v35  ;;  %v3960_v42 = vrot.slane %v3959_v36, 2 }
 0xf1e   :  { %v3941_v57 = vrot.slane %v3940_v20, 1  ;;  %v3954_v44 = vmax.f32 %v3952_v28, %v3953_v23  ;;  %v3968_v50 = vmax.f32 %v3966_v32, %v3967_v24  ;;  %v3974_v51 = vrot.slane %v3973_v27, 2 }
 0xf1f   :  { %v3948_v52 = vrot.slane %v3947_v38, 1  ;;  %v3961_v14 = vmax.f32 %v3959_v36, %v3960_v42 }
 0xf20   :  { %v3942_v26 = vmax.f32 %v3940_v20, %v3941_v57  ;;  %v3955_v21 = vrot.slane %v3954_v44, 1  ;;  %v3969_v53 = vrot.slane %v3968_v50, 1  ;;  %v3975_v54 = vmax.f32 %v3973_v27, %v3974_v51 }
 0xf21   :  { %v3949_v37 = vmax.f32 %v3947_v38, %v3948_v52  ;;  %v3962_v46 = vrot.slane %v3961_v14, 1 }
 0xf22   :  { %v3956_v43 = vmax.f32 %v3954_v44, %v3955_v21  ;;  %v3970_v33 = vmax.f32 %v3968_v50, %v3969_v53  ;;  %v3976_v45 = vrot.slane %v3975_v54, 1  ;;  %v3978_v49 = vsub.f32 %v3930_v6, %v3942_v26 }
 0xf23   :  { %v3963_v48 = vmax.f32 %v3961_v14, %v3962_v46  ;;  %v3979_v17 = vsub.f32 %v3931_v55, %v3949_v37 }
 0xf24   :  { %v3977_v62 = vmax.f32 %v3975_v54, %v3976_v45  ;;  %v3980_v15 = vsub.f32 %v3932_v47, %v3956_v43  ;;  %v3982_v1 = vsub.f32 %v3934_v4, %v3970_v33  ;;  %v3984_v3 = vmul.f32 1.442695, %v3978_v49 }
 0xf25   :  { %v3981_v41 = vsub.f32 %v3933_v5, %v3963_v48  ;;  %v3986_v60 = vmul.f32 1.442695, %v3979_v17 }
 0xf26   :  { %v3983_v7 = vsub.f32 %v3935_v56, %v3977_v62  ;;  %7937 = vpow2.f32 %v3984_v3  ;;  %v3988_v8 = vmul.f32 1.442695, %v3980_v15  ;;  %v3992_v58 = vmul.f32 1.442695, %v3982_v1 }
 0xf27   :  { %7939 = vpow2.f32 %v3986_v60  ;;  %v3990_v9 = vmul.f32 1.442695, %v3981_v41 }
 0xf28   :  { %7941 = vpow2.f32 %v3988_v8  ;;  %v3994_v22 = vmul.f32 1.442695, %v3983_v7 }
 0xf29   :  { %7943 = vpow2.f32 %v3990_v9 }
 0xf2a   :  { %7945 = vpow2.f32 %v3992_v58 }
 0xf2b   :  { %7947 = vpow2.f32 %v3994_v22 }
 0xf30   :  { %v7938_v6 = vpop.eup %7937 }
 0xf31   :  { %v7940_v12 = vpop.eup %7939  ;;  %v3996_v55 = vsel %vm798_vm8, %v7938_v6, 0.0 }
 0xf32   :  { %v7942_v47 = vpop.eup %7941  ;;  %v3997_v4 = vrot.slane %v3996_v55, 4  ;;  %v4003_v5 = vsel %vm798_vm8, %v7940_v12, 0.0 }
 0xf33   :  { %v7944_v63 = vpop.eup %7943  ;;  %v4004_v56 = vrot.slane %v4003_v5, 4  ;;  %v4010_v40 = vsel %vm798_vm8, %v7942_v47, 0.0 }
 0xf34   :  { %v7946_v30 = vpop.eup %7945  ;;  %v3998_v16 = vadd.f32 %v3997_v4, %v3996_v55  ;;  %v4011_v18 = vrot.slane %v4010_v40, 4  ;;  %v4017_v19 = vsel %vm798_vm8, %v7944_v63, 0.0 }
 0xf35   :  { %v7948_v13 = vpop.eup %7947  ;;  %v4005_v28 = vadd.f32 %v4004_v56, %v4003_v5  ;;  %v4018_v32 = vrot.slane %v4017_v19, 4  ;;  %v4024_v34 = vsel %vm798_vm8, %v7946_v30, 0.0 }
 0xf36   :  { %v3999_v35 = vrot.slane %v3998_v16, 2  ;;  %v4012_v36 = vadd.f32 %v4011_v18, %v4010_v40  ;;  %v4025_v20 = vrot.slane %v4024_v34, 4  ;;  %v4031_v23 = vsel %vm798_vm8, %v7948_v13, 0.0 }
 0xf37   :  { %v4006_v24 = vrot.slane %v4005_v28, 2  ;;  %v4019_v27 = vadd.f32 %v4018_v32, %v4017_v19  ;;  %v4032_v38 = vrot.slane %v4031_v23, 4 }
 0xf38   :  { %v4000_v42 = vadd.f32 %v3999_v35, %v3998_v16  ;;  %v4013_v57 = vrot.slane %v4012_v36, 2  ;;  %v4026_v44 = vadd.f32 %v4025_v20, %v4024_v34 }
 0xf39   :  { %v4007_v50 = vadd.f32 %v4006_v24, %v4005_v28  ;;  %v4020_v51 = vrot.slane %v4019_v27, 2  ;;  %v4033_v52 = vadd.f32 %v4032_v38, %v4031_v23 }
 0xf3a   :  { %v4001_v14 = vrot.slane %v4000_v42, 1  ;;  %v4014_v26 = vadd.f32 %v4013_v57, %v4012_v36  ;;  %v4027_v21 = vrot.slane %v4026_v44, 2 }
 0xf3b   :  { %v4008_v53 = vrot.slane %v4007_v50, 1  ;;  %v4021_v54 = vadd.f32 %v4020_v51, %v4019_v27  ;;  %v4034_v37 = vrot.slane %v4033_v52, 2 }
 0xf3c   :  { %v4002_v46 = vadd.f32 %v4001_v14, %v4000_v42  ;;  %v4015_v43 = vrot.slane %v4014_v26, 1  ;;  %v4028_v33 = vadd.f32 %v4027_v21, %v4026_v44 }
 0xf3d   :  { %v4009_v45 = vadd.f32 %v4008_v53, %v4007_v50  ;;  %v4022_v49 = vrot.slane %v4021_v54, 1  ;;  %v4035_v48 = vadd.f32 %v4034_v37, %v4033_v52 }
 0xf3e   :  { %v4016_v17 = vadd.f32 %v4015_v43, %v4014_v26  ;;  %v4029_v62 = vrot.slane %v4028_v33, 1  ;;  %7949 = vrcp.f32 %v4002_v46 }
 0xf3f   :  { %v4023_v15 = vadd.f32 %v4022_v49, %v4021_v54  ;;  %7951 = vrcp.f32 %v4009_v45  ;;  %v4036_v1 = vrot.slane %v4035_v48, 1 }
 0xf40   :  { %7953 = vrcp.f32 %v4016_v17  ;;  %v4030_v3 = vadd.f32 %v4029_v62, %v4028_v33 }
 0xf41   :  { %v4037_v41 = vadd.f32 %v4036_v1, %v4035_v48  ;;  %7955 = vrcp.f32 %v4023_v15 }
 0xf42   :  { %7957 = vrcp.f32 %v4030_v3 }
 0xf43   :  { %7959 = vrcp.f32 %v4037_v41 }
 0xf48   :  { %v7950_v60 = vpop.eup %7949 }
 0xf49   :  { %v7952_v7 = vpop.eup %7951  ;;  %v4039_v8 = vmul.f32 %v7950_v60, %v7938_v6 }
 0xf4a   :  { %v7954_v58 = vpop.eup %7953  ;;  %v4041_v9 = vmul.f32 %v7952_v7, %v7940_v12 }
 0xf4b   :  { %v7956_v22 = vpop.eup %7955  ;;  %v4043_v55 = vmul.f32 %v7954_v58, %v7942_v47  ;;  %v4050_v4 = vmul.f32 %v4039_v8, %v9344_v39 }
 0xf4c   :  { %v7958_v5 = vpop.eup %7957  ;;  %v4045_v56 = vmul.f32 %v7956_v22, %v7944_v63  ;;  %v4051_v40 = vmul.f32 %v4041_v9, %v9344_v39 }
 0xf4d   :  { %v7960_v16 = vpop.eup %7959  ;;  %v4047_v18 = vmul.f32 %v7958_v5, %v7946_v30  ;;  %v4052_v19 = vmul.f32 %v4043_v55, %v9344_v39  ;;  %v4056_v28 = vsel %vm798_vm8, %v4050_v4, 0.0 }
 0xf4e   :  { %v4049_v32 = vmul.f32 %v7960_v16, %v7948_v13  ;;  %v4053_v34 = vmul.f32 %v4045_v56, %v9344_v39  ;;  %v4057_v6 = vrot.slane %v4056_v28, 4  ;;  %v4063_v12 = vsel %vm798_vm8, %v4051_v40, 0.0 }
 0xf4f   :  { %v4054_v47 = vmul.f32 %v4047_v18, %v9344_v39  ;;  %v4064_v35 = vrot.slane %v4063_v12, 4  ;;  %v4070_v36 = vsel %vm798_vm8, %v4052_v19, 0.0 }
 0xf50   :  { %v4055_v63 = vmul.f32 %v4049_v32, %v9344_v39  ;;  %v4058_v20 = vadd.f32 %v4057_v6, %v4056_v28  ;;  %v4071_v23 = vrot.slane %v4070_v36, 4  ;;  %v4077_v30 = vsel %vm798_vm8, %v4053_v34, 0.0 }
 0xf51   :  { %v4065_v24 = vadd.f32 %v4064_v35, %v4063_v12  ;;  %v4078_v27 = vrot.slane %v4077_v30, 4  ;;  %v4084_v13 = vsel %vm798_vm8, %v4054_v47, 0.0 }
 0xf52   :  { %v4059_v38 = vrot.slane %v4058_v20, 2  ;;  %v4072_v42 = vadd.f32 %v4071_v23, %v4070_v36  ;;  %v4085_v57 = vrot.slane %v4084_v13, 4  ;;  %v4091_v44 = vsel %vm798_vm8, %v4055_v63, 0.0  ;;  %v6622_v23 = vld [vmem:[%s10037_s14] ss:$0 sm:$0xff] }
 0xf53   :  { %v4066_v50 = vrot.slane %v4065_v24, 2  ;;  %v4079_v51 = vadd.f32 %v4078_v27, %v4077_v30  ;;  %v4092_v52 = vrot.slane %v4091_v44, 4 }
 0xf54   :  { %v4060_v14 = vadd.f32 %v4059_v38, %v4058_v20  ;;  %v4073_v26 = vrot.slane %v4072_v42, 2  ;;  %v4086_v21 = vadd.f32 %v4085_v57, %v4084_v13  ;;  %v4944_v13 = vrot.slane %v8381_v11, 6  ;;  %v7629_v11 = vld [vmem:[%s10038_s17] ss:$16 sps:$4 sm:$0xff]  }
 0xf55   :  { %v4067_v39 = vadd.f32 %v4066_v50, %v4065_v24  ;;  %v4080_v53 = vrot.slane %v4079_v51, 2  ;;  %v4093_v54 = vadd.f32 %v4092_v52, %v4091_v44  ;;  %v8025_v44 = vld [vmem:[%s10055_s30 + $0x18] sm:$0x1f] }
 0xf56   :  { %v4061_v37 = vrot.slane %v4060_v14, 1  ;;  %v4074_v46 = vadd.f32 %v4073_v26, %v4072_v42  ;;  %v4087_v43 = vrot.slane %v4086_v21, 2  ;;  %v9402_v50 = vsel %vm794_vm7, %v8025_v44, %v4944_v13  ;;  %v7632_v52 = vld [vmem:[%s10038_s17 + $0x8] ss:$16 sps:$4 sm:$0xff]   ;;  %v7637_v26 = vld [vmem:[%s10038_s17 + $0x24] ss:$16 sps:$4 sm:$0xff]  }
 0xf57   :  { %v4068_v33 = vrot.slane %v4067_v39, 1  ;;  %v4081_v45 = vadd.f32 %v4080_v53, %v4079_v51  ;;  %v4094_v49 = vrot.slane %v4093_v54, 2  ;;  %v7631_v51 = vld [vmem:[%s10038_s17 + $0x4] ss:$16 sps:$4 sm:$0xff]   ;;  %v7638_v53 = vld [vmem:[%s10038_s17 + $0x28] ss:$16 sps:$4 sm:$0xff]  }
 0xf58   :  { %v4062_v48 = vadd.f32 %v4061_v37, %v4060_v14  ;;  %v4075_v17 = vrot.slane %v4074_v46, 1  ;;  %v4088_v62 = vadd.f32 %v4087_v43, %v4086_v21  ;;  %v7634_v14 = vld [vmem:[%s10038_s17 + $0xc] ss:$16 sps:$4 sm:$0xff]   ;;  %4480 = vmatprep.subr.bf16.mxu1 %v7631_v51  ;;  %v7644_v43 = vld [vmem:[%s10038_s17 + $0x48] ss:$16 sps:$4 sm:$0xff]   ;;  %v7678_v44 = vld [vmem:[%s10041_s19 + $0xc0] sm:$0xff]  }
 0xf59   :  { %v4069_v15 = vadd.f32 %v4068_v33, %v4067_v39  ;;  %v4082_v1 = vrot.slane %v4081_v45, 1  ;;  %v4095_v3 = vadd.f32 %v4094_v49, %v4093_v54  ;;  %v7640_v21 = vld [vmem:[%s10038_s17 + $0x2c] ss:$16 sps:$4 sm:$0xff]   ;;  %4521 = vmatprep.subr.bf16.mxu0 %v7634_v14  ;;  %4481 = vmatpush1.bf16.msra.mxu1 %v7629_v11  ;;  %v7635_v39 = vld [vmem:[%s10038_s17 + $0x20] ss:$16 sps:$4 sm:$0xff]  }
 0xf5a   :  { %v4076_v41 = vadd.f32 %v4075_v17, %v4074_v46  ;;  %v4089_v60 = vrot.slane %v4088_v62, 1  ;;  %v4114_v7 = vpack.c.bf16 %v4062_v48, %v4062_v48  ;;  %4482 = vmatprep.subr.bf16.mxu1 %v7637_v26  ;;  %v7643_v54 = vld [vmem:[%s10038_s17 + $0x44] ss:$16 sps:$4 sm:$0xff]   ;;  %v7646_v37 = vld [vmem:[%s10038_s17 + $0x4c] ss:$16 sps:$4 sm:$0xff]  }
 0xf5b   :  { %v4083_v8 = vadd.f32 %v4082_v1, %v4081_v45  ;;  %v4096_v58 = vrot.slane %v4095_v3, 1  ;;  %v4115_v9 = vpack.c.bf16 %v4069_v15, %v4069_v15  ;;  %v7641_v46 = vld [vmem:[%s10038_s17 + $0x40] ss:$16 sps:$4 sm:$0xff]   ;;  %v7681_v51 = vld [vmem:[%s10041_s19 + $0x48] sm:$0xff]  }
 0xf5c   :  { %v4090_v22 = vadd.f32 %v4089_v60, %v4088_v62  ;;  %v4116_v55 = vpack.c.bf16 %v4076_v41, %v4076_v41  ;;  %v4126_v56 = vunpack.c.l.b16 %v4114_v7  ;;  %v7647_v60 = vld [vmem:[%s10038_s17 + $0x60] ss:$16 sps:$4 sm:$0xff]   ;;  %v7649_v7 = vld [vmem:[%s10038_s17 + $0x64] ss:$16 sps:$4 sm:$0xff]   ;;  %v7683_v14 = vld [vmem:[%s10041_s19 + $0x8] sm:$0xff]  }
 0xf5d   :  { %v4097_v4 = vadd.f32 %v4096_v58, %v4095_v3  ;;  %v4117_v5 = vpack.c.bf16 %v4083_v8, %v4083_v8  ;;  %v4127_v40 = vunpack.c.l.b16 %v4115_v9  ;;  %4483 = vmatpush1.bf16.msra.mxu1 %v7635_v39  ;;  %v7650_v8 = vld [vmem:[%s10038_s17 + $0x68] ss:$16 sps:$4 sm:$0xff]   ;;  %v7652_v58 = vld [vmem:[%s10038_s17 + $0x6c] ss:$16 sps:$4 sm:$0xff]   ;;  %v7653_v9 = vld [vmem:[%s10038_s17 + $0x80] ss:$16 sps:$4 sm:$0xff]  }
 0xf5e   :  { %v4118_v16 = vpack.c.bf16 %v4090_v22, %v4090_v22  ;;  %v4128_v18 = vunpack.c.l.b16 %v4116_v55  ;;  %4484 = vmatprep.subr.bf16.mxu1 %v7643_v54  ;;  %v7655_v22 = vld [vmem:[%s10038_s17 + $0x84] ss:$16 sps:$4 sm:$0xff]   ;;  %v7656_v55 = vld [vmem:[%s10038_s17 + $0x88] ss:$16 sps:$4 sm:$0xff]  }
 0xf5f   :  { %v4119_v19 = vpack.c.bf16 %v4097_v4, %v4097_v4  ;;  %v4129_v28 = vunpack.c.l.b16 %v4117_v5  ;;  %v4132_v32 = vsel %vm109_vm1, %v4127_v40, %v4126_v56  ;;  %v7658_v4 = vld [vmem:[%s10038_s17 + $0x8c] ss:$16 sps:$4 sm:$0xff]   ;;  %v7661_v5 = vld [vmem:[%s10038_s17 + $0xa4] ss:$16 sps:$4 sm:$0xff]   ;;  %v7659_v40 = vld [vmem:[%s10038_s17 + $0xa0] ss:$16 sps:$4 sm:$0xff]  }
 0xf60   :  { %v4130_v34 = vunpack.c.l.b16 %v4118_v16  ;;  %v4133_v6 = vsel %vm112_vm2, %v4128_v18, %v4132_v32  ;;  %v7664_v56 = vld [vmem:[%s10038_s17 + $0xac] ss:$16 sps:$4 sm:$0xff]   ;;  %v7662_v16 = vld [vmem:[%s10038_s17 + $0xa8] ss:$16 sps:$4 sm:$0xff]   ;;  %v7667_v18 = vld [vmem:[%s10038_s17 + $0xc4] ss:$16 sps:$4 sm:$0xff]  }
 0xf61   :  { %v4131_v12 = vunpack.c.l.b16 %v4119_v19  ;;  %v4134_v47 = vsel %vm115_vm3, %v4129_v28, %v4133_v6  ;;  %4485 = vmatpush1.bf16.msra.mxu1 %v7641_v46  ;;  %v7670_v19 = vld [vmem:[%s10038_s17 + $0xcc] ss:$16 sps:$4 sm:$0xff]   ;;  %v7665_v28 = vld [vmem:[%s10038_s17 + $0xc0] ss:$16 sps:$4 sm:$0xff]   ;;  %v7668_v32 = vld [vmem:[%s10038_s17 + $0xc8] ss:$16 sps:$4 sm:$0xff]  }
 0xf62   :  { %v4135_v35 = vsel %vm1368_vm9, %v4130_v34, %v4134_v47  ;;  %4486 = vmatprep.subr.bf16.mxu1 %v7649_v7  ;;  %v7673_v34 = vld [vmem:[%s10038_s17 + $0xe4] ss:$16 sps:$4 sm:$0xff]   ;;  %v7676_v6 = vld [vmem:[%s10038_s17 + $0xec] ss:$16 sps:$4 sm:$0xff]   ;;  %v7674_v47 = vld [vmem:[%s10038_s17 + $0xe8] ss:$16 sps:$4 sm:$0xff]  }
 0xf63   :  { %v4136_v36 = vsel %vm1370_vm10, %v4131_v12, %v4135_v35  ;;  %v7671_v12 = vld [vmem:[%s10038_s17 + $0xe0] ss:$16 sps:$4 sm:$0xff]   ;;  %v7684_v26 = vld [vmem:[%s10041_s19 + $0x88] sm:$0xff]   ;;  %v7690_v46 = vld [vmem:[%s10041_s19 + $0xd8] sm:$0xff]  }
 0xf64   :  { %v4137_v63 = vpack.c.b16 %v4136_v36, %v4136_v36  ;;  %v7680_v11 = vld [vmem:[%s10041_s19 + $0x80] sm:$0xff]   ;;  %v7686_v39 = vld [vmem:[%s10041_s19 + $0xd0] sm:$0xff]  }
 0xf65   :  { %4487 = vmatpush1.bf16.msra.mxu1 %v7647_v60  ;;  %v7688_v54 = vld [vmem:[%s10041_s19 + $0x90] sm:$0xff]  }
 0xf66   :  { %7254 = vmatmul.mubr.bf16.vlgmr.msra.gmra.mrb[40].mxu0 %v4137_v63  ;;  %4488 = vmatprep.subr.bf16.mxu1 %v7655_v22  ;;  %v7701_v60 = vld [vmem:[%s10041_s19 + $0x70] sm:$0xff]   ;;  %v7706_v22 = vld [vmem:[%s10041_s19 + $0xf8] sm:$0xff]  }
 0xf67   :  { %4553 = vmatprep.mubr.bf16.mxu0 %v8028_v59  ;;  %4522 = vmatpush1.bf16.msra.mxu0 %v7632_v52  ;;  %v7682_v52 = vld [vmem:[%s10041_s19 + $0xc8] sm:$0xff]   ;;  %v7702_v7 = vld [vmem:[%s10041_s19 + $0xf0] sm:$0xff]  }
 0xf68   :  { %4523 = vmatprep.subr.bf16.mxu0 %v7640_v21  ;;  %v7685_v21 = vld [vmem:[%s10041_s19 + $0x50] sm:$0xff]  }
 0xf69   :  { %4489 = vmatpush1.bf16.msra.mxu1 %v7653_v9  ;;  %v7705_v9 = vld [vmem:[%s10041_s19 + $0x78] sm:$0xff]  }
 0xf6a   :  { %4490 = vmatprep.subr.bf16.mxu1 %v7661_v5  ;;  %v7711_v5 = vld [vmem:[%s10032_s11 + $0x4] ss:$12 sps:$4 sm:$0xff]  }
 0xf6b   :  { %4524 = vmatpush1.bf16.msra.mxu0 %v7638_v53  ;;  %v7687_v53 = vld [vmem:[%s10041_s19 + $0x10] sm:$0xff]  }
 0xf6c   :  { %4525 = vmatprep.subr.bf16.mxu0 %v7646_v37  ;;  %v7689_v37 = vld [vmem:[%s10041_s19 + $0x58] sm:$0xff]  }
 0xf6d   :  { %4491 = vmatpush1.bf16.msra.mxu1 %v7659_v40 }
 0xf6e   :  { %4492 = vmatprep.subr.bf16.mxu1 %v7667_v18 }
 0xf6f   :  { %4526 = vmatpush1.bf16.msra.mxu0 %v7644_v43  ;;  %v7691_v43 = vld [vmem:[%s10041_s19 + $0x18] sm:$0xff]  }
 0xf70   :  { %4527 = vmatprep.subr.bf16.mxu0 %v7652_v58  ;;  %v7704_v58 = vld [vmem:[%s10041_s19 + $0xb0] sm:$0xff]  }
 0xf71   :  { %4493 = vmatpush1.bf16.msra.mxu1 %v7665_v28 }
 0xf72   :  { %4494 = vmatprep.subr.bf16.mxu1 %v7673_v34 }
 0xf73   :  { %4528 = vmatpush1.bf16.msra.mxu0 %v7650_v8  ;;  %v7703_v8 = vld [vmem:[%s10041_s19 + $0x30] sm:$0xff]  }
 0xf74   :  { %4529 = vmatprep.subr.bf16.mxu0 %v7658_v4  ;;  %v7708_v4 = vld [vmem:[%s10041_s19 + $0xb8] sm:$0xff]  }
 0xf75   :  { %4495 = vmatpush1.bf16.msra.mxu1 %v7671_v12 }
 0xf77   :  { %4530 = vmatpush1.bf16.msra.mxu0 %v7656_v55  ;;  %v7707_v55 = vld [vmem:[%s10041_s19 + $0x38] sm:$0xff]  }
 0xf78   :  { %4531 = vmatprep.subr.bf16.mxu0 %v7664_v56  ;;  %v4298_v56 = vld [vmem:[%s10042_s18] sm:$0xf] }
 0xf79   :  { %v4303_v40 = vrot.slane %v4298_v56, %v8330_v25  ;;  %v4307_v18 = vrot.slane %v4298_v56, %v8343_v31 }
 0xf7b   :  { %4532 = vmatpush1.bf16.msra.mxu0 %v7662_v16  ;;  %v4311_v16 = vrot.slane %v4298_v56, %v8363_v10 }
 0xf7c   :  { %4533 = vmatprep.subr.bf16.mxu0 %v7670_v19  ;;  %v4315_v19 = vrot.slane %v4298_v56, %v8793_v61  ;;  %v7717_v56 = vld [vmem:[%s10032_s11 + $0x30] ss:$12 sps:$4 sm:$0xff]  }
 0xf7f   :  { %4534 = vmatpush1.bf16.msra.mxu0 %v7668_v32 }
 0xf80   :  { %4535 = vmatprep.subr.bf16.mxu0 %v7676_v6 }
 0xf83   :  { %4536 = vmatpush1.bf16.msra.mxu0 %v7674_v47 }
 0xf84   :  { %6993 = vmatprep.subr.bf16.mxu0 %v7678_v44 }
0x1039   :  { %v4221_v20 = vpop.f32.mrb[40].mxu0 }
0x103a   :  { %v4227_v30 = vadd.f32 %v4221_v20, %v8990_v2  ;;  %v7255_v24 = vpop.f32.mrb[41].mxu0  ;;  %v4949_v2 = vsel %vm798_vm8, %v9402_v50, 0.0 }
0x103b   :  { %v4224_v27 = vpop.f32.mrb[42].mxu0  ;;  %v6624_v24 = vld [vmem:[%s10040_s16] ss:$0 sm:$0xff] }
0x103c   :  { %v9394_v38 = vadd.f32 %v6622_v23, %v4227_v30  ;;  %v7256_v42 = vpop.f32.mrb[43].mxu0  ;;  %v6623_v23 = vld [vmem:[%s10039_s15] ss:$0 sm:$0xff] }
0x103e   :  { %v4238_v57 = vsel %vm794_vm7, %v9394_v38, 0.0 }
0x103f   :  { %4239 = vadd.xlane.f32.xlu0 %v4238_v57  ;;  %v7677_v57 = vld [vmem:[%s10041_s19 + $0x40] sm:$0xff]  }
0x1040   :  { %6971 = vmatprep.subr.bf16.mxu1 %v7677_v57 }
0x1043   :  { %4950 = vadd.xlane.f32.xlu0 %v4949_v2  ;;  %v7679_v2 = vld [vmem:[%s10041_s19] sm:$0xff]  }
0x10cc   :  { %v4240_v33 = vpop.xlane.xlu0 %4239 }
0x10cd   :  { %v4241_v45 = vmul.f32 0.0078125, %v4240_v33  ;;  %v7692_v33 = vld [vmem:[%s10041_s19 + $0x98] sm:$0xff]  }
0x10cf   :  { %v4242_v49 = vsub.f32 %v9394_v38, %v4241_v45  ;;  %v7693_v45 = vld [vmem:[%s10041_s19 + $0x60] sm:$0xff]  }
0x10d0   :  { %v4951_v48 = vpop.xlane.xlu0 %4950 }
0x10d1   :  { %v4952_v17 = vmul.f32 0.0078125, %v4951_v48  ;;  %v4243_v62 = vmul.f32 %v4242_v49, %v4242_v49  ;;  %v7695_v48 = vld [vmem:[%s10041_s19 + $0x20] sm:$0xff]  }
0x10d3   :  { %v9444_v15 = vsub.f32 %v9402_v50, %v4952_v17  ;;  %v4244_v1 = vsel %vm794_vm7, %v4243_v62, 0.0  ;;  %v7696_v17 = vld [vmem:[%s10041_s19 + $0xa0] sm:$0xff]   ;;  %v7697_v62 = vld [vmem:[%s10041_s19 + $0x68] sm:$0xff]  }
0x10d4   :  { %4245 = vadd.xlane.f32.xlu1 %v4244_v1  ;;  %v7698_v1 = vld [vmem:[%s10041_s19 + $0xe8] sm:$0xff]  }
0x10d5   :  { %v4954_v3 = vmul.f32 %v9444_v15, %v9444_v15 }
0x10d7   :  { %v4955_v41 = vsel %vm798_vm8, %v4954_v3, 0.0  ;;  %v7699_v3 = vld [vmem:[%s10041_s19 + $0x28] sm:$0xff]  }
0x10d8   :  { %4956 = vadd.xlane.f32.xlu1 %v4955_v41  ;;  %v7700_v41 = vld [vmem:[%s10041_s19 + $0xa8] sm:$0xff]  }
0x1161   :  { %v4246_v35 = vpop.xlane.xlu1 %4245 }
0x1162   :  { %v4247_v36 = vmul.f32 0.0078125, %v4246_v35 }
0x1164   :  { %v4248_v63 = vadd.f32 1e-05, %v4247_v36 }
0x1166   :  { %7961 = vrsqrt.f32 %v4248_v63 }
0x1170   :  { %v7962_v20 = vpop.eup %7961 }
0x1171   :  { %v4250_v30 = vmul.f32 %v7962_v20, %v4242_v49  ;;  %v7694_v49 = vld [vmem:[%s10041_s19 + $0xe0] sm:$0xff]  }
0x1173   :  { %v4257_v27 = vmul.f32 %v6623_v23, %v4250_v30 }
0x1175   :  { %v4264_v13 = vadd.f32 %v6624_v24, %v4257_v27 }
0x1177   :  { %v4297_v42 = vpack.c.bf16 %v4264_v13, %v4264_v13 }
0x1179   :  { %4513 = vmatmul.mubr.bf16.vlgmr.msra.gmra.mrb[40].mxu1 %v4297_v42  ;;  %4554 = vmatmul.mubr.bf16.vlgmr.msra.gmra.mrb[44].mxu0 %v4297_v42 }
0x117a   :  { %6972 = vmatpush3.bf16.msra.mxu1 %v7679_v2  ;;  %6994 = vmatpush3.bf16.msra.mxu0 %v7680_v11 }
0x117b   :  { %6973 = vmatprep.subr.bf16.mxu1 %v7681_v51  ;;  %6995 = vmatprep.subr.bf16.mxu0 %v7682_v52 }
0x117e   :  { %6974 = vmatpush3.bf16.msra.mxu1 %v7683_v14  ;;  %6996 = vmatpush3.bf16.msra.mxu0 %v7684_v26 }
0x117f   :  { %6975 = vmatprep.subr.bf16.mxu1 %v7685_v21  ;;  %6997 = vmatprep.subr.bf16.mxu0 %v7686_v39 }
0x1182   :  { %6976 = vmatpush3.bf16.msra.mxu1 %v7687_v53  ;;  %6998 = vmatpush3.bf16.msra.mxu0 %v7688_v54 }
0x1183   :  { %6977 = vmatprep.subr.bf16.mxu1 %v7689_v37  ;;  %6999 = vmatprep.subr.bf16.mxu0 %v7690_v46 }
0x1186   :  { %6978 = vmatpush3.bf16.msra.mxu1 %v7691_v43  ;;  %7000 = vmatpush3.bf16.msra.mxu0 %v7692_v33  ;;  %v4957_v33 = vpop.xlane.xlu1 %4956 }
0x1187   :  { %6979 = vmatprep.subr.bf16.mxu1 %v7693_v45  ;;  %7001 = vmatprep.subr.bf16.mxu0 %v7694_v49 }
0x118a   :  { %6980 = vmatpush3.bf16.msra.mxu1 %v7695_v48  ;;  %7002 = vmatpush3.bf16.msra.mxu0 %v7696_v17 }
0x118b   :  { %6981 = vmatprep.subr.bf16.mxu1 %v7697_v62  ;;  %7003 = vmatprep.subr.bf16.mxu0 %v7698_v1  ;;  %v4958_v1 = vmul.f32 0.0078125, %v4957_v33 }
0x118e   :  { %6982 = vmatpush3.bf16.msra.mxu1 %v7699_v3  ;;  %7004 = vmatpush3.bf16.msra.mxu0 %v7700_v41  ;;  %v7709_v41 = vld [vmem:[%s10032_s11] ss:$12 sps:$4 sm:$0xff]  }
0x118f   :  { %6983 = vmatprep.subr.bf16.mxu1 %v7701_v60  ;;  %7005 = vmatprep.subr.bf16.mxu0 %v7702_v7 }
0x1192   :  { %6984 = vmatpush3.bf16.msra.mxu1 %v7703_v8  ;;  %7006 = vmatpush3.bf16.msra.mxu0 %v7704_v58  ;;  %v7712_v8 = vld [vmem:[%s10032_s11 + $0x8] ss:$12 sps:$4 sm:$0xff]  }
0x1193   :  { %6985 = vmatprep.subr.bf16.mxu1 %v7705_v9  ;;  %7007 = vmatprep.subr.bf16.mxu0 %v7706_v22  ;;  %v7715_v58 = vld [vmem:[%s10032_s11 + $0x1c] ss:$12 sps:$4 sm:$0xff]   ;;  %v4959_v22 = vadd.f32 1e-05, %v4958_v1 }
0x1196   :  { %6986 = vmatpush3.bf16.msra.mxu1 %v7707_v55  ;;  %7008 = vmatpush3.bf16.msra.mxu0 %v7708_v4  ;;  %v7713_v55 = vld [vmem:[%s10032_s11 + $0x18] ss:$12 sps:$4 sm:$0xff]   ;;  %v7716_v4 = vld [vmem:[%s10032_s11 + $0x20] ss:$12 sps:$4 sm:$0xff]  }
0x1197   :  { %7257 = vmatprep.subr.bf16.mxu0 %v8026_v0  ;;  %5154 = vmatprep.subr.bf16.mxu1 %v7711_v5  ;;  %v7719_v5 = vld [vmem:[%s10032_s11 + $0x34] ss:$12 sps:$4 sm:$0xff]  }
0x124c   :  { %v4514_v28 = vpop.f32.mrb[40].mxu1  ;;  %v4555_v32 = vpop.f32.mrb[44].mxu0 }
0x124d   :  { %v4515_v34 = vadd.f32 %v4514_v28, %v4303_v40  ;;  %v4556_v6 = vadd.f32 %v4555_v32, %v4311_v16  ;;  %v4516_v12 = vpop.f32.mrb[41].mxu1  ;;  %v4557_v47 = vpop.f32.mrb[45].mxu0  ;;  %v7720_v40 = vld [vmem:[%s10032_s11 + $0x38] ss:$12 sps:$4 sm:$0xff]   ;;  %v7725_v32 = vld [vmem:[%s10032_s11 + $0x60] ss:$12 sps:$4 sm:$0xff]  }
0x124e   :  { %v4517_v35 = vadd.f32 %v4516_v12, %v4307_v18  ;;  %v4558_v36 = vadd.f32 %v4557_v47, %v4315_v19  ;;  %v4518_v63 = vpop.f32.mrb[42].mxu1  ;;  %v4559_v20 = vpop.f32.mrb[46].mxu0  ;;  %v7723_v16 = vld [vmem:[%s10032_s11 + $0x4c] ss:$12 sps:$4 sm:$0xff]   ;;  %v7721_v18 = vld [vmem:[%s10032_s11 + $0x48] ss:$12 sps:$4 sm:$0xff]  }
0x124f   :  { %v6657_v23 = vmul.f32 -1.702, %v4515_v34  ;;  %v6659_v30 = vmul.f32 -1.702, %v4556_v6  ;;  %v4519_v24 = vpop.f32.mrb[43].mxu1  ;;  %v4560_v27 = vpop.f32.mrb[47].mxu0 }
0x1250   :  { %v6658_v13 = vmul.f32 -1.702, %v4517_v35  ;;  %v6660_v42 = vmul.f32 -1.702, %v4558_v36  ;;  %v7724_v19 = vld [vmem:[%s10032_s11 + $0x50] ss:$12 sps:$4 sm:$0xff]  }
0x1251   :  { %v4570_v57 = vmul.f32 1.442695, %v6657_v23  ;;  %v4574_v44 = vmul.f32 1.442695, %v6659_v30  ;;  %v7727_v28 = vld [vmem:[%s10032_s11 + $0x64] ss:$12 sps:$4 sm:$0xff]  }
0x1252   :  { %v4572_v2 = vmul.f32 1.442695, %v6658_v13  ;;  %v4576_v11 = vmul.f32 1.442695, %v6660_v42  ;;  %v7729_v47 = vld [vmem:[%s10032_s11 + $0x78] ss:$12 sps:$4 sm:$0xff]  }
0x1253   :  { %7963 = vpow2.f32 %v4570_v57  ;;  %v6695_v20 = vld [vmem:[%s10033_s9] ss:$0 sm:$0xff]  ;;  %v7733_v23 = vld [vmem:[%s10032_s11 + $0x90] ss:$12 sps:$4 sm:$0xff]   ;;  %v7736_v30 = vld [vmem:[%s10032_s11 + $0x98] ss:$12 sps:$4 sm:$0xff]  }
0x1254   :  { %7965 = vpow2.f32 %v4574_v44  ;;  %v6696_v27 = vld [vmem:[%s10034_s10] ss:$0 sm:$0xff]  ;;  %v7737_v13 = vld [vmem:[%s10032_s11 + $0xa8] ss:$12 sps:$4 sm:$0xff]   ;;  %v7740_v42 = vld [vmem:[%s10032_s11 + $0xb0] ss:$12 sps:$4 sm:$0xff]  }
0x1255   :  { %7967 = vpow2.f32 %v4572_v2  ;;  %v7741_v2 = vld [vmem:[%s10035_s13] sm:$0xff]  }
0x1256   :  { %7969 = vpow2.f32 %v4576_v11  ;;  %v7742_v11 = vld [vmem:[%s10035_s13 + $0x8] sm:$0xff]  }
0x125d   :  { %v7964_v51 = vpop.eup %7963 }
0x125e   :  { %v7966_v52 = vpop.eup %7965  ;;  %v4578_v14 = vadd.f32 1.0, %v7964_v51  ;;  %v7743_v51 = vld [vmem:[%s10035_s13 + $0x10] sm:$0xff]  }
0x125f   :  { %v7968_v26 = vpop.eup %7967  ;;  %v4580_v21 = vadd.f32 1.0, %v7966_v52  ;;  %v7744_v52 = vld [vmem:[%s10035_s13 + $0x18] sm:$0xff]  }
0x1260   :  { %v7970_v39 = vpop.eup %7969  ;;  %7971 = vrcp.f32 %v4578_v14  ;;  %v4579_v53 = vadd.f32 1.0, %v7968_v26  ;;  %v7745_v14 = vld [vmem:[%s10035_s13 + $0x20] sm:$0xff]   ;;  %v7746_v26 = vld [vmem:[%s10035_s13 + $0x28] sm:$0xff]  }
0x1261   :  { %7973 = vrcp.f32 %v4580_v21  ;;  %v4581_v54 = vadd.f32 1.0, %v7970_v39  ;;  %v7747_v21 = vld [vmem:[%s10035_s13 + $0x30] sm:$0xff]   ;;  %v7748_v39 = vld [vmem:[%s10035_s13 + $0x38] sm:$0xff]  }
0x1262   :  { %7975 = vrcp.f32 %v4579_v53 }
0x1263   :  { %7977 = vrcp.f32 %v4581_v54 }
0x1264   :  { %7979 = vrsqrt.f32 %v4959_v22 }
0x126a   :  { %v7972_v37 = vpop.eup %7971 }
0x126b   :  { %v7974_v46 = vpop.eup %7973  ;;  %v4590_v45 = vmul.f32 %v7972_v37, %v4515_v34  ;;  %v7728_v34 = vld [vmem:[%s10032_s11 + $0x68] ss:$12 sps:$4 sm:$0xff]   ;;  %v6661_v37 = vld [vmem:[%s10043_s20] ss:$0 sm:$0xff] }
0x126c   :  { %v7976_v43 = vpop.eup %7975  ;;  %v4592_v48 = vmul.f32 %v7974_v46, %v4556_v6  ;;  %v7731_v6 = vld [vmem:[%s10032_s11 + $0x7c] ss:$12 sps:$4 sm:$0xff]  }
0x126d   :  { %v7978_v49 = vpop.eup %7977  ;;  %v4591_v17 = vmul.f32 %v7976_v43, %v4517_v35  ;;  %v4658_v60 = vpack.c.bf16 %v4590_v45, %v4590_v45  ;;  %v7732_v35 = vld [vmem:[%s10032_s11 + $0x80] ss:$12 sps:$4 sm:$0xff]  }
0x126e   :  { %v4593_v62 = vmul.f32 %v7978_v49, %v4558_v36  ;;  %v4660_v9 = vpack.c.bf16 %v4592_v48, %v4592_v48  ;;  %v7980_v12 = vpop.eup %7979  ;;  %v7735_v36 = vld [vmem:[%s10032_s11 + $0x94] ss:$12 sps:$4 sm:$0xff]  }
0x126f   :  { %v4659_v3 = vpack.c.bf16 %v4591_v17, %v4591_v17  ;;  %v4961_v63 = vmul.f32 %v7980_v12, %v9444_v15  ;;  %v7739_v15 = vld [vmem:[%s10032_s11 + $0xac] ss:$12 sps:$4 sm:$0xff]  }
0x1270   :  { %v4661_v7 = vpack.c.bf16 %v4593_v62, %v4593_v62 }
0x1271   :  { %4893 = vmatprep.mubr.bf16.mxu1 %v4659_v3  ;;  %v4968_v24 = vmul.f32 %v6695_v20, %v4961_v63 }
0x1272   :  { %4933 = vmatprep.mubr.bf16.mxu0 %v4661_v7  ;;  %4894 = vmatmul.mubr.bf16.vlgmr.msra.gmra.mrb[44].mxu1 %v4658_v60 }
0x1273   :  { %4934 = vmatmul.mubr.bf16.vlgmr.msra.gmra.mrb[48].mxu0 %v4660_v9  ;;  %5155 = vmatpush1.bf16.msra.mxu1 %v7709_v41  ;;  %v4975_v57 = vadd.f32 %v6696_v27, %v4968_v24 }
0x1274   :  { %7258 = vmatpush3.bf16.msra.mxu0 %v7712_v8  ;;  %5156 = vmatprep.subr.bf16.mxu1 %v7715_v58 }
0x1275   :  { %7259 = vmatprep.subr.bf16.mxu0 %v8026_v0  ;;  %5186 = vmatprep.mubr.bf16.mxu1 %v8028_v59  ;;  %v5008_v44 = vpack.c.bf16 %v4975_v57, %v4975_v57 }
0x1276   :  { %7273 = vmatprep.mubr.msk.bf16.mxu0 %vm8027_vm0, %v8026_v0 }
0x1277   :  { %5157 = vmatpush1.bf16.msra.mxu1 %v7713_v55 }
0x1278   :  { %7260 = vmatpush3.bf16.msra.mxu0 %v7716_v4  ;;  %5158 = vmatprep.subr.bf16.mxu1 %v7719_v5 }
0x1279   :  { %7261 = vmatprep.subr.bf16.mxu0 %v8026_v0 }
0x127b   :  { %5159 = vmatpush1.bf16.msra.mxu1 %v7717_v56 }
0x127c   :  { %7262 = vmatpush3.bf16.msra.mxu0 %v7720_v40  ;;  %5160 = vmatprep.subr.bf16.mxu1 %v7723_v16 }
0x127d   :  { %7263 = vmatprep.subr.bf16.mxu0 %v8026_v0 }
0x127f   :  { %5161 = vmatpush1.bf16.msra.mxu1 %v7721_v18 }
0x1280   :  { %7264 = vmatpush3.bf16.msra.mxu0 %v7724_v19  ;;  %5162 = vmatprep.subr.bf16.mxu1 %v7727_v28 }
0x1281   :  { %7265 = vmatprep.subr.bf16.mxu0 %v8026_v0 }
0x1283   :  { %5163 = vmatpush1.bf16.msra.mxu1 %v7725_v32 }
0x1284   :  { %7266 = vmatpush3.bf16.msra.mxu0 %v7728_v34  ;;  %5164 = vmatprep.subr.bf16.mxu1 %v7731_v6 }
0x1285   :  { %7267 = vmatprep.subr.bf16.mxu0 %v8026_v0 }
0x1287   :  { %5165 = vmatpush1.bf16.msra.mxu1 %v7729_v47 }
0x1288   :  { %7268 = vmatpush3.bf16.msra.mxu0 %v7732_v35  ;;  %5166 = vmatprep.subr.bf16.mxu1 %v7735_v36 }
0x1289   :  { %7269 = vmatprep.subr.bf16.mxu0 %v8026_v0 }
0x128b   :  { %5167 = vmatpush1.bf16.msra.mxu1 %v7733_v23 }
0x128c   :  { %7270 = vmatpush3.bf16.msra.mxu0 %v7736_v30  ;;  %5168 = vmatprep.subr.bf16.mxu1 %v7739_v15 }
0x128d   :  { %7271 = vmatprep.subr.bf16.mxu0 %v8026_v0 }
0x128f   :  { %5169 = vmatpush1.bf16.msra.mxu1 %v7737_v13 }
0x1290   :  { %7272 = vmatpush3.bf16.msra.mxu0 %v7740_v42  ;;  %7277 = vmatprep.subr.bf16.mxu1 %v8026_v0 }
0x1292   :  { %5187 = vmatmul.mubr.bf16.vlgmr.msra.gmra.mrb[48].mxu1 %v5008_v44 }
0x1293   :  { %7274 = vmatmul.mubr.bf16.vlgmr.msra.gmra.mrb[52].mxu0 %v5008_v44  ;;  %7293 = vmatprep.mubr.msk.bf16.mxu1 %vm8027_vm0, %v8026_v0 }
0x1294   :  { %5895 = vmatprep.mubr.bf16.mxu0 %v8028_v59  ;;  %7278 = vmatpush3.bf16.msra.mxu1 %v7741_v2 }
0x1295   :  { %7279 = vmatprep.subr.bf16.mxu1 %v8026_v0 }
0x1298   :  { %7280 = vmatpush3.bf16.msra.mxu1 %v7742_v11 }
0x1299   :  { %7281 = vmatprep.subr.bf16.mxu1 %v8026_v0 }
0x129c   :  { %7282 = vmatpush3.bf16.msra.mxu1 %v7743_v51 }
0x129d   :  { %7283 = vmatprep.subr.bf16.mxu1 %v8026_v0 }
0x12a0   :  { %7284 = vmatpush3.bf16.msra.mxu1 %v7744_v52 }
0x12a1   :  { %7285 = vmatprep.subr.bf16.mxu1 %v8026_v0 }
0x12a4   :  { %7286 = vmatpush3.bf16.msra.mxu1 %v7745_v14 }
0x12a5   :  { %7287 = vmatprep.subr.bf16.mxu1 %v8026_v0 }
0x12a8   :  { %7288 = vmatpush3.bf16.msra.mxu1 %v7746_v26 }
0x12a9   :  { %7289 = vmatprep.subr.bf16.mxu1 %v8026_v0 }
0x12ac   :  { %7290 = vmatpush3.bf16.msra.mxu1 %v7747_v21 }
0x12ad   :  { %7291 = vmatprep.subr.bf16.mxu1 %v8026_v0  ;;  %v5009_v0 = vld [vmem:[%s10036_s12] sm:$0x7] }
0x12ae   :  { %v5014_v60 = vrot.slane %v5009_v0, %v8330_v25  ;;  %v5022_v7 = vrot.slane %v5009_v0, %v8363_v10  ;;  %v5018_v18 = vrot.slane %v5009_v0, %v8343_v31 }
0x12b0   :  { %7292 = vmatpush3.bf16.msra.mxu1 %v7748_v39 }
0x1345   :  { %v6987_v53 = vpop.f32.mrb[44].mxu1 }
0x1346   :  { %v7009_v54 = vpop.f32.mrb[48].mxu0  ;;  %v6988_v46 = vpop.f32.mrb[45].mxu1 }
0x1347   :  { %v6989_v43 = vadd.f32 %v6988_v46, %v6987_v53  ;;  %v7010_v33 = vpop.f32.mrb[49].mxu0  ;;  %v6990_v45 = vpop.f32.mrb[46].mxu1 }
0x1348   :  { %v7011_v49 = vadd.f32 %v7010_v33, %v7009_v54  ;;  %v7012_v48 = vpop.f32.mrb[50].mxu0  ;;  %v6991_v17 = vpop.f32.mrb[47].mxu1 }
0x1349   :  { %v4896_v62 = vadd.f32 %v6989_v43, %v6661_v37  ;;  %v7013_v1 = vpop.f32.mrb[51].mxu0 }
0x134b   :  { %v4936_v3 = vadd.f32 %v7011_v49, %v4896_v62 }
0x134d   :  { %v4941_v41 = vadd.f32 %v4936_v3, %v9394_v38 }
0x134f   :  { %6694 = vst [vmem:[%s10044_s21 + $0x10] sm:$0x1f] %v4941_v41 }
0x1365   :  { %v5188_v8 = vpop.f32.mrb[48].mxu1 }
0x1366   :  { %v5189_v58 = vadd.f32 %v5188_v8, %v5014_v60  ;;  %v5229_v9 = vpop.f32.mrb[52].mxu0  ;;  %v5190_v22 = vpop.f32.mrb[49].mxu1 }
0x1367   :  { %v9756_v55 = vadd.f32 %v5229_v9, %v5022_v7  ;;  %v7275_v4 = vpop.f32.mrb[53].mxu0  ;;  %v5192_v38 = vpop.f32.mrb[50].mxu1  ;;  %v5191_v63 = vadd.f32 %v5190_v22, %v5018_v18 }
0x1368   :  { %v5236_v5 = vcombine.high %v5189_v58, %v5189_v58  ;;  %v5243_v56 = vrot.slane %v5189_v58, %v8340_v29  ;;  %v5232_v40 = vpop.f32.mrb[54].mxu0  ;;  %v5193_v16 = vpop.f32.mrb[51].mxu1 }
0x1369   :  { %v7276_v19 = vpop.f32.mrb[55].mxu0 }
0x136a   :  { %v5250_v28 = vrot.slane %v5236_v5, %v8340_v29  ;;  %v5251_v32 = vcombine.high %v5243_v56, %v5243_v56  ;;  %v5259_v34 = vrot.slane %v5243_v56, %v8340_v29 }
0x136c   :  { %v5252_v6 = vcombine.high %v5250_v28, %v5250_v28  ;;  %v5266_v12 = vrot.slane %v5250_v28, %v8340_v29  ;;  %v5273_v47 = vrot.slane %v5251_v32, %v8340_v29  ;;  %v5281_v35 = vcombine.high %v5259_v34, %v5259_v34 }
0x136d   :  { %v5286_v36 = vrot.slane %v5259_v34, %v8330_v25 }
0x136e   :  { %v5280_v20 = vrot.slane %v5252_v6, %v8340_v29  ;;  %v5282_v23 = vcombine.high %v5273_v47, %v5273_v47  ;;  %v5290_v30 = vrot.slane %v5273_v47, %v8330_v25  ;;  %v5294_v15 = vrot.slane %v5281_v35, %v8330_v25 }
0x136f   :  { %v5302_v24 = vrot.slane %v5266_v12, %v8330_v25  ;;  %v5313_v27 = vmul.f32 %v5286_v36, %v5191_v63 }
0x1370   :  { %v5298_v13 = vrot.slane %v5282_v23, %v8330_v25  ;;  %v5306_v42 = vrot.slane %v5280_v20, %v8330_v25  ;;  %v5314_v57 = vmul.f32 %v5290_v30, %v5191_v63  ;;  %v5315_v44 = vmul.f32 %v5294_v15, %v5191_v63 }
0x1371   :  { %v5317_v2 = vmul.f32 %v5302_v24, %v5191_v63  ;;  %v5319_v11 = vsel %vm798_vm8, %v5313_v27, -inf }
0x1372   :  { %v5316_v51 = vmul.f32 %v5298_v13, %v5191_v63  ;;  %v5318_v52 = vmul.f32 %v5306_v42, %v5191_v63  ;;  %v5320_v29 = vrot.slane %v5319_v11, 4  ;;  %v5326_v14 = vsel %vm798_vm8, %v5314_v57, -inf }
0x1373   :  { %v5327_v26 = vrot.slane %v5326_v14, 4  ;;  %v5333_v21 = vsel %vm798_vm8, %v5315_v44, -inf  ;;  %v5347_v39 = vsel %vm798_vm8, %v5317_v2, -inf }
0x1374   :  { %v5321_v53 = vmax.f32 %v5319_v11, %v5320_v29  ;;  %v5334_v54 = vrot.slane %v5333_v21, 4  ;;  %v5340_v37 = vsel %vm798_vm8, %v5316_v51, -inf  ;;  %v5348_v46 = vrot.slane %v5347_v39, 4 }
0x1375   :  { %v5328_v43 = vmax.f32 %v5326_v14, %v5327_v26  ;;  %v5341_v33 = vrot.slane %v5340_v37, 4  ;;  %v5354_v45 = vsel %vm798_vm8, %v5318_v52, -inf }
0x1376   :  { %v5322_v49 = vrot.slane %v5321_v53, 2  ;;  %v5335_v48 = vmax.f32 %v5333_v21, %v5334_v54  ;;  %v5349_v17 = vmax.f32 %v5347_v39, %v5348_v46  ;;  %v5355_v62 = vrot.slane %v5354_v45, 4 }
0x1377   :  { %v5329_v1 = vrot.slane %v5328_v43, 2  ;;  %v5342_v3 = vmax.f32 %v5340_v37, %v5341_v33 }
0x1378   :  { %v5323_v41 = vmax.f32 %v5321_v53, %v5322_v49  ;;  %v5336_v0 = vrot.slane %v5335_v48, 2  ;;  %v5350_v60 = vrot.slane %v5349_v17, 2  ;;  %v5356_v7 = vmax.f32 %v5354_v45, %v5355_v62 }
0x1379   :  { %v5330_v8 = vmax.f32 %v5328_v43, %v5329_v1  ;;  %v5343_v58 = vrot.slane %v5342_v3, 2 }
0x137a   :  { %v5324_v9 = vrot.slane %v5323_v41, 1  ;;  %v5337_v22 = vmax.f32 %v5335_v48, %v5336_v0  ;;  %v5351_v4 = vmax.f32 %v5349_v17, %v5350_v60  ;;  %v5357_v38 = vrot.slane %v5356_v7, 2 }
0x137b   :  { %v5331_v5 = vrot.slane %v5330_v8, 1  ;;  %v5344_v56 = vmax.f32 %v5342_v3, %v5343_v58 }
0x137c   :  { %v5325_v40 = vmax.f32 %v5323_v41, %v5324_v9  ;;  %v5338_v16 = vrot.slane %v5337_v22, 1  ;;  %v5352_v18 = vrot.slane %v5351_v4, 1  ;;  %v5358_v19 = vmax.f32 %v5356_v7, %v5357_v38 }
0x137d   :  { %v5332_v28 = vmax.f32 %v5330_v8, %v5331_v5  ;;  %v5345_v32 = vrot.slane %v5344_v56, 1 }
0x137e   :  { %v5339_v34 = vmax.f32 %v5337_v22, %v5338_v16  ;;  %v5353_v6 = vmax.f32 %v5351_v4, %v5352_v18  ;;  %v5359_v12 = vrot.slane %v5358_v19, 1  ;;  %v5361_v47 = vsub.f32 %v5313_v27, %v5325_v40 }
0x137f   :  { %v5346_v35 = vmax.f32 %v5344_v56, %v5345_v32  ;;  %v5362_v36 = vsub.f32 %v5314_v57, %v5332_v28 }
0x1380   :  { %v5360_v63 = vmax.f32 %v5358_v19, %v5359_v12  ;;  %v5363_v20 = vsub.f32 %v5315_v44, %v5339_v34  ;;  %v5365_v23 = vsub.f32 %v5317_v2, %v5353_v6  ;;  %v5367_v30 = vmul.f32 1.442695, %v5361_v47 }
0x1381   :  { %v5364_v15 = vsub.f32 %v5316_v51, %v5346_v35  ;;  %v5369_v24 = vmul.f32 1.442695, %v5362_v36 }
0x1382   :  { %v5366_v13 = vsub.f32 %v5318_v52, %v5360_v63  ;;  %7981 = vpow2.f32 %v5367_v30  ;;  %v5371_v42 = vmul.f32 1.442695, %v5363_v20  ;;  %v5375_v11 = vmul.f32 1.442695, %v5365_v23 }
0x1383   :  { %7983 = vpow2.f32 %v5369_v24  ;;  %v5373_v29 = vmul.f32 1.442695, %v5364_v15 }
0x1384   :  { %7985 = vpow2.f32 %v5371_v42  ;;  %v5377_v14 = vmul.f32 1.442695, %v5366_v13 }
0x1385   :  { %7987 = vpow2.f32 %v5373_v29 }
0x1386   :  { %7989 = vpow2.f32 %v5375_v11 }
0x1387   :  { %7991 = vpow2.f32 %v5377_v14 }
0x138c   :  { %v7982_v27 = vpop.eup %7981 }
0x138d   :  { %v7984_v26 = vpop.eup %7983  ;;  %v5379_v57 = vsel %vm798_vm8, %v7982_v27, 0.0 }
0x138e   :  { %v7986_v44 = vpop.eup %7985  ;;  %v5380_v2 = vrot.slane %v5379_v57, 4  ;;  %v5386_v51 = vsel %vm798_vm8, %v7984_v26, 0.0 }
0x138f   :  { %v7988_v21 = vpop.eup %7987  ;;  %v5387_v52 = vrot.slane %v5386_v51, 4  ;;  %v5393_v39 = vsel %vm798_vm8, %v7986_v44, 0.0 }
0x1390   :  { %v7990_v53 = vpop.eup %7989  ;;  %v5381_v54 = vadd.f32 %v5380_v2, %v5379_v57  ;;  %v5394_v37 = vrot.slane %v5393_v39, 4  ;;  %v5400_v46 = vsel %vm798_vm8, %v7988_v21, 0.0 }
0x1391   :  { %v7992_v43 = vpop.eup %7991  ;;  %v5388_v33 = vadd.f32 %v5387_v52, %v5386_v51  ;;  %v5401_v45 = vrot.slane %v5400_v46, 4  ;;  %v5407_v49 = vsel %vm798_vm8, %v7990_v53, 0.0 }
0x1392   :  { %v5382_v48 = vrot.slane %v5381_v54, 2  ;;  %v5395_v17 = vadd.f32 %v5394_v37, %v5393_v39  ;;  %v5408_v62 = vrot.slane %v5407_v49, 4  ;;  %v5414_v1 = vsel %vm798_vm8, %v7992_v43, 0.0 }
0x1393   :  { %v5389_v3 = vrot.slane %v5388_v33, 2  ;;  %v5402_v41 = vadd.f32 %v5401_v45, %v5400_v46  ;;  %v5415_v0 = vrot.slane %v5414_v1, 4 }
0x1394   :  { %v5383_v60 = vadd.f32 %v5382_v48, %v5381_v54  ;;  %v5396_v7 = vrot.slane %v5395_v17, 2  ;;  %v5409_v8 = vadd.f32 %v5408_v62, %v5407_v49 }
0x1395   :  { %v5390_v58 = vadd.f32 %v5389_v3, %v5388_v33  ;;  %v5403_v9 = vrot.slane %v5402_v41, 2  ;;  %v5416_v22 = vadd.f32 %v5415_v0, %v5414_v1 }
0x1396   :  { %v5384_v4 = vrot.slane %v5383_v60, 1  ;;  %v5397_v38 = vadd.f32 %v5396_v7, %v5395_v17  ;;  %v5410_v5 = vrot.slane %v5409_v8, 2 }
0x1397   :  { %v5391_v56 = vrot.slane %v5390_v58, 1  ;;  %v5404_v40 = vadd.f32 %v5403_v9, %v5402_v41  ;;  %v5417_v16 = vrot.slane %v5416_v22, 2 }
0x1398   :  { %v5385_v18 = vadd.f32 %v5384_v4, %v5383_v60  ;;  %v5398_v19 = vrot.slane %v5397_v38, 1  ;;  %v5411_v28 = vadd.f32 %v5410_v5, %v5409_v8 }
0x1399   :  { %v5392_v32 = vadd.f32 %v5391_v56, %v5390_v58  ;;  %v5405_v34 = vrot.slane %v5404_v40, 1  ;;  %v5418_v6 = vadd.f32 %v5417_v16, %v5416_v22 }
0x139a   :  { %v5399_v12 = vadd.f32 %v5398_v19, %v5397_v38  ;;  %v5412_v47 = vrot.slane %v5411_v28, 1  ;;  %7993 = vrcp.f32 %v5385_v18 }
0x139b   :  { %v5406_v35 = vadd.f32 %v5405_v34, %v5404_v40  ;;  %7995 = vrcp.f32 %v5392_v32  ;;  %v5419_v36 = vrot.slane %v5418_v6, 1 }
0x139c   :  { %7997 = vrcp.f32 %v5399_v12  ;;  %v5413_v63 = vadd.f32 %v5412_v47, %v5411_v28 }
0x139d   :  { %v5420_v20 = vadd.f32 %v5419_v36, %v5418_v6  ;;  %7999 = vrcp.f32 %v5406_v35 }
0x139e   :  { %8001 = vrcp.f32 %v5413_v63 }
0x139f   :  { %8003 = vrcp.f32 %v5420_v20 }
0x13a4   :  { %v7994_v23 = vpop.eup %7993 }
0x13a5   :  { %v7996_v30 = vpop.eup %7995  ;;  %v5422_v15 = vmul.f32 %v7994_v23, %v7982_v27 }
0x13a6   :  { %v7998_v24 = vpop.eup %7997  ;;  %v5424_v13 = vmul.f32 %v7996_v30, %v7984_v26 }
0x13a7   :  { %v8000_v42 = vpop.eup %7999  ;;  %v5426_v11 = vmul.f32 %v7998_v24, %v7986_v44  ;;  %v5433_v29 = vmul.f32 %v5422_v15, %v9756_v55 }
0x13a8   :  { %v8002_v14 = vpop.eup %8001  ;;  %v5428_v57 = vmul.f32 %v8000_v42, %v7988_v21  ;;  %v5434_v2 = vmul.f32 %v5424_v13, %v9756_v55 }
0x13a9   :  { %v8004_v51 = vpop.eup %8003  ;;  %v5430_v52 = vmul.f32 %v8002_v14, %v7990_v53  ;;  %v5435_v39 = vmul.f32 %v5426_v11, %v9756_v55  ;;  %v5439_v54 = vsel %vm798_vm8, %v5433_v29, 0.0 }
0x13aa   :  { %v5432_v37 = vmul.f32 %v8004_v51, %v7992_v43  ;;  %v5436_v46 = vmul.f32 %v5428_v57, %v9756_v55  ;;  %v5440_v27 = vrot.slane %v5439_v54, 4  ;;  %v5446_v26 = vsel %vm798_vm8, %v5434_v2, 0.0 }
0x13ab   :  { %v5437_v44 = vmul.f32 %v5430_v52, %v9756_v55  ;;  %v5447_v33 = vrot.slane %v5446_v26, 4  ;;  %v5453_v45 = vsel %vm798_vm8, %v5435_v39, 0.0 }
0x13ac   :  { %v5438_v21 = vmul.f32 %v5432_v37, %v9756_v55  ;;  %v5441_v49 = vadd.f32 %v5440_v27, %v5439_v54  ;;  %v5454_v48 = vrot.slane %v5453_v45, 4  ;;  %v5460_v53 = vsel %vm798_vm8, %v5436_v46, 0.0 }
0x13ad   :  { %v5448_v17 = vadd.f32 %v5447_v33, %v5446_v26  ;;  %v5461_v62 = vrot.slane %v5460_v53, 4  ;;  %v5467_v43 = vsel %vm798_vm8, %v5437_v44, 0.0 }
0x13ae   :  { %v5442_v1 = vrot.slane %v5441_v49, 2  ;;  %v5455_v3 = vadd.f32 %v5454_v48, %v5453_v45  ;;  %v5468_v41 = vrot.slane %v5467_v43, 4  ;;  %v5474_v0 = vsel %vm798_vm8, %v5438_v21, 0.0  ;;  %v6729_v45 = vld [vmem:[%s10037_s14] ss:$0 sm:$0xff] }
0x13af   :  { %v5449_v60 = vrot.slane %v5448_v17, 2  ;;  %v5462_v7 = vadd.f32 %v5461_v62, %v5460_v53  ;;  %v5475_v8 = vrot.slane %v5474_v0, 4 }
0x13b0   :  { %v5443_v58 = vadd.f32 %v5442_v1, %v5441_v49  ;;  %v5456_v9 = vrot.slane %v5455_v3, 2  ;;  %v5469_v22 = vadd.f32 %v5468_v41, %v5467_v43  ;;  %v7751_v43 = vld [vmem:[%s10038_s17 + $0x4] ss:$16 sps:$4 sm:$0xff]   ;;  %v7754_v1 = vld [vmem:[%s10038_s17 + $0xc] ss:$16 sps:$4 sm:$0xff]  }
0x13b1   :  { %v5450_v55 = vadd.f32 %v5449_v60, %v5448_v17  ;;  %v5463_v4 = vrot.slane %v5462_v7, 2  ;;  %v5476_v38 = vadd.f32 %v5475_v8, %v5474_v0  ;;  %5863 = vmatprep.subr.bf16.mxu0 %v7751_v43  ;;  %v7760_v41 = vld [vmem:[%s10038_s17 + $0x2c] ss:$16 sps:$4 sm:$0xff]   ;;  %5904 = vmatprep.subr.bf16.mxu1 %v7754_v1  ;;  %v7755_v0 = vld [vmem:[%s10038_s17 + $0x20] ss:$16 sps:$4 sm:$0xff]  }
0x13b2   :  { %v5444_v5 = vrot.slane %v5443_v58, 1  ;;  %v5457_v56 = vadd.f32 %v5456_v9, %v5455_v3  ;;  %v5470_v40 = vrot.slane %v5469_v22, 2  ;;  %v7757_v3 = vld [vmem:[%s10038_s17 + $0x24] ss:$16 sps:$4 sm:$0xff]   ;;  %v7758_v60 = vld [vmem:[%s10038_s17 + $0x28] ss:$16 sps:$4 sm:$0xff]  }
0x13b3   :  { %v5451_v16 = vrot.slane %v5450_v55, 1  ;;  %v5464_v18 = vadd.f32 %v5463_v4, %v5462_v7  ;;  %v5477_v19 = vrot.slane %v5476_v38, 2  ;;  %v7763_v7 = vld [vmem:[%s10038_s17 + $0x44] ss:$16 sps:$4 sm:$0xff]   ;;  %v7766_v8 = vld [vmem:[%s10038_s17 + $0x4c] ss:$16 sps:$4 sm:$0xff]  }
0x13b4   :  { %v5445_v28 = vadd.f32 %v5444_v5, %v5443_v58  ;;  %v5458_v32 = vrot.slane %v5457_v56, 1  ;;  %v5471_v34 = vadd.f32 %v5470_v40, %v5469_v22  ;;  %v7761_v58 = vld [vmem:[%s10038_s17 + $0x40] ss:$16 sps:$4 sm:$0xff]   ;;  %v7764_v9 = vld [vmem:[%s10038_s17 + $0x48] ss:$16 sps:$4 sm:$0xff]  }
0x13b5   :  { %v5452_v6 = vadd.f32 %v5451_v16, %v5450_v55  ;;  %v5465_v12 = vrot.slane %v5464_v18, 1  ;;  %v5478_v47 = vadd.f32 %v5477_v19, %v5476_v38  ;;  %v7772_v40 = vld [vmem:[%s10038_s17 + $0x6c] ss:$16 sps:$4 sm:$0xff]   ;;  %v7767_v16 = vld [vmem:[%s10038_s17 + $0x60] ss:$16 sps:$4 sm:$0xff]  }
0x13b6   :  { %v5459_v35 = vadd.f32 %v5458_v32, %v5457_v56  ;;  %v5472_v36 = vrot.slane %v5471_v34, 1  ;;  %v5497_v63 = vpack.c.bf16 %v5445_v28, %v5445_v28  ;;  %v7769_v56 = vld [vmem:[%s10038_s17 + $0x64] ss:$16 sps:$4 sm:$0xff]   ;;  %v7778_v28 = vld [vmem:[%s10038_s17 + $0x8c] ss:$16 sps:$4 sm:$0xff]  }
0x13b7   :  { %v5466_v20 = vadd.f32 %v5465_v12, %v5464_v18  ;;  %v5479_v23 = vrot.slane %v5478_v47, 1  ;;  %v5498_v30 = vpack.c.bf16 %v5452_v6, %v5452_v6  ;;  %v7770_v18 = vld [vmem:[%s10038_s17 + $0x68] ss:$16 sps:$4 sm:$0xff]   ;;  %v7775_v19 = vld [vmem:[%s10038_s17 + $0x84] ss:$16 sps:$4 sm:$0xff]  }
0x13b8   :  { %v5473_v15 = vadd.f32 %v5472_v36, %v5471_v34  ;;  %v5499_v24 = vpack.c.bf16 %v5459_v35, %v5459_v35  ;;  %v5509_v11 = vunpack.c.l.b16 %v5497_v63  ;;  %v7773_v32 = vld [vmem:[%s10038_s17 + $0x80] ss:$16 sps:$4 sm:$0xff]   ;;  %v7776_v34 = vld [vmem:[%s10038_s17 + $0x88] ss:$16 sps:$4 sm:$0xff]   ;;  %v7781_v6 = vld [vmem:[%s10038_s17 + $0xa4] ss:$16 sps:$4 sm:$0xff]  }
0x13b9   :  { %v5480_v13 = vadd.f32 %v5479_v23, %v5478_v47  ;;  %v5500_v42 = vpack.c.bf16 %v5466_v20, %v5466_v20  ;;  %v5510_v29 = vunpack.c.l.b16 %v5498_v30  ;;  %v7784_v12 = vld [vmem:[%s10038_s17 + $0xac] ss:$16 sps:$4 sm:$0xff]   ;;  %v7779_v47 = vld [vmem:[%s10038_s17 + $0xa0] ss:$16 sps:$4 sm:$0xff]   ;;  %v7782_v35 = vld [vmem:[%s10038_s17 + $0xa8] ss:$16 sps:$4 sm:$0xff]  }
0x13ba   :  { %v5501_v14 = vpack.c.bf16 %v5473_v15, %v5473_v15  ;;  %v5511_v57 = vunpack.c.l.b16 %v5499_v24  ;;  %v7785_v36 = vld [vmem:[%s10038_s17 + $0xc0] ss:$16 sps:$4 sm:$0xff]   ;;  %v7787_v63 = vld [vmem:[%s10038_s17 + $0xc4] ss:$16 sps:$4 sm:$0xff]   ;;  %v7788_v20 = vld [vmem:[%s10038_s17 + $0xc8] ss:$16 sps:$4 sm:$0xff]  }
0x13bb   :  { %v5502_v2 = vpack.c.bf16 %v5480_v13, %v5480_v13  ;;  %v5512_v51 = vunpack.c.l.b16 %v5500_v42  ;;  %v5515_v52 = vsel %vm109_vm1, %v5510_v29, %v5509_v11  ;;  %v7790_v23 = vld [vmem:[%s10038_s17 + $0xcc] ss:$16 sps:$4 sm:$0xff]   ;;  %v7793_v30 = vld [vmem:[%s10038_s17 + $0xe4] ss:$16 sps:$4 sm:$0xff]   ;;  %v7791_v24 = vld [vmem:[%s10038_s17 + $0xe0] ss:$16 sps:$4 sm:$0xff]  }
0x13bc   :  { %v5513_v39 = vunpack.c.l.b16 %v5501_v14  ;;  %v5516_v54 = vsel %vm112_vm2, %v5511_v57, %v5515_v52  ;;  %v7796_v15 = vld [vmem:[%s10038_s17 + $0xec] ss:$16 sps:$4 sm:$0xff]   ;;  %v7794_v13 = vld [vmem:[%s10038_s17 + $0xe8] ss:$16 sps:$4 sm:$0xff]   ;;  %v6730_v57 = vld [vmem:[%s10039_s15] ss:$0 sm:$0xff] }
0x13bd   :  { %v5514_v37 = vunpack.c.l.b16 %v5502_v2  ;;  %v5517_v46 = vsel %vm115_vm3, %v5512_v51, %v5516_v54  ;;  %v6731_v51 = vld [vmem:[%s10040_s16] ss:$0 sm:$0xff]  ;;  %v7810_v43 = vld [vmem:[%s10041_s19 + $0xd8] sm:$0xff]  }
0x13be   :  { %v5518_v27 = vsel %vm1368_vm9, %v5513_v39, %v5517_v46  ;;  %v7798_v46 = vld [vmem:[%s10041_s19 + $0xc0] sm:$0xff]   ;;  %v7812_v1 = vld [vmem:[%s10041_s19 + $0x98] sm:$0xff]  }
0x13bf   :  { %v5519_v26 = vsel %vm1370_vm10, %v5514_v37, %v5518_v27  ;;  %v7797_v37 = vld [vmem:[%s10041_s19 + $0x40] sm:$0xff]  }
0x13c0   :  { %v5520_v44 = vpack.c.b16 %v5519_v26, %v5519_v26  ;;  %v7799_v27 = vld [vmem:[%s10041_s19] sm:$0xff]  }
0x13c1   :  { %v7800_v26 = vld [vmem:[%s10041_s19 + $0x80] sm:$0xff]  }
0x13c2   :  { %7294 = vmatmul.mubr.bf16.vlgmr.msra.gmra.mrb[52].mxu1 %v5520_v44  ;;  %v7801_v44 = vld [vmem:[%s10041_s19 + $0x48] sm:$0xff]  }
0x13c3   :  { %5936 = vmatprep.mubr.bf16.mxu1 %v8028_v59  ;;  %v7749_v59 = vld [vmem:[%s10038_s17] ss:$16 sps:$4 sm:$0xff]  }
0x13c4   :  { %5864 = vmatpush1.bf16.msra.mxu0 %v7749_v59  ;;  %v7809_v59 = vld [vmem:[%s10041_s19 + $0x58] sm:$0xff]  }
0x13c5   :  { %5865 = vmatprep.subr.bf16.mxu0 %v7757_v3  ;;  %v7813_v3 = vld [vmem:[%s10041_s19 + $0x60] sm:$0xff]  }
0x13c8   :  { %5866 = vmatpush1.bf16.msra.mxu0 %v7755_v0  ;;  %v7815_v0 = vld [vmem:[%s10041_s19 + $0x20] sm:$0xff]  }
0x13c9   :  { %5867 = vmatprep.subr.bf16.mxu0 %v7763_v7  ;;  %v7817_v7 = vld [vmem:[%s10041_s19 + $0x68] sm:$0xff]  }
0x13cc   :  { %5868 = vmatpush1.bf16.msra.mxu0 %v7761_v58  ;;  %v7819_v58 = vld [vmem:[%s10041_s19 + $0x28] sm:$0xff]  }
0x13cd   :  { %5869 = vmatprep.subr.bf16.mxu0 %v7769_v56  ;;  %v7826_v56 = vld [vmem:[%s10041_s19 + $0xf8] sm:$0xff]  }
0x13d0   :  { %5870 = vmatpush1.bf16.msra.mxu0 %v7767_v16  ;;  %v7828_v16 = vld [vmem:[%s10041_s19 + $0xb8] sm:$0xff]  }
0x13d1   :  { %5871 = vmatprep.subr.bf16.mxu0 %v7775_v19 }
0x13d4   :  { %5872 = vmatpush1.bf16.msra.mxu0 %v7773_v32 }
0x13d5   :  { %5873 = vmatprep.subr.bf16.mxu0 %v7781_v6 }
0x13d8   :  { %5874 = vmatpush1.bf16.msra.mxu0 %v7779_v47 }
0x13d9   :  { %5875 = vmatprep.subr.bf16.mxu0 %v7787_v63 }
0x13dc   :  { %5876 = vmatpush1.bf16.msra.mxu0 %v7785_v36 }
0x13dd   :  { %5877 = vmatprep.subr.bf16.mxu0 %v7793_v30 }
0x13e0   :  { %5878 = vmatpush1.bf16.msra.mxu0 %v7791_v24 }
0x13e1   :  { %7033 = vmatprep.subr.bf16.mxu0 %v7797_v37 }
0x1495   :  { %v5604_v33 = vpop.f32.mrb[52].mxu1 }
0x1496   :  { %v5610_v21 = vadd.f32 %v5604_v33, %v9402_v50  ;;  %v7295_v49 = vpop.f32.mrb[53].mxu1  ;;  %v7752_v50 = vld [vmem:[%s10038_s17 + $0x8] ss:$16 sps:$4 sm:$0xff]  }
0x1497   :  { %v5607_v48 = vpop.f32.mrb[54].mxu1  ;;  %5905 = vmatpush1.bf16.msra.mxu1 %v7752_v50  ;;  %v7802_v33 = vld [vmem:[%s10041_s19 + $0xc8] sm:$0xff]   ;;  %v7805_v49 = vld [vmem:[%s10041_s19 + $0x50] sm:$0xff]   ;;  %v7811_v50 = vld [vmem:[%s10041_s19 + $0x18] sm:$0xff]  }
0x1498   :  { %v9805_v53 = vadd.f32 %v6729_v45, %v5610_v21  ;;  %v7296_v17 = vpop.f32.mrb[55].mxu1  ;;  %5906 = vmatprep.subr.bf16.mxu1 %v7760_v41  ;;  %v7803_v45 = vld [vmem:[%s10041_s19 + $0x8] sm:$0xff]   ;;  %v7806_v48 = vld [vmem:[%s10041_s19 + $0xd0] sm:$0xff]   ;;  %v7814_v41 = vld [vmem:[%s10041_s19 + $0xe0] sm:$0xff]  }
0x1499   :  { %v7804_v21 = vld [vmem:[%s10041_s19 + $0x88] sm:$0xff]   ;;  %v7807_v17 = vld [vmem:[%s10041_s19 + $0x10] sm:$0xff]  }
0x149a   :  { %v5621_v62 = vsel %vm794_vm7, %v9805_v53, 0.0 }
0x149b   :  { %5622 = vadd.xlane.f32.xlu0 %v5621_v62  ;;  %5907 = vmatpush1.bf16.msra.mxu1 %v7758_v60  ;;  %v7808_v62 = vld [vmem:[%s10041_s19 + $0x90] sm:$0xff]   ;;  %v7816_v60 = vld [vmem:[%s10041_s19 + $0xa0] sm:$0xff]  }
0x149c   :  { %5908 = vmatprep.subr.bf16.mxu1 %v7766_v8  ;;  %v7818_v8 = vld [vmem:[%s10041_s19 + $0xe8] sm:$0xff]  }
0x149f   :  { %5909 = vmatpush1.bf16.msra.mxu1 %v7764_v9  ;;  %v7820_v9 = vld [vmem:[%s10041_s19 + $0xa8] sm:$0xff]  }
0x14a0   :  { %5910 = vmatprep.subr.bf16.mxu1 %v7772_v40  ;;  %v7827_v40 = vld [vmem:[%s10041_s19 + $0x38] sm:$0xff]  }
0x14a3   :  { %5911 = vmatpush1.bf16.msra.mxu1 %v7770_v18  ;;  %v5681_v18 = vld [vmem:[%s10042_s18] sm:$0xf] }
0x14a4   :  { %5912 = vmatprep.subr.bf16.mxu1 %v7778_v28  ;;  %v5686_v19 = vrot.slane %v5681_v18, %v8330_v25  ;;  %v5694_v28 = vrot.slane %v5681_v18, %v8363_v10  ;;  %v5690_v32 = vrot.slane %v5681_v18, %v8343_v31 }
0x14a7   :  { %5913 = vmatpush1.bf16.msra.mxu1 %v7776_v34  ;;  %v5698_v34 = vrot.slane %v5681_v18, %v8793_v61 }
0x14a8   :  { %5914 = vmatprep.subr.bf16.mxu1 %v7784_v12 }
0x14ab   :  { %5915 = vmatpush1.bf16.msra.mxu1 %v7782_v35 }
0x14ac   :  { %5916 = vmatprep.subr.bf16.mxu1 %v7790_v23 }
0x14af   :  { %5917 = vmatpush1.bf16.msra.mxu1 %v7788_v20 }
0x14b0   :  { %5918 = vmatprep.subr.bf16.mxu1 %v7796_v15 }
0x14b3   :  { %5919 = vmatpush1.bf16.msra.mxu1 %v7794_v13 }
0x14b4   :  { %7055 = vmatprep.subr.bf16.mxu1 %v7798_v46 }
0x1528   :  { %v5623_v22 = vpop.xlane.xlu0 %5622 }
0x1529   :  { %v5624_v55 = vmul.f32 0.0078125, %v5623_v22  ;;  %v7821_v22 = vld [vmem:[%s10041_s19 + $0x70] sm:$0xff]  }
0x152b   :  { %v5625_v4 = vsub.f32 %v9805_v53, %v5624_v55  ;;  %v7822_v55 = vld [vmem:[%s10041_s19 + $0xf0] sm:$0xff]  }
0x152d   :  { %v5626_v38 = vmul.f32 %v5625_v4, %v5625_v4 }
0x152f   :  { %v5627_v5 = vsel %vm794_vm7, %v5626_v38, 0.0  ;;  %v7824_v38 = vld [vmem:[%s10041_s19 + $0xb0] sm:$0xff]  }
0x1530   :  { %5628 = vadd.xlane.f32.xlu1 %v5627_v5  ;;  %v7825_v5 = vld [vmem:[%s10041_s19 + $0x78] sm:$0xff]  }
0x15bd   :  { %v5629_v42 = vpop.xlane.xlu1 %5628 }
0x15be   :  { %v5630_v11 = vmul.f32 0.0078125, %v5629_v42 }
0x15c0   :  { %v5631_v29 = vadd.f32 1e-05, %v5630_v11 }
0x15c2   :  { %8005 = vrsqrt.f32 %v5631_v29 }
0x15cc   :  { %v8006_v14 = vpop.eup %8005 }
0x15cd   :  { %v5633_v2 = vmul.f32 %v8006_v14, %v5625_v4  ;;  %v7823_v4 = vld [vmem:[%s10041_s19 + $0x30] sm:$0xff]  }
0x15cf   :  { %v5640_v52 = vmul.f32 %v6730_v57, %v5633_v2 }
0x15d1   :  { %v5647_v39 = vadd.f32 %v6731_v51, %v5640_v52 }
0x15d3   :  { %v5680_v54 = vpack.c.bf16 %v5647_v39, %v5647_v39 }
0x15d5   :  { %5896 = vmatmul.mubr.bf16.vlgmr.msra.gmra.mrb[56].mxu0 %v5680_v54  ;;  %5937 = vmatmul.mubr.bf16.vlgmr.msra.gmra.mrb[56].mxu1 %v5680_v54 }
0x15d6   :  { %7034 = vmatpush3.bf16.msra.mxu0 %v7799_v27  ;;  %7056 = vmatpush3.bf16.msra.mxu1 %v7800_v26 }
0x15d7   :  { %7035 = vmatprep.subr.bf16.mxu0 %v7801_v44  ;;  %7057 = vmatprep.subr.bf16.mxu1 %v7802_v33 }
0x15da   :  { %7036 = vmatpush3.bf16.msra.mxu0 %v7803_v45  ;;  %7058 = vmatpush3.bf16.msra.mxu1 %v7804_v21 }
0x15db   :  { %7037 = vmatprep.subr.bf16.mxu0 %v7805_v49  ;;  %7059 = vmatprep.subr.bf16.mxu1 %v7806_v48 }
0x15de   :  { %7038 = vmatpush3.bf16.msra.mxu0 %v7807_v17  ;;  %7060 = vmatpush3.bf16.msra.mxu1 %v7808_v62 }
0x15df   :  { %7039 = vmatprep.subr.bf16.mxu0 %v7809_v59  ;;  %7061 = vmatprep.subr.bf16.mxu1 %v7810_v43 }
0x15e2   :  { %7040 = vmatpush3.bf16.msra.mxu0 %v7811_v50  ;;  %7062 = vmatpush3.bf16.msra.mxu1 %v7812_v1 }
0x15e3   :  { %7041 = vmatprep.subr.bf16.mxu0 %v7813_v3  ;;  %7063 = vmatprep.subr.bf16.mxu1 %v7814_v41  ;;  %v6768_v3 = vld [vmem:[%s10043_s20] ss:$0 sm:$0xff] }
0x15e6   :  { %7042 = vmatpush3.bf16.msra.mxu0 %v7815_v0  ;;  %7064 = vmatpush3.bf16.msra.mxu1 %v7816_v60 }
0x15e7   :  { %7043 = vmatprep.subr.bf16.mxu0 %v7817_v7  ;;  %7065 = vmatprep.subr.bf16.mxu1 %v7818_v8 }
0x15ea   :  { %7044 = vmatpush3.bf16.msra.mxu0 %v7819_v58  ;;  %7066 = vmatpush3.bf16.msra.mxu1 %v7820_v9 }
0x15eb   :  { %7045 = vmatprep.subr.bf16.mxu0 %v7821_v22  ;;  %7067 = vmatprep.subr.bf16.mxu1 %v7822_v55 }
0x15ee   :  { %7046 = vmatpush3.bf16.msra.mxu0 %v7823_v4  ;;  %7068 = vmatpush3.bf16.msra.mxu1 %v7824_v38 }
0x15ef   :  { %7047 = vmatprep.subr.bf16.mxu0 %v7825_v5  ;;  %7069 = vmatprep.subr.bf16.mxu1 %v7826_v56 }
0x15f2   :  { %7048 = vmatpush3.bf16.msra.mxu0 %v7827_v40  ;;  %7070 = vmatpush3.bf16.msra.mxu1 %v7828_v16 }
0x16a8   :  { %v5897_v6 = vpop.f32.mrb[56].mxu0  ;;  %v5938_v12 = vpop.f32.mrb[56].mxu1 }
0x16a9   :  { %v5898_v47 = vadd.f32 %v5897_v6, %v5686_v19  ;;  %v5939_v35 = vadd.f32 %v5938_v12, %v5694_v28  ;;  %v5899_v36 = vpop.f32.mrb[57].mxu0  ;;  %v5940_v63 = vpop.f32.mrb[57].mxu1 }
0x16aa   :  { %v5900_v20 = vadd.f32 %v5899_v36, %v5690_v32  ;;  %v5941_v23 = vadd.f32 %v5940_v63, %v5698_v34  ;;  %v5901_v30 = vpop.f32.mrb[58].mxu0  ;;  %v5942_v15 = vpop.f32.mrb[58].mxu1 }
0x16ab   :  { %v6764_v24 = vmul.f32 -1.702, %v5898_v47  ;;  %v6766_v13 = vmul.f32 -1.702, %v5939_v35  ;;  %v5902_v42 = vpop.f32.mrb[59].mxu0  ;;  %v5943_v25 = vpop.f32.mrb[59].mxu1 }
0x16ac   :  { %v6765_v11 = vmul.f32 -1.702, %v5900_v20  ;;  %v6767_v10 = vmul.f32 -1.702, %v5941_v23 }
0x16ad   :  { %v5953_v29 = vmul.f32 1.442695, %v6764_v24  ;;  %v5957_v31 = vmul.f32 1.442695, %v6766_v13 }
0x16ae   :  { %v5955_v14 = vmul.f32 1.442695, %v6765_v11  ;;  %v5959_v61 = vmul.f32 1.442695, %v6767_v10 }
0x16af   :  { %8007 = vpow2.f32 %v5953_v29 }
0x16b0   :  { %8009 = vpow2.f32 %v5957_v31 }
0x16b1   :  { %8011 = vpow2.f32 %v5955_v14 }
0x16b2   :  { %8013 = vpow2.f32 %v5959_v61 }
0x16b9   :  { %v8008_v57 = vpop.eup %8007 }
0x16ba   :  { %v8010_v2 = vpop.eup %8009  ;;  %v5961_v51 = vadd.f32 1.0, %v8008_v57 }
0x16bb   :  { %v8012_v52 = vpop.eup %8011  ;;  %v5963_v39 = vadd.f32 1.0, %v8010_v2 }
0x16bc   :  { %v8014_v54 = vpop.eup %8013  ;;  %8015 = vrcp.f32 %v5961_v51  ;;  %v5962_v37 = vadd.f32 1.0, %v8012_v52 }
0x16bd   :  { %8017 = vrcp.f32 %v5963_v39  ;;  %v5964_v46 = vadd.f32 1.0, %v8014_v54 }
0x16be   :  { %8019 = vrcp.f32 %v5962_v37 }
0x16bf   :  { %8021 = vrcp.f32 %v5964_v46 }
0x16c6   :  { %v8016_v27 = vpop.eup %8015 }
0x16c7   :  { %v8018_v26 = vpop.eup %8017  ;;  %v5973_v33 = vmul.f32 %v8016_v27, %v5898_v47 }
0x16c8   :  { %v8020_v44 = vpop.eup %8019  ;;  %v5975_v21 = vmul.f32 %v8018_v26, %v5939_v35 }
0x16c9   :  { %v8022_v45 = vpop.eup %8021  ;;  %v5974_v49 = vmul.f32 %v8020_v44, %v5900_v20  ;;  %v6041_v62 = vpack.c.bf16 %v5973_v33, %v5973_v33 }
0x16ca   :  { %v5976_v48 = vmul.f32 %v8022_v45, %v5941_v23  ;;  %v6043_v43 = vpack.c.bf16 %v5975_v21, %v5975_v21 }
0x16cb   :  { %v6042_v17 = vpack.c.bf16 %v5974_v49, %v5974_v49 }
0x16cc   :  { %v6044_v59 = vpack.c.bf16 %v5976_v48, %v5976_v48 }
0x16cd   :  { %6276 = vmatprep.mubr.bf16.mxu0 %v6042_v17 }
0x16ce   :  { %6316 = vmatprep.mubr.bf16.mxu1 %v6044_v59  ;;  %6277 = vmatmul.mubr.bf16.vlgmr.msra.gmra.mrb[60].mxu0 %v6041_v62 }
0x16cf   :  { %6317 = vmatmul.mubr.bf16.vlgmr.msra.gmra.mrb[60].mxu1 %v6043_v43 }
0x17a1   :  { %v7049_v50 = vpop.f32.mrb[60].mxu0 }
0x17a2   :  { %v7071_v1 = vpop.f32.mrb[60].mxu1  ;;  %v7050_v41 = vpop.f32.mrb[61].mxu0 }
0x17a3   :  { %v7051_v0 = vadd.f32 %v7050_v41, %v7049_v50  ;;  %v7072_v60 = vpop.f32.mrb[61].mxu1  ;;  %v7052_v7 = vpop.f32.mrb[62].mxu0 }
0x17a4   :  { %v7073_v8 = vadd.f32 %v7072_v60, %v7071_v1  ;;  %v7074_v58 = vpop.f32.mrb[62].mxu1  ;;  %v7053_v9 = vpop.f32.mrb[63].mxu0 }
0x17a5   :  { %v6279_v22 = vadd.f32 %v7051_v0, %v6768_v3  ;;  %v7075_v55 = vpop.f32.mrb[63].mxu1 }
0x17a7   :  { %v6319_v4 = vadd.f32 %v7073_v8, %v6279_v22 }
0x17a9   :  { %v6324_v38 = vadd.f32 %v6319_v4, %v9805_v53 }
0x17ab   :  { %6801 = vst [vmem:[%s10044_s21 + $0x18] sm:$0x1f] %v6324_v38 }

</bundles_post_ra>
